<compile_context>
chip_gen: v6e
topology: v6e:2x2x1
jax: 0.10.0
libtpu: 0.0.40
codegen_flags: <defaults>
</compile_context>

<pallas_src>
import numpy as np
import jax
import jax.numpy as jnp
from jax import lax
from jax.experimental import pallas as pl
from jax.experimental.pallas import tpu as pltpu

BN_EPS = 1e-5


# ----------------------------------------------------------------------------
# shared helpers
# ----------------------------------------------------------------------------
def _sigmoid(x):
    return 1.0 / (1.0 + jnp.exp(-x))


def _interp_weights(out_size, in_size):
    # PyTorch F.interpolate(mode='bilinear', align_corners=False) weights.
    dst = np.arange(out_size, dtype=np.float64)
    scale = in_size / out_size
    src = np.maximum((dst + 0.5) * scale - 0.5, 0.0)
    i0 = np.minimum(np.floor(src).astype(np.int64), in_size - 1)
    i1 = np.minimum(i0 + 1, in_size - 1)
    lam = src - i0
    w = np.zeros((out_size, in_size), np.float64)
    idx = dst.astype(np.int64)
    np.add.at(w, (idx, i0), 1.0 - lam)
    np.add.at(w, (idx, i1), lam)
    return w


def _bilinear_matrix(H, W, hs, ws):
    wy = _interp_weights(H, hs)                      # (H, hs)
    wx = _interp_weights(W, ws)                      # (W, ws)
    b = np.einsum('yi,xj->yxij', wy, wx).reshape(H * W, hs * ws)
    return b.astype(np.float32)


def _pick_tile(total, cap=512):
    # largest multiple of 8 that divides `total` and is <= cap
    assert total % 8 == 0
    best = 8
    t = 8
    while t <= min(total, cap):
        if total % t == 0:
            best = t
        t += 8
    return best


# ----------------------------------------------------------------------------
# Pass 1: BN1 batch statistics of e_tp  (resident (1, C) accumulators)
# ----------------------------------------------------------------------------
def _bn1_stats_kernel(e_ref, s_ref, ss_ref):
    @pl.when(pl.program_id(0) == 0)
    def _():
        s_ref[...] = jnp.zeros_like(s_ref)
        ss_ref[...] = jnp.zeros_like(ss_ref)

    e = e_ref[...].astype(jnp.float32)
    s_ref[...] += jnp.sum(e, axis=0, keepdims=True)
    ss_ref[...] += jnp.sum(e * e, axis=0, keepdims=True)


# ----------------------------------------------------------------------------
# Pass 2: t = cat([x, BN1(e)]) @ W1 + b1 (two K=128 matmuls) + BN2 statistics
# ----------------------------------------------------------------------------
def _front_t_kernel(x_ref, e_ref, sc1_ref, sh1_ref, w1x_ref, w1e_ref, b1_ref,
                    t_ref, st_ref, sst_ref):
    @pl.when(pl.program_id(0) == 0)
    def _():
        st_ref[...] = jnp.zeros_like(st_ref)
        sst_ref[...] = jnp.zeros_like(sst_ref)

    e_n = e_ref[...].astype(jnp.float32) * sc1_ref[...] + sh1_ref[...]
    # TODO(synk): on v6e/v7x the two K=128 matmuls could be fused into one
    # K=256 matmul if profiling shows the MXU cadence is the binding slot.
    t = (jnp.dot(x_ref[...], w1x_ref[...], preferred_element_type=jnp.float32)
         + jnp.dot(e_n.astype(jnp.bfloat16), w1e_ref[...],
                   preferred_element_type=jnp.float32)
         + b1_ref[...])
    tb = t.astype(jnp.bfloat16)
    t_ref[...] = tb
    # BN2 stats on exactly the (bf16-rounded) values pass 3 will normalize.
    t32 = tb.astype(jnp.float32)
    st_ref[...] += jnp.sum(t32, axis=0, keepdims=True)
    sst_ref[...] += jnp.sum(t32 * t32, axis=0, keepdims=True)


# ----------------------------------------------------------------------------
# Pass 3: BN2 + PReLU + 1x1 conv (W2) + ESA conv1 + per-image feat sums (CA)
# ----------------------------------------------------------------------------
def _front_feat_kernel(t_ref, sc2_ref, sh2_ref, a_ref, w2_ref, b2_ref,
                       wc1_ref, bc1_ref, feat_ref, c1p_ref, fsum_ref):
    q = pl.program_id(1)

    tn = t_ref[...].astype(jnp.float32) * sc2_ref[...] + sh2_ref[...]
    p = jnp.where(tn >= 0.0, tn, tn * a_ref[...])          # PReLU (shared a)

    feat = (jnp.dot(p.astype(jnp.bfloat16), w2_ref[...],
                    preferred_element_type=jnp.float32) + b2_ref[...])
    featb = feat.astype(jnp.bfloat16)                       # single bf16 cast
    feat_ref[...] = featb

    # ESA conv1 (1x1, C -> C//16), consumed by the (XLA) ESA interior.
    # TODO(synk): c1p lane width is f=8 (<128); could be packed 16-per-row if
    # masked stores ever show up as the binding vst slot.
    c1p_ref[...] = (jnp.dot(featb, wc1_ref[...],
                            preferred_element_type=jnp.float32)
                    + bc1_ref[...]).astype(jnp.bfloat16)

    # per-image channel sums of feat for the CA branch (resident per image).
    @pl.when(q == 0)
    def _():
        fsum_ref[...] = jnp.zeros_like(fsum_ref)
    fsum_ref[...] += jnp.sum(feat, axis=0, keepdims=True).reshape(
        fsum_ref.shape)


# ----------------------------------------------------------------------------
# Tail: ESA conv_f + bilinear-as-matmul + conv4 + sigmoid, combine with CA gate
# ----------------------------------------------------------------------------
def _mba_tail_kernel(feat_ref, c1p_ref, yca_ref, bmat_ref, c3s_ref,
                     wcf_ref, bcf_ref, wc4_ref, bc4_ref, out_ref):
    cf = (jnp.dot(c1p_ref[...], wcf_ref[...],
                  preferred_element_type=jnp.float32) + bcf_ref[...])
    c3up = jnp.dot(bmat_ref[...], c3s_ref[0],
                   preferred_element_type=jnp.float32)
    c4 = (jnp.dot((c3up + cf).astype(jnp.bfloat16), wc4_ref[...],
                  preferred_element_type=jnp.float32) + bc4_ref[...])
    m_esa = _sigmoid(c4)

    # output = ESA(feature) + CA(feature) = feature * (m + y)
    out_ref[...] = feat_ref[...].astype(jnp.float32) * (m_esa + yca_ref[0])


# ----------------------------------------------------------------------------
# ESA interior (tiny spatial maps, C//16 channels) -- left to XLA.
# TODO(synk): stride-2 3x3 conv / 7x7-s3 max-pool / 3x3 convs at f=C//16
#             channels have no clean lane-aligned Pallas mapping; <1% of FLOPs.
# ----------------------------------------------------------------------------
def _esa_interior(c1p_nhwf, params):
    dn = ('NHWC', 'HWIO', 'NHWC')
    c1 = lax.conv_general_dilated(c1p_nhwf, params['wc2'], (2, 2), 'VALID',
                                  dimension_numbers=dn) + params['bc2']
    vmax = lax.reduce_window(c1, -jnp.inf, lax.max,
                             (1, 7, 7, 1), (1, 3, 3, 1), 'VALID')
    vr = jnp.maximum(
        lax.conv_general_dilated(vmax, params['wcm'], (1, 1),
                                 [(1, 1), (1, 1)], dimension_numbers=dn)
        + params['bcm'], 0.0)
    c3 = jnp.maximum(
        lax.conv_general_dilated(vr, params['wc3'], (1, 1),
                                 [(1, 1), (1, 1)], dimension_numbers=dn)
        + params['bc3'], 0.0)
    c3 = lax.conv_general_dilated(c3, params['wc3b'], (1, 1),
                                  [(1, 1), (1, 1)], dimension_numbers=dn) \
        + params['bc3b']
    return c3


# ----------------------------------------------------------------------------
# Full MBA forward (Pallas)
# ----------------------------------------------------------------------------
def mba_forward(x_nchw, e_nchw, params):
    N, C, H, W = x_nchw.shape
    f = C // 16
    HW = H * W
    M = N * HW
    assert C % 128 == 0 and HW % 8 == 0

    f32, bf16 = jnp.float32, jnp.bfloat16

    # NHWC, pixels flattened to rows; activations cross HBM as bf16.
    x2 = jnp.transpose(x_nchw, (0, 2, 3, 1)).reshape(M, C).astype(bf16)
    e2 = jnp.transpose(e_nchw, (0, 2, 3, 1)).reshape(M, C).astype(bf16)

    # constant MXU operands pre-cast to bf16 once (halves weight DMA / VMEM).
    w1x, w1e = params['w1x'].astype(bf16), params['w1e'].astype(bf16)
    w2, wc1 = params['w2'].astype(bf16), params['wc1'].astype(bf16)
    wcf, wc4 = params['wcf'].astype(bf16), params['wc4'].astype(bf16)

    b1 = params['b1'].reshape(1, C)
    b2 = params['b2'].reshape(1, C)
    bc1 = params['bc1'].reshape(1, f)
    bcf = params['bcf'].reshape(1, f)
    bc4 = params['bc4'].reshape(1, C)
    alpha = jnp.broadcast_to(params['prelu_a'].reshape(1, 1), (1, C)).astype(f32)

    TM = _pick_tile(M)                 # pixel tile for the reduction passes
    TQ = _pick_tile(HW)                # per-image pixel tile
    QT = HW // TQ

    # ---- pass 1: BN1 batch statistics of e_tp ------------------------------
    s1, ss1 = pl.pallas_call(
        _bn1_stats_kernel,
        out_shape=(jax.ShapeDtypeStruct((1, C), f32),
                   jax.ShapeDtypeStruct((1, C), f32)),
        grid=(M // TM,),
        in_specs=[pl.BlockSpec((TM, C), lambda i: (i, 0))],
        out_specs=(pl.BlockSpec((1, C), lambda i: (0, 0)),
                   pl.BlockSpec((1, C), lambda i: (0, 0))),
        compiler_params=pltpu.CompilerParams(
            dimension_semantics=("arbitrary",)),
    )(e2)
    mean1 = s1 / M
    var1 = jnp.maximum(ss1 / M - mean1 * mean1, 0.0)   # clamp: no NaN in rsqrt
    sc1 = params['bn1_g'].reshape(1, C) * lax.rsqrt(var1 + BN_EPS)
    sh1 = params['bn1_b'].reshape(1, C) - mean1 * sc1

    # ---- pass 2: t = conv1x1(cat([x, BN1(e)])) + BN2 statistics ------------
    t, st, sst = pl.pallas_call(
        _front_t_kernel,
        out_shape=(jax.ShapeDtypeStruct((M, C), bf16),
                   jax.ShapeDtypeStruct((1, C), f32),
                   jax.ShapeDtypeStruct((1, C), f32)),
        grid=(M // TM,),
        in_specs=[pl.BlockSpec((TM, C), lambda i: (i, 0)),
                  pl.BlockSpec((TM, C), lambda i: (i, 0)),
                  pl.BlockSpec((1, C), lambda i: (0, 0)),
                  pl.BlockSpec((1, C), lambda i: (0, 0)),
                  pl.BlockSpec((C, C), lambda i: (0, 0)),
                  pl.BlockSpec((C, C), lambda i: (0, 0)),
                  pl.BlockSpec((1, C), lambda i: (0, 0))],
        out_specs=(pl.BlockSpec((TM, C), lambda i: (i, 0)),
                   pl.BlockSpec((1, C), lambda i: (0, 0)),
                   pl.BlockSpec((1, C), lambda i: (0, 0))),
        compiler_params=pltpu.CompilerParams(
            dimension_semantics=("arbitrary",)),
    )(x2, e2, sc1, sh1, w1x, w1e, b1)
    mean2 = st / M
    var2 = jnp.maximum(sst / M - mean2 * mean2, 0.0)
    sc2 = params['bn2_g'].reshape(1, C) * lax.rsqrt(var2 + BN_EPS)
    sh2 = params['bn2_b'].reshape(1, C) - mean2 * sc2

    # ---- pass 3: BN2 + PReLU + W2 + ESA conv1 + per-image feat sums --------
    feat, c1p, fsum = pl.pallas_call(
        _front_feat_kernel,
        out_shape=(jax.ShapeDtypeStruct((M, C), bf16),
                   jax.ShapeDtypeStruct((M, f), bf16),
                   jax.ShapeDtypeStruct((N, 1, C), f32)),
        grid=(N, QT),
        in_specs=[pl.BlockSpec((TQ, C), lambda n, q: (n * QT + q, 0)),
                  pl.BlockSpec((1, C), lambda n, q: (0, 0)),
                  pl.BlockSpec((1, C), lambda n, q: (0, 0)),
                  pl.BlockSpec((1, C), lambda n, q: (0, 0)),
                  pl.BlockSpec((C, C), lambda n, q: (0, 0)),
                  pl.BlockSpec((1, C), lambda n, q: (0, 0)),
                  pl.BlockSpec((C, f), lambda n, q: (0, 0)),
                  pl.BlockSpec((1, f), lambda n, q: (0, 0))],
        out_specs=(pl.BlockSpec((TQ, C), lambda n, q: (n * QT + q, 0)),
                   pl.BlockSpec((TQ, f), lambda n, q: (n * QT + q, 0)),
                   pl.BlockSpec((1, 1, C), lambda n, q: (n, 0, 0))),
        compiler_params=pltpu.CompilerParams(
            dimension_semantics=("parallel", "arbitrary")),
    )(t, sc2, sh2, alpha, w2, b2, wc1, bc1)

    # ---- CA gate: tiny (N, C) squeeze-excite MLP in XLA ---------------------
    favg = fsum[:, 0, :] / HW                                      # (N, C)
    z = jnp.maximum(jnp.dot(favg, params['wdu1']), 0.0)
    yca = _sigmoid(jnp.dot(z, params['wdu2'])).reshape(N, 1, C)

    # ---- tiny ESA interior (XLA glue) ---------------------------------------
    c3s = _esa_interior(c1p.astype(f32).reshape(N, H, W, f), params)
    hs, ws = int(c3s.shape[1]), int(c3s.shape[2])
    k0 = hs * ws
    kp = ((k0 + 15) // 16) * 16                # zero-pad reduction dim for MXU
    c3sp = jnp.pad(c3s.reshape(N, k0, f),
                   ((0, 0), (0, kp - k0), (0, 0))).astype(bf16)
    bmat = np.pad(_bilinear_matrix(H, W, hs, ws), ((0, 0), (0, kp - k0)))
    bmat = jnp.asarray(bmat, bf16)                                 # (HW, kp)

    # ---- tail: ESA tail + combine, gridded (N, HW-tiles), fully parallel ----
    out2 = pl.pallas_call(
        _mba_tail_kernel,
        out_shape=jax.ShapeDtypeStruct((M, C), f32),
        grid=(N, QT),
        in_specs=[pl.BlockSpec((TQ, C), lambda n, q: (n * QT + q, 0)),
                  pl.BlockSpec((TQ, f), lambda n, q: (n * QT + q, 0)),
                  pl.BlockSpec((1, 1, C), lambda n, q: (n, 0, 0)),
                  pl.BlockSpec((TQ, kp), lambda n, q: (q, 0)),
                  pl.BlockSpec((1, kp, f), lambda n, q: (n, 0, 0)),
                  pl.BlockSpec((f, f), lambda n, q: (0, 0)),
                  pl.BlockSpec((1, f), lambda n, q: (0, 0)),
                  pl.BlockSpec((f, C), lambda n, q: (0, 0)),
                  pl.BlockSpec((1, C), lambda n, q: (0, 0))],
        out_specs=pl.BlockSpec((TQ, C), lambda n, q: (n * QT + q, 0)),
        compiler_params=pltpu.CompilerParams(
            dimension_semantics=("parallel", "parallel")),
    )(feat, c1p, yca, bmat, c3sp, wcf, bcf, wc4, bc4)

    # TODO(synk): BatchNorm running-stat updates (training bookkeeping) are not
    # reproduced; train-mode batch statistics are used, matching module default.
    return jnp.transpose(out2.reshape(N, H, W, C), (0, 3, 1, 2))


# ----------------------------------------------------------------------------
# Parameter init (PyTorch-ish scales; layouts already transposed for matmuls)
# ----------------------------------------------------------------------------
def init_params(key, C):
    f = C // 16
    r = C // 16
    keys = iter(jax.random.split(key, 32))

    def w(shape, fan_in):
        return jax.random.normal(next(keys), shape, jnp.float32) / np.sqrt(fan_in)

    def b(shape, scale=0.05):
        return scale * jax.random.normal(next(keys), shape, jnp.float32)

    return {
        'bn1_g': 1.0 + 0.1 * jax.random.normal(next(keys), (C,), jnp.float32),
        'bn1_b': b((C,), 0.1),
        'w1x': w((C, C), 2 * C), 'w1e': w((C, C), 2 * C), 'b1': b((C,)),
        'bn2_g': 1.0 + 0.1 * jax.random.normal(next(keys), (C,), jnp.float32),
        'bn2_b': b((C,), 0.1),
        'prelu_a': jnp.full((1,), 0.25, jnp.float32),
        'w2': w((C, C), C), 'b2': b((C,)),
        'wdu1': w((C, r), C), 'wdu2': w((r, C), r),            # CA (bias=False)
        'wc1': w((C, f), C), 'bc1': b((f,)),                   # ESA conv1
        'wcf': w((f, f), f), 'bcf': b((f,)),                   # ESA conv_f
        'wc2': w((3, 3, f, f), 9 * f), 'bc2': b((f,)),         # ESA conv2 (s2)
        'wcm': w((3, 3, f, f), 9 * f), 'bcm': b((f,)),         # ESA conv_max
        'wc3': w((3, 3, f, f), 9 * f), 'bc3': b((f,)),         # ESA conv3
        'wc3b': w((3, 3, f, f), 9 * f), 'bc3b': b((f,)),       # ESA conv3_
        'wc4': w((f, C), f), 'bc4': b((C,)),                   # ESA conv4
    }


# ----------------------------------------------------------------------------
# Pure-JAX reference (mirrors the bf16 cast points / stat formulas of the
# kernels; remaining differences are f32 reduction-order and bf16 rounding).
# ----------------------------------------------------------------------------
def mba_reference(x_nchw, e_nchw, params):
    N, C, H, W = x_nchw.shape
    f = C // 16
    HW = H * W
    M = N * HW
    f32, bf16 = jnp.float32, jnp.bfloat16

    x = jnp.transpose(x_nchw, (0, 2, 3, 1)).reshape(M, C).astype(bf16)
    e = jnp.transpose(e_nchw, (0, 2, 3, 1)).reshape(M, C).astype(bf16)
    e32 = e.astype(f32)

    m1 = jnp.sum(e32, axis=0, keepdims=True) / M
    v1 = jnp.maximum(jnp.sum(e32 * e32, axis=0, keepdims=True) / M - m1 * m1, 0.0)
    sc1 = params['bn1_g'][None, :] * lax.rsqrt(v1 + BN_EPS)
    sh1 = params['bn1_b'][None, :] - m1 * sc1
    e_n = e32 * sc1 + sh1

    t = (jnp.dot(x, params['w1x'].astype(bf16), preferred_element_type=f32)
         + jnp.dot(e_n.astype(bf16), params['w1e'].astype(bf16),
                   preferred_element_type=f32)
         + params['b1'][None, :])
    t32 = t.astype(bf16).astype(f32)
    m2 = jnp.sum(t32, axis=0, keepdims=True) / M
    v2 = jnp.maximum(jnp.sum(t32 * t32, axis=0, keepdims=True) / M - m2 * m2, 0.0)
    sc2 = params['bn2_g'][None, :] * lax.rsqrt(v2 + BN_EPS)
    sh2 = params['bn2_b'][None, :] - m2 * sc2
    tn = t32 * sc2 + sh2
    p = jnp.where(tn >= 0, tn, params['prelu_a'][0] * tn)
    feat = (jnp.dot(p.astype(bf16), params['w2'].astype(bf16),
                    preferred_element_type=f32) + params['b2'][None, :])
    featb = feat.astype(bf16)
    c1p = (jnp.dot(featb, params['wc1'].astype(bf16), preferred_element_type=f32)
           + params['bc1'][None, :]).astype(bf16)

    # ESA
    c3s = _esa_interior(c1p.astype(f32).reshape(N, H, W, f), params)
    hs, ws = int(c3s.shape[1]), int(c3s.shape[2])
    k0 = hs * ws
    kp = ((k0 + 15) // 16) * 16
    c3sp = jnp.pad(c3s.reshape(N, k0, f),
                   ((0, 0), (0, kp - k0), (0, 0))).astype(bf16)
    bmat = jnp.asarray(np.pad(_bilinear_matrix(H, W, hs, ws),
                              ((0, 0), (0, kp - k0))), bf16)
    c3up = jax.vmap(lambda c: jnp.dot(bmat, c, preferred_element_type=f32))(c3sp)
    cf = (jnp.dot(c1p, params['wcf'].astype(bf16), preferred_element_type=f32)
          + params['bcf'][None, :]).reshape(N, HW, f)
    c4 = (jnp.dot((c3up + cf).reshape(M, f).astype(bf16),
                  params['wc4'].astype(bf16), preferred_element_type=f32)
          + params['bc4'][None, :])
    mgate = _sigmoid(c4).reshape(N, HW, C)

    # CA
    favg = jnp.mean(feat.reshape(N, HW, C), axis=1)
    z = jnp.maximum(jnp.dot(favg, params['wdu1']), 0.0)
    yca = _sigmoid(jnp.dot(z, params['wdu2']))

    out = featb.astype(f32).reshape(N, HW, C) * (mgate + yca[:, None, :])
    return jnp.transpose(out.reshape(N, H, W, C), (0, 3, 1, 2))


# ----------------------------------------------------------------------------
if __name__ == "__main__":
    key = jax.random.PRNGKey(0)
    B, C, H, W = 2, 128, 32, 32          # lane-dense channel count (C = 128)

    kx, ke, kparam = jax.random.split(key, 3)
    x = jax.random.normal(kx, (B, C, H, W), jnp.float32)
    e_tp = jax.random.normal(ke, (B, C, H, W), jnp.float32)
    params = init_params(kparam, C)

    out = jax.jit(mba_forward)(x, e_tp, params)
    jax.block_until_ready(out)
    assert out.shape == (B, C, H, W), out.shape

    ref = jax.jit(mba_reference)(x, e_tp, params)
    jax.block_until_ready(ref)

    err = float(jnp.max(jnp.abs(out - ref)))
    mean_err = float(jnp.mean(jnp.abs(out - ref)))
    scale = float(jnp.max(jnp.abs(ref)))
    # bf16 activations in HBM: kernel and reference can disagree by a few bf16
    # ulps of the output range where differing f32 reduction orders flip a
    # rounding boundary; a real bug would show errors ~O(scale).
    assert err <= 2e-3 + 3e-2 * scale, (err, scale)
    assert mean_err <= 1e-3 + 2e-3 * scale, (mean_err, scale)

    print("KERNEL_OK")
</pallas_src>

<mosaic_0001>
module attributes {stable_mosaic.version = 11 : i64} {
  func.func @_bn1_stats_kernel(%arg0: i32, %arg1: memref<512x128xbf16, #tpu.memory_space<vmem>>, %arg2: memref<1x128xf32, #tpu.memory_space<vmem>>, %arg3: memref<1x128xf32, #tpu.memory_space<vmem>>) attributes {dimension_semantics = [#tpu.dimension_semantics<arbitrary>], iteration_bounds = array<i64: 4>, scalar_prefetch = 0 : i64, scratch_operands = 0 : i64, tpu.core_type = #tpu.core_type<tc>, window_params = [{transform_indices = @transform_0, window_bounds = array<i64: 512, 128>}, {pipeline_mode = #tpu.pipeline_mode<synchronous>, transform_indices = @transform_1, window_bounds = array<i64: 1, 128>}, {pipeline_mode = #tpu.pipeline_mode<synchronous>, transform_indices = @transform_2, window_bounds = array<i64: 1, 128>}]} {
    %c0_i32 = arith.constant 0 : i32
    %0 = arith.cmpi eq, %arg0, %c0_i32 : i32
    %1 = arith.extui %0 : i1 to i32
    %c0_i32_0 = arith.constant 0 : i32
    %2 = arith.cmpi ne, %1, %c0_i32_0 : i32
    scf.if %2 {
      %cst_11 = arith.constant 0.000000e+00 : f32
      %16 = vector.broadcast %cst_11 : f32 to vector<1x128xf32>
      %c0_12 = arith.constant 0 : index
      %c0_13 = arith.constant 0 : index
      %17 = vector.load %arg2[%c0_12, %c0_13] : memref<1x128xf32, #tpu.memory_space<vmem>>, vector<1x128xf32>
      tpu.vector_store %arg2[%c0_12, %c0_13], %16 {strides = array<i32>} : memref<1x128xf32, #tpu.memory_space<vmem>>, vector<1x128xf32>,
      %cst_14 = arith.constant 0.000000e+00 : f32
      %18 = vector.broadcast %cst_14 : f32 to vector<1x128xf32>
      %c0_15 = arith.constant 0 : index
      %c0_16 = arith.constant 0 : index
      %19 = vector.load %arg3[%c0_15, %c0_16] : memref<1x128xf32, #tpu.memory_space<vmem>>, vector<1x128xf32>
      tpu.vector_store %arg3[%c0_15, %c0_16], %18 {strides = array<i32>} : memref<1x128xf32, #tpu.memory_space<vmem>>, vector<1x128xf32>,
    } else {
    }
    %c0 = arith.constant 0 : index
    %c0_1 = arith.constant 0 : index
    %3 = vector.load %arg1[%c0, %c0_1] : memref<512x128xbf16, #tpu.memory_space<vmem>>, vector<512x128xbf16>
    %4 = arith.extf %3 : vector<512x128xbf16> to vector<512x128xf32>
    %c0_2 = arith.constant 0 : index
    %c0_3 = arith.constant 0 : index
    %5 = vector.load %arg2[%c0_2, %c0_3] : memref<1x128xf32, #tpu.memory_space<vmem>>, vector<1x128xf32>
    %cst = arith.constant dense<0.000000e+00> : vector<128xf32>
    %6 = vector.multi_reduction <add>, %4, %cst [0] : vector<512x128xf32> to vector<128xf32>
    %7 = vector.shape_cast %6 : vector<128xf32> to vector<1x128xf32>
    %8 = arith.addf %5, %7 : vector<1x128xf32>
    %c0_4 = arith.constant 0 : index
    %c0_5 = arith.constant 0 : index
    %9 = vector.load %arg2[%c0_4, %c0_5] : memref<1x128xf32, #tpu.memory_space<vmem>>, vector<1x128xf32>
    tpu.vector_store %arg2[%c0_4, %c0_5], %8 {strides = array<i32>} : memref<1x128xf32, #tpu.memory_space<vmem>>, vector<1x128xf32>,
    %c0_6 = arith.constant 0 : index
    %c0_7 = arith.constant 0 : index
    %10 = vector.load %arg3[%c0_6, %c0_7] : memref<1x128xf32, #tpu.memory_space<vmem>>, vector<1x128xf32>
    %11 = arith.mulf %4, %4 : vector<512x128xf32>
    %cst_8 = arith.constant dense<0.000000e+00> : vector<128xf32>
    %12 = vector.multi_reduction <add>, %11, %cst_8 [0] : vector<512x128xf32> to vector<128xf32>
    %13 = vector.shape_cast %12 : vector<128xf32> to vector<1x128xf32>
    %14 = arith.addf %10, %13 : vector<1x128xf32>
    %c0_9 = arith.constant 0 : index
    %c0_10 = arith.constant 0 : index
    %15 = vector.load %arg3[%c0_9, %c0_10] : memref<1x128xf32, #tpu.memory_space<vmem>>, vector<1x128xf32>
    tpu.vector_store %arg3[%c0_9, %c0_10], %14 {strides = array<i32>} : memref<1x128xf32, #tpu.memory_space<vmem>>, vector<1x128xf32>,
    return
  }
  func.func @transform_0(%arg0: i32) -> (i32, i32) {
    %c0_i32 = arith.constant 0 : i32
    %c0_i32_0 = arith.constant 0 : i32
    return %arg0, %c0_i32 : i32, i32
  }
  func.func @transform_1(%arg0: i32) -> (i32, i32) {
    %c0_i32 = arith.constant 0 : i32
    %c0_i32_0 = arith.constant 0 : i32
    %c0_i32_1 = arith.constant 0 : i32
    return %c0_i32, %c0_i32_0 : i32, i32
  }
  func.func @transform_2(%arg0: i32) -> (i32, i32) {
    %c0_i32 = arith.constant 0 : i32
    %c0_i32_0 = arith.constant 0 : i32
    %c0_i32_1 = arith.constant 0 : i32
    return %c0_i32, %c0_i32_0 : i32, i32
  }
}

module attributes {stable_mosaic.version = 11 : i64} {
  func.func @_front_t_kernel(%arg0: i32, %arg1: memref<512x128xbf16, #tpu.memory_space<vmem>>, %arg2: memref<512x128xbf16, #tpu.memory_space<vmem>>, %arg3: memref<1x128xf32, #tpu.memory_space<vmem>>, %arg4: memref<1x128xf32, #tpu.memory_space<vmem>>, %arg5: memref<128x128xbf16, #tpu.memory_space<vmem>>, %arg6: memref<128x128xbf16, #tpu.memory_space<vmem>>, %arg7: memref<1x128xf32, #tpu.memory_space<vmem>>, %arg8: memref<512x128xbf16, #tpu.memory_space<vmem>>, %arg9: memref<1x128xf32, #tpu.memory_space<vmem>>, %arg10: memref<1x128xf32, #tpu.memory_space<vmem>>) attributes {dimension_semantics = [#tpu.dimension_semantics<arbitrary>], iteration_bounds = array<i64: 4>, scalar_prefetch = 0 : i64, scratch_operands = 0 : i64, tpu.core_type = #tpu.core_type<tc>, window_params = [{transform_indices = @transform_0, window_bounds = array<i64: 512, 128>}, {transform_indices = @transform_1, window_bounds = array<i64: 512, 128>}, {pipeline_mode = #tpu.pipeline_mode<synchronous>, transform_indices = @transform_2, window_bounds = array<i64: 1, 128>}, {pipeline_mode = #tpu.pipeline_mode<synchronous>, transform_indices = @transform_3, window_bounds = array<i64: 1, 128>}, {pipeline_mode = #tpu.pipeline_mode<synchronous>, transform_indices = @transform_4, window_bounds = array<i64: 128, 128>}, {pipeline_mode = #tpu.pipeline_mode<synchronous>, transform_indices = @transform_5, window_bounds = array<i64: 128, 128>}, {pipeline_mode = #tpu.pipeline_mode<synchronous>, transform_indices = @transform_6, window_bounds = array<i64: 1, 128>}, {transform_indices = @transform_7, window_bounds = array<i64: 512, 128>}, {pipeline_mode = #tpu.pipeline_mode<synchronous>, transform_indices = @transform_8, window_bounds = array<i64: 1, 128>}, {pipeline_mode = #tpu.pipeline_mode<synchronous>, transform_indices = @transform_9, window_bounds = array<i64: 1, 128>}]} {
    %c0_i32 = arith.constant 0 : i32
    %0 = arith.cmpi eq, %arg0, %c0_i32 : i32
    %1 = arith.extui %0 : i1 to i32
    %c0_i32_0 = arith.constant 0 : i32
    %2 = arith.cmpi ne, %1, %c0_i32_0 : i32
    scf.if %2 {
      %cst_27 = arith.constant 0.000000e+00 : f32
      %35 = vector.broadcast %cst_27 : f32 to vector<1x128xf32>
      %c0_28 = arith.constant 0 : index
      %c0_29 = arith.constant 0 : index
      %36 = vector.load %arg9[%c0_28, %c0_29] : memref<1x128xf32, #tpu.memory_space<vmem>>, vector<1x128xf32>
      tpu.vector_store %arg9[%c0_28, %c0_29], %35 {strides = array<i32>} : memref<1x128xf32, #tpu.memory_space<vmem>>, vector<1x128xf32>,
      %cst_30 = arith.constant 0.000000e+00 : f32
      %37 = vector.broadcast %cst_30 : f32 to vector<1x128xf32>
      %c0_31 = arith.constant 0 : index
      %c0_32 = arith.constant 0 : index
      %38 = vector.load %arg10[%c0_31, %c0_32] : memref<1x128xf32, #tpu.memory_space<vmem>>, vector<1x128xf32>
      tpu.vector_store %arg10[%c0_31, %c0_32], %37 {strides = array<i32>} : memref<1x128xf32, #tpu.memory_space<vmem>>, vector<1x128xf32>,
    } else {
    }
    %c0 = arith.constant 0 : index
    %c0_1 = arith.constant 0 : index
    %3 = vector.load %arg2[%c0, %c0_1] : memref<512x128xbf16, #tpu.memory_space<vmem>>, vector<512x128xbf16>
    %4 = arith.extf %3 : vector<512x128xbf16> to vector<512x128xf32>
    %c0_2 = arith.constant 0 : index
    %c0_3 = arith.constant 0 : index
    %5 = vector.load %arg3[%c0_2, %c0_3] : memref<1x128xf32, #tpu.memory_space<vmem>>, vector<1x128xf32>
    %6 = vector.broadcast %5 : vector<1x128xf32> to vector<512x128xf32>
    %7 = arith.mulf %4, %6 : vector<512x128xf32>
    %c0_4 = arith.constant 0 : index
    %c0_5 = arith.constant 0 : index
    %8 = vector.load %arg4[%c0_4, %c0_5] : memref<1x128xf32, #tpu.memory_space<vmem>>, vector<1x128xf32>
    %9 = vector.broadcast %8 : vector<1x128xf32> to vector<512x128xf32>
    %10 = arith.addf %7, %9 : vector<512x128xf32>
    %c0_6 = arith.constant 0 : index
    %c0_7 = arith.constant 0 : index
    %11 = vector.load %arg1[%c0_6, %c0_7] : memref<512x128xbf16, #tpu.memory_space<vmem>>, vector<512x128xbf16>
    %c0_8 = arith.constant 0 : index
    %c0_9 = arith.constant 0 : index
    %12 = vector.load %arg5[%c0_8, %c0_9] : memref<128x128xbf16, #tpu.memory_space<vmem>>, vector<128x128xbf16>
    %cst = arith.constant dense<0.000000e+00> : vector<512x128xf32>
    %13 = tpu.matmul %11, %12, %cst {dimension_numbers = #tpu.dot_dimension_numbers<[1], [0], [0], [1], [0, 0, 1, 1], [], []>} : vector<512x128xbf16>, vector<128x128xbf16>, vector<512x128xf32> -> vector<512x128xf32>
    %14 = arith.truncf %10 : vector<512x128xf32> to vector<512x128xbf16>
    %c0_10 = arith.constant 0 : index
    %c0_11 = arith.constant 0 : index
    %15 = vector.load %arg6[%c0_10, %c0_11] : memref<128x128xbf16, #tpu.memory_space<vmem>>, vector<128x128xbf16>
    %cst_12 = arith.constant dense<0.000000e+00> : vector<512x128xf32>
    %16 = tpu.matmul %14, %15, %cst_12 {dimension_numbers = #tpu.dot_dimension_numbers<[1], [0], [0], [1], [0, 0, 1, 1], [], []>} : vector<512x128xbf16>, vector<128x128xbf16>, vector<512x128xf32> -> vector<512x128xf32>
    %17 = arith.addf %13, %16 : vector<512x128xf32>
    %c0_13 = arith.constant 0 : index
    %c0_14 = arith.constant 0 : index
    %18 = vector.load %arg7[%c0_13, %c0_14] : memref<1x128xf32, #tpu.memory_space<vmem>>, vector<1x128xf32>
    %19 = vector.broadcast %18 : vector<1x128xf32> to vector<512x128xf32>
    %20 = arith.addf %17, %19 : vector<512x128xf32>
    %21 = arith.truncf %20 : vector<512x128xf32> to vector<512x128xbf16>
    %c0_15 = arith.constant 0 : index
    %c0_16 = arith.constant 0 : index
    %22 = vector.load %arg8[%c0_15, %c0_16] : memref<512x128xbf16, #tpu.memory_space<vmem>>, vector<512x128xbf16>
    tpu.vector_store %arg8[%c0_15, %c0_16], %21 {strides = array<i32>} : memref<512x128xbf16, #tpu.memory_space<vmem>>, vector<512x128xbf16>,
    %23 = arith.extf %21 : vector<512x128xbf16> to vector<512x128xf32>
    %c0_17 = arith.constant 0 : index
    %c0_18 = arith.constant 0 : index
    %24 = vector.load %arg9[%c0_17, %c0_18] : memref<1x128xf32, #tpu.memory_space<vmem>>, vector<1x128xf32>
    %cst_19 = arith.constant dense<0.000000e+00> : vector<128xf32>
    %25 = vector.multi_reduction <add>, %23, %cst_19 [0] : vector<512x128xf32> to vector<128xf32>
    %26 = vector.shape_cast %25 : vector<128xf32> to vector<1x128xf32>
    %27 = arith.addf %24, %26 : vector<1x128xf32>
    %c0_20 = arith.constant 0 : index
    %c0_21 = arith.constant 0 : index
    %28 = vector.load %arg9[%c0_20, %c0_21] : memref<1x128xf32, #tpu.memory_space<vmem>>, vector<1x128xf32>
    tpu.vector_store %arg9[%c0_20, %c0_21], %27 {strides = array<i32>} : memref<1x128xf32, #tpu.memory_space<vmem>>, vector<1x128xf32>,
    %c0_22 = arith.constant 0 : index
    %c0_23 = arith.constant 0 : index
    %29 = vector.load %arg10[%c0_22, %c0_23] : memref<1x128xf32, #tpu.memory_space<vmem>>, vector<1x128xf32>
    %30 = arith.mulf %23, %23 : vector<512x128xf32>
    %cst_24 = arith.constant dense<0.000000e+00> : vector<128xf32>
    %31 = vector.multi_reduction <add>, %30, %cst_24 [0] : vector<512x128xf32> to vector<128xf32>
    %32 = vector.shape_cast %31 : vector<128xf32> to vector<1x128xf32>
    %33 = arith.addf %29, %32 : vector<1x128xf32>
    %c0_25 = arith.constant 0 : index
    %c0_26 = arith.constant 0 : index
    %34 = vector.load %arg10[%c0_25, %c0_26] : memref<1x128xf32, #tpu.memory_space<vmem>>, vector<1x128xf32>
    tpu.vector_store %arg10[%c0_25, %c0_26], %33 {strides = array<i32>} : memref<1x128xf32, #tpu.memory_space<vmem>>, vector<1x128xf32>,
    return
  }
  func.func @transform_0(%arg0: i32) -> (i32, i32) {
    %c0_i32 = arith.constant 0 : i32
    %c0_i32_0 = arith.constant 0 : i32
    return %arg0, %c0_i32 : i32, i32
  }
  func.func @transform_1(%arg0: i32) -> (i32, i32) {
    %c0_i32 = arith.constant 0 : i32
    %c0_i32_0 = arith.constant 0 : i32
    return %arg0, %c0_i32 : i32, i32
  }
  func.func @transform_2(%arg0: i32) -> (i32, i32) {
    %c0_i32 = arith.constant 0 : i32
    %c0_i32_0 = arith.constant 0 : i32
    %c0_i32_1 = arith.constant 0 : i32
    return %c0_i32, %c0_i32_0 : i32, i32
  }
  func.func @transform_3(%arg0: i32) -> (i32, i32) {
    %c0_i32 = arith.constant 0 : i32
    %c0_i32_0 = arith.constant 0 : i32
    %c0_i32_1 = arith.constant 0 : i32
    return %c0_i32, %c0_i32_0 : i32, i32
  }
  func.func @transform_4(%arg0: i32) -> (i32, i32) {
    %c0_i32 = arith.constant 0 : i32
    %c0_i32_0 = arith.constant 0 : i32
    %c0_i32_1 = arith.constant 0 : i32
    return %c0_i32, %c0_i32_0 : i32, i32
  }
  func.func @transform_5(%arg0: i32) -> (i32, i32) {
    %c0_i32 = arith.constant 0 : i32
    %c0_i32_0 = arith.constant 0 : i32
    %c0_i32_1 = arith.constant 0 : i32
    return %c0_i32, %c0_i32_0 : i32, i32
  }
  func.func @transform_6(%arg0: i32) -> (i32, i32) {
    %c0_i32 = arith.constant 0 : i32
    %c0_i32_0 = arith.constant 0 : i32
    %c0_i32_1 = arith.constant 0 : i32
    return %c0_i32, %c0_i32_0 : i32, i32
  }
  func.func @transform_7(%arg0: i32) -> (i32, i32) {
    %c0_i32 = arith.constant 0 : i32
    %c0_i32_0 = arith.constant 0 : i32
    return %arg0, %c0_i32 : i32, i32
  }
  func.func @transform_8(%arg0: i32) -> (i32, i32) {
    %c0_i32 = arith.constant 0 : i32
    %c0_i32_0 = arith.constant 0 : i32
    %c0_i32_1 = arith.constant 0 : i32
    return %c0_i32, %c0_i32_0 : i32, i32
  }
  func.func @transform_9(%arg0: i32) -> (i32, i32) {
    %c0_i32 = arith.constant 0 : i32
    %c0_i32_0 = arith.constant 0 : i32
    %c0_i32_1 = arith.constant 0 : i32
    return %c0_i32, %c0_i32_0 : i32, i32
  }
}

module attributes {stable_mosaic.version = 11 : i64} {
  func.func @_front_feat_kernel(%arg0: i32, %arg1: i32, %arg2: memref<512x128xbf16, #tpu.memory_space<vmem>>, %arg3: memref<1x128xf32, #tpu.memory_space<vmem>>, %arg4: memref<1x128xf32, #tpu.memory_space<vmem>>, %arg5: memref<1x128xf32, #tpu.memory_space<vmem>>, %arg6: memref<128x128xbf16, #tpu.memory_space<vmem>>, %arg7: memref<1x128xf32, #tpu.memory_space<vmem>>, %arg8: memref<128x8xbf16, #tpu.memory_space<vmem>>, %arg9: memref<1x8xf32, #tpu.memory_space<vmem>>, %arg10: memref<512x128xbf16, #tpu.memory_space<vmem>>, %arg11: memref<512x8xbf16, #tpu.memory_space<vmem>>, %arg12: memref<1x1x128xf32, #tpu.memory_space<vmem>>) attributes {dimension_semantics = [#tpu.dimension_semantics<parallel>, #tpu.dimension_semantics<arbitrary>], iteration_bounds = array<i64: 2, 2>, scalar_prefetch = 0 : i64, scratch_operands = 0 : i64, tpu.core_type = #tpu.core_type<tc>, window_params = [{transform_indices = @transform_0, window_bounds = array<i64: 512, 128>}, {pipeline_mode = #tpu.pipeline_mode<synchronous>, transform_indices = @transform_1, window_bounds = array<i64: 1, 128>}, {pipeline_mode = #tpu.pipeline_mode<synchronous>, transform_indices = @transform_2, window_bounds = array<i64: 1, 128>}, {pipeline_mode = #tpu.pipeline_mode<synchronous>, transform_indices = @transform_3, window_bounds = array<i64: 1, 128>}, {pipeline_mode = #tpu.pipeline_mode<synchronous>, transform_indices = @transform_4, window_bounds = array<i64: 128, 128>}, {pipeline_mode = #tpu.pipeline_mode<synchronous>, transform_indices = @transform_5, window_bounds = array<i64: 1, 128>}, {pipeline_mode = #tpu.pipeline_mode<synchronous>, transform_indices = @transform_6, window_bounds = array<i64: 128, 8>}, {pipeline_mode = #tpu.pipeline_mode<synchronous>, transform_indices = @transform_7, window_bounds = array<i64: 1, 8>}, {transform_indices = @transform_8, window_bounds = array<i64: 512, 128>}, {transform_indices = @transform_9, window_bounds = array<i64: 512, 8>}, {transform_indices = @transform_10, window_bounds = array<i64: 1, 1, 128>}]} {
    %c0 = arith.constant 0 : index
    %c0_0 = arith.constant 0 : index
    %0 = vector.load %arg2[%c0, %c0_0] : memref<512x128xbf16, #tpu.memory_space<vmem>>, vector<512x128xbf16>
    %1 = arith.extf %0 : vector<512x128xbf16> to vector<512x128xf32>
    %c0_1 = arith.constant 0 : index
    %c0_2 = arith.constant 0 : index
    %2 = vector.load %arg3[%c0_1, %c0_2] : memref<1x128xf32, #tpu.memory_space<vmem>>, vector<1x128xf32>
    %3 = vector.broadcast %2 : vector<1x128xf32> to vector<512x128xf32>
    %4 = arith.mulf %1, %3 : vector<512x128xf32>
    %c0_3 = arith.constant 0 : index
    %c0_4 = arith.constant 0 : index
    %5 = vector.load %arg4[%c0_3, %c0_4] : memref<1x128xf32, #tpu.memory_space<vmem>>, vector<1x128xf32>
    %6 = vector.broadcast %5 : vector<1x128xf32> to vector<512x128xf32>
    %7 = arith.addf %4, %6 : vector<512x128xf32>
    %cst = arith.constant 0.000000e+00 : f32
    %8 = vector.broadcast %cst : f32 to vector<512x128xf32>
    %9 = arith.cmpf oge, %7, %8 : vector<512x128xf32>
    %c0_5 = arith.constant 0 : index
    %c0_6 = arith.constant 0 : index
    %10 = vector.load %arg5[%c0_5, %c0_6] : memref<1x128xf32, #tpu.memory_space<vmem>>, vector<1x128xf32>
    %11 = vector.broadcast %10 : vector<1x128xf32> to vector<512x128xf32>
    %12 = arith.mulf %7, %11 : vector<512x128xf32>
    %13 = arith.select %9, %7, %12 : vector<512x128xi1>, vector<512x128xf32>
    %14 = arith.truncf %13 : vector<512x128xf32> to vector<512x128xbf16>
    %c0_7 = arith.constant 0 : index
    %c0_8 = arith.constant 0 : index
    %15 = vector.load %arg6[%c0_7, %c0_8] : memref<128x128xbf16, #tpu.memory_space<vmem>>, vector<128x128xbf16>
    %cst_9 = arith.constant dense<0.000000e+00> : vector<512x128xf32>
    %16 = tpu.matmul %14, %15, %cst_9 {dimension_numbers = #tpu.dot_dimension_numbers<[1], [0], [0], [1], [0, 0, 1, 1], [], []>} : vector<512x128xbf16>, vector<128x128xbf16>, vector<512x128xf32> -> vector<512x128xf32>
    %c0_10 = arith.constant 0 : index
    %c0_11 = arith.constant 0 : index
    %17 = vector.load %arg7[%c0_10, %c0_11] : memref<1x128xf32, #tpu.memory_space<vmem>>, vector<1x128xf32>
    %18 = vector.broadcast %17 : vector<1x128xf32> to vector<512x128xf32>
    %19 = arith.addf %16, %18 : vector<512x128xf32>
    %20 = arith.truncf %19 : vector<512x128xf32> to vector<512x128xbf16>
    %c0_12 = arith.constant 0 : index
    %c0_13 = arith.constant 0 : index
    %21 = vector.load %arg10[%c0_12, %c0_13] : memref<512x128xbf16, #tpu.memory_space<vmem>>, vector<512x128xbf16>
    tpu.vector_store %arg10[%c0_12, %c0_13], %20 {strides = array<i32>} : memref<512x128xbf16, #tpu.memory_space<vmem>>, vector<512x128xbf16>,
    %c0_14 = arith.constant 0 : index
    %c0_15 = arith.constant 0 : index
    %22 = vector.load %arg8[%c0_14, %c0_15] : memref<128x8xbf16, #tpu.memory_space<vmem>>, vector<128x8xbf16>
    %cst_16 = arith.constant dense<0.000000e+00> : vector<512x8xf32>
    %23 = tpu.matmul %20, %22, %cst_16 {dimension_numbers = #tpu.dot_dimension_numbers<[1], [0], [0], [1], [0, 0, 1, 1], [], []>} : vector<512x128xbf16>, vector<128x8xbf16>, vector<512x8xf32> -> vector<512x8xf32>
    %c0_17 = arith.constant 0 : index
    %c0_18 = arith.constant 0 : index
    %24 = vector.load %arg9[%c0_17, %c0_18] : memref<1x8xf32, #tpu.memory_space<vmem>>, vector<1x8xf32>
    %25 = vector.broadcast %24 : vector<1x8xf32> to vector<512x8xf32>
    %26 = arith.addf %23, %25 : vector<512x8xf32>
    %27 = arith.truncf %26 : vector<512x8xf32> to vector<512x8xbf16>
    %c0_19 = arith.constant 0 : index
    %c0_20 = arith.constant 0 : index
    %28 = vector.load %arg11[%c0_19, %c0_20] : memref<512x8xbf16, #tpu.memory_space<vmem>>, vector<512x8xbf16>
    tpu.vector_store %arg11[%c0_19, %c0_20], %27 {strides = array<i32>} : memref<512x8xbf16, #tpu.memory_space<vmem>>, vector<512x8xbf16>,
    %c0_i32 = arith.constant 0 : i32
    %29 = arith.cmpi eq, %arg1, %c0_i32 : i32
    %30 = arith.extui %29 : i1 to i32
    %c0_i32_21 = arith.constant 0 : i32
    %31 = arith.cmpi ne, %30, %c0_i32_21 : i32
    scf.if %31 {
      %cst_29 = arith.constant 0.000000e+00 : f32
      %38 = vector.broadcast %cst_29 : f32 to vector<1x1x128xf32>
      %c0_30 = arith.constant 0 : index
      %c0_31 = arith.constant 0 : index
      %c0_32 = arith.constant 0 : index
      %39 = vector.load %arg12[%c0_30, %c0_31, %c0_32] : memref<1x1x128xf32, #tpu.memory_space<vmem>>, vector<1x1x128xf32>
      tpu.vector_store %arg12[%c0_30, %c0_31, %c0_32], %38 {strides = array<i32>} : memref<1x1x128xf32, #tpu.memory_space<vmem>>, vector<1x1x128xf32>,
    } else {
    }
    %c0_22 = arith.constant 0 : index
    %c0_23 = arith.constant 0 : index
    %c0_24 = arith.constant 0 : index
    %32 = vector.load %arg12[%c0_22, %c0_23, %c0_24] : memref<1x1x128xf32, #tpu.memory_space<vmem>>, vector<1x1x128xf32>
    %cst_25 = arith.constant dense<0.000000e+00> : vector<128xf32>
    %33 = vector.multi_reduction <add>, %19, %cst_25 [0] : vector<512x128xf32> to vector<128xf32>
    %34 = vector.shape_cast %33 : vector<128xf32> to vector<1x128xf32>
    %35 = vector.shape_cast %34 : vector<1x128xf32> to vector<1x1x128xf32>
    %36 = arith.addf %32, %35 : vector<1x1x128xf32>
    %c0_26 = arith.constant 0 : index
    %c0_27 = arith.constant 0 : index
    %c0_28 = arith.constant 0 : index
    %37 = vector.load %arg12[%c0_26, %c0_27, %c0_28] : memref<1x1x128xf32, #tpu.memory_space<vmem>>, vector<1x1x128xf32>
    tpu.vector_store %arg12[%c0_26, %c0_27, %c0_28], %36 {strides = array<i32>} : memref<1x1x128xf32, #tpu.memory_space<vmem>>, vector<1x1x128xf32>,
    return
  }
  func.func @transform_0(%arg0: i32, %arg1: i32) -> (i32, i32) {
    %c2_i32 = arith.constant 2 : i32
    %0 = arith.muli %arg0, %c2_i32 : i32
    %1 = arith.addi %0, %arg1 : i32
    %c0_i32 = arith.constant 0 : i32
    %c0_i32_0 = arith.constant 0 : i32
    return %1, %c0_i32 : i32, i32
  }
  func.func @transform_1(%arg0: i32, %arg1: i32) -> (i32, i32) {
    %c0_i32 = arith.constant 0 : i32
    %c0_i32_0 = arith.constant 0 : i32
    %c0_i32_1 = arith.constant 0 : i32
    return %c0_i32, %c0_i32_0 : i32, i32
  }
  func.func @transform_2(%arg0: i32, %arg1: i32) -> (i32, i32) {
    %c0_i32 = arith.constant 0 : i32
    %c0_i32_0 = arith.constant 0 : i32
    %c0_i32_1 = arith.constant 0 : i32
    return %c0_i32, %c0_i32_0 : i32, i32
  }
  func.func @transform_3(%arg0: i32, %arg1: i32) -> (i32, i32) {
    %c0_i32 = arith.constant 0 : i32
    %c0_i32_0 = arith.constant 0 : i32
    %c0_i32_1 = arith.constant 0 : i32
    return %c0_i32, %c0_i32_0 : i32, i32
  }
  func.func @transform_4(%arg0: i32, %arg1: i32) -> (i32, i32) {
    %c0_i32 = arith.constant 0 : i32
    %c0_i32_0 = arith.constant 0 : i32
    %c0_i32_1 = arith.constant 0 : i32
    return %c0_i32, %c0_i32_0 : i32, i32
  }
  func.func @transform_5(%arg0: i32, %arg1: i32) -> (i32, i32) {
    %c0_i32 = arith.constant 0 : i32
    %c0_i32_0 = arith.constant 0 : i32
    %c0_i32_1 = arith.constant 0 : i32
    return %c0_i32, %c0_i32_0 : i32, i32
  }
  func.func @transform_6(%arg0: i32, %arg1: i32) -> (i32, i32) {
    %c0_i32 = arith.constant 0 : i32
    %c0_i32_0 = arith.constant 0 : i32
    %c0_i32_1 = arith.constant 0 : i32
    return %c0_i32, %c0_i32_0 : i32, i32
  }
  func.func @transform_7(%arg0: i32, %arg1: i32) -> (i32, i32) {
    %c0_i32 = arith.constant 0 : i32
    %c0_i32_0 = arith.constant 0 : i32
    %c0_i32_1 = arith.constant 0 : i32
    return %c0_i32, %c0_i32_0 : i32, i32
  }
  func.func @transform_8(%arg0: i32, %arg1: i32) -> (i32, i32) {
    %c2_i32 = arith.constant 2 : i32
    %0 = arith.muli %arg0, %c2_i32 : i32
    %1 = arith.addi %0, %arg1 : i32
    %c0_i32 = arith.constant 0 : i32
    %c0_i32_0 = arith.constant 0 : i32
    return %1, %c0_i32 : i32, i32
  }
  func.func @transform_9(%arg0: i32, %arg1: i32) -> (i32, i32) {
    %c2_i32 = arith.constant 2 : i32
    %0 = arith.muli %arg0, %c2_i32 : i32
    %1 = arith.addi %0, %arg1 : i32
    %c0_i32 = arith.constant 0 : i32
    %c0_i32_0 = arith.constant 0 : i32
    return %1, %c0_i32 : i32, i32
  }
  func.func @transform_10(%arg0: i32, %arg1: i32) -> (i32, i32, i32) {
    %c0_i32 = arith.constant 0 : i32
    %c0_i32_0 = arith.constant 0 : i32
    %c0_i32_1 = arith.constant 0 : i32
    return %arg0, %c0_i32, %c0_i32_0 : i32, i32, i32
  }
}

module attributes {stable_mosaic.version = 11 : i64} {
  func.func @_mba_tail_kernel(%arg0: i32, %arg1: i32, %arg2: memref<512x128xbf16, #tpu.memory_space<vmem>>, %arg3: memref<512x8xbf16, #tpu.memory_space<vmem>>, %arg4: memref<1x1x128xf32, #tpu.memory_space<vmem>>, %arg5: memref<512x16xbf16, #tpu.memory_space<vmem>>, %arg6: memref<1x16x8xbf16, #tpu.memory_space<vmem>>, %arg7: memref<8x8xbf16, #tpu.memory_space<vmem>>, %arg8: memref<1x8xf32, #tpu.memory_space<vmem>>, %arg9: memref<8x128xbf16, #tpu.memory_space<vmem>>, %arg10: memref<1x128xf32, #tpu.memory_space<vmem>>, %arg11: memref<512x128xf32, #tpu.memory_space<vmem>>) attributes {dimension_semantics = [#tpu.dimension_semantics<parallel>, #tpu.dimension_semantics<parallel>], iteration_bounds = array<i64: 2, 2>, scalar_prefetch = 0 : i64, scratch_operands = 0 : i64, tpu.core_type = #tpu.core_type<tc>, window_params = [{transform_indices = @transform_0, window_bounds = array<i64: 512, 128>}, {transform_indices = @transform_1, window_bounds = array<i64: 512, 8>}, {transform_indices = @transform_2, window_bounds = array<i64: 1, 1, 128>}, {transform_indices = @transform_3, window_bounds = array<i64: 512, 16>}, {transform_indices = @transform_4, window_bounds = array<i64: 1, 16, 8>}, {pipeline_mode = #tpu.pipeline_mode<synchronous>, transform_indices = @transform_5, window_bounds = array<i64: 8, 8>}, {pipeline_mode = #tpu.pipeline_mode<synchronous>, transform_indices = @transform_6, window_bounds = array<i64: 1, 8>}, {pipeline_mode = #tpu.pipeline_mode<synchronous>, transform_indices = @transform_7, window_bounds = array<i64: 8, 128>}, {pipeline_mode = #tpu.pipeline_mode<synchronous>, transform_indices = @transform_8, window_bounds = array<i64: 1, 128>}, {transform_indices = @transform_9, window_bounds = array<i64: 512, 128>}]} {
    %c0 = arith.constant 0 : index
    %c0_0 = arith.constant 0 : index
    %0 = vector.load %arg3[%c0, %c0_0] : memref<512x8xbf16, #tpu.memory_space<vmem>>, vector<512x8xbf16>
    %c0_1 = arith.constant 0 : index
    %c0_2 = arith.constant 0 : index
    %1 = vector.load %arg7[%c0_1, %c0_2] : memref<8x8xbf16, #tpu.memory_space<vmem>>, vector<8x8xbf16>
    %cst = arith.constant dense<0.000000e+00> : vector<512x8xf32>
    %2 = tpu.matmul %0, %1, %cst {dimension_numbers = #tpu.dot_dimension_numbers<[1], [0], [0], [1], [0, 0, 1, 1], [], []>} : vector<512x8xbf16>, vector<8x8xbf16>, vector<512x8xf32> -> vector<512x8xf32>
    %c0_3 = arith.constant 0 : index
    %c0_4 = arith.constant 0 : index
    %3 = vector.load %arg8[%c0_3, %c0_4] : memref<1x8xf32, #tpu.memory_space<vmem>>, vector<1x8xf32>
    %4 = vector.broadcast %3 : vector<1x8xf32> to vector<512x8xf32>
    %5 = arith.addf %2, %4 : vector<512x8xf32>
    %c0_5 = arith.constant 0 : index
    %c0_6 = arith.constant 0 : index
    %6 = vector.load %arg5[%c0_5, %c0_6] : memref<512x16xbf16, #tpu.memory_space<vmem>>, vector<512x16xbf16>
    %c0_7 = arith.constant 0 : index
    %c0_8 = arith.constant 0 : index
    %c0_9 = arith.constant 0 : index
    %7 = vector.load %arg6[%c0_7, %c0_8, %c0_9] : memref<1x16x8xbf16, #tpu.memory_space<vmem>>, vector<1x16x8xbf16>
    %8 = vector.shape_cast %7 : vector<1x16x8xbf16> to vector<16x8xbf16>
    %cst_10 = arith.constant dense<0.000000e+00> : vector<512x8xf32>
    %9 = tpu.matmul %6, %8, %cst_10 {dimension_numbers = #tpu.dot_dimension_numbers<[1], [0], [0], [1], [0, 0, 1, 1], [], []>} : vector<512x16xbf16>, vector<16x8xbf16>, vector<512x8xf32> -> vector<512x8xf32>
    %10 = arith.addf %9, %5 : vector<512x8xf32>
    %11 = arith.truncf %10 : vector<512x8xf32> to vector<512x8xbf16>
    %c0_11 = arith.constant 0 : index
    %c0_12 = arith.constant 0 : index
    %12 = vector.load %arg9[%c0_11, %c0_12] : memref<8x128xbf16, #tpu.memory_space<vmem>>, vector<8x128xbf16>
    %cst_13 = arith.constant dense<0.000000e+00> : vector<512x128xf32>
    %13 = tpu.matmul %11, %12, %cst_13 {dimension_numbers = #tpu.dot_dimension_numbers<[1], [0], [0], [1], [0, 0, 1, 1], [], []>} : vector<512x8xbf16>, vector<8x128xbf16>, vector<512x128xf32> -> vector<512x128xf32>
    %c0_14 = arith.constant 0 : index
    %c0_15 = arith.constant 0 : index
    %14 = vector.load %arg10[%c0_14, %c0_15] : memref<1x128xf32, #tpu.memory_space<vmem>>, vector<1x128xf32>
    %15 = vector.broadcast %14 : vector<1x128xf32> to vector<512x128xf32>
    %16 = arith.addf %13, %15 : vector<512x128xf32>
    %cst_16 = arith.constant 0.000000e+00 : f32
    %17 = vector.broadcast %cst_16 : f32 to vector<512x128xf32>
    %18 = arith.subf %17, %16 : vector<512x128xf32>
    %19 = math.exp %18 : vector<512x128xf32>
    %cst_17 = arith.constant 1.000000e+00 : f32
    %20 = vector.broadcast %cst_17 : f32 to vector<512x128xf32>
    %21 = arith.addf %20, %19 : vector<512x128xf32>
    %cst_18 = arith.constant 1.000000e+00 : f32
    %22 = vector.broadcast %cst_18 : f32 to vector<512x128xf32>
    %23 = arith.divf %22, %21 : vector<512x128xf32>
    %c0_19 = arith.constant 0 : index
    %c0_20 = arith.constant 0 : index
    %24 = vector.load %arg2[%c0_19, %c0_20] : memref<512x128xbf16, #tpu.memory_space<vmem>>, vector<512x128xbf16>
    %25 = arith.extf %24 : vector<512x128xbf16> to vector<512x128xf32>
    %c0_21 = arith.constant 0 : index
    %c0_22 = arith.constant 0 : index
    %c0_23 = arith.constant 0 : index
    %26 = vector.load %arg4[%c0_21, %c0_22, %c0_23] : memref<1x1x128xf32, #tpu.memory_space<vmem>>, vector<1x1x128xf32>
    %27 = vector.shape_cast %26 : vector<1x1x128xf32> to vector<1x128xf32>
    %28 = vector.broadcast %27 : vector<1x128xf32> to vector<512x128xf32>
    %29 = arith.addf %23, %28 : vector<512x128xf32>
    %30 = arith.mulf %25, %29 : vector<512x128xf32>
    %c0_24 = arith.constant 0 : index
    %c0_25 = arith.constant 0 : index
    %31 = vector.load %arg11[%c0_24, %c0_25] : memref<512x128xf32, #tpu.memory_space<vmem>>, vector<512x128xf32>
    tpu.vector_store %arg11[%c0_24, %c0_25], %30 {strides = array<i32>} : memref<512x128xf32, #tpu.memory_space<vmem>>, vector<512x128xf32>,
    return
  }
  func.func @transform_0(%arg0: i32, %arg1: i32) -> (i32, i32) {
    %c2_i32 = arith.constant 2 : i32
    %0 = arith.muli %arg0, %c2_i32 : i32
    %1 = arith.addi %0, %arg1 : i32
    %c0_i32 = arith.constant 0 : i32
    %c0_i32_0 = arith.constant 0 : i32
    return %1, %c0_i32 : i32, i32
  }
  func.func @transform_1(%arg0: i32, %arg1: i32) -> (i32, i32) {
    %c2_i32 = arith.constant 2 : i32
    %0 = arith.muli %arg0, %c2_i32 : i32
    %1 = arith.addi %0, %arg1 : i32
    %c0_i32 = arith.constant 0 : i32
    %c0_i32_0 = arith.constant 0 : i32
    return %1, %c0_i32 : i32, i32
  }
  func.func @transform_2(%arg0: i32, %arg1: i32) -> (i32, i32, i32) {
    %c0_i32 = arith.constant 0 : i32
    %c0_i32_0 = arith.constant 0 : i32
    %c0_i32_1 = arith.constant 0 : i32
    return %arg0, %c0_i32, %c0_i32_0 : i32, i32, i32
  }
  func.func @transform_3(%arg0: i32, %arg1: i32) -> (i32, i32) {
    %c0_i32 = arith.constant 0 : i32
    %c0_i32_0 = arith.constant 0 : i32
    return %arg1, %c0_i32 : i32, i32
  }
  func.func @transform_4(%arg0: i32, %arg1: i32) -> (i32, i32, i32) {
    %c0_i32 = arith.constant 0 : i32
    %c0_i32_0 = arith.constant 0 : i32
    %c0_i32_1 = arith.constant 0 : i32
    return %arg0, %c0_i32, %c0_i32_0 : i32, i32, i32
  }
  func.func @transform_5(%arg0: i32, %arg1: i32) -> (i32, i32) {
    %c0_i32 = arith.constant 0 : i32
    %c0_i32_0 = arith.constant 0 : i32
    %c0_i32_1 = arith.constant 0 : i32
    return %c0_i32, %c0_i32_0 : i32, i32
  }
  func.func @transform_6(%arg0: i32, %arg1: i32) -> (i32, i32) {
    %c0_i32 = arith.constant 0 : i32
    %c0_i32_0 = arith.constant 0 : i32
    %c0_i32_1 = arith.constant 0 : i32
    return %c0_i32, %c0_i32_0 : i32, i32
  }
  func.func @transform_7(%arg0: i32, %arg1: i32) -> (i32, i32) {
    %c0_i32 = arith.constant 0 : i32
    %c0_i32_0 = arith.constant 0 : i32
    %c0_i32_1 = arith.constant 0 : i32
    return %c0_i32, %c0_i32_0 : i32, i32
  }
  func.func @transform_8(%arg0: i32, %arg1: i32) -> (i32, i32) {
    %c0_i32 = arith.constant 0 : i32
    %c0_i32_0 = arith.constant 0 : i32
    %c0_i32_1 = arith.constant 0 : i32
    return %c0_i32, %c0_i32_0 : i32, i32
  }
  func.func @transform_9(%arg0: i32, %arg1: i32) -> (i32, i32) {
    %c2_i32 = arith.constant 2 : i32
    %0 = arith.muli %arg0, %c2_i32 : i32
    %1 = arith.addi %0, %arg1 : i32
    %c0_i32 = arith.constant 0 : i32
    %c0_i32_0 = arith.constant 0 : i32
    return %1, %c0_i32 : i32, i32
  }
}

</mosaic_0001>

<bundles_post_ra>
// kernel: mba_forward.4
= control target key start
LH: loop header
LB: loop body
LE: loop exit
PB: predicated region body
PF: predicated region fallthrough
CT: control target
= control target key end

     0   :  { %s706_s9 = smov 0   ;;  %s772_s0 = inlined_call_operand.vmem [shape: bf16[2048,128], index: 0, kind: input, shape index: {}]   ;;  %s773_s1 = inlined_call_operand.vmem [shape: f32[1,128], index: 1, kind: output, shape index: {0}]   ;;  %s774_s2 = inlined_call_operand.vmem [shape: f32[1,128], index: 2, kind: output, shape index: {1}]  }
   0x1 LB: > { %s505_s10 = sadd.s32 4294967295, %s688_s9   ;;  %p508_p0 = scmp.ge.s32.totalorder %s688_s9, 1  ;;  %s688_s9 = sphi %s706_s9, %s13_s9  }
   0x2   : > { %p106_p1 = scmp.lt.s32.totalorder %s688_s9, 5 }
   0x4   : > { %p107_p2 = pnand %p508_p0, %p106_p1 }
   0x5   : > { %s509_s11 = sshll.u32 (!%p107_p2), %s505_s10, 6  ;;  %p511_p4 = scmp.ne.s32.totalorder (!%p107_p2), %s505_s10, 0 }
   0x6   : > { %110 = sbr.rel (%p107_p2) target bundleno = 165 (0xa5), region = 24  ;;  %p124_p3 = scmp.lt.s32.totalorder (!%p107_p2), %s509_s11, 255 }
   0xb   : > { %s776_s11 = smov (!%p124_p3, %s509_s11), 255  ;;  %132 = sbr.rel (%p511_p4) target bundleno = 18 (0x12), region = 28 }
   0xc   : > { %s510_s12 = sshll.u32 %s776_s11, 2 }
   0xd   : > { %s717_s15 = scalar_lea.vmem %s772_s0, %s510_s12 }
  0x10   : > { %v690_v0 = vmov 0.0  }
  0x11   : > { %133 = vst [vmem:[%s773_s1] sm:$0x1] %v690_v0  ;;  %134 = vst [vmem:[%s774_s2] sm:$0x1] %v690_v0 }
  0x12 PF: > { %v515_v1 = vld [vmem:[%s717_s15] sm:$0xff]   ;;  %v642_v2 = vld [vmem:[%s717_s15 + $0x8] sm:$0xff]   ;;  %v643_v7 = vld [vmem:[%s717_s15 + $0x10] sm:$0xff]  }
  0x13   : > { %v516_v3 = vunpack.c.l.bf16 %v515_v1  ;;  %v517_v4 = vunpack.c.h.bf16 %v515_v1  ;;  %v520_v5 = vunpack.c.l.bf16 %v642_v2  ;;  %v521_v8 = vunpack.c.h.bf16 %v642_v2  ;;  %v644_v12 = vld [vmem:[%s717_s15 + $0x18] sm:$0xff]   ;;  %v645_v17 = vld [vmem:[%s717_s15 + $0x20] sm:$0xff]   ;;  %v646_v22 = vld [vmem:[%s717_s15 + $0x28] sm:$0xff]  }
  0x14   : > { %v524_v10 = vunpack.c.l.bf16 %v643_v7  ;;  %v525_v13 = vunpack.c.h.bf16 %v643_v7  ;;  %v528_v15 = vunpack.c.l.bf16 %v644_v12  ;;  %v529_v18 = vunpack.c.h.bf16 %v644_v12  ;;  %v647_v30 = vld [vmem:[%s717_s15 + $0x30] sm:$0xff]   ;;  %v648_v39 = vld [vmem:[%s717_s15 + $0x38] sm:$0xff]   ;;  %v649_v48 = vld [vmem:[%s717_s15 + $0x40] sm:$0xff]  }
  0x15   : > { %v264_v6 = vadd.f32 %v517_v4, %v516_v3  ;;  %v532_v20 = vunpack.c.l.bf16 %v645_v17  ;;  %v533_v23 = vunpack.c.h.bf16 %v645_v17  ;;  %v336_v25 = vmul.f32 %v516_v3, %v516_v3  ;;  %v650_v57 = vld [vmem:[%s717_s15 + $0x48] sm:$0xff]   ;;  %v651_v2 = vld [vmem:[%s717_s15 + $0x50] sm:$0xff]  }
  0x16   : > { %v337_v26 = vmul.f32 %v517_v4, %v517_v4  ;;  %v536_v27 = vunpack.c.l.bf16 %v646_v22  ;;  %v338_v29 = vmul.f32 %v520_v5, %v520_v5  ;;  %v537_v31 = vunpack.c.h.bf16 %v646_v22 }
  0x17   : > { %v265_v9 = vadd.f32 %v520_v5, %v264_v6  ;;  %v339_v33 = vmul.f32 %v521_v8, %v521_v8  ;;  %v540_v35 = vunpack.c.l.bf16 %v647_v30  ;;  %v340_v37 = vmul.f32 %v524_v10, %v524_v10 }
  0x18   : > { %v400_v34 = vadd.f32 %v337_v26, %v336_v25  ;;  %v541_v40 = vunpack.c.h.bf16 %v647_v30  ;;  %v341_v42 = vmul.f32 %v525_v13, %v525_v13  ;;  %v544_v44 = vunpack.c.l.bf16 %v648_v39 }
  0x19   : > { %v266_v11 = vadd.f32 %v521_v8, %v265_v9  ;;  %v342_v46 = vmul.f32 %v528_v15, %v528_v15  ;;  %v545_v49 = vunpack.c.h.bf16 %v648_v39  ;;  %v343_v51 = vmul.f32 %v529_v18, %v529_v18 }
  0x1a   : > { %v401_v38 = vadd.f32 %v400_v34, %v338_v29  ;;  %v548_v53 = vunpack.c.l.bf16 %v649_v48  ;;  %v344_v55 = vmul.f32 %v532_v20, %v532_v20  ;;  %v549_v58 = vunpack.c.h.bf16 %v649_v48  ;;  %v654_v29 = vld [vmem:[%s717_s15 + $0x68] sm:$0xff]  }
  0x1b   : > { %v267_v14 = vadd.f32 %v524_v10, %v266_v11  ;;  %v345_v60 = vmul.f32 %v533_v23, %v533_v23  ;;  %v552_v62 = vunpack.c.l.bf16 %v650_v57  ;;  %v346_v0 = vmul.f32 %v536_v27, %v536_v27  ;;  %v652_v11 = vld [vmem:[%s717_s15 + $0x58] sm:$0xff]  }
  0x1c   : > { %v402_v43 = vadd.f32 %v401_v38, %v339_v33  ;;  %v553_v3 = vunpack.c.h.bf16 %v650_v57  ;;  %v347_v5 = vmul.f32 %v537_v31, %v537_v31  ;;  %v556_v7 = vunpack.c.l.bf16 %v651_v2  ;;  %v655_v38 = vld [vmem:[%s717_s15 + $0x70] sm:$0xff]  }
  0x1d   : > { %v268_v16 = vadd.f32 %v525_v13, %v267_v14  ;;  %v348_v9 = vmul.f32 %v540_v35, %v540_v35  ;;  %v557_v12 = vunpack.c.h.bf16 %v651_v2  ;;  %v349_v14 = vmul.f32 %v541_v40, %v541_v40 }
  0x1e   : > { %v403_v47 = vadd.f32 %v402_v43, %v340_v37  ;;  %v568_v34 = vunpack.c.l.bf16 %v654_v29  ;;  %v569_v39 = vunpack.c.h.bf16 %v654_v29  ;;  %v572_v43 = vunpack.c.l.bf16 %v655_v38 }
  0x1f   : > { %v269_v19 = vadd.f32 %v528_v15, %v268_v16  ;;  %v560_v16 = vunpack.c.l.bf16 %v652_v11  ;;  %v573_v48 = vunpack.c.h.bf16 %v655_v38 }
  0x20   : > { %v404_v52 = vadd.f32 %v403_v47, %v341_v42  ;;  %v656_v47 = vld [vmem:[%s717_s15 + $0x78] sm:$0xff]  }
  0x21   : > { %v270_v21 = vadd.f32 %v529_v18, %v269_v19  ;;  %v350_v18 = vmul.f32 %v544_v44, %v544_v44  ;;  %v577_v57 = vunpack.c.h.bf16 %v656_v47 }
  0x22   : > { %v405_v56 = vadd.f32 %v404_v52, %v342_v46  ;;  %v576_v52 = vunpack.c.l.bf16 %v656_v47 }
  0x23   : > { %v271_v24 = vadd.f32 %v532_v20, %v270_v21  ;;  %v653_v20 = vld [vmem:[%s717_s15 + $0x60] sm:$0xff]   ;;  %v561_v21 = vunpack.c.h.bf16 %v652_v11 }
  0x24   : > { %v406_v61 = vadd.f32 %v405_v56, %v343_v51  ;;  %v564_v25 = vunpack.c.l.bf16 %v653_v20  ;;  %v565_v30 = vunpack.c.h.bf16 %v653_v20  ;;  %v657_v56 = vld [vmem:[%s717_s15 + $0x80] sm:$0xff]  }
  0x25   : > { %v272_v28 = vadd.f32 %v533_v23, %v271_v24  ;;  %v351_v23 = vmul.f32 %v545_v49, %v545_v49  ;;  %v581_v2 = vunpack.c.h.bf16 %v657_v56 }
  0x26   : > { %v407_v1 = vadd.f32 %v406_v61, %v344_v55  ;;  %v580_v61 = vunpack.c.l.bf16 %v657_v56 }
  0x27   : > { %v273_v32 = vadd.f32 %v536_v27, %v272_v28  ;;  %v352_v27 = vmul.f32 %v548_v53, %v548_v53 }
  0x28   : > { %v408_v6 = vadd.f32 %v407_v1, %v345_v60  ;;  %v658_v1 = vld [vmem:[%s717_s15 + $0x88] sm:$0xff]  }
  0x29   : > { %v274_v36 = vadd.f32 %v537_v31, %v273_v32  ;;  %v353_v32 = vmul.f32 %v549_v58, %v549_v58  ;;  %v585_v11 = vunpack.c.h.bf16 %v658_v1 }
  0x2a   : > { %v409_v10 = vadd.f32 %v408_v6, %v346_v0  ;;  %v584_v6 = vunpack.c.l.bf16 %v658_v1 }
  0x2b   : > { %v275_v41 = vadd.f32 %v540_v35, %v274_v36  ;;  %v354_v36 = vmul.f32 %v552_v62, %v552_v62 }
  0x2c   : > { %v410_v15 = vadd.f32 %v409_v10, %v347_v5  ;;  %v659_v10 = vld [vmem:[%s717_s15 + $0x90] sm:$0xff]  }
  0x2d   : > { %v276_v45 = vadd.f32 %v541_v40, %v275_v41  ;;  %v355_v41 = vmul.f32 %v553_v3, %v553_v3  ;;  %v589_v20 = vunpack.c.h.bf16 %v659_v10 }
  0x2e   : > { %v411_v19 = vadd.f32 %v410_v15, %v348_v9  ;;  %v588_v15 = vunpack.c.l.bf16 %v659_v10 }
  0x2f   : > { %v277_v50 = vadd.f32 %v544_v44, %v276_v45  ;;  %v356_v45 = vmul.f32 %v556_v7, %v556_v7 }
  0x30   : > { %v412_v24 = vadd.f32 %v411_v19, %v349_v14  ;;  %v660_v19 = vld [vmem:[%s717_s15 + $0x98] sm:$0xff]  }
  0x31   : > { %v278_v54 = vadd.f32 %v545_v49, %v277_v50  ;;  %v357_v50 = vmul.f32 %v557_v12, %v557_v12  ;;  %v593_v29 = vunpack.c.h.bf16 %v660_v19 }
  0x32   : > { %v413_v28 = vadd.f32 %v412_v24, %v350_v18  ;;  %v592_v24 = vunpack.c.l.bf16 %v660_v19 }
  0x33   : > { %v279_v59 = vadd.f32 %v548_v53, %v278_v54  ;;  %v358_v54 = vmul.f32 %v560_v16, %v560_v16 }
  0x34   : > { %v414_v33 = vadd.f32 %v413_v28, %v351_v23  ;;  %v661_v28 = vld [vmem:[%s717_s15 + $0xa0] sm:$0xff]  }
  0x35   : > { %v280_v63 = vadd.f32 %v549_v58, %v279_v59  ;;  %v359_v59 = vmul.f32 %v561_v21, %v561_v21  ;;  %v597_v38 = vunpack.c.h.bf16 %v661_v28 }
  0x36   : > { %v415_v37 = vadd.f32 %v414_v33, %v352_v27  ;;  %v596_v33 = vunpack.c.l.bf16 %v661_v28 }
  0x37   : > { %v281_v4 = vadd.f32 %v552_v62, %v280_v63  ;;  %v360_v63 = vmul.f32 %v564_v25, %v564_v25 }
  0x38   : > { %v416_v42 = vadd.f32 %v415_v37, %v353_v32  ;;  %v662_v37 = vld [vmem:[%s717_s15 + $0xa8] sm:$0xff]  }
  0x39   : > { %v282_v8 = vadd.f32 %v553_v3, %v281_v4  ;;  %v361_v4 = vmul.f32 %v565_v30, %v565_v30  ;;  %v601_v47 = vunpack.c.h.bf16 %v662_v37 }
  0x3a   : > { %v417_v46 = vadd.f32 %v416_v42, %v354_v36  ;;  %v600_v42 = vunpack.c.l.bf16 %v662_v37 }
  0x3b   : > { %v283_v13 = vadd.f32 %v556_v7, %v282_v8  ;;  %v362_v8 = vmul.f32 %v568_v34, %v568_v34 }
  0x3c   : > { %v418_v51 = vadd.f32 %v417_v46, %v355_v41  ;;  %v663_v46 = vld [vmem:[%s717_s15 + $0xb0] sm:$0xff]  }
  0x3d   : > { %v284_v17 = vadd.f32 %v557_v12, %v283_v13  ;;  %v363_v13 = vmul.f32 %v569_v39, %v569_v39  ;;  %v605_v56 = vunpack.c.h.bf16 %v663_v46 }
  0x3e   : > { %v419_v55 = vadd.f32 %v418_v51, %v356_v45  ;;  %v604_v51 = vunpack.c.l.bf16 %v663_v46 }
  0x3f   : > { %v285_v22 = vadd.f32 %v560_v16, %v284_v17  ;;  %v364_v17 = vmul.f32 %v572_v43, %v572_v43 }
  0x40   : > { %v420_v60 = vadd.f32 %v419_v55, %v357_v50  ;;  %v664_v55 = vld [vmem:[%s717_s15 + $0xb8] sm:$0xff]  }
  0x41   : > { %v286_v26 = vadd.f32 %v561_v21, %v285_v22  ;;  %v365_v22 = vmul.f32 %v573_v48, %v573_v48  ;;  %v609_v1 = vunpack.c.h.bf16 %v664_v55 }
  0x42   : > { %v421_v0 = vadd.f32 %v420_v60, %v358_v54  ;;  %v608_v60 = vunpack.c.l.bf16 %v664_v55 }
  0x43   : > { %v287_v31 = vadd.f32 %v564_v25, %v286_v26  ;;  %v366_v26 = vmul.f32 %v576_v52, %v576_v52 }
  0x44   : > { %v422_v5 = vadd.f32 %v421_v0, %v359_v59  ;;  %v665_v0 = vld [vmem:[%s717_s15 + $0xc0] sm:$0xff]  }
  0x45   : > { %v288_v35 = vadd.f32 %v565_v30, %v287_v31  ;;  %v367_v31 = vmul.f32 %v577_v57, %v577_v57  ;;  %v613_v10 = vunpack.c.h.bf16 %v665_v0 }
  0x46   : > { %v423_v9 = vadd.f32 %v422_v5, %v360_v63  ;;  %v612_v5 = vunpack.c.l.bf16 %v665_v0 }
  0x47   : > { %v289_v40 = vadd.f32 %v568_v34, %v288_v35  ;;  %v368_v35 = vmul.f32 %v580_v61, %v580_v61 }
  0x48   : > { %v424_v14 = vadd.f32 %v423_v9, %v361_v4  ;;  %v666_v9 = vld [vmem:[%s717_s15 + $0xc8] sm:$0xff]  }
  0x49   : > { %v290_v44 = vadd.f32 %v569_v39, %v289_v40  ;;  %v369_v40 = vmul.f32 %v581_v2, %v581_v2  ;;  %v617_v19 = vunpack.c.h.bf16 %v666_v9 }
  0x4a   : > { %v425_v18 = vadd.f32 %v424_v14, %v362_v8  ;;  %v616_v14 = vunpack.c.l.bf16 %v666_v9 }
  0x4b   : > { %v291_v49 = vadd.f32 %v572_v43, %v290_v44  ;;  %v370_v44 = vmul.f32 %v584_v6, %v584_v6 }
  0x4c   : > { %v426_v23 = vadd.f32 %v425_v18, %v363_v13  ;;  %v667_v18 = vld [vmem:[%s717_s15 + $0xd0] sm:$0xff]  }
  0x4d   : > { %v292_v53 = vadd.f32 %v573_v48, %v291_v49  ;;  %v371_v49 = vmul.f32 %v585_v11, %v585_v11  ;;  %v621_v28 = vunpack.c.h.bf16 %v667_v18 }
  0x4e   : > { %v427_v27 = vadd.f32 %v426_v23, %v364_v17  ;;  %v620_v23 = vunpack.c.l.bf16 %v667_v18 }
  0x4f   : > { %v293_v58 = vadd.f32 %v576_v52, %v292_v53  ;;  %v372_v53 = vmul.f32 %v588_v15, %v588_v15 }
  0x50   : > { %v428_v32 = vadd.f32 %v427_v27, %v365_v22  ;;  %v668_v27 = vld [vmem:[%s717_s15 + $0xd8] sm:$0xff]  }
  0x51   : > { %v294_v62 = vadd.f32 %v577_v57, %v293_v58  ;;  %v373_v58 = vmul.f32 %v589_v20, %v589_v20  ;;  %v625_v37 = vunpack.c.h.bf16 %v668_v27 }
  0x52   : > { %v429_v36 = vadd.f32 %v428_v32, %v366_v26  ;;  %v624_v32 = vunpack.c.l.bf16 %v668_v27 }
  0x53   : > { %v295_v3 = vadd.f32 %v580_v61, %v294_v62  ;;  %v374_v62 = vmul.f32 %v592_v24, %v592_v24 }
  0x54   : > { %v430_v41 = vadd.f32 %v429_v36, %v367_v31  ;;  %v669_v36 = vld [vmem:[%s717_s15 + $0xe0] sm:$0xff]  }
  0x55   : > { %v296_v7 = vadd.f32 %v581_v2, %v295_v3  ;;  %v375_v3 = vmul.f32 %v593_v29, %v593_v29  ;;  %v629_v46 = vunpack.c.h.bf16 %v669_v36 }
  0x56   : > { %v431_v45 = vadd.f32 %v430_v41, %v368_v35  ;;  %v628_v41 = vunpack.c.l.bf16 %v669_v36 }
  0x57   : > { %v297_v12 = vadd.f32 %v584_v6, %v296_v7  ;;  %v376_v7 = vmul.f32 %v596_v33, %v596_v33 }
  0x58   : > { %v432_v50 = vadd.f32 %v431_v45, %v369_v40  ;;  %v670_v45 = vld [vmem:[%s717_s15 + $0xe8] sm:$0xff]  }
  0x59   : > { %v298_v16 = vadd.f32 %v585_v11, %v297_v12  ;;  %v377_v12 = vmul.f32 %v597_v38, %v597_v38  ;;  %v633_v55 = vunpack.c.h.bf16 %v670_v45 }
  0x5a   : > { %v433_v54 = vadd.f32 %v432_v50, %v370_v44  ;;  %v632_v50 = vunpack.c.l.bf16 %v670_v45 }
  0x5b   : > { %v299_v21 = vadd.f32 %v588_v15, %v298_v16  ;;  %v378_v16 = vmul.f32 %v600_v42, %v600_v42 }
  0x5c   : > { %v434_v59 = vadd.f32 %v433_v54, %v371_v49  ;;  %v671_v54 = vld [vmem:[%s717_s15 + $0xf0] sm:$0xff]  }
  0x5d   : > { %v300_v25 = vadd.f32 %v589_v20, %v299_v21  ;;  %v379_v21 = vmul.f32 %v601_v47, %v601_v47  ;;  %v637_v0 = vunpack.c.h.bf16 %v671_v54 }
  0x5e   : > { %v435_v63 = vadd.f32 %v434_v59, %v372_v53  ;;  %v636_v59 = vunpack.c.l.bf16 %v671_v54 }
  0x5f   : > { %v301_v30 = vadd.f32 %v592_v24, %v300_v25  ;;  %v380_v25 = vmul.f32 %v604_v51, %v604_v51 }
  0x60   : > { %v436_v4 = vadd.f32 %v435_v63, %v373_v58  ;;  %v672_v63 = vld [vmem:[%s717_s15 + $0xf8] sm:$0xff]  }
  0x61   : > { %v302_v34 = vadd.f32 %v593_v29, %v301_v30  ;;  %v381_v30 = vmul.f32 %v605_v56, %v605_v56 }
  0x62   : > { %v437_v8 = vadd.f32 %v436_v4, %v374_v62  ;;  %v640_v4 = vunpack.c.l.bf16 %v672_v63 }
  0x63   : > { %v303_v39 = vadd.f32 %v596_v33, %v302_v34  ;;  %v382_v34 = vmul.f32 %v608_v60, %v608_v60 }
  0x64   : > { %v438_v13 = vadd.f32 %v437_v8, %v375_v3  ;;  %v641_v8 = vunpack.c.h.bf16 %v672_v63 }
  0x65   : > { %v304_v43 = vadd.f32 %v597_v38, %v303_v39  ;;  %v383_v39 = vmul.f32 %v609_v1, %v609_v1 }
  0x66   : > { %v439_v17 = vadd.f32 %v438_v13, %v376_v7  ;;  %v392_v13 = vmul.f32 %v628_v41, %v628_v41 }
  0x67   : > { %v305_v48 = vadd.f32 %v600_v42, %v304_v43  ;;  %v384_v43 = vmul.f32 %v612_v5, %v612_v5 }
  0x68   : > { %v440_v22 = vadd.f32 %v439_v17, %v377_v12 }
  0x69   : > { %v306_v52 = vadd.f32 %v601_v47, %v305_v48  ;;  %v385_v48 = vmul.f32 %v613_v10, %v613_v10 }
  0x6a   : > { %v441_v26 = vadd.f32 %v440_v22, %v378_v16  ;;  %v393_v16 = vmul.f32 %v629_v46, %v629_v46  ;;  %v395_v22 = vmul.f32 %v633_v55, %v633_v55 }
  0x6b   : > { %v307_v57 = vadd.f32 %v604_v51, %v306_v52  ;;  %v386_v52 = vmul.f32 %v616_v14, %v616_v14 }
  0x6c   : > { %v442_v31 = vadd.f32 %v441_v26, %v379_v21 }
  0x6d   : > { %v308_v61 = vadd.f32 %v605_v56, %v307_v57  ;;  %v387_v57 = vmul.f32 %v617_v19, %v617_v19 }
  0x6e   : > { %v443_v35 = vadd.f32 %v442_v31, %v380_v25  ;;  %v396_v25 = vmul.f32 %v636_v59, %v636_v59 }
  0x6f   : > { %v309_v2 = vadd.f32 %v608_v60, %v308_v61  ;;  %v388_v61 = vmul.f32 %v620_v23, %v620_v23 }
  0x70   : > { %v444_v40 = vadd.f32 %v443_v35, %v381_v30  ;;  %v263_v30 = vld [vmem:[%s773_s1] sm:$0x1]  ;;  %v399_v35 = vmul.f32 %v641_v8, %v641_v8 }
  0x71   : > { %v310_v6 = vadd.f32 %v609_v1, %v309_v2  ;;  %v389_v2 = vmul.f32 %v621_v28, %v621_v28 }
  0x72   : > { %v445_v44 = vadd.f32 %v444_v40, %v382_v34 }
  0x73   : > { %v311_v11 = vadd.f32 %v612_v5, %v310_v6  ;;  %v390_v6 = vmul.f32 %v624_v32, %v624_v32 }
  0x74   : > { %v446_v49 = vadd.f32 %v445_v44, %v383_v39  ;;  %v335_v44 = vld [vmem:[%s774_s2] sm:$0x1] }
  0x75   : > { %v312_v15 = vadd.f32 %v613_v10, %v311_v11  ;;  %v391_v10 = vmul.f32 %v625_v37, %v625_v37 }
  0x76   : > { %v447_v53 = vadd.f32 %v446_v49, %v384_v43 }
  0x77   : > { %v313_v20 = vadd.f32 %v616_v14, %v312_v15 }
  0x78   : > { %v448_v58 = vadd.f32 %v447_v53, %v385_v48 }
  0x79   : > { %v314_v24 = vadd.f32 %v617_v19, %v313_v20  ;;  %v394_v19 = vmul.f32 %v632_v50, %v632_v50 }
  0x7a   : > { %v449_v62 = vadd.f32 %v448_v58, %v386_v52 }
  0x7b   : > { %v315_v29 = vadd.f32 %v620_v23, %v314_v24 }
  0x7c   : > { %v450_v3 = vadd.f32 %v449_v62, %v387_v57 }
  0x7d   : > { %v316_v33 = vadd.f32 %v621_v28, %v315_v29  ;;  %v397_v28 = vmul.f32 %v637_v0, %v637_v0 }
  0x7e   : > { %v451_v7 = vadd.f32 %v450_v3, %v388_v61 }
  0x7f   : > { %v317_v38 = vadd.f32 %v624_v32, %v316_v33  ;;  %v398_v32 = vmul.f32 %v640_v4, %v640_v4 }
  0x80   : > { %v452_v11 = vadd.f32 %v451_v7, %v389_v2 }
  0x81   : > { %v318_v42 = vadd.f32 %v625_v37, %v317_v38 }
  0x82   : > { %v453_v14 = vadd.f32 %v452_v11, %v390_v6 }
  0x83   : > { %v319_v47 = vadd.f32 %v628_v41, %v318_v42 }
  0x84   : > { %v454_v17 = vadd.f32 %v453_v14, %v391_v10 }
  0x85   : > { %v320_v51 = vadd.f32 %v629_v46, %v319_v47 }
  0x86   : > { %v455_v20 = vadd.f32 %v454_v17, %v392_v13 }
  0x87   : > { %v321_v56 = vadd.f32 %v632_v50, %v320_v51 }
  0x88   : > { %v456_v23 = vadd.f32 %v455_v20, %v393_v16 }
  0x89   : > { %v322_v60 = vadd.f32 %v633_v55, %v321_v56 }
  0x8a   : > { %v457_v26 = vadd.f32 %v456_v23, %v394_v19 }
  0x8b   : > { %v323_v1 = vadd.f32 %v636_v59, %v322_v60 }
  0x8c   : > { %v458_v29 = vadd.f32 %v457_v26, %v395_v22 }
  0x8d   : > { %v324_v5 = vadd.f32 %v637_v0, %v323_v1 }
  0x8e   : > { %v459_v33 = vadd.f32 %v458_v29, %v396_v25 }
  0x8f   : > { %v325_v9 = vadd.f32 %v640_v4, %v324_v5 }
  0x90   : > { %v460_v36 = vadd.f32 %v459_v33, %v397_v28 }
  0x91   : > { %v326_v12 = vadd.f32 %v641_v8, %v325_v9 }
  0x92   : > { %v461_v37 = vadd.f32 %v460_v36, %v398_v32 }
  0x93   : > { %v327_v15 = vrot.slane %v326_v12, 4 }
  0x94   : > { %v462_v38 = vadd.f32 %v461_v37, %v399_v35 }
  0x95   : > { %v328_v18 = vadd.f32 %v327_v15, %v326_v12 }
  0x96   : > { %v463_v39 = vrot.slane %v462_v38, 4 }
  0x97   : > { %v329_v21 = vrot.slane %v328_v18, 2 }
  0x98   : > { %v464_v40 = vadd.f32 %v463_v39, %v462_v38 }
  0x99   : > { %v330_v24 = vadd.f32 %v329_v21, %v328_v18 }
  0x9a   : > { %v465_v41 = vrot.slane %v464_v40, 2 }
  0x9b   : > { %v331_v27 = vrot.slane %v330_v24, 1 }
  0x9c   : > { %v466_v42 = vadd.f32 %v465_v41, %v464_v40 }
  0x9d   : > { %v332_v31 = vadd.f32 %v331_v27, %v330_v24 }
  0x9e   : > { %v467_v43 = vrot.slane %v466_v42, 1 }
  0x9f   : > { %v333_v34 = vadd.f32 %v332_v31, %v263_v30 }
  0xa0   : > { %v468_v45 = vadd.f32 %v467_v43, %v466_v42 }
  0xa1   : > { %334 = vst [vmem:[%s773_s1] sm:$0x1] %v333_v34 }
  0xa2   : > { %v469_v46 = vadd.f32 %v468_v45, %v335_v44 }
  0xa4   : > { %470 = vst [vmem:[%s774_s2] sm:$0x1] %v469_v46 }
  0xa5 PF: > { %s13_s9 = sadd.s32 1, %s688_s9  }
  0xa6   : > { %p10_p5 = scmp.ge.s32.totalorder %s13_s9, 6  }
  0xa8   :  { %12 = sbr.rel (!%p10_p5) target bundleno = 1 (0x1), region = 62 }

// kernel: mba_forward.5
= control target key start
LH: loop header
LB: loop body
LE: loop exit
PB: predicated region body
PF: predicated region fallthrough
CT: control target
= control target key end

     0   :  { %s3267_s30 = smov 0   ;;  %s3892_s0 = inlined_call_operand.vmem [shape: bf16[2048,128], index: 0, kind: input, shape index: {}]   ;;  %s3893_s1 = inlined_call_operand.vmem [shape: bf16[2048,128], index: 1, kind: input, shape index: {}]   ;;  %s3894_s2 = inlined_call_operand.vmem [shape: f32[1,128], index: 2, kind: input, shape index: {}]   ;;  %s3895_s3 = inlined_call_operand.vmem [shape: f32[1,128], index: 3, kind: input, shape index: {}]   ;;  %s3896_s4 = inlined_call_operand.vmem [shape: bf16[128,128], index: 4, kind: input, shape index: {}]   ;;  %s3897_s5 = inlined_call_operand.vmem [shape: bf16[128,128], index: 5, kind: input, shape index: {}]   ;;  %s3898_s6 = inlined_call_operand.vmem [shape: f32[1,128], index: 6, kind: input, shape index: {}]   ;;  %s3899_s7 = inlined_call_operand.vmem [shape: bf16[2048,128], index: 7, kind: output, shape index: {0}]   ;;  %s3900_s8 = inlined_call_operand.vmem [shape: f32[1,128], index: 8, kind: output, shape index: {1}]   ;;  %s3901_s9 = inlined_call_operand.vmem [shape: f32[1,128], index: 9, kind: output, shape index: {2}]  }
   0x1 LB: > { %s2367_s10 = sadd.s32 4294967295, %s3214_s30   ;;  %p2371_p0 = scmp.ge.s32.totalorder %s3214_s30, 1  ;;  %s3214_s30 = sphi %s3267_s30, %s20_s30  }
   0x2   : > { %p294_p1 = scmp.lt.s32.totalorder %s3214_s30, 5 }
   0x4   : > { %p295_p2 = pnand %p2371_p0, %p294_p1 }
   0x5   : > { %s2372_s11 = sshll.u32 (!%p295_p2), %s2367_s10, 6  ;;  %p2378_p4 = scmp.ne.s32.totalorder (!%p295_p2), %s2367_s10, 0 }
   0x6   : > { %298 = sbr.rel (%p295_p2) target bundleno = 404 (0x194), region = 48  ;;  %p336_p3 = scmp.lt.s32.totalorder (!%p295_p2), %s2372_s11, 255 }
   0xb   : > { %s3908_s11 = smov (!%p336_p3, %s2372_s11), 255  ;;  %357 = sbr.rel (%p2378_p4) target bundleno = 18 (0x12), region = 52 }
   0xc   : > { %s2373_s12 = sshll.u32 %s3908_s11, 2 }
   0xd   : > { %s3278_s15 = scalar_lea.vmem %s3892_s0, %s2373_s12  ;;  %s3283_s18 = scalar_lea.vmem %s3893_s1, %s2373_s12 }
   0xe   : > { %s3288_s21 = scalar_lea.vmem %s3899_s7, %s2373_s12 }
  0x10   : > { %v3216_v0 = vmov 0.0  }
  0x11   : > { %358 = vst [vmem:[%s3900_s8] sm:$0x1] %v3216_v0  ;;  %359 = vst [vmem:[%s3901_s9] sm:$0x1] %v3216_v0 }
  0x12 PF: > { %v3159_v1 = vld [vmem:[%s3897_s5 + $0x38] sm:$0xff]   ;;  %v3161_v3 = vld [vmem:[%s3897_s5 + $0x30] sm:$0xff]   ;;  %v3163_v5 = vld [vmem:[%s3897_s5 + $0x28] sm:$0xff]  }
  0x13   : > { %v3160_v2 = vld [vmem:[%s3896_s4 + $0x38] sm:$0xff]   ;;  %2990 = vmatprep.subr.bf16.mxu0 %v3159_v1  ;;  %v3162_v4 = vld [vmem:[%s3896_s4 + $0x30] sm:$0xff]   ;;  %v3164_v6 = vld [vmem:[%s3896_s4 + $0x28] sm:$0xff]  }
  0x14   : > { %3070 = vmatprep.subr.bf16.mxu1 %v3160_v2  ;;  %2991 = vmatpush3.bf16.msra.mxu0 %v3159_v1  ;;  %v3165_v7 = vld [vmem:[%s3897_s5 + $0x20] sm:$0xff]   ;;  %v3167_v9 = vld [vmem:[%s3897_s5 + $0x18] sm:$0xff]   ;;  %v3169_v11 = vld [vmem:[%s3897_s5 + $0x10] sm:$0xff]  }
  0x15   : > { %3071 = vmatpush3.bf16.msra.mxu1 %v3160_v2  ;;  %2992 = vmatprep.subr.bf16.mxu0 %v3161_v3  ;;  %v3166_v8 = vld [vmem:[%s3896_s4 + $0x20] sm:$0xff]   ;;  %v3168_v10 = vld [vmem:[%s3896_s4 + $0x18] sm:$0xff]   ;;  %v3170_v12 = vld [vmem:[%s3896_s4 + $0x10] sm:$0xff]  }
  0x16   : > { %3072 = vmatprep.subr.bf16.mxu1 %v3162_v4  ;;  %v2561_v13 = vld [vmem:[%s3283_s18] sm:$0xff]   ;;  %v2848_v19 = vld [vmem:[%s3283_s18 + $0x8] sm:$0xff]   ;;  %v2849_v24 = vld [vmem:[%s3283_s18 + $0x10] sm:$0xff]  }
  0x17   : > { %v3336_v14 = vld [vmem:[%s3894_s2] ss:$0 sm:$0xff]  ;;  %v2562_v16 = vunpack.c.l.bf16 %v2561_v13  ;;  %v2563_v17 = vunpack.c.h.bf16 %v2561_v13  ;;  %v2566_v22 = vunpack.c.l.bf16 %v2848_v19  ;;  %v2567_v23 = vunpack.c.h.bf16 %v2848_v19  ;;  %v3171_v25 = vld [vmem:[%s3897_s5 + $0x8] sm:$0xff]   ;;  %v2850_v28 = vld [vmem:[%s3283_s18 + $0x18] sm:$0xff]  }
  0x18   : > { %2993 = vmatpush3.bf16.msra.mxu0 %v3161_v3  ;;  %v3341_v15 = vld [vmem:[%s3895_s3] ss:$0 sm:$0xff]  ;;  %v2570_v26 = vunpack.c.l.bf16 %v2849_v24  ;;  %v2571_v27 = vunpack.c.h.bf16 %v2849_v24  ;;  %v3172_v29 = vld [vmem:[%s3896_s4 + $0x8] sm:$0xff]   ;;  %v2574_v36 = vunpack.c.l.bf16 %v2850_v28  ;;  %v2575_v37 = vunpack.c.h.bf16 %v2850_v28  ;;  %v2853_v46 = vld [vmem:[%s3283_s18 + $0x30] sm:$0xff]  }
  0x19   : > { %3073 = vmatpush3.bf16.msra.mxu1 %v3162_v4  ;;  %2994 = vmatprep.subr.bf16.mxu0 %v3163_v5  ;;  %v3175_v18 = vld [vmem:[%s3278_s15] sm:$0xff]   ;;  %v495_v20 = vmul.f32 %v2562_v16, %v3336_v14  ;;  %v496_v21 = vmul.f32 %v2563_v17, %v3336_v14  ;;  %v497_v32 = vmul.f32 %v2566_v22, %v3336_v14  ;;  %v2852_v41 = vld [vmem:[%s3283_s18 + $0x28] sm:$0xff]   ;;  %v2854_v56 = vld [vmem:[%s3283_s18 + $0x38] sm:$0xff]   ;;  %v2586_v58 = vunpack.c.l.bf16 %v2853_v46 }
  0x1a   : > { %3074 = vmatprep.subr.bf16.mxu1 %v3164_v6  ;;  %3086 = vmatprep.mubr.bf16.mxu1 %v3175_v18  ;;  %v498_v33 = vmul.f32 %v2567_v23, %v3336_v14  ;;  %v499_v34 = vmul.f32 %v2570_v26, %v3336_v14  ;;  %v500_v35 = vmul.f32 %v2571_v27, %v3336_v14  ;;  %v2851_v38 = vld [vmem:[%s3283_s18 + $0x20] sm:$0xff]   ;;  %v2582_v51 = vunpack.c.l.bf16 %v2852_v41  ;;  %v2856_v4 = vld [vmem:[%s3283_s18 + $0x48] sm:$0xff]   ;;  %v2857_v13 = vld [vmem:[%s3283_s18 + $0x50] sm:$0xff]  }
  0x1b   : > { %v566_v30 = vadd.f32 %v3341_v15, %v495_v20  ;;  %v567_v31 = vadd.f32 %v3341_v15, %v496_v21  ;;  %v2578_v40 = vunpack.c.l.bf16 %v2851_v38  ;;  %v3173_v42 = vld [vmem:[%s3897_s5] sm:$0xff]   ;;  %v568_v43 = vadd.f32 %v3341_v15, %v497_v32  ;;  %v3177_v16 = vld [vmem:[%s3278_s15 + $0x10] sm:$0xff]   ;;  %v2858_v21 = vld [vmem:[%s3283_s18 + $0x58] sm:$0xff]  }
  0x1c   : > { %2995 = vmatpush3.bf16.msra.mxu0 %v3163_v5  ;;  %v501_v44 = vmul.f32 %v2574_v36, %v3336_v14  ;;  %v2579_v45 = vunpack.c.h.bf16 %v2851_v38  ;;  %v3174_v47 = vld [vmem:[%s3896_s4] sm:$0xff]   ;;  %v569_v48 = vadd.f32 %v3341_v15, %v498_v33  ;;  %v502_v49 = vmul.f32 %v2575_v37, %v3336_v14 }
  0x1d   : > { %3075 = vmatpush3.bf16.msra.mxu1 %v3164_v6  ;;  %2996 = vmatprep.subr.bf16.mxu0 %v3165_v7  ;;  %v710_v39 = vpack.c.bf16 %v567_v31, %v566_v30  ;;  %v503_v50 = vmul.f32 %v2578_v40, %v3336_v14  ;;  %v570_v52 = vadd.f32 %v3341_v15, %v499_v34  ;;  %v2583_v55 = vunpack.c.h.bf16 %v2852_v41  ;;  %v2855_v63 = vld [vmem:[%s3283_s18 + $0x40] sm:$0xff]  }
  0x1e   : > { %3076 = vmatprep.subr.bf16.mxu1 %v3166_v8  ;;  %v571_v53 = vadd.f32 %v3341_v15, %v500_v35  ;;  %v504_v54 = vmul.f32 %v2579_v45, %v3336_v14  ;;  %v3380_v57 = vadd.f32 %v3341_v15, %v501_v44  ;;  %v3383_v59 = vadd.f32 %v3341_v15, %v502_v49  ;;  %v2859_v30 = vld [vmem:[%s3283_s18 + $0x60] sm:$0xff]   ;;  %v3178_v44 = vld [vmem:[%s3278_s15 + $0x18] sm:$0xff]  }
  0x1f   : > { %3006 = vmatprep.mubr.bf16.mxu0 %v710_v39  ;;  %v505_v60 = vmul.f32 %v2582_v51, %v3336_v14  ;;  %v2587_v61 = vunpack.c.h.bf16 %v2853_v46  ;;  %v2590_v62 = vunpack.c.l.bf16 %v2854_v56  ;;  %v3388_v0 = vadd.f32 %v3341_v15, %v503_v50 }
  0x20   : > { %2997 = vmatpush3.bf16.msra.mxu0 %v3165_v7  ;;  %v3391_v1 = vadd.f32 %v3341_v15, %v504_v54  ;;  %v506_v2 = vmul.f32 %v2583_v55, %v3336_v14  ;;  %v2591_v3 = vunpack.c.h.bf16 %v2854_v56  ;;  %v711_v5 = vpack.c.bf16 %v569_v48, %v568_v43  ;;  %v2860_v43 = vld [vmem:[%s3283_s18 + $0x68] sm:$0xff]   ;;  %v2862_v54 = vld [vmem:[%s3283_s18 + $0x78] sm:$0xff]   ;;  %v3179_v55 = vld [vmem:[%s3278_s15 + $0x20] sm:$0xff]  }
  0x21   : > { %3077 = vmatpush3.bf16.msra.mxu1 %v3166_v8  ;;  %2998 = vmatprep.subr.bf16.mxu0 %v3167_v9  ;;  %v712_v6 = vpack.c.bf16 %v571_v53, %v570_v52  ;;  %v507_v7 = vmul.f32 %v2586_v58, %v3336_v14  ;;  %v3176_v8 = vld [vmem:[%s3278_s15 + $0x8] sm:$0xff]   ;;  %v713_v17 = vpack.c.bf16 %v3383_v59, %v3380_v57  ;;  %v2598_v20 = vunpack.c.l.bf16 %v2856_v4  ;;  %v2861_v53 = vld [vmem:[%s3283_s18 + $0x70] sm:$0xff]  }
  0x22   : > { %3078 = vmatprep.subr.bf16.mxu1 %v3168_v10  ;;  %v3404_v18 = vadd.f32 %v3341_v15, %v505_v60  ;;  %v510_v19 = vmul.f32 %v2591_v3, %v3336_v14  ;;  %v714_v22 = vpack.c.bf16 %v3391_v1, %v3388_v0  ;;  %v3411_v23 = vadd.f32 %v3341_v15, %v506_v2 }
  0x23   : > { %v513_v27 = vmul.f32 %v2598_v20, %v3336_v14  ;;  %v2602_v28 = vunpack.c.l.bf16 %v2857_v13  ;;  %v3418_v31 = vadd.f32 %v3341_v15, %v507_v7  ;;  %v2606_v34 = vunpack.c.l.bf16 %v2858_v21  ;;  %v2865_v20 = vld [vmem:[%s3283_s18 + $0x90] sm:$0xff]  }
  0x24   : > { %2999 = vmatpush3.bf16.msra.mxu0 %v3167_v9  ;;  %v508_v9 = vmul.f32 %v2587_v61, %v3336_v14  ;;  %v3427_v35 = vadd.f32 %v3341_v15, %v510_v19  ;;  %v2607_v40 = vunpack.c.h.bf16 %v2858_v21  ;;  %v2611_v48 = vunpack.c.h.bf16 %v2859_v30 }
  0x25   : > { %3079 = vmatpush3.bf16.msra.mxu1 %v3168_v10  ;;  %3000 = vmatprep.subr.bf16.mxu0 %v3169_v11  ;;  %v509_v10 = vmul.f32 %v2590_v62, %v3336_v14  ;;  %v515_v37 = vmul.f32 %v2602_v28, %v3336_v14  ;;  %v517_v41 = vmul.f32 %v2606_v34, %v3336_v14  ;;  %v2614_v58 = vunpack.c.l.bf16 %v2860_v43 }
  0x26   : > { %3080 = vmatprep.subr.bf16.mxu1 %v3170_v12  ;;  %v3421_v32 = vadd.f32 %v3341_v15, %v508_v9  ;;  %v3442_v46 = vadd.f32 %v3341_v15, %v513_v27  ;;  %v518_v51 = vmul.f32 %v2607_v40, %v3336_v14  ;;  %v715_v56 = vpack.c.bf16 %v3411_v23, %v3404_v18  ;;  %v2864_v9 = vld [vmem:[%s3283_s18 + $0x88] sm:$0xff]  }
  0x27   : > { %v3424_v33 = vadd.f32 %v3341_v15, %v509_v10  ;;  %v3448_v49 = vadd.f32 %v3341_v15, %v515_v37  ;;  %v520_v57 = vmul.f32 %v2611_v48, %v3336_v14  ;;  %v2615_v59 = vunpack.c.h.bf16 %v2860_v43 }
  0x28   : > { %3001 = vmatpush3.bf16.msra.mxu0 %v3169_v11  ;;  %v2594_v11 = vunpack.c.l.bf16 %v2855_v63  ;;  %v716_v60 = vpack.c.bf16 %v3421_v32, %v3418_v31  ;;  %v3466_v62 = vadd.f32 %v3341_v15, %v517_v41  ;;  %v2618_v2 = vunpack.c.l.bf16 %v2861_v53  ;;  %v3181_v31 = vld [vmem:[%s3278_s15 + $0x30] sm:$0xff]  }
  0x29   : > { %3081 = vmatpush3.bf16.msra.mxu1 %v3170_v12  ;;  %3002 = vmatprep.subr.bf16.mxu0 %v3171_v25  ;;  %v2595_v12 = vunpack.c.h.bf16 %v2855_v63  ;;  %v717_v61 = vpack.c.bf16 %v3427_v35, %v3424_v33  ;;  %v3469_v63 = vadd.f32 %v3341_v15, %v518_v51  ;;  %v3475_v1 = vadd.f32 %v3341_v15, %v520_v57 }
  0x2a   : > { %3082 = vmatprep.subr.bf16.mxu1 %v3172_v29  ;;  %v511_v24 = vmul.f32 %v2594_v11, %v3336_v14  ;;  %v2622_v3 = vunpack.c.l.bf16 %v2862_v54  ;;  %v3486_v10 = vmul.f32 %v2614_v58, %v3336_v14  ;;  %v3489_v11 = vmul.f32 %v2615_v59, %v3336_v14 }
  0x2b   : > { %v512_v26 = vmul.f32 %v2595_v12, %v3336_v14  ;;  %v2619_v12 = vunpack.c.h.bf16 %v2861_v53  ;;  %v2635_v37 = vunpack.c.h.bf16 %v2865_v20  ;;  %v2868_v53 = vld [vmem:[%s3283_s18 + $0xa8] sm:$0xff]  }
  0x2c   : > { %3003 = vmatpush3.bf16.msra.mxu0 %v3171_v25  ;;  %v2599_v25 = vunpack.c.h.bf16 %v2856_v4  ;;  %v3433_v39 = vadd.f32 %v3341_v15, %v511_v24  ;;  %v2863_v4 = vld [vmem:[%s3283_s18 + $0x80] sm:$0xff]   ;;  %v2630_v24 = vunpack.c.l.bf16 %v2864_v9 }
  0x2d   : > { %3083 = vmatpush3.bf16.msra.mxu1 %v3172_v29  ;;  %3004 = vmatprep.subr.bf16.mxu0 %v3173_v42  ;;  %v2603_v29 = vunpack.c.h.bf16 %v2857_v13  ;;  %v3439_v45 = vadd.f32 %v3341_v15, %v512_v26  ;;  %v525_v13 = vmul.f32 %v2622_v3, %v3336_v14  ;;  %v2626_v18 = vunpack.c.l.bf16 %v2863_v4 }
  0x2e   : > { %3084 = vmatprep.subr.bf16.mxu1 %v3174_v47  ;;  %v514_v36 = vmul.f32 %v2599_v25, %v3336_v14  ;;  %v2627_v19 = vunpack.c.h.bf16 %v2863_v4  ;;  %v3180_v25 = vld [vmem:[%s3278_s15 + $0x28] sm:$0xff]   ;;  %v3513_v32 = vmul.f32 %v2619_v12, %v3336_v14  ;;  %v529_v34 = vmul.f32 %v2630_v24, %v3336_v14  ;;  %v3182_v24 = vld [vmem:[%s3278_s15 + $0x38] sm:$0xff]  }
  0x2f   : > { %v516_v38 = vmul.f32 %v2603_v29, %v3336_v14  ;;  %v3502_v23 = vadd.f32 %v3341_v15, %v525_v13  ;;  %v527_v27 = vmul.f32 %v2626_v18, %v3336_v14  ;;  %v2631_v29 = vunpack.c.h.bf16 %v2864_v9  ;;  %v2870_v13 = vld [vmem:[%s3283_s18 + $0xb8] sm:$0xff]  }
  0x30   : > { %3005 = vmatpush3.bf16.msra.mxu0 %v3173_v42  ;;  %v2610_v42 = vunpack.c.l.bf16 %v2859_v30  ;;  %v528_v28 = vmul.f32 %v2627_v19, %v3336_v14  ;;  %v2866_v30 = vld [vmem:[%s3283_s18 + $0x98] sm:$0xff]   ;;  %v532_v51 = vmul.f32 %v2635_v37, %v3336_v14  ;;  %v2646_v12 = vunpack.c.l.bf16 %v2868_v53 }
  0x31   : > { %3085 = vmatpush3.bf16.msra.mxu1 %v3174_v47  ;;  %v3445_v47 = vadd.f32 %v3341_v15, %v514_v36  ;;  %v3451_v50 = vadd.f32 %v3341_v15, %v516_v38  ;;  %v2634_v36 = vunpack.c.l.bf16 %v2865_v20  ;;  %v2867_v38 = vld [vmem:[%s3283_s18 + $0xa0] sm:$0xff]   ;;  %v3520_v41 = vadd.f32 %v3341_v15, %v527_v27 }
  0x32   : > { %v519_v52 = vmul.f32 %v2610_v42, %v3336_v14  ;;  %v3523_v42 = vadd.f32 %v3341_v15, %v528_v28  ;;  %v530_v43 = vmul.f32 %v2631_v29, %v3336_v14  ;;  %v2642_v57 = vunpack.c.l.bf16 %v2867_v38 }
  0x33   : > { %3007 = vmatmul.mubr.bf16.vlgmr.msra.gmra.mxu0 %v711_v5  ;;  %v718_v5 = vpack.c.bf16 %v3439_v45, %v3433_v39  ;;  %v720_v7 = vpack.c.bf16 %v3451_v50, %v3448_v49  ;;  %v531_v48 = vmul.f32 %v2634_v36, %v3336_v14  ;;  %v3541_v59 = vadd.f32 %v3341_v15, %v532_v51 }
  0x34   : > { %3087 = vmatmul.mubr.bf16.vlgmr.msra.gmra.mxu1 %v3176_v8  ;;  %3010 = vmatprep.mubr.bf16.mxu0 %v712_v6  ;;  %v3472_v0 = vadd.f32 %v3341_v15, %v519_v52  ;;  %v719_v6 = vpack.c.bf16 %v3445_v47, %v3442_v46  ;;  %v2623_v8 = vunpack.c.h.bf16 %v2862_v54  ;;  %v2638_v52 = vunpack.c.l.bf16 %v2866_v30 }
  0x35   : > { %3090 = vmatprep.mubr.bf16.mxu1 %v3177_v16  ;;  %v721_v16 = vpack.c.bf16 %v3469_v63, %v3466_v62  ;;  %v726_v54 = vpack.c.bf16 %v3523_v42, %v3520_v41  ;;  %v3538_v58 = vadd.f32 %v3341_v15, %v531_v48  ;;  %v2643_v3 = vunpack.c.h.bf16 %v2867_v38  ;;  %v2871_v38 = vld [vmem:[%s3283_s18 + $0xc0] sm:$0xff]   ;;  %v3197_v41 = vld [vmem:[%s3278_s15 + $0xb0] sm:$0xff]   ;;  %v3198_v42 = vld [vmem:[%s3278_s15 + $0xb8] sm:$0xff]  }
  0x36   : > { %v722_v21 = vpack.c.bf16 %v3475_v1, %v3472_v0  ;;  %v535_v9 = vmul.f32 %v2642_v57, %v3336_v14  ;;  %v2647_v20 = vunpack.c.h.bf16 %v2868_v53  ;;  %v537_v28 = vmul.f32 %v2646_v12, %v3336_v14  ;;  %v2872_v53 = vld [vmem:[%s3283_s18 + $0xc8] sm:$0xff]  }
  0x37   : > { %v536_v19 = vmul.f32 %v2643_v3, %v3336_v14  ;;  %v2654_v37 = vunpack.c.l.bf16 %v2870_v13  ;;  %v2658_v35 = vunpack.c.l.bf16 %v2871_v38  ;;  %v2662_v45 = vunpack.c.l.bf16 %v2872_v53  ;;  %v3188_v1 = vld [vmem:[%s3278_s15 + $0x68] sm:$0xff]  }
  0x38   : > { %v3561_v27 = vadd.f32 %v3341_v15, %v535_v9  ;;  %v3573_v48 = vadd.f32 %v3341_v15, %v537_v28  ;;  %v595_v62 = vadd.f32 %v3341_v15, %v3513_v32  ;;  %v3192_v32 = vld [vmem:[%s3278_s15 + $0x88] sm:$0xff]  }
  0x39   : > { %v541_v3 = vmul.f32 %v2654_v37, %v3336_v14  ;;  %v3184_v37 = vld [vmem:[%s3278_s15 + $0x48] sm:$0xff]  }
  0x3b   : > { %3011 = vmatmul.mubr.bf16.gmra.mxu0 %v713_v17  ;;  %v526_v17 = vmul.f32 %v2623_v8, %v3336_v14  ;;  %v3601_v39 = vadd.f32 %v3341_v15, %v541_v3 }
  0x3c   : > { %3091 = vmatmul.mubr.bf16.gmra.mxu1 %v3178_v44  ;;  %3014 = vmatprep.mubr.bf16.mxu0 %v714_v22  ;;  %v3499_v22 = vmul.f32 %v2618_v2, %v3336_v14  ;;  %v3527_v44 = vadd.f32 %v3341_v15, %v529_v34  ;;  %v533_v2 = vmul.f32 %v2638_v52, %v3336_v14  ;;  %v2655_v52 = vunpack.c.h.bf16 %v2870_v13 }
  0x3d   : > { %3094 = vmatprep.mubr.bf16.mxu1 %v3179_v55  ;;  %v3506_v26 = vadd.f32 %v3341_v15, %v526_v17  ;;  %v3535_v55 = vadd.f32 %v3341_v15, %v530_v43  ;;  %v728_v17 = vpack.c.bf16 %v3541_v59, %v3538_v58  ;;  %v538_v34 = vmul.f32 %v2647_v20, %v3336_v14  ;;  %v3200_v58 = vld [vmem:[%s3278_s15 + $0xc8] sm:$0xff]   ;;  %v3201_v59 = vld [vmem:[%s3278_s15 + $0xd0] sm:$0xff]  }
  0x3e   : > { %v3553_v18 = vadd.f32 %v3341_v15, %v533_v2  ;;  %v542_v33 = vmul.f32 %v2655_v52, %v3336_v14  ;;  %v543_v13 = vmul.f32 %v2658_v35, %v3336_v14  ;;  %v2663_v20 = vunpack.c.h.bf16 %v2872_v53 }
  0x3f   : > { %v725_v40 = vpack.c.bf16 %v3506_v26, %v3502_v23  ;;  %v727_v4 = vpack.c.bf16 %v3535_v55, %v3527_v44  ;;  %v3583_v57 = vadd.f32 %v3341_v15, %v538_v34  ;;  %v3194_v23 = vld [vmem:[%s3278_s15 + $0x98] sm:$0xff]   ;;  %v3195_v26 = vld [vmem:[%s3278_s15 + $0xa0] sm:$0xff]  }
  0x40   : > { %v546_v53 = vmul.f32 %v2663_v20, %v3336_v14  ;;  %v3199_v44 = vld [vmem:[%s3278_s15 + $0xc0] sm:$0xff]  }
  0x41   : > { %v731_v9 = vpack.c.bf16 %v3583_v57, %v3573_v48  ;;  %v3206_v48 = vld [vmem:[%s3278_s15 + $0xf8] sm:$0xff]  }
  0x43   : > { %3015 = vmatmul.mubr.bf16.gmra.mxu0 %v715_v56  ;;  %v2639_v56 = vunpack.c.h.bf16 %v2866_v30  ;;  %v3183_v30 = vld [vmem:[%s3278_s15 + $0x40] sm:$0xff]  }
  0x44   : > { %3095 = vmatmul.mubr.bf16.gmra.mxu1 %v3180_v25  ;;  %3018 = vmatprep.mubr.bf16.mxu0 %v716_v60  ;;  %v2869_v60 = vld [vmem:[%s3283_s18 + $0xb0] sm:$0xff]  }
  0x45   : > { %3098 = vmatprep.mubr.bf16.mxu1 %v3181_v31  ;;  %v534_v8 = vmul.f32 %v2639_v56, %v3336_v14  ;;  %v2650_v29 = vunpack.c.l.bf16 %v2869_v60  ;;  %v3566_v31 = vadd.f32 %v3341_v15, %v536_v19  ;;  %v2651_v36 = vunpack.c.h.bf16 %v2869_v60 }
  0x47   : > { %v3558_v25 = vadd.f32 %v3341_v15, %v534_v8  ;;  %v539_v51 = vmul.f32 %v2650_v29, %v3336_v14  ;;  %v730_v56 = vpack.c.bf16 %v3566_v31, %v3561_v27  ;;  %v540_v2 = vmul.f32 %v2651_v36, %v3336_v14  ;;  %v2873_v8 = vld [vmem:[%s3283_s18 + $0xd0] sm:$0xff]   ;;  %v2875_v36 = vld [vmem:[%s3283_s18 + $0xe0] sm:$0xff]   ;;  %v3204_v31 = vld [vmem:[%s3278_s15 + $0xe8] sm:$0xff]  }
  0x48   : > { %v545_v29 = vmul.f32 %v2662_v45, %v3336_v14  ;;  %v2667_v34 = vunpack.c.h.bf16 %v2873_v8  ;;  %v2674_v20 = vunpack.c.l.bf16 %v2875_v36  ;;  %v2877_v45 = vld [vmem:[%s3283_s18 + $0xf0] sm:$0xff]  }
  0x49   : > { %v729_v43 = vpack.c.bf16 %v3558_v25, %v3553_v18  ;;  %v3591_v60 = vadd.f32 %v3341_v15, %v539_v51  ;;  %v3598_v12 = vadd.f32 %v3341_v15, %v540_v2  ;;  %v3617_v51 = vadd.f32 %v3341_v15, %v543_v13  ;;  %v3185_v2 = vld [vmem:[%s3278_s15 + $0x50] sm:$0xff]   ;;  %v3202_v18 = vld [vmem:[%s3278_s15 + $0xd8] sm:$0xff]   ;;  %v3203_v25 = vld [vmem:[%s3278_s15 + $0xe0] sm:$0xff]  }
  0x4a   : > { %v3625_v3 = vadd.f32 %v3341_v15, %v545_v29  ;;  %v548_v35 = vmul.f32 %v2667_v34, %v3336_v14  ;;  %v3633_v13 = vadd.f32 %v3341_v15, %v546_v53  ;;  %v551_v47 = vmul.f32 %v2674_v20, %v3336_v14  ;;  %v2878_v53 = vld [vmem:[%s3283_s18 + $0xf8] sm:$0xff]  }
  0x4b   : > { %3019 = vmatmul.mubr.bf16.gmra.mxu0 %v717_v61  ;;  %v2659_v61 = vunpack.c.h.bf16 %v2871_v38  ;;  %v732_v28 = vpack.c.bf16 %v3598_v12, %v3591_v60  ;;  %v2675_v38 = vunpack.c.h.bf16 %v2875_v36  ;;  %v2683_v20 = vunpack.c.h.bf16 %v2877_v45  ;;  %v3186_v36 = vld [vmem:[%s3278_s15 + $0x58] sm:$0xff]  }
  0x4c   : > { %3099 = vmatmul.mubr.bf16.gmra.mxu1 %v3182_v24  ;;  %3022 = vmatprep.mubr.bf16.mxu0 %v718_v5  ;;  %v3604_v5 = vadd.f32 %v3341_v15, %v542_v33  ;;  %v2874_v24 = vld [vmem:[%s3283_s18 + $0xd8] sm:$0xff]  }
  0x4d   : > { %3102 = vmatprep.mubr.bf16.mxu1 %v3183_v30  ;;  %v544_v19 = vmul.f32 %v2659_v61, %v3336_v14  ;;  %v2666_v30 = vunpack.c.l.bf16 %v2873_v8  ;;  %v2670_v61 = vunpack.c.l.bf16 %v2874_v24  ;;  %v2876_v8 = vld [vmem:[%s3283_s18 + $0xe8] sm:$0xff]   ;;  %v552_v49 = vmul.f32 %v2675_v38, %v3336_v14 }
  0x4e   : > { %v2679_v50 = vunpack.c.h.bf16 %v2876_v8  ;;  %v592_v38 = vadd.f32 %v3341_v15, %v3486_v10 }
  0x4f   : > { %v3620_v52 = vadd.f32 %v3341_v15, %v544_v19  ;;  %v547_v33 = vmul.f32 %v2666_v30, %v3336_v14  ;;  %v2671_v19 = vunpack.c.h.bf16 %v2874_v24  ;;  %v3642_v30 = vadd.f32 %v3341_v15, %v548_v35  ;;  %v3187_v24 = vld [vmem:[%s3278_s15 + $0x60] sm:$0xff]  }
  0x50   : > { %v549_v34 = vmul.f32 %v2670_v61, %v3336_v14  ;;  %v2682_v61 = vunpack.c.l.bf16 %v2877_v45  ;;  %v556_v45 = vmul.f32 %v2683_v20, %v3336_v14 }
  0x51   : > { %v3639_v29 = vadd.f32 %v3341_v15, %v547_v33  ;;  %v550_v46 = vmul.f32 %v2671_v19, %v3336_v14  ;;  %v3664_v33 = vadd.f32 %v3341_v15, %v551_v47  ;;  %v554_v19 = vmul.f32 %v2679_v50, %v3336_v14 }
  0x52   : > { %v2687_v47 = vunpack.c.h.bf16 %v2878_v53  ;;  %v3700_v20 = vadd.f32 %v3341_v15, %v556_v45  ;;  %v3903_v55 = vpack.c.bf16 %v3620_v52, %v3617_v51 }
  0x53   : > { %3023 = vmatmul.mubr.bf16.gmra.mxu0 %v719_v6  ;;  %v2678_v6 = vunpack.c.l.bf16 %v2876_v8 }
  0x54   : > { %3103 = vmatmul.mubr.bf16.gmra.mxu1 %v3184_v37  ;;  %3026 = vmatprep.mubr.bf16.mxu0 %v720_v7  ;;  %v3657_v37 = vadd.f32 %v3341_v15, %v549_v34  ;;  %v3661_v7 = vadd.f32 %v3341_v15, %v550_v46  ;;  %v2686_v34 = vunpack.c.l.bf16 %v2878_v53  ;;  %v555_v46 = vmul.f32 %v2682_v61, %v3336_v14 }
  0x55   : > { %3106 = vmatprep.mubr.bf16.mxu1 %v3185_v2  ;;  %v553_v35 = vmul.f32 %v2678_v6, %v3336_v14  ;;  %v3668_v2 = vadd.f32 %v3341_v15, %v552_v49  ;;  %v3682_v49 = vadd.f32 %v3341_v15, %v554_v19  ;;  %v558_v53 = vmul.f32 %v2687_v47, %v3336_v14 }
  0x56   : > { %v557_v50 = vmul.f32 %v2686_v34, %v3336_v14  ;;  %v593_v61 = vadd.f32 %v3341_v15, %v3489_v11  ;;  %v594_v14 = vadd.f32 %v3341_v15, %v3499_v22  ;;  %v3190_v22 = vld [vmem:[%s3278_s15 + $0x78] sm:$0xff]   ;;  %v3906_v27 = vpack.c.bf16 %v3661_v7, %v3657_v37 }
  0x57   : > { %v3675_v8 = vadd.f32 %v3341_v15, %v553_v35  ;;  %v738_v6 = vpack.c.bf16 %v3668_v2, %v3664_v33  ;;  %v3689_v35 = vadd.f32 %v3341_v15, %v555_v46  ;;  %v629_v63 = vadd.f32 %v3341_v15, %v558_v53 }
  0x58   : > { %v3703_v10 = vadd.f32 %v3341_v15, %v557_v50  ;;  %v723_v0 = vpack.c.bf16 %v593_v61, %v592_v38  ;;  %v3191_v15 = vld [vmem:[%s3278_s15 + $0x80] sm:$0xff]  }
  0x59   : > { %v739_v19 = vpack.c.bf16 %v3682_v49, %v3675_v8  ;;  %v740_v11 = vpack.c.bf16 %v3700_v20, %v3689_v35 }
  0x5b   : > { %3027 = vmatmul.mubr.bf16.gmra.mxu0 %v721_v16  ;;  %v741_v16 = vpack.c.bf16 %v629_v63, %v3703_v10 }
  0x5c   : > { %3107 = vmatmul.mubr.bf16.gmra.mxu1 %v3186_v36  ;;  %3030 = vmatprep.mubr.bf16.mxu0 %v722_v21  ;;  %v724_v21 = vpack.c.bf16 %v595_v62, %v594_v14  ;;  %v3189_v36 = vld [vmem:[%s3278_s15 + $0x70] sm:$0xff]  }
  0x5d   : > { %3110 = vmatprep.mubr.bf16.mxu1 %v3187_v24  ;;  %v3193_v24 = vld [vmem:[%s3278_s15 + $0x90] sm:$0xff]  }
  0x63   : > { %3031 = vmatmul.mubr.bf16.gmra.mxu0 %v723_v0 }
  0x64   : > { %3111 = vmatmul.mubr.bf16.gmra.mxu1 %v3188_v1  ;;  %3034 = vmatprep.mubr.bf16.mxu0 %v724_v21 }
  0x65   : > { %3114 = vmatprep.mubr.bf16.mxu1 %v3189_v36 }
  0x6b   : > { %3035 = vmatmul.mubr.bf16.gmra.mxu0 %v725_v40  ;;  %v3196_v40 = vld [vmem:[%s3278_s15 + $0xa8] sm:$0xff]  }
  0x6c   : > { %3115 = vmatmul.mubr.bf16.gmra.mxu1 %v3190_v22  ;;  %3038 = vmatprep.mubr.bf16.mxu0 %v726_v54  ;;  %v3902_v54 = vpack.c.bf16 %v3604_v5, %v3601_v39  ;;  %v3780_v5 = vld [vmem:[%s3898_s6] ss:$0 sm:$0xff] }
  0x6d   : > { %3118 = vmatprep.mubr.bf16.mxu1 %v3191_v15 }
  0x73   : > { %3039 = vmatmul.mubr.bf16.gmra.mxu0 %v727_v4  ;;  %v3904_v4 = vpack.c.bf16 %v3633_v13, %v3625_v3 }
  0x74   : > { %3119 = vmatmul.mubr.bf16.gmra.mxu1 %v3192_v32  ;;  %3042 = vmatprep.mubr.bf16.mxu0 %v728_v17  ;;  %v3905_v17 = vpack.c.bf16 %v3642_v30, %v3639_v29 }
  0x75   : > { %3122 = vmatprep.mubr.bf16.mxu1 %v3193_v24 }
  0x7b   : > { %3043 = vmatmul.mubr.bf16.gmra.mxu0 %v729_v43  ;;  %v3205_v43 = vld [vmem:[%s3278_s15 + $0xf0] sm:$0xff]  }
  0x7c   : > { %3123 = vmatmul.mubr.bf16.gmra.mxu1 %v3194_v23  ;;  %3046 = vmatprep.mubr.bf16.mxu0 %v730_v56 }
  0x7d   : > { %3126 = vmatprep.mubr.bf16.mxu1 %v3195_v26 }
  0x83   : > { %3047 = vmatmul.mubr.bf16.gmra.mxu0 %v731_v9 }
  0x84   : > { %3127 = vmatmul.mubr.bf16.gmra.mxu1 %v3196_v40  ;;  %3050 = vmatprep.mubr.bf16.mxu0 %v732_v28 }
  0x85   : > { %3130 = vmatprep.mubr.bf16.mxu1 %v3197_v41 }
  0x8b   : > { %3051 = vmatmul.mubr.bf16.gmra.mxu0 %v3902_v54 }
  0x8c   : > { %3131 = vmatmul.mubr.bf16.gmra.mxu1 %v3198_v42  ;;  %3054 = vmatprep.mubr.bf16.mxu0 %v3903_v55 }
  0x8d   : > { %3134 = vmatprep.mubr.bf16.mxu1 %v3199_v44 }
  0x93   : > { %3055 = vmatmul.mubr.bf16.gmra.mxu0 %v3904_v4 }
  0x94   : > { %3135 = vmatmul.mubr.bf16.gmra.mxu1 %v3200_v58  ;;  %3058 = vmatprep.mubr.bf16.mxu0 %v3905_v17 }
  0x95   : > { %3138 = vmatprep.mubr.bf16.mxu1 %v3201_v59 }
  0x9b   : > { %3059 = vmatmul.mubr.bf16.gmra.mxu0 %v3906_v27 }
  0x9c   : > { %3139 = vmatmul.mubr.bf16.gmra.mxu1 %v3202_v18  ;;  %3062 = vmatprep.mubr.bf16.mxu0 %v738_v6 }
  0x9d   : > { %3142 = vmatprep.mubr.bf16.mxu1 %v3203_v25 }
  0xa3   : > { %3063 = vmatmul.mubr.bf16.gmra.mxu0 %v739_v19 }
  0xa4   : > { %3143 = vmatmul.mubr.bf16.gmra.mxu1 %v3204_v31  ;;  %3066 = vmatprep.mubr.bf16.mxu0 %v740_v11 }
  0xa5   : > { %3146 = vmatprep.mubr.bf16.mxu1 %v3205_v43 }
  0xab   : > { %3067 = vmatmul.mubr.bf16.gmra.mxu0 %v741_v16 }
  0xac   : > { %3147 = vmatmul.mubr.bf16.gmra.mxu1 %v3206_v48 }
  0xf3   : > { %v3008_v56 = vpop.f32.mrf.mxu0 }
  0xf4   : > { %v3088_v57 = vpop.f32.mrf.mxu1 }
  0xf5   : > { %v840_v60 = vpop.f32.mrf.mxu0  ;;  %v1378_v12 = vadd.f32 %v3088_v57, %v3008_v56 }
  0xf6   : > { %v1369_v9 = vpop.f32.mrf.mxu1 }
  0xf7   : > { %v3009_v39 = vpop.f32.mrf.mxu0  ;;  %v1370_v51 = vadd.f32 %v1369_v9, %v840_v60  ;;  %v1633_v29 = vadd.f32 %v3780_v5, %v1378_v12 }
  0xf8   : > { %v3089_v28 = vpop.f32.mrf.mxu1 }
  0xf9   : > { %v1381_v52 = vadd.f32 %v3089_v28, %v3009_v39  ;;  %v843_v3 = vpop.f32.mrf.mxu0  ;;  %v1631_v2 = vadd.f32 %v3780_v5, %v1370_v51 }
  0xfa   : > { %v1372_v13 = vpop.f32.mrf.mxu1 }
  0xfb   : > { %v1634_v30 = vadd.f32 %v3780_v5, %v1381_v52  ;;  %v1373_v37 = vadd.f32 %v1372_v13, %v843_v3  ;;  %v3012_v7 = vpop.f32.mrf.mxu0 }
  0xfc   : > { %v3092_v33 = vpop.f32.mrf.mxu1 }
  0xfd   : > { %v1696_v34 = vpack.c.bf16 %v1634_v30, %v1633_v29  ;;  %v1632_v38 = vadd.f32 %v3780_v5, %v1373_v37  ;;  %v856_v8 = vpop.f32.mrf.mxu0  ;;  %v1394_v45 = vadd.f32 %v3092_v33, %v3012_v7 }
  0xfe   : > { %v1385_v46 = vpop.f32.mrf.mxu1 }
  0xff   : > { %2879 = vst [vmem:[%s3288_s21 + $0x8] sm:$0xff] %v1696_v34   ;;  %v1695_v47 = vpack.c.bf16 %v1632_v38, %v1631_v2  ;;  %v3013_v6 = vpop.f32.mrf.mxu0  ;;  %v2017_v49 = vunpack.c.l.bf16 %v1696_v34  ;;  %v1386_v61 = vadd.f32 %v1385_v46, %v856_v8  ;;  %v2018_v0 = vunpack.c.h.bf16 %v1696_v34 }
 0x100   : > { %v3093_v50 = vpop.f32.mrf.mxu1  ;;  %v1637_v21 = vadd.f32 %v3780_v5, %v1394_v45 }
 0x101   : > { %2692 = vst [vmem:[%s3288_s21] sm:$0xff] %v1695_v47   ;;  %v2015_v35 = vunpack.c.l.bf16 %v1695_v47  ;;  %v2016_v53 = vunpack.c.h.bf16 %v1695_v47  ;;  %v859_v19 = vpop.f32.mrf.mxu0  ;;  %v1397_v20 = vadd.f32 %v3093_v50, %v3013_v6  ;;  %v2154_v1 = vmul.f32 %v2017_v49, %v2017_v49 }
 0x102   : > { %v1388_v10 = vpop.f32.mrf.mxu1  ;;  %v1635_v24 = vadd.f32 %v3780_v5, %v1386_v61  ;;  %v2155_v58 = vmul.f32 %v2018_v0, %v2018_v0 }
 0x103   : > { %v2080_v14 = vadd.f32 %v2016_v53, %v2015_v35  ;;  %v2152_v62 = vmul.f32 %v2015_v35, %v2015_v35  ;;  %v2153_v63 = vmul.f32 %v2016_v53, %v2016_v53  ;;  %v1389_v11 = vadd.f32 %v1388_v10, %v859_v19  ;;  %v3016_v16 = vpop.f32.mrf.mxu0 }
 0x104   : > { %v1638_v36 = vadd.f32 %v3780_v5, %v1397_v20  ;;  %v3096_v22 = vpop.f32.mrf.mxu1 }
 0x105   : > { %v2081_v15 = vadd.f32 %v2080_v14, %v2017_v49  ;;  %v2216_v32 = vadd.f32 %v2153_v63, %v2152_v62  ;;  %v1636_v23 = vadd.f32 %v3780_v5, %v1389_v11  ;;  %v872_v26 = vpop.f32.mrf.mxu0  ;;  %v1410_v41 = vadd.f32 %v3096_v22, %v3016_v16 }
 0x106   : > { %v1698_v40 = vpack.c.bf16 %v1638_v36, %v1637_v21  ;;  %v1401_v42 = vpop.f32.mrf.mxu1 }
 0x107   : > { %v2217_v44 = vadd.f32 %v2216_v32, %v2154_v1  ;;  %v1697_v54 = vpack.c.bf16 %v1636_v23, %v1635_v24  ;;  %v3017_v55 = vpop.f32.mrf.mxu0  ;;  %v2082_v18 = vadd.f32 %v2081_v15, %v2018_v0  ;;  %v1641_v43 = vadd.f32 %v3780_v5, %v1410_v41 }
 0x108   : > { %2881 = vst [vmem:[%s3288_s21 + $0x18] sm:$0xff] %v1698_v40   ;;  %v3097_v59 = vpop.f32.mrf.mxu1  ;;  %v2021_v31 = vunpack.c.l.bf16 %v1698_v40  ;;  %v1402_v48 = vadd.f32 %v1401_v42, %v872_v26  ;;  %v2022_v28 = vunpack.c.h.bf16 %v1698_v40 }
 0x109   : > { %2880 = vst [vmem:[%s3288_s21 + $0x10] sm:$0xff] %v1697_v54   ;;  %v2019_v4 = vunpack.c.l.bf16 %v1697_v54  ;;  %v2020_v17 = vunpack.c.h.bf16 %v1697_v54  ;;  %v1413_v25 = vadd.f32 %v3097_v59, %v3017_v55  ;;  %v875_v27 = vpop.f32.mrf.mxu0  ;;  %v2218_v9 = vadd.f32 %v2217_v44, %v2155_v58 }
 0x10a   : > { %v1404_v56 = vpop.f32.mrf.mxu1  ;;  %v1639_v7 = vadd.f32 %v3780_v5, %v1402_v48  ;;  %v2158_v34 = vmul.f32 %v2021_v31, %v2021_v31  ;;  %v2159_v45 = vmul.f32 %v2022_v28, %v2022_v28 }
 0x10b   : > { %v2083_v57 = vadd.f32 %v2082_v18, %v2019_v4  ;;  %v2156_v60 = vmul.f32 %v2019_v4, %v2019_v4  ;;  %v1642_v12 = vadd.f32 %v3780_v5, %v1413_v25  ;;  %v3020_v39 = vpop.f32.mrf.mxu0  ;;  %v1405_v51 = vadd.f32 %v1404_v56, %v875_v27 }
 0x10c   : > { %v3100_v52 = vpop.f32.mrf.mxu1  ;;  %v2157_v13 = vmul.f32 %v2020_v17, %v2020_v17 }
 0x10d   : > { %v2084_v3 = vadd.f32 %v2083_v57, %v2020_v17  ;;  %v2219_v29 = vadd.f32 %v2218_v9, %v2156_v60  ;;  %v1700_v30 = vpack.c.bf16 %v1642_v12, %v1641_v43  ;;  %v888_v37 = vpop.f32.mrf.mxu0  ;;  %v1640_v33 = vadd.f32 %v3780_v5, %v1405_v51 }
 0x10e   : > { %v1417_v2 = vpop.f32.mrf.mxu1  ;;  %v1426_v6 = vadd.f32 %v3100_v52, %v3020_v39 }
 0x10f   : > { %v2085_v38 = vadd.f32 %v2084_v3, %v2021_v31  ;;  %v2220_v8 = vadd.f32 %v2219_v29, %v2157_v13  ;;  %2883 = vst [vmem:[%s3288_s21 + $0x28] sm:$0xff] %v1700_v30   ;;  %v3021_v46 = vpop.f32.mrf.mxu0  ;;  %v1699_v47 = vpack.c.bf16 %v1640_v33, %v1639_v7  ;;  %v1418_v53 = vadd.f32 %v1417_v2, %v888_v37 }
 0x110   : > { %v3101_v49 = vpop.f32.mrf.mxu1  ;;  %v2025_v62 = vunpack.c.l.bf16 %v1700_v30  ;;  %v1645_v21 = vadd.f32 %v3780_v5, %v1426_v6  ;;  %v2026_v15 = vunpack.c.h.bf16 %v1700_v30 }
 0x111   : > { %v2221_v50 = vadd.f32 %v2220_v8, %v2158_v34  ;;  %v2086_v35 = vadd.f32 %v2085_v38, %v2022_v28  ;;  %v891_v61 = vpop.f32.mrf.mxu0  ;;  %2882 = vst [vmem:[%s3288_s21 + $0x20] sm:$0xff] %v1699_v47   ;;  %v2023_v19 = vunpack.c.l.bf16 %v1699_v47  ;;  %v2024_v20 = vunpack.c.h.bf16 %v1699_v47 }
 0x112   : > { %v1429_v10 = vadd.f32 %v3101_v49, %v3021_v46  ;;  %v1420_v14 = vpop.f32.mrf.mxu1  ;;  %v1643_v32 = vadd.f32 %v3780_v5, %v1418_v53  ;;  %v2162_v59 = vmul.f32 %v2025_v62, %v2025_v62  ;;  %v2163_v48 = vmul.f32 %v2026_v15, %v2026_v15 }
 0x113   : > { %v2222_v63 = vadd.f32 %v2221_v50, %v2159_v45  ;;  %v1421_v11 = vadd.f32 %v1420_v14, %v891_v61  ;;  %v3024_v16 = vpop.f32.mrf.mxu0  ;;  %v2087_v0 = vadd.f32 %v2086_v35, %v2023_v19  ;;  %v2160_v1 = vmul.f32 %v2023_v19, %v2023_v19 }
 0x114   : > { %v1646_v36 = vadd.f32 %v3780_v5, %v1429_v10  ;;  %v3104_v22 = vpop.f32.mrf.mxu1  ;;  %v2161_v40 = vmul.f32 %v2024_v20, %v2024_v20 }
 0x115   : > { %v1644_v24 = vadd.f32 %v3780_v5, %v1421_v11  ;;  %v904_v23 = vpop.f32.mrf.mxu0  ;;  %v2088_v26 = vadd.f32 %v2087_v0, %v2024_v20  ;;  %v2223_v41 = vadd.f32 %v2222_v63, %v2160_v1  ;;  %v1442_v55 = vadd.f32 %v3104_v22, %v3024_v16 }
 0x116   : > { %v1702_v42 = vpack.c.bf16 %v1646_v36, %v1645_v21  ;;  %v1433_v44 = vpop.f32.mrf.mxu1 }
 0x117   : > { %v1701_v54 = vpack.c.bf16 %v1644_v24, %v1643_v32  ;;  %v3025_v58 = vpop.f32.mrf.mxu0  ;;  %v2089_v4 = vadd.f32 %v2088_v26, %v2025_v62  ;;  %v2224_v17 = vadd.f32 %v2223_v41, %v2161_v40  ;;  %v1434_v27 = vadd.f32 %v1433_v44, %v904_v23 }
 0x118   : > { %2885 = vst [vmem:[%s3288_s21 + $0x38] sm:$0xff] %v1702_v42   ;;  %v3105_v18 = vpop.f32.mrf.mxu1  ;;  %v1649_v39 = vadd.f32 %v3780_v5, %v1442_v55  ;;  %v2029_v3 = vunpack.c.l.bf16 %v1702_v42  ;;  %v2030_v37 = vunpack.c.h.bf16 %v1702_v42 }
 0x119   : > { %2884 = vst [vmem:[%s3288_s21 + $0x30] sm:$0xff] %v1701_v54   ;;  %v2027_v25 = vunpack.c.l.bf16 %v1701_v54  ;;  %v1445_v31 = vadd.f32 %v3105_v18, %v3025_v58  ;;  %v907_v43 = vpop.f32.mrf.mxu0  ;;  %v2225_v56 = vadd.f32 %v2224_v17, %v2162_v59  ;;  %v2028_v57 = vunpack.c.h.bf16 %v1701_v54 }
 0x11a   : > { %v2090_v60 = vadd.f32 %v2089_v4, %v2026_v15  ;;  %v1436_v9 = vpop.f32.mrf.mxu1  ;;  %v1647_v7 = vadd.f32 %v3780_v5, %v1434_v27  ;;  %v2166_v45 = vmul.f32 %v2029_v3, %v2029_v3  ;;  %v2167_v19 = vmul.f32 %v2030_v37, %v2030_v37 }
 0x11b   : > { %v2164_v12 = vmul.f32 %v2027_v25, %v2027_v25  ;;  %v1650_v28 = vadd.f32 %v3780_v5, %v1445_v31  ;;  %v1437_v51 = vadd.f32 %v1436_v9, %v907_v43  ;;  %v3028_v52 = vpop.f32.mrf.mxu0  ;;  %v2226_v29 = vadd.f32 %v2225_v56, %v2163_v48 }
 0x11c   : > { %v2091_v13 = vadd.f32 %v2090_v60, %v2027_v25  ;;  %v3108_v30 = vpop.f32.mrf.mxu1  ;;  %v2165_v8 = vmul.f32 %v2028_v57, %v2028_v57 }
 0x11d   : > { %v1704_v33 = vpack.c.bf16 %v1650_v28, %v1649_v39  ;;  %v1648_v2 = vadd.f32 %v3780_v5, %v1437_v51  ;;  %v920_v34 = vpop.f32.mrf.mxu0  ;;  %v2227_v46 = vadd.f32 %v2226_v29, %v2164_v12  ;;  %v1458_v53 = vadd.f32 %v3108_v30, %v3028_v52 }
 0x11e   : > { %v2092_v38 = vadd.f32 %v2091_v13, %v2028_v57  ;;  %v1449_v47 = vpop.f32.mrf.mxu1 }
 0x11f   : > { %2887 = vst [vmem:[%s3288_s21 + $0x48] sm:$0xff] %v1704_v33   ;;  %v1703_v6 = vpack.c.bf16 %v1648_v2, %v1647_v7  ;;  %v3029_v49 = vpop.f32.mrf.mxu0  ;;  %v2228_v35 = vadd.f32 %v2227_v46, %v2165_v8  ;;  %v1450_v10 = vadd.f32 %v1449_v47, %v920_v34  ;;  %v2033_v1 = vunpack.c.l.bf16 %v1704_v33 }
 0x120   : > { %v2093_v50 = vadd.f32 %v2092_v38, %v2029_v3  ;;  %v3109_v61 = vpop.f32.mrf.mxu1  ;;  %v1653_v24 = vadd.f32 %v3780_v5, %v1458_v53  ;;  %v2034_v40 = vunpack.c.h.bf16 %v1704_v33 }
 0x121   : > { %2886 = vst [vmem:[%s3288_s21 + $0x40] sm:$0xff] %v1703_v6   ;;  %v2031_v20 = vunpack.c.l.bf16 %v1703_v6  ;;  %v923_v14 = vpop.f32.mrf.mxu0  ;;  %v2229_v62 = vadd.f32 %v2228_v35, %v2166_v45  ;;  %v2032_v63 = vunpack.c.h.bf16 %v1703_v6  ;;  %v1461_v16 = vadd.f32 %v3109_v61, %v3029_v49 }
 0x122   : > { %v2094_v11 = vadd.f32 %v2093_v50, %v2030_v37  ;;  %v1452_v0 = vpop.f32.mrf.mxu1  ;;  %v1651_v41 = vadd.f32 %v3780_v5, %v1450_v10  ;;  %v2170_v27 = vmul.f32 %v2033_v1, %v2033_v1  ;;  %v2171_v12 = vmul.f32 %v2034_v40, %v2034_v40 }
 0x123   : > { %v2168_v21 = vmul.f32 %v2031_v20, %v2031_v20  ;;  %v1453_v36 = vadd.f32 %v1452_v0, %v923_v14  ;;  %v3032_v22 = vpop.f32.mrf.mxu0  ;;  %v2230_v32 = vadd.f32 %v2229_v62, %v2167_v19  ;;  %v1654_v23 = vadd.f32 %v3780_v5, %v1461_v16 }
 0x124   : > { %v2095_v15 = vadd.f32 %v2094_v11, %v2031_v20  ;;  %v3112_v26 = vpop.f32.mrf.mxu1  ;;  %v2169_v55 = vmul.f32 %v2032_v63, %v2032_v63 }
 0x125   : > { %v1652_v42 = vadd.f32 %v3780_v5, %v1453_v36  ;;  %v936_v44 = vpop.f32.mrf.mxu0  ;;  %v2231_v58 = vadd.f32 %v2230_v32, %v2168_v21  ;;  %v1706_v59 = vpack.c.bf16 %v1654_v23, %v1653_v24  ;;  %v1474_v18 = vadd.f32 %v3112_v26, %v3032_v22 }
 0x126   : > { %v2096_v54 = vadd.f32 %v2095_v15, %v2032_v63  ;;  %v1465_v4 = vpop.f32.mrf.mxu1 }
 0x127   : > { %v1705_v17 = vpack.c.bf16 %v1652_v42, %v1651_v41  ;;  %v3033_v25 = vpop.f32.mrf.mxu0  ;;  %v2232_v43 = vadd.f32 %v2231_v58, %v2169_v55  ;;  %2889 = vst [vmem:[%s3288_s21 + $0x58] sm:$0xff] %v1706_v59   ;;  %v1466_v57 = vadd.f32 %v1465_v4, %v936_v44  ;;  %v1657_v13 = vadd.f32 %v3780_v5, %v1474_v18 }
 0x128   : > { %v2097_v31 = vadd.f32 %v2096_v54, %v2033_v1  ;;  %v3113_v48 = vpop.f32.mrf.mxu1  ;;  %v2037_v7 = vunpack.c.l.bf16 %v1706_v59  ;;  %v2038_v38 = vunpack.c.h.bf16 %v1706_v59 }
 0x129   : > { %2888 = vst [vmem:[%s3288_s21 + $0x50] sm:$0xff] %v1705_v17   ;;  %v2035_v56 = vunpack.c.l.bf16 %v1705_v17  ;;  %v1477_v60 = vadd.f32 %v3113_v48, %v3033_v25  ;;  %v939_v9 = vpop.f32.mrf.mxu0  ;;  %v2233_v39 = vadd.f32 %v2232_v43, %v2170_v27  ;;  %v2036_v28 = vunpack.c.h.bf16 %v1705_v17 }
 0x12a   : > { %v2098_v51 = vadd.f32 %v2097_v31, %v2034_v40  ;;  %v1468_v52 = vpop.f32.mrf.mxu1  ;;  %v1655_v8 = vadd.f32 %v3780_v5, %v1466_v57  ;;  %v2174_v19 = vmul.f32 %v2037_v7, %v2037_v7  ;;  %v2175_v63 = vmul.f32 %v2038_v38, %v2038_v38 }
 0x12b   : > { %v2172_v3 = vmul.f32 %v2035_v56, %v2035_v56  ;;  %v1658_v29 = vadd.f32 %v3780_v5, %v1477_v60  ;;  %v1469_v30 = vadd.f32 %v1468_v52, %v939_v9  ;;  %v3036_v37 = vpop.f32.mrf.mxu0  ;;  %v2234_v2 = vadd.f32 %v2233_v39, %v2171_v12 }
 0x12c   : > { %v2099_v33 = vadd.f32 %v2098_v51, %v2035_v56  ;;  %v3116_v34 = vpop.f32.mrf.mxu1  ;;  %v2173_v45 = vmul.f32 %v2036_v28, %v2036_v28 }
 0x12d   : > { %v1708_v46 = vpack.c.bf16 %v1658_v29, %v1657_v13  ;;  %v1656_v47 = vadd.f32 %v3780_v5, %v1469_v30  ;;  %v952_v6 = vpop.f32.mrf.mxu0  ;;  %v2235_v50 = vadd.f32 %v2234_v2, %v2172_v3  ;;  %v1490_v14 = vadd.f32 %v3116_v34, %v3036_v37 }
 0x12e   : > { %v2100_v49 = vadd.f32 %v2099_v33, %v2036_v28  ;;  %v1481_v35 = vpop.f32.mrf.mxu1 }
 0x12f   : > { %2891 = vst [vmem:[%s3288_s21 + $0x68] sm:$0xff] %v1708_v46   ;;  %v1707_v53 = vpack.c.bf16 %v1656_v47, %v1655_v8  ;;  %v3037_v61 = vpop.f32.mrf.mxu0  ;;  %v2236_v10 = vadd.f32 %v2235_v50, %v2173_v45  ;;  %v1482_v16 = vadd.f32 %v1481_v35, %v952_v6  ;;  %v2041_v32 = vunpack.c.l.bf16 %v1708_v46 }
 0x130   : > { %v2101_v20 = vadd.f32 %v2100_v49, %v2037_v7  ;;  %v3117_v62 = vpop.f32.mrf.mxu1  ;;  %v1661_v42 = vadd.f32 %v3780_v5, %v1490_v14  ;;  %v2042_v55 = vunpack.c.h.bf16 %v1708_v46 }
 0x131   : > { %2890 = vst [vmem:[%s3288_s21 + $0x60] sm:$0xff] %v1707_v53   ;;  %v2039_v11 = vunpack.c.l.bf16 %v1707_v53  ;;  %v955_v0 = vpop.f32.mrf.mxu0  ;;  %v2237_v1 = vadd.f32 %v2236_v10, %v2174_v19  ;;  %v2040_v21 = vunpack.c.h.bf16 %v1707_v53  ;;  %v1493_v22 = vadd.f32 %v3117_v62, %v3037_v61 }
 0x132   : > { %v2102_v36 = vadd.f32 %v2101_v20, %v2038_v38  ;;  %v1484_v15 = vpop.f32.mrf.mxu1  ;;  %v1659_v58 = vadd.f32 %v3780_v5, %v1482_v16  ;;  %v2178_v57 = vmul.f32 %v2041_v32, %v2041_v32  ;;  %v2179_v3 = vmul.f32 %v2042_v55, %v2042_v55 }
 0x133   : > { %v2176_v24 = vmul.f32 %v2039_v11, %v2039_v11  ;;  %v1485_v23 = vadd.f32 %v1484_v15, %v955_v0  ;;  %v3040_v26 = vpop.f32.mrf.mxu0  ;;  %v2238_v41 = vadd.f32 %v2237_v1, %v2175_v63  ;;  %v1662_v44 = vadd.f32 %v3780_v5, %v1493_v22 }
 0x134   : > { %v2103_v40 = vadd.f32 %v2102_v36, %v2039_v11  ;;  %v3120_v54 = vpop.f32.mrf.mxu1  ;;  %v2177_v18 = vmul.f32 %v2040_v21, %v2040_v21 }
 0x135   : > { %v1660_v59 = vadd.f32 %v3780_v5, %v1485_v23  ;;  %v968_v4 = vpop.f32.mrf.mxu0  ;;  %v2239_v25 = vadd.f32 %v2238_v41, %v2176_v24  ;;  %v1710_v27 = vpack.c.bf16 %v1662_v44, %v1661_v42  ;;  %v1506_v48 = vadd.f32 %v3120_v54, %v3040_v26 }
 0x136   : > { %v2104_v17 = vadd.f32 %v2103_v40, %v2040_v21  ;;  %v1497_v31 = vpop.f32.mrf.mxu1 }
 0x137   : > { %v1709_v43 = vpack.c.bf16 %v1660_v59, %v1659_v58  ;;  %v3041_v56 = vpop.f32.mrf.mxu0  ;;  %v2240_v9 = vadd.f32 %v2239_v25, %v2177_v18  ;;  %2893 = vst [vmem:[%s3288_s21 + $0x78] sm:$0xff] %v1710_v27   ;;  %v1498_v28 = vadd.f32 %v1497_v31, %v968_v4  ;;  %v1665_v33 = vadd.f32 %v3780_v5, %v1506_v48 }
 0x138   : > { %v2105_v60 = vadd.f32 %v2104_v17, %v2041_v32  ;;  %v3121_v12 = vpop.f32.mrf.mxu1  ;;  %v2045_v8 = vunpack.c.l.bf16 %v1710_v27  ;;  %v2046_v49 = vunpack.c.h.bf16 %v1710_v27 }
 0x139   : > { %2892 = vst [vmem:[%s3288_s21 + $0x70] sm:$0xff] %v1709_v43   ;;  %v2043_v39 = vunpack.c.l.bf16 %v1709_v43  ;;  %v1509_v51 = vadd.f32 %v3121_v12, %v3041_v56  ;;  %v971_v52 = vpop.f32.mrf.mxu0  ;;  %v2241_v13 = vadd.f32 %v2240_v9, %v2178_v57  ;;  %v2044_v29 = vunpack.c.h.bf16 %v1709_v43 }
 0x13a   : > { %v2106_v30 = vadd.f32 %v2105_v60, %v2042_v55  ;;  %v1500_v37 = vpop.f32.mrf.mxu1  ;;  %v1663_v45 = vadd.f32 %v3780_v5, %v1498_v28  ;;  %v2182_v63 = vmul.f32 %v2045_v8, %v2045_v8  ;;  %v2183_v21 = vmul.f32 %v2046_v49, %v2046_v49 }
 0x13b   : > { %v2180_v7 = vmul.f32 %v2043_v39, %v2043_v39  ;;  %v1666_v2 = vadd.f32 %v3780_v5, %v1509_v51  ;;  %v1501_v34 = vadd.f32 %v1500_v37, %v971_v52  ;;  %v3044_v38 = vpop.f32.mrf.mxu0  ;;  %v2242_v47 = vadd.f32 %v2241_v13, %v2179_v3 }
 0x13c   : > { %v2107_v46 = vadd.f32 %v2106_v30, %v2043_v39  ;;  %v3124_v6 = vpop.f32.mrf.mxu1  ;;  %v2181_v19 = vmul.f32 %v2044_v29, %v2044_v29 }
 0x13d   : > { %v1712_v50 = vpack.c.bf16 %v1666_v2, %v1665_v33  ;;  %v1664_v35 = vadd.f32 %v3780_v5, %v1501_v34  ;;  %v984_v53 = vpop.f32.mrf.mxu0  ;;  %v2243_v20 = vadd.f32 %v2242_v47, %v2180_v7  ;;  %v1522_v0 = vadd.f32 %v3124_v6, %v3044_v38 }
 0x13e   : > { %v2108_v61 = vadd.f32 %v2107_v46, %v2044_v29  ;;  %v1513_v10 = vpop.f32.mrf.mxu1 }
 0x13f   : > { %2895 = vst [vmem:[%s3288_s21 + $0x88] sm:$0xff] %v1712_v50   ;;  %v1711_v14 = vpack.c.bf16 %v1664_v35, %v1663_v45  ;;  %v3045_v62 = vpop.f32.mrf.mxu0  ;;  %v2244_v16 = vadd.f32 %v2243_v20, %v2181_v19  ;;  %v1514_v22 = vadd.f32 %v1513_v10, %v984_v53  ;;  %v2049_v41 = vunpack.c.l.bf16 %v1712_v50 }
 0x140   : > { %v2109_v11 = vadd.f32 %v2108_v61, %v2045_v8  ;;  %v3125_v1 = vpop.f32.mrf.mxu1  ;;  %v1669_v59 = vadd.f32 %v3780_v5, %v1522_v0  ;;  %v2050_v18 = vunpack.c.h.bf16 %v1712_v50 }
 0x141   : > { %2894 = vst [vmem:[%s3288_s21 + $0x80] sm:$0xff] %v1711_v14   ;;  %v2047_v36 = vunpack.c.l.bf16 %v1711_v14  ;;  %v987_v15 = vpop.f32.mrf.mxu0  ;;  %v2245_v32 = vadd.f32 %v2244_v16, %v2182_v63  ;;  %v2048_v24 = vunpack.c.h.bf16 %v1711_v14  ;;  %v1525_v26 = vadd.f32 %v3125_v1, %v3045_v62 }
 0x142   : > { %v2110_v23 = vadd.f32 %v2109_v11, %v2046_v49  ;;  %v1516_v40 = vpop.f32.mrf.mxu1  ;;  %v1667_v25 = vadd.f32 %v3780_v5, %v1514_v22  ;;  %v2186_v28 = vmul.f32 %v2049_v41, %v2049_v41  ;;  %v2187_v7 = vmul.f32 %v2050_v18, %v2050_v18 }
 0x143   : > { %v2184_v42 = vmul.f32 %v2047_v36, %v2047_v36  ;;  %v1517_v44 = vadd.f32 %v1516_v40, %v987_v15  ;;  %v3048_v54 = vpop.f32.mrf.mxu0  ;;  %v2246_v58 = vadd.f32 %v2245_v32, %v2183_v21  ;;  %v1670_v4 = vadd.f32 %v3780_v5, %v1525_v26 }
 0x144   : > { %v2111_v55 = vadd.f32 %v2110_v23, %v2047_v36  ;;  %v3128_v17 = vpop.f32.mrf.mxu1  ;;  %v2185_v48 = vmul.f32 %v2048_v24, %v2048_v24 }
 0x145   : > { %v1668_v27 = vadd.f32 %v3780_v5, %v1517_v44  ;;  %v1000_v31 = vpop.f32.mrf.mxu0  ;;  %v2247_v56 = vadd.f32 %v2246_v58, %v2184_v42  ;;  %v1714_v57 = vpack.c.bf16 %v1670_v4, %v1669_v59  ;;  %v1538_v12 = vadd.f32 %v3128_v17, %v3048_v54 }
 0x146   : > { %v2112_v43 = vadd.f32 %v2111_v55, %v2048_v24  ;;  %v1529_v60 = vpop.f32.mrf.mxu1 }
 0x147   : > { %v1713_v9 = vpack.c.bf16 %v1668_v27, %v1667_v25  ;;  %v3049_v39 = vpop.f32.mrf.mxu0  ;;  %v2248_v52 = vadd.f32 %v2247_v56, %v2185_v48  ;;  %2897 = vst [vmem:[%s3288_s21 + $0x98] sm:$0xff] %v1714_v57   ;;  %v1530_v29 = vadd.f32 %v1529_v60, %v1000_v31  ;;  %v1673_v46 = vadd.f32 %v3780_v5, %v1538_v12 }
 0x148   : > { %v2113_v51 = vadd.f32 %v2112_v43, %v2049_v41  ;;  %v3129_v3 = vpop.f32.mrf.mxu1  ;;  %v2053_v45 = vunpack.c.l.bf16 %v1714_v57  ;;  %v2054_v61 = vunpack.c.h.bf16 %v1714_v57 }
 0x149   : > { %2896 = vst [vmem:[%s3288_s21 + $0x90] sm:$0xff] %v1713_v9   ;;  %v2051_v13 = vunpack.c.l.bf16 %v1713_v9  ;;  %v1541_v30 = vadd.f32 %v3129_v3, %v3049_v39  ;;  %v1003_v37 = vpop.f32.mrf.mxu0  ;;  %v2249_v33 = vadd.f32 %v2248_v52, %v2186_v28  ;;  %v2052_v2 = vunpack.c.h.bf16 %v1713_v9 }
 0x14a   : > { %v2114_v34 = vadd.f32 %v2113_v51, %v2050_v18  ;;  %v1532_v38 = vpop.f32.mrf.mxu1  ;;  %v1671_v19 = vadd.f32 %v3780_v5, %v1530_v29  ;;  %v2190_v21 = vmul.f32 %v2053_v45, %v2053_v45  ;;  %v2191_v24 = vmul.f32 %v2054_v61, %v2054_v61 }
 0x14b   : > { %v2188_v8 = vmul.f32 %v2051_v13, %v2051_v13  ;;  %v1674_v47 = vadd.f32 %v3780_v5, %v1541_v30  ;;  %v1533_v6 = vadd.f32 %v1532_v38, %v1003_v37  ;;  %v3052_v49 = vpop.f32.mrf.mxu0  ;;  %v2250_v35 = vadd.f32 %v2249_v33, %v2187_v7 }
 0x14c   : > { %v2115_v50 = vadd.f32 %v2114_v34, %v2051_v13  ;;  %v3132_v53 = vpop.f32.mrf.mxu1  ;;  %v2189_v63 = vmul.f32 %v2052_v2, %v2052_v2 }
 0x14d   : > { %v1716_v20 = vpack.c.bf16 %v1674_v47, %v1673_v46  ;;  %v1672_v10 = vadd.f32 %v3780_v5, %v1533_v6  ;;  %v1016_v14 = vpop.f32.mrf.mxu0  ;;  %v2251_v11 = vadd.f32 %v2250_v35, %v2188_v8  ;;  %v1554_v15 = vadd.f32 %v3132_v53, %v3052_v49 }
 0x14e   : > { %v2116_v62 = vadd.f32 %v2115_v50, %v2052_v2  ;;  %v1545_v16 = vpop.f32.mrf.mxu1 }
 0x14f   : > { %2899 = vst [vmem:[%s3288_s21 + $0xa8] sm:$0xff] %v1716_v20   ;;  %v1715_v0 = vpack.c.bf16 %v1672_v10, %v1671_v19  ;;  %v3053_v1 = vpop.f32.mrf.mxu0  ;;  %v2252_v22 = vadd.f32 %v2251_v11, %v2189_v63  ;;  %v1546_v26 = vadd.f32 %v1545_v16, %v1016_v14  ;;  %v2057_v58 = vunpack.c.l.bf16 %v1716_v20 }
 0x150   : > { %v2117_v36 = vadd.f32 %v2116_v62, %v2053_v45  ;;  %v3133_v32 = vpop.f32.mrf.mxu1  ;;  %v1677_v27 = vadd.f32 %v3780_v5, %v1554_v15  ;;  %v2058_v48 = vunpack.c.h.bf16 %v1716_v20 }
 0x151   : > { %2898 = vst [vmem:[%s3288_s21 + $0xa0] sm:$0xff] %v1715_v0   ;;  %v2055_v23 = vunpack.c.l.bf16 %v1715_v0  ;;  %v1019_v40 = vpop.f32.mrf.mxu0  ;;  %v2253_v41 = vadd.f32 %v2252_v22, %v2190_v21  ;;  %v2056_v42 = vunpack.c.h.bf16 %v1715_v0  ;;  %v1557_v54 = vadd.f32 %v3133_v32, %v3053_v1 }
 0x152   : > { %v2118_v44 = vadd.f32 %v2117_v36, %v2054_v61  ;;  %v1548_v55 = vpop.f32.mrf.mxu1  ;;  %v1675_v56 = vadd.f32 %v3780_v5, %v1546_v26  ;;  %v2194_v29 = vmul.f32 %v2057_v58, %v2057_v58  ;;  %v2195_v8 = vmul.f32 %v2058_v48, %v2058_v48 }
 0x153   : > { %v2192_v59 = vmul.f32 %v2055_v23, %v2055_v23  ;;  %v1549_v4 = vadd.f32 %v1548_v55, %v1019_v40  ;;  %v3056_v17 = vpop.f32.mrf.mxu0  ;;  %v2254_v25 = vadd.f32 %v2253_v41, %v2191_v24  ;;  %v1678_v31 = vadd.f32 %v3780_v5, %v1557_v54 }
 0x154   : > { %v2119_v18 = vadd.f32 %v2118_v44, %v2055_v23  ;;  %v3136_v43 = vpop.f32.mrf.mxu1  ;;  %v2193_v12 = vmul.f32 %v2056_v42, %v2056_v42 }
 0x155   : > { %v1676_v57 = vadd.f32 %v3780_v5, %v1549_v4  ;;  %v1032_v60 = vpop.f32.mrf.mxu0  ;;  %v2255_v39 = vadd.f32 %v2254_v25, %v2192_v59  ;;  %v1718_v28 = vpack.c.bf16 %v1678_v31, %v1677_v27  ;;  %v1570_v3 = vadd.f32 %v3136_v43, %v3056_v17 }
 0x156   : > { %v2120_v9 = vadd.f32 %v2119_v18, %v2056_v42  ;;  %v1561_v51 = vpop.f32.mrf.mxu1 }
 0x157   : > { %v1717_v52 = vpack.c.bf16 %v1676_v57, %v1675_v56  ;;  %v3057_v13 = vpop.f32.mrf.mxu0  ;;  %v2256_v37 = vadd.f32 %v2255_v39, %v2193_v12  ;;  %2901 = vst [vmem:[%s3288_s21 + $0xb8] sm:$0xff] %v1718_v28   ;;  %v1562_v2 = vadd.f32 %v1561_v51, %v1032_v60  ;;  %v1681_v50 = vadd.f32 %v3780_v5, %v1570_v3 }
 0x158   : > { %v2121_v30 = vadd.f32 %v2120_v9, %v2057_v58  ;;  %v3137_v7 = vpop.f32.mrf.mxu1  ;;  %v2061_v19 = vunpack.c.l.bf16 %v1718_v28  ;;  %v2062_v62 = vunpack.c.h.bf16 %v1718_v28 }
 0x159   : > { %2900 = vst [vmem:[%s3288_s21 + $0xb0] sm:$0xff] %v1717_v52   ;;  %v2059_v33 = vunpack.c.l.bf16 %v1717_v52  ;;  %v1573_v34 = vadd.f32 %v3137_v7, %v3057_v13  ;;  %v1035_v38 = vpop.f32.mrf.mxu0  ;;  %v2257_v46 = vadd.f32 %v2256_v37, %v2194_v29  ;;  %v2060_v47 = vunpack.c.h.bf16 %v1717_v52 }
 0x15a   : > { %v2122_v6 = vadd.f32 %v2121_v30, %v2058_v48  ;;  %v1564_v49 = vpop.f32.mrf.mxu1  ;;  %v1679_v63 = vadd.f32 %v3780_v5, %v1562_v2  ;;  %v2198_v24 = vmul.f32 %v2061_v19, %v2061_v19  ;;  %v2199_v42 = vmul.f32 %v2062_v62, %v2062_v62 }
 0x15b   : > { %v2196_v45 = vmul.f32 %v2059_v33, %v2059_v33  ;;  %v1682_v35 = vadd.f32 %v3780_v5, %v1573_v34  ;;  %v1565_v53 = vadd.f32 %v1564_v49, %v1035_v38  ;;  %v3060_v61 = vpop.f32.mrf.mxu0  ;;  %v2258_v10 = vadd.f32 %v2257_v46, %v2195_v8 }
 0x15c   : > { %v2123_v20 = vadd.f32 %v2122_v6, %v2059_v33  ;;  %v3140_v14 = vpop.f32.mrf.mxu1  ;;  %v2197_v21 = vmul.f32 %v2060_v47, %v2060_v47 }
 0x15d   : > { %v1720_v11 = vpack.c.bf16 %v1682_v35, %v1681_v50  ;;  %v1680_v16 = vadd.f32 %v3780_v5, %v1565_v53  ;;  %v1048_v0 = vpop.f32.mrf.mxu0  ;;  %v2259_v36 = vadd.f32 %v2258_v10, %v2196_v45  ;;  %v1586_v40 = vadd.f32 %v3140_v14, %v3060_v61 }
 0x15e   : > { %v2124_v1 = vadd.f32 %v2123_v20, %v2060_v47  ;;  %v1577_v22 = vpop.f32.mrf.mxu1 }
 0x15f   : > { %2903 = vst [vmem:[%s3288_s21 + $0xc8] sm:$0xff] %v1720_v11   ;;  %v1719_v15 = vpack.c.bf16 %v1680_v16, %v1679_v63  ;;  %v3061_v32 = vpop.f32.mrf.mxu0  ;;  %v2260_v26 = vadd.f32 %v2259_v36, %v2197_v21  ;;  %v1578_v54 = vadd.f32 %v1577_v22, %v1048_v0  ;;  %v2065_v25 = vunpack.c.l.bf16 %v1720_v11 }
 0x160   : > { %v2125_v23 = vadd.f32 %v2124_v1, %v2061_v19  ;;  %v3141_v41 = vpop.f32.mrf.mxu1  ;;  %v1685_v57 = vadd.f32 %v3780_v5, %v1586_v40  ;;  %v2066_v12 = vunpack.c.h.bf16 %v1720_v11 }
 0x161   : > { %2902 = vst [vmem:[%s3288_s21 + $0xc0] sm:$0xff] %v1719_v15   ;;  %v2063_v44 = vunpack.c.l.bf16 %v1719_v15  ;;  %v1051_v55 = vpop.f32.mrf.mxu0  ;;  %v2261_v58 = vadd.f32 %v2260_v26, %v2198_v24  ;;  %v2064_v59 = vunpack.c.h.bf16 %v1719_v15  ;;  %v1589_v17 = vadd.f32 %v3141_v41, %v3061_v32 }
 0x162   : > { %v2126_v4 = vadd.f32 %v2125_v23, %v2062_v62  ;;  %v1580_v18 = vpop.f32.mrf.mxu1  ;;  %v1683_v39 = vadd.f32 %v3780_v5, %v1578_v54  ;;  %v2202_v2 = vmul.f32 %v2065_v25, %v2065_v25  ;;  %v2203_v45 = vmul.f32 %v2066_v12, %v2066_v12 }
 0x163   : > { %v2200_v27 = vmul.f32 %v2063_v44, %v2063_v44  ;;  %v1581_v31 = vadd.f32 %v1580_v18, %v1051_v55  ;;  %v3064_v43 = vpop.f32.mrf.mxu0  ;;  %v2262_v56 = vadd.f32 %v2261_v58, %v2199_v42  ;;  %v1686_v60 = vadd.f32 %v3780_v5, %v1589_v17 }
 0x164   : > { %v2127_v48 = vadd.f32 %v2126_v4, %v2063_v44  ;;  %v3144_v9 = vpop.f32.mrf.mxu1  ;;  %v2201_v3 = vmul.f32 %v2064_v59, %v2064_v59 }
 0x165   : > { %v1684_v28 = vadd.f32 %v3780_v5, %v1581_v31  ;;  %v1064_v51 = vpop.f32.mrf.mxu0  ;;  %v2263_v13 = vadd.f32 %v2262_v56, %v2200_v27  ;;  %v1722_v29 = vpack.c.bf16 %v1686_v60, %v1685_v57  ;;  %v1602_v7 = vadd.f32 %v3144_v9, %v3064_v43 }
 0x166   : > { %v2128_v52 = vadd.f32 %v2127_v48, %v2064_v59  ;;  %v1593_v30 = vpop.f32.mrf.mxu1 }
 0x167   : > { %v1721_v37 = vpack.c.bf16 %v1684_v28, %v1683_v39  ;;  %v3065_v33 = vpop.f32.mrf.mxu0  ;;  %v2264_v38 = vadd.f32 %v2263_v13, %v2201_v3  ;;  %2905 = vst [vmem:[%s3288_s21 + $0xd8] sm:$0xff] %v1722_v29   ;;  %v1594_v47 = vadd.f32 %v1593_v30, %v1064_v51  ;;  %v1689_v20 = vadd.f32 %v3780_v5, %v1602_v7 }
 0x168   : > { %v2129_v34 = vadd.f32 %v2128_v52, %v2065_v25  ;;  %v3145_v8 = vpop.f32.mrf.mxu1  ;;  %v2069_v63 = vunpack.c.l.bf16 %v1722_v29  ;;  %v2070_v1 = vunpack.c.h.bf16 %v1722_v29 }
 0x169   : > { %2904 = vst [vmem:[%s3288_s21 + $0xd0] sm:$0xff] %v1721_v37   ;;  %v2067_v46 = vunpack.c.l.bf16 %v1721_v37  ;;  %v1605_v6 = vadd.f32 %v3145_v8, %v3065_v33  ;;  %v1067_v49 = vpop.f32.mrf.mxu0  ;;  %v2265_v50 = vadd.f32 %v2264_v38, %v2202_v2  ;;  %v2068_v35 = vunpack.c.h.bf16 %v1721_v37 }
 0x16a   : > { %v2130_v53 = vadd.f32 %v2129_v34, %v2066_v12  ;;  %v1596_v61 = vpop.f32.mrf.mxu1  ;;  %v1687_v21 = vadd.f32 %v3780_v5, %v1594_v47  ;;  %v2206_v42 = vmul.f32 %v2069_v63, %v2069_v63  ;;  %v2207_v59 = vmul.f32 %v2070_v1, %v2070_v1  ;;  %v3207_v12 = vld [vmem:[%s3898_s6] ss:$0 sm:$0xff] }
 0x16b   : > { %v2204_v19 = vmul.f32 %v2067_v46, %v2067_v46  ;;  %v1690_v10 = vadd.f32 %v3780_v5, %v1605_v6  ;;  %v1597_v14 = vadd.f32 %v1596_v61, %v1067_v49  ;;  %v3068_v62 = vpop.f32.mrf.mxu0  ;;  %v2266_v16 = vadd.f32 %v2265_v50, %v2203_v45 }
 0x16c   : > { %v2131_v11 = vadd.f32 %v2130_v53, %v2067_v46  ;;  %v3148_v0 = vpop.f32.mrf.mxu1  ;;  %v2205_v24 = vmul.f32 %v2068_v35, %v2068_v35 }
 0x16d   : > { %v1724_v36 = vpack.c.bf16 %v1690_v10, %v1689_v20  ;;  %v1688_v22 = vadd.f32 %v3780_v5, %v1597_v14  ;;  %v1080_v15 = vpop.f32.mrf.mxu0  ;;  %v2267_v23 = vadd.f32 %v2266_v16, %v2204_v19  ;;  %v1618_v55 = vadd.f32 %v3148_v0, %v3068_v62 }
 0x16e   : > { %v2132_v32 = vadd.f32 %v2131_v11, %v2068_v35  ;;  %v1609_v26 = vpop.f32.mrf.mxu1 }
 0x16f   : > { %2907 = vst [vmem:[%s3288_s21 + $0xe8] sm:$0xff] %v1724_v36   ;;  %v1723_v40 = vpack.c.bf16 %v1688_v22, %v1687_v21  ;;  %v3069_v41 = vpop.f32.mrf.mxu0  ;;  %v2268_v54 = vadd.f32 %v2267_v23, %v2205_v24  ;;  %v1610_v17 = vadd.f32 %v1609_v26, %v1080_v15  ;;  %v2073_v48 = vunpack.c.l.bf16 %v1724_v36 }
 0x170   : > { %v2133_v44 = vadd.f32 %v2132_v32, %v2069_v63  ;;  %v3149_v58 = vpop.f32.mrf.mxu1  ;;  %v1693_v39 = vadd.f32 %v3207_v12, %v1618_v55  ;;  %v2074_v51 = vunpack.c.h.bf16 %v1724_v36 }
 0x171   : > { %2906 = vst [vmem:[%s3288_s21 + $0xe0] sm:$0xff] %v1723_v40   ;;  %v2071_v4 = vunpack.c.l.bf16 %v1723_v40  ;;  %v1083_v18 = vpop.f32.mrf.mxu0  ;;  %v2269_v25 = vadd.f32 %v2268_v54, %v2206_v42  ;;  %v2072_v5 = vunpack.c.h.bf16 %v1723_v40  ;;  %v1621_v31 = vadd.f32 %v3149_v58, %v3069_v41  ;;  %v2079_v40 = vld [vmem:[%s3900_s8] sm:$0x1] }
 0x172   : > { %v2134_v27 = vadd.f32 %v2133_v44, %v2070_v1  ;;  %v1612_v43 = vpop.f32.mrf.mxu1  ;;  %v1691_v52 = vadd.f32 %v3207_v12, %v1610_v17  ;;  %v2210_v33 = vmul.f32 %v2073_v48, %v2073_v48  ;;  %v2211_v8 = vmul.f32 %v2074_v51, %v2074_v51  ;;  %v2151_v44 = vld [vmem:[%s3901_s9] sm:$0x1] }
 0x173   : > { %v2208_v56 = vmul.f32 %v2071_v4, %v2071_v4  ;;  %v1613_v57 = vadd.f32 %v1612_v43, %v1083_v18  ;;  %v2270_v9 = vadd.f32 %v2269_v25, %v2207_v59  ;;  %v1694_v28 = vadd.f32 %v3207_v12, %v1621_v31 }
 0x174   : > { %v2135_v60 = vadd.f32 %v2134_v27, %v2071_v4  ;;  %v2209_v29 = vmul.f32 %v2072_v5, %v2072_v5 }
 0x175   : > { %v1692_v3 = vadd.f32 %v3207_v12, %v1613_v57  ;;  %v2271_v30 = vadd.f32 %v2270_v9, %v2208_v56  ;;  %v1726_v37 = vpack.c.bf16 %v1694_v28, %v1693_v39 }
 0x176   : > { %v2136_v13 = vadd.f32 %v2135_v60, %v2072_v5 }
 0x177   : > { %v1725_v7 = vpack.c.bf16 %v1692_v3, %v1691_v52  ;;  %v2272_v34 = vadd.f32 %v2271_v30, %v2209_v29  ;;  %2909 = vst [vmem:[%s3288_s21 + $0xf8] sm:$0xff] %v1726_v37   ;;  %v2077_v45 = vunpack.c.l.bf16 %v1726_v37  ;;  %v2078_v53 = vunpack.c.h.bf16 %v1726_v37 }
 0x178   : > { %v2137_v2 = vadd.f32 %v2136_v13, %v2073_v48 }
 0x179   : > { %2908 = vst [vmem:[%s3288_s21 + $0xf0] sm:$0xff] %v1725_v7   ;;  %v2075_v38 = vunpack.c.l.bf16 %v1725_v7  ;;  %v2273_v46 = vadd.f32 %v2272_v34, %v2210_v33  ;;  %v2076_v47 = vunpack.c.h.bf16 %v1725_v7  ;;  %v2214_v10 = vmul.f32 %v2077_v45, %v2077_v45 }
 0x17a   : > { %v2138_v6 = vadd.f32 %v2137_v2, %v2074_v51  ;;  %v2215_v63 = vmul.f32 %v2078_v53, %v2078_v53 }
 0x17b   : > { %v2212_v49 = vmul.f32 %v2075_v38, %v2075_v38  ;;  %v2274_v35 = vadd.f32 %v2273_v46, %v2211_v8  ;;  %v2213_v19 = vmul.f32 %v2076_v47, %v2076_v47 }
 0x17c   : > { %v2139_v50 = vadd.f32 %v2138_v6, %v2075_v38 }
 0x17d   : > { %v2275_v20 = vadd.f32 %v2274_v35, %v2212_v49 }
 0x17e   : > { %v2140_v61 = vadd.f32 %v2139_v50, %v2076_v47 }
 0x17f   : > { %v2276_v62 = vadd.f32 %v2275_v20, %v2213_v19 }
 0x180   : > { %v2141_v14 = vadd.f32 %v2140_v61, %v2077_v45 }
 0x181   : > { %v2277_v16 = vadd.f32 %v2276_v62, %v2214_v10 }
 0x182   : > { %v2142_v11 = vadd.f32 %v2141_v14, %v2078_v53 }
 0x183   : > { %v2278_v1 = vadd.f32 %v2277_v16, %v2215_v63 }
 0x184   : > { %v2143_v0 = vrot.slane %v2142_v11, 4 }
 0x185   : > { %v2279_v36 = vrot.slane %v2278_v1, 4 }
 0x186   : > { %v2144_v21 = vadd.f32 %v2143_v0, %v2142_v11 }
 0x187   : > { %v2280_v15 = vadd.f32 %v2279_v36, %v2278_v1 }
 0x188   : > { %v2145_v22 = vrot.slane %v2144_v21, 2 }
 0x189   : > { %v2281_v24 = vrot.slane %v2280_v15, 2 }
 0x18a   : > { %v2146_v32 = vadd.f32 %v2145_v22, %v2144_v21 }
 0x18b   : > { %v2282_v26 = vadd.f32 %v2281_v24, %v2280_v15 }
 0x18c   : > { %v2147_v23 = vrot.slane %v2146_v32, 1 }
 0x18d   : > { %v2283_v42 = vrot.slane %v2282_v26, 1 }
 0x18e   : > { %v2148_v41 = vadd.f32 %v2147_v23, %v2146_v32 }
 0x18f   : > { %v2284_v55 = vadd.f32 %v2283_v42, %v2282_v26 }
 0x190   : > { %v2149_v54 = vadd.f32 %v2148_v41, %v2079_v40 }
 0x191   : > { %v2285_v58 = vadd.f32 %v2284_v55, %v2151_v44 }
 0x192   : > { %2150 = vst [vmem:[%s3900_s8] sm:$0x1] %v2149_v54 }
 0x193   : > { %2286 = vst [vmem:[%s3901_s9] sm:$0x1] %v2285_v58 }
 0x194 PF: > { %s20_s30 = sadd.s32 1, %s3214_s30  }
 0x195   : > { %p17_p5 = scmp.ge.s32.totalorder %s20_s30, 6  }
 0x197   :  { %19 = sbr.rel (!%p17_p5) target bundleno = 1 (0x1), region = 101 }

// kernel: mba_forward.6
= control target key start
LH: loop header
LB: loop body
LE: loop exit
PB: predicated region body
PF: predicated region fallthrough
CT: control target
= control target key end

     0   :  { %s3554_s13 = smov 0   ;;  %s3556_s14 = smov 0   ;;  %s4485_s0 = inlined_call_operand.vmem [shape: bf16[2048,128], index: 0, kind: input, shape index: {}]   ;;  %s4486_s1 = inlined_call_operand.vmem [shape: f32[1,128], index: 1, kind: input, shape index: {}]   ;;  %s4487_s2 = inlined_call_operand.vmem [shape: f32[1,128], index: 2, kind: input, shape index: {}]   ;;  %s4488_s3 = inlined_call_operand.vmem [shape: f32[1,128], index: 3, kind: input, shape index: {}]   ;;  %s4489_s4 = inlined_call_operand.vmem [shape: bf16[128,128], index: 4, kind: input, shape index: {}]   ;;  %s4490_s5 = inlined_call_operand.vmem [shape: f32[1,128], index: 5, kind: input, shape index: {}]   ;;  %s4491_s6 = inlined_call_operand.vmem [shape: bf16[128,8], index: 6, kind: input, shape index: {}]   ;;  %s4492_s7 = inlined_call_operand.vmem [shape: f32[1,8], index: 7, kind: input, shape index: {}]   ;;  %s4493_s8 = inlined_call_operand.vmem [shape: bf16[2048,128], index: 8, kind: output, shape index: {0}]   ;;  %s4494_s9 = inlined_call_operand.vmem [shape: bf16[2048,8], index: 9, kind: output, shape index: {1}]   ;;  %s4495_s10 = inlined_call_operand.vmem [shape: f32[2,1,128], index: 10, kind: output, shape index: {2}]  }
   0x1   :  { %s3558_s15 = smov 0   ;;  %s3560_s16 = smov 0  }
   0x2   :  { %s3562_s17 = smov 0  }
   0x3 LB: > { %s30_s18 = sadd.s32 1, %s3488_s15  ;;  %s33_s19 = sadd.s32 1, %s3492_s16  ;;  %s3496_s17 = sphi %s3562_s17, %s21_s17   ;;  %s3492_s16 = sphi %s3560_s16, %s4538_s16   ;;  %s3488_s15 = sphi %s3558_s15, %s4537_s15   ;;  %s3484_s14 = sphi %s3556_s14, %s4536_s14   ;;  %s3480_s13 = sphi %s3554_s13, %s4535_s13  }
   0x4   : > { %p31_p0 = scmp.ge.s32.totalorder %s30_s18, 2  ;;  %p2520_p1 = scmp.ge.s32.totalorder %s3496_s17, 1 }
   0x5   : > { %p346_p2 = scmp.lt.s32.totalorder %s3496_s17, 5 }
   0x6   : > { %s4540_s18 = smov (%p31_p0, %s30_s18), 0  ;;  %s4542_s19 = smov (!%p31_p0, %s33_s19), %s3492_s16 }
   0x7   : > { %p347_p3 = pnand %p2520_p1, %p346_p2  ;;  %p35_p4 = scmp.ge.s32.totalorder %s4542_s19, 2 }
   0x9   : > { %s4544_s19 = smov (%p35_p4, %s4542_s19), 0  ;;  %350 = sbr.rel (%p347_p3) target bundleno = 718 (0x2ce), region = 52 }
   0xe   : > { %p428_p5 = scmp.lt.s32.totalorder %s3484_s14, 1  ;;  %v3441_v0 = vld [vmem:[%s4489_s4 + $0x38] sm:$0xff]   ;;  %v3442_v1 = vld [vmem:[%s4489_s4 + $0x30] sm:$0xff]   ;;  %s2521_s24 = sshll.u32 %s3484_s14, 1  ;;  %v3443_v2 = vld [vmem:[%s4489_s4 + $0x28] sm:$0xff]  }
   0xf   : > { %3240 = vmatprep.subr.bf16.mxu0 %v3441_v0  ;;  %s399_s25 = sadd.s32 %s3480_s13, %s2521_s24  ;;  %v3444_v3 = vld [vmem:[%s4489_s4 + $0x20] sm:$0xff]   ;;  %v3445_v8 = vld [vmem:[%s4489_s4 + $0x18] sm:$0xff]   ;;  %v3446_v27 = vld [vmem:[%s4489_s4 + $0x10] sm:$0xff]   ;;  %p2679_p7 = scmp.ne.s32.totalorder %s3480_s13, 0 }
  0x10   : > { %s4546_s14 = smov (!%p428_p5, %s3484_s14), 1  ;;  %3241 = vmatpush3.bf16.msra.mxu0 %v3441_v0  ;;  %s2522_s11 = sshll.u32 %s399_s25, 6  ;;  %v3609_v4 = vld [vmem:[%s4486_s1] ss:$0 sm:$0xff]  ;;  %v3447_v38 = vld [vmem:[%s4489_s4 + $0x8] sm:$0xff]   ;;  %v3449_v63 = vld [vmem:[%s4491_s6 + $0x38] sm:$0xff]  }
  0x11   : > { %s3596_s28 = scalar_lea.vmem %s4495_s10, %s4546_s14  ;;  %3242 = vmatprep.subr.bf16.mxu0 %v3442_v1  ;;  %p401_p6 = scmp.lt.s32.totalorder %s2522_s11, 255  ;;  %v3627_v14 = vld [vmem:[%s4487_s2] ss:$0 sm:$0xff]  ;;  %v3450_v0 = vld [vmem:[%s4491_s6 + $0x30] sm:$0xff]   ;;  %3320 = vmatprep.subr.bf16.mxu1 %v3449_v63 }
  0x12   : > { %v3636_v23 = vld [vmem:[%s4488_s3] ss:$0 sm:$0xff]  ;;  %3321 = vmatpush3.bf16.msra.mxu1 %v3449_v63 }
  0x13   : > { %s4548_s11 = smov (!%p401_p6, %s2522_s11), 255  ;;  %v3448_v47 = vld [vmem:[%s4489_s4] sm:$0xff]   ;;  %3322 = vmatprep.subr.bf16.mxu1 %v3450_v0 }
  0x14   : > { %3243 = vmatpush3.bf16.msra.mxu0 %v3442_v1  ;;  %s3604_s21 = sshll.u32 %s4548_s11, 2 }
  0x15   : > { %3244 = vmatprep.subr.bf16.mxu0 %v3443_v2  ;;  %s3615_s25 = scalar_lea.vmem %s4485_s0, %s3604_s21  ;;  %s3915_s26 = scalar_lea.vmem %s4493_s8, %s3604_s21 }
  0x16   : > { %v2811_v5 = vld [vmem:[%s3615_s25] sm:$0xff]   ;;  %v3098_v6 = vld [vmem:[%s3615_s25 + $0x8] sm:$0xff]   ;;  %v3099_v7 = vld [vmem:[%s3615_s25 + $0x10] sm:$0xff]   ;;  %3323 = vmatpush3.bf16.msra.mxu1 %v3450_v0  ;;  %s4209_s12 = scalar_lea.vmem %s4494_s9, %s3604_s21 }
  0x17   : > { %v2812_v9 = vunpack.c.l.bf16 %v2811_v5  ;;  %v2813_v10 = vunpack.c.h.bf16 %v2811_v5  ;;  %v2816_v11 = vunpack.c.l.bf16 %v3098_v6  ;;  %v2817_v12 = vunpack.c.h.bf16 %v3098_v6  ;;  %v3100_v13 = vld [vmem:[%s3615_s25 + $0x18] sm:$0xff]   ;;  %v3101_v41 = vld [vmem:[%s3615_s25 + $0x20] sm:$0xff]   ;;  %v3102_v46 = vld [vmem:[%s3615_s25 + $0x28] sm:$0xff]  }
  0x18   : > { %3245 = vmatpush3.bf16.msra.mxu0 %v3443_v2  ;;  %v2820_v15 = vunpack.c.l.bf16 %v3099_v7  ;;  %v2821_v16 = vunpack.c.h.bf16 %v3099_v7  ;;  %v2824_v17 = vunpack.c.l.bf16 %v3100_v13  ;;  %v2825_v18 = vunpack.c.h.bf16 %v3100_v13  ;;  %v3103_v50 = vld [vmem:[%s3615_s25 + $0x30] sm:$0xff]   ;;  %v3451_v13 = vld [vmem:[%s4491_s6 + $0x28] sm:$0xff]  }
  0x19   : > { %3246 = vmatprep.subr.bf16.mxu0 %v3444_v3  ;;  %v567_v19 = vmul.f32 %v2812_v9, %v3609_v4  ;;  %v568_v20 = vmul.f32 %v2813_v10, %v3609_v4  ;;  %v569_v21 = vmul.f32 %v2816_v11, %v3609_v4  ;;  %v570_v22 = vmul.f32 %v2817_v12, %v3609_v4  ;;  %v3104_v10 = vld [vmem:[%s3615_s25 + $0x38] sm:$0xff]  }
  0x1a   : > { %v571_v24 = vmul.f32 %v2820_v15, %v3609_v4  ;;  %v572_v25 = vmul.f32 %v2821_v16, %v3609_v4  ;;  %v573_v26 = vmul.f32 %v2824_v17, %v3609_v4  ;;  %v574_v34 = vmul.f32 %v2825_v18, %v3609_v4  ;;  %3324 = vmatprep.subr.bf16.mxu1 %v3451_v13 }
  0x1b   : > { %v638_v28 = vadd.f32 %v3627_v14, %v567_v19  ;;  %v639_v29 = vadd.f32 %v3627_v14, %v568_v20  ;;  %v640_v30 = vadd.f32 %v3627_v14, %v569_v21  ;;  %v641_v31 = vadd.f32 %v3627_v14, %v570_v22  ;;  %v3105_v22 = vld [vmem:[%s3615_s25 + $0x40] sm:$0xff]   ;;  %3325 = vmatpush3.bf16.msra.mxu1 %v3451_v13 }
  0x1c   : > { %3247 = vmatpush3.bf16.msra.mxu0 %v3444_v3  ;;  %v642_v32 = vadd.f32 %v3627_v14, %v571_v24  ;;  %v643_v33 = vadd.f32 %v3627_v14, %v572_v25  ;;  %v644_v37 = vadd.f32 %v3627_v14, %v573_v26  ;;  %v645_v49 = vadd.f32 %v3627_v14, %v574_v34 }
  0x1d   : > { %3248 = vmatprep.subr.bf16.mxu0 %v3445_v8  ;;  %vm702_vm0 = vcmp.ge.f32.partialorder %v638_v28, 0.0  ;;  %vm703_vm1 = vcmp.ge.f32.partialorder %v639_v29, 0.0  ;;  %v773_v35 = vmul.f32 %v3636_v23, %v638_v28  ;;  %v774_v36 = vmul.f32 %v3636_v23, %v639_v29 }
  0x1e   : > { %vm704_vm2 = vcmp.ge.f32.partialorder %v640_v30, 0.0  ;;  %vm705_vm3 = vcmp.ge.f32.partialorder %v641_v31, 0.0  ;;  %v775_v43 = vmul.f32 %v3636_v23, %v640_v30  ;;  %v776_v44 = vmul.f32 %v3636_v23, %v641_v31 }
  0x1f   : > { %v837_v39 = vsel %vm702_vm0, %v638_v28, %v773_v35  ;;  %v838_v40 = vsel %vm703_vm1, %v639_v29, %v774_v36  ;;  %v777_v45 = vmul.f32 %v3636_v23, %v642_v32  ;;  %vm706_vm4 = vcmp.ge.f32.partialorder %v642_v32, 0.0  ;;  %v3452_v28 = vld [vmem:[%s4491_s6 + $0x20] sm:$0xff]  }
  0x20   : > { %3249 = vmatpush3.bf16.msra.mxu0 %v3445_v8  ;;  %v901_v42 = vpack.c.bf16 %v838_v40, %v837_v39  ;;  %vm707_vm5 = vcmp.ge.f32.partialorder %v643_v33, 0.0  ;;  %v778_v48 = vmul.f32 %v3636_v23, %v643_v33  ;;  %v2828_v51 = vunpack.c.l.bf16 %v3101_v41  ;;  %3326 = vmatprep.subr.bf16.mxu1 %v3452_v28 }
  0x21   : > { %3250 = vmatprep.subr.bf16.mxu0 %v3446_v27  ;;  %v2829_v52 = vunpack.c.h.bf16 %v3101_v41  ;;  %v2832_v53 = vunpack.c.l.bf16 %v3102_v46  ;;  %v2833_v54 = vunpack.c.h.bf16 %v3102_v46  ;;  %v839_v55 = vsel %vm704_vm2, %v640_v30, %v775_v43  ;;  %v3106_v41 = vld [vmem:[%s3615_s25 + $0x48] sm:$0xff]   ;;  %3327 = vmatpush3.bf16.msra.mxu1 %v3452_v28 }
  0x22   : > { %3256 = vmatprep.mubr.bf16.mxu0 %v901_v42  ;;  %v840_v56 = vsel %vm705_vm3, %v641_v31, %v776_v44  ;;  %v841_v57 = vsel %vm706_vm4, %v642_v32, %v777_v45  ;;  %v575_v58 = vmul.f32 %v2828_v51, %v3609_v4  ;;  %v842_v59 = vsel %vm707_vm5, %v643_v33, %v778_v48  ;;  %v3453_v42 = vld [vmem:[%s4491_s6 + $0x18] sm:$0xff]  }
  0x23   : > { %v779_v60 = vmul.f32 %v3636_v23, %v644_v37  ;;  %v780_v61 = vmul.f32 %v3636_v23, %v645_v49  ;;  %v576_v62 = vmul.f32 %v2829_v52, %v3609_v4  ;;  %v577_v2 = vmul.f32 %v2832_v53, %v3609_v4  ;;  %3328 = vmatprep.subr.bf16.mxu1 %v3453_v42 }
  0x24   : > { %3251 = vmatpush3.bf16.msra.mxu0 %v3446_v27  ;;  %v646_v1 = vadd.f32 %v3627_v14, %v575_v58  ;;  %v2836_v3 = vunpack.c.l.bf16 %v3103_v50  ;;  %v2837_v5 = vunpack.c.h.bf16 %v3103_v50  ;;  %vm708_vm6 = vcmp.ge.f32.partialorder %v644_v37, 0.0 }
  0x25   : > { %3252 = vmatprep.subr.bf16.mxu0 %v3447_v38  ;;  %vm709_vm7 = vcmp.ge.f32.partialorder %v645_v49, 0.0  ;;  %v647_v6 = vadd.f32 %v3627_v14, %v576_v62  ;;  %v578_v7 = vmul.f32 %v2833_v54, %v3609_v4  ;;  %v902_v11 = vpack.c.bf16 %v840_v56, %v839_v55  ;;  %3329 = vmatpush3.bf16.msra.mxu1 %v3453_v42 }
  0x26   : > { %v579_v8 = vmul.f32 %v2836_v3, %v3609_v4  ;;  %v580_v9 = vmul.f32 %v2837_v5, %v3609_v4  ;;  %v903_v12 = vpack.c.bf16 %v842_v59, %v841_v57  ;;  %v843_v15 = vsel %vm708_vm6, %v644_v37, %v779_v60  ;;  %v3108_v3 = vld [vmem:[%s3615_s25 + $0x58] sm:$0xff]  }
  0x27   : > { %v844_v16 = vsel %vm709_vm7, %v645_v49, %v780_v61  ;;  %v781_v17 = vmul.f32 %v3636_v23, %v646_v1  ;;  %v648_v18 = vadd.f32 %v3627_v14, %v577_v2  ;;  %vm710_vm8 = vcmp.ge.f32.partialorder %v646_v1, 0.0 }
  0x28   : > { %3253 = vmatpush3.bf16.msra.mxu0 %v3447_v38  ;;  %v782_v19 = vmul.f32 %v3636_v23, %v647_v6  ;;  %v649_v20 = vadd.f32 %v3627_v14, %v578_v7  ;;  %v2840_v21 = vunpack.c.l.bf16 %v3104_v10  ;;  %vm711_vm9 = vcmp.ge.f32.partialorder %v647_v6, 0.0  ;;  %v3109_v7 = vld [vmem:[%s3615_s25 + $0x60] sm:$0xff]  }
  0x29   : > { %3254 = vmatprep.subr.bf16.mxu0 %v3448_v47  ;;  %v650_v24 = vadd.f32 %v3627_v14, %v579_v8  ;;  %v651_v25 = vadd.f32 %v3627_v14, %v580_v9  ;;  %v2841_v26 = vunpack.c.h.bf16 %v3104_v10  ;;  %v904_v27 = vpack.c.bf16 %v844_v16, %v843_v15 }
  0x2a   : > { %v845_v29 = vsel %vm710_vm8, %v646_v1, %v781_v17  ;;  %vm712_vm10 = vcmp.ge.f32.partialorder %v648_v18, 0.0  ;;  %v2844_v30 = vunpack.c.l.bf16 %v3105_v22  ;;  %v2845_v31 = vunpack.c.h.bf16 %v3105_v22 }
  0x2b   : > { %v846_v32 = vsel %vm711_vm9, %v647_v6, %v782_v19  ;;  %v783_v33 = vmul.f32 %v3636_v23, %v648_v18  ;;  %v784_v34 = vmul.f32 %v3636_v23, %v649_v20  ;;  %v581_v35 = vmul.f32 %v2840_v21, %v3609_v4 }
  0x2c   : > { %3255 = vmatpush3.bf16.msra.mxu0 %v3448_v47  ;;  %vm713_vm11 = vcmp.ge.f32.partialorder %v649_v20, 0.0  ;;  %v785_v36 = vmul.f32 %v3636_v23, %v650_v24  ;;  %v786_v37 = vmul.f32 %v3636_v23, %v651_v25  ;;  %v582_v38 = vmul.f32 %v2841_v26, %v3609_v4  ;;  %v3107_v47 = vld [vmem:[%s3615_s25 + $0x50] sm:$0xff]  }
  0x2d   : > { %vm714_vm12 = vcmp.ge.f32.partialorder %v650_v24, 0.0  ;;  %vm715_vm13 = vcmp.ge.f32.partialorder %v651_v25, 0.0  ;;  %v583_v39 = vmul.f32 %v2844_v30, %v3609_v4  ;;  %v584_v40 = vmul.f32 %v2845_v31, %v3609_v4 }
  0x2e   : > { %v905_v43 = vpack.c.bf16 %v846_v32, %v845_v29  ;;  %v847_v44 = vsel %vm712_vm10, %v648_v18, %v783_v33  ;;  %v848_v45 = vsel %vm713_vm11, %v649_v20, %v784_v34  ;;  %v652_v46 = vadd.f32 %v3627_v14, %v581_v35  ;;  %v3111_v32 = vld [vmem:[%s3615_s25 + $0x70] sm:$0xff]  }
  0x2f   : > { %3257 = vmatmul.mubr.bf16.vlgmr.msra.gmra.mxu0 %v902_v11  ;;  %v849_v48 = vsel %vm714_vm12, %v650_v24, %v785_v36  ;;  %v850_v49 = vsel %vm715_vm13, %v651_v25, %v786_v37  ;;  %v653_v50 = vadd.f32 %v3627_v14, %v582_v38  ;;  %v2848_v51 = vunpack.c.l.bf16 %v3106_v41  ;;  %v3110_v24 = vld [vmem:[%s3615_s25 + $0x68] sm:$0xff]  }
  0x30   : > { %3260 = vmatprep.mubr.bf16.mxu0 %v903_v12  ;;  %v654_v52 = vadd.f32 %v3627_v14, %v583_v39  ;;  %v655_v53 = vadd.f32 %v3627_v14, %v584_v40  ;;  %v2849_v54 = vunpack.c.h.bf16 %v3106_v41  ;;  %v2852_v55 = vunpack.c.l.bf16 %v3107_v47 }
  0x31   : > { %v2853_v56 = vunpack.c.h.bf16 %v3107_v47  ;;  %v906_v57 = vpack.c.bf16 %v848_v45, %v847_v44  ;;  %v907_v58 = vpack.c.bf16 %v850_v49, %v849_v48  ;;  %vm716_vm14 = vcmp.ge.f32.partialorder %v652_v46, 0.0  ;;  %v3112_v48 = vld [vmem:[%s3615_s25 + $0x78] sm:$0xff]  }
  0x32   : > { %vm717_vm15 = vcmp.ge.f32.partialorder %v653_v50, 0.0  ;;  %v787_v59 = vmul.f32 %v3636_v23, %v652_v46  ;;  %v585_v60 = vmul.f32 %v2848_v51, %v3609_v4  ;;  %v788_v61 = vmul.f32 %v3636_v23, %v653_v50  ;;  %v3113_v51 = vld [vmem:[%s3615_s25 + $0x80] sm:$0xff]  }
  0x33   : > { %v789_v62 = vmul.f32 %v3636_v23, %v654_v52  ;;  %v790_v63 = vmul.f32 %v3636_v23, %v655_v53  ;;  %v586_v0 = vmul.f32 %v2849_v54, %v3609_v4  ;;  %vm718_vm0 = vcmp.ge.f32.partialorder %v654_v52, 0.0 }
  0x34   : > { %vm719_vm1 = vcmp.ge.f32.partialorder %v655_v53, 0.0  ;;  %v587_v1 = vmul.f32 %v2852_v55, %v3609_v4  ;;  %v588_v2 = vmul.f32 %v2853_v56, %v3609_v4  ;;  %v851_v5 = vsel %vm716_vm14, %v652_v46, %v787_v59 }
  0x35   : > { %v656_v6 = vadd.f32 %v3627_v14, %v585_v60  ;;  %v852_v8 = vsel %vm717_vm15, %v653_v50, %v788_v61  ;;  %v853_v9 = vsel %vm718_vm0, %v654_v52, %v789_v62  ;;  %v854_v10 = vsel %vm719_vm1, %v655_v53, %v790_v63 }
  0x36   : > { %v657_v11 = vadd.f32 %v3627_v14, %v586_v0  ;;  %v658_v12 = vadd.f32 %v3627_v14, %v587_v1  ;;  %v659_v13 = vadd.f32 %v3627_v14, %v588_v2  ;;  %v2856_v15 = vunpack.c.l.bf16 %v3108_v3 }
  0x37   : > { %3261 = vmatmul.mubr.bf16.gmra.mxu0 %v904_v27  ;;  %v2857_v16 = vunpack.c.h.bf16 %v3108_v3  ;;  %v2860_v17 = vunpack.c.l.bf16 %v3109_v7  ;;  %v2861_v18 = vunpack.c.h.bf16 %v3109_v7  ;;  %v908_v19 = vpack.c.bf16 %v852_v8, %v851_v5 }
  0x38   : > { %3264 = vmatprep.mubr.bf16.mxu0 %v905_v43  ;;  %vm720_vm2 = vcmp.ge.f32.partialorder %v656_v6, 0.0  ;;  %v909_v20 = vpack.c.bf16 %v854_v10, %v853_v9  ;;  %vm721_vm3 = vcmp.ge.f32.partialorder %v657_v11, 0.0  ;;  %v791_v21 = vmul.f32 %v3636_v23, %v656_v6 }
  0x39   : > { %v792_v22 = vmul.f32 %v3636_v23, %v657_v11  ;;  %v793_v25 = vmul.f32 %v3636_v23, %v658_v12  ;;  %v794_v26 = vmul.f32 %v3636_v23, %v659_v13  ;;  %v589_v27 = vmul.f32 %v2856_v15, %v3609_v4 }
  0x3a   : > { %v590_v28 = vmul.f32 %v2857_v16, %v3609_v4  ;;  %vm722_vm4 = vcmp.ge.f32.partialorder %v658_v12, 0.0  ;;  %vm723_vm5 = vcmp.ge.f32.partialorder %v659_v13, 0.0  ;;  %v591_v29 = vmul.f32 %v2860_v17, %v3609_v4 }
  0x3b   : > { %v592_v30 = vmul.f32 %v2861_v18, %v3609_v4  ;;  %v2864_v31 = vunpack.c.l.bf16 %v3110_v24  ;;  %v855_v33 = vsel %vm720_vm2, %v656_v6, %v791_v21  ;;  %v856_v34 = vsel %vm721_vm3, %v657_v11, %v792_v22  ;;  %v3114_v11 = vld [vmem:[%s3615_s25 + $0x88] sm:$0xff]  }
  0x3c   : > { %v2865_v35 = vunpack.c.h.bf16 %v3110_v24  ;;  %v857_v36 = vsel %vm722_vm4, %v658_v12, %v793_v25  ;;  %v858_v37 = vsel %vm723_vm5, %v659_v13, %v794_v26  ;;  %v660_v38 = vadd.f32 %v3627_v14, %v589_v27 }
  0x3d   : > { %v661_v39 = vadd.f32 %v3627_v14, %v590_v28  ;;  %v662_v40 = vadd.f32 %v3627_v14, %v591_v29  ;;  %v663_v41 = vadd.f32 %v3627_v14, %v592_v30  ;;  %v2868_v42 = vunpack.c.l.bf16 %v3111_v32 }
  0x3e   : > { %v2869_v43 = vunpack.c.h.bf16 %v3111_v32  ;;  %v593_v44 = vmul.f32 %v2864_v31, %v3609_v4  ;;  %v910_v45 = vpack.c.bf16 %v856_v34, %v855_v33  ;;  %v911_v46 = vpack.c.bf16 %v858_v37, %v857_v36  ;;  %v3116_v36 = vld [vmem:[%s3615_s25 + $0x98] sm:$0xff]  }
  0x3f   : > { %3265 = vmatmul.mubr.bf16.gmra.mxu0 %v906_v57  ;;  %v594_v47 = vmul.f32 %v2865_v35, %v3609_v4  ;;  %vm724_vm6 = vcmp.ge.f32.partialorder %v660_v38, 0.0  ;;  %vm725_vm7 = vcmp.ge.f32.partialorder %v661_v39, 0.0  ;;  %v795_v49 = vmul.f32 %v3636_v23, %v660_v38 }
  0x40   : > { %3268 = vmatprep.mubr.bf16.mxu0 %v907_v58  ;;  %v796_v50 = vmul.f32 %v3636_v23, %v661_v39  ;;  %v797_v52 = vmul.f32 %v3636_v23, %v662_v40  ;;  %v798_v53 = vmul.f32 %v3636_v23, %v663_v41  ;;  %v595_v54 = vmul.f32 %v2868_v42, %v3609_v4  ;;  %v3117_v42 = vld [vmem:[%s3615_s25 + $0xa0] sm:$0xff]  }
  0x41   : > { %v596_v55 = vmul.f32 %v2869_v43, %v3609_v4  ;;  %vm726_vm8 = vcmp.ge.f32.partialorder %v662_v40, 0.0  ;;  %vm727_vm9 = vcmp.ge.f32.partialorder %v663_v41, 0.0  ;;  %v664_v56 = vadd.f32 %v3627_v14, %v593_v44 }
  0x42   : > { %v2872_v57 = vunpack.c.l.bf16 %v3112_v48  ;;  %v665_v58 = vadd.f32 %v3627_v14, %v594_v47  ;;  %v2873_v59 = vunpack.c.h.bf16 %v3112_v48  ;;  %v2876_v60 = vunpack.c.l.bf16 %v3113_v51 }
  0x43   : > { %v859_v61 = vsel %vm724_vm6, %v660_v38, %v795_v49  ;;  %v860_v62 = vsel %vm725_vm7, %v661_v39, %v796_v50  ;;  %v2877_v63 = vunpack.c.h.bf16 %v3113_v51  ;;  %v861_v0 = vsel %vm726_vm8, %v662_v40, %v797_v52 }
  0x44   : > { %v862_v1 = vsel %vm727_vm9, %v663_v41, %v798_v53  ;;  %v666_v2 = vadd.f32 %v3627_v14, %v595_v54  ;;  %v667_v3 = vadd.f32 %v3627_v14, %v596_v55  ;;  %v799_v5 = vmul.f32 %v3636_v23, %v664_v56 }
  0x45   : > { %v597_v6 = vmul.f32 %v2872_v57, %v3609_v4  ;;  %v912_v7 = vpack.c.bf16 %v860_v62, %v859_v61  ;;  %v800_v8 = vmul.f32 %v3636_v23, %v665_v58  ;;  %v598_v9 = vmul.f32 %v2873_v59, %v3609_v4  ;;  %v3118_v59 = vld [vmem:[%s3615_s25 + $0xa8] sm:$0xff]  }
  0x46   : > { %v599_v10 = vmul.f32 %v2876_v60, %v3609_v4  ;;  %v913_v12 = vpack.c.bf16 %v862_v1, %v861_v0  ;;  %vm728_vm10 = vcmp.ge.f32.partialorder %v664_v56, 0.0  ;;  %vm729_vm11 = vcmp.ge.f32.partialorder %v665_v58, 0.0 }
  0x47   : > { %3269 = vmatmul.mubr.bf16.gmra.mxu0 %v908_v19  ;;  %v600_v13 = vmul.f32 %v2877_v63, %v3609_v4  ;;  %v801_v15 = vmul.f32 %v3636_v23, %v666_v2  ;;  %v802_v16 = vmul.f32 %v3636_v23, %v667_v3  ;;  %vm730_vm12 = vcmp.ge.f32.partialorder %v666_v2, 0.0  ;;  %v3115_v19 = vld [vmem:[%s3615_s25 + $0x90] sm:$0xff]  }
  0x48   : > { %3272 = vmatprep.mubr.bf16.mxu0 %v909_v20  ;;  %vm731_vm13 = vcmp.ge.f32.partialorder %v667_v3, 0.0  ;;  %v668_v17 = vadd.f32 %v3627_v14, %v597_v6  ;;  %v2880_v18 = vunpack.c.l.bf16 %v3114_v11  ;;  %v863_v20 = vsel %vm728_vm10, %v664_v56, %v799_v5  ;;  %v3119_v5 = vld [vmem:[%s3615_s25 + $0xb0] sm:$0xff]  }
  0x49   : > { %v864_v21 = vsel %vm729_vm11, %v665_v58, %v800_v8  ;;  %v669_v22 = vadd.f32 %v3627_v14, %v598_v9  ;;  %v670_v24 = vadd.f32 %v3627_v14, %v599_v10  ;;  %v671_v25 = vadd.f32 %v3627_v14, %v600_v13 }
  0x4a   : > { %v2881_v26 = vunpack.c.h.bf16 %v3114_v11  ;;  %v865_v27 = vsel %vm730_vm12, %v666_v2, %v801_v15  ;;  %v866_v28 = vsel %vm731_vm13, %v667_v3, %v802_v16  ;;  %v2884_v29 = vunpack.c.l.bf16 %v3115_v19 }
  0x4b   : > { %v2885_v30 = vunpack.c.h.bf16 %v3115_v19  ;;  %v914_v31 = vpack.c.bf16 %v864_v21, %v863_v20  ;;  %v803_v32 = vmul.f32 %v3636_v23, %v668_v17  ;;  %v601_v33 = vmul.f32 %v2880_v18, %v3609_v4 }
  0x4c   : > { %vm732_vm14 = vcmp.ge.f32.partialorder %v668_v17, 0.0  ;;  %vm733_vm15 = vcmp.ge.f32.partialorder %v669_v22, 0.0  ;;  %v804_v34 = vmul.f32 %v3636_v23, %v669_v22  ;;  %v805_v35 = vmul.f32 %v3636_v23, %v670_v24 }
  0x4d   : > { %v915_v37 = vpack.c.bf16 %v866_v28, %v865_v27  ;;  %vm734_vm0 = vcmp.ge.f32.partialorder %v670_v24, 0.0  ;;  %v806_v38 = vmul.f32 %v3636_v23, %v671_v25  ;;  %v602_v39 = vmul.f32 %v2881_v26, %v3609_v4  ;;  %v3120_v26 = vld [vmem:[%s3615_s25 + $0xb8] sm:$0xff]  }
  0x4e   : > { %vm735_vm1 = vcmp.ge.f32.partialorder %v671_v25, 0.0  ;;  %v603_v40 = vmul.f32 %v2884_v29, %v3609_v4  ;;  %v604_v41 = vmul.f32 %v2885_v30, %v3609_v4  ;;  %v867_v43 = vsel %vm732_vm14, %v668_v17, %v803_v32  ;;  %v3454_v29 = vld [vmem:[%s4491_s6 + $0x10] sm:$0xff]   ;;  %v3121_v32 = vld [vmem:[%s3615_s25 + $0xc0] sm:$0xff]  }
  0x4f   : > { %3273 = vmatmul.mubr.bf16.gmra.mxu0 %v910_v45  ;;  %v2888_v44 = vunpack.c.l.bf16 %v3116_v36  ;;  %v868_v45 = vsel %vm733_vm15, %v669_v22, %v804_v34  ;;  %v672_v47 = vadd.f32 %v3627_v14, %v601_v33  ;;  %v2889_v48 = vunpack.c.h.bf16 %v3116_v36  ;;  %3330 = vmatprep.subr.bf16.mxu1 %v3454_v29 }
  0x50   : > { %3276 = vmatprep.mubr.bf16.mxu0 %v911_v46  ;;  %v869_v46 = vsel %vm734_vm0, %v670_v24, %v805_v35  ;;  %v870_v49 = vsel %vm735_vm1, %v671_v25, %v806_v38  ;;  %v673_v50 = vadd.f32 %v3627_v14, %v602_v39  ;;  %v2892_v51 = vunpack.c.l.bf16 %v3117_v42  ;;  %3331 = vmatpush3.bf16.msra.mxu1 %v3454_v29 }
  0x51   : > { %v2893_v52 = vunpack.c.h.bf16 %v3117_v42  ;;  %v674_v53 = vadd.f32 %v3627_v14, %v603_v40  ;;  %v675_v54 = vadd.f32 %v3627_v14, %v604_v41  ;;  %v605_v55 = vmul.f32 %v2888_v44, %v3609_v4 }
  0x52   : > { %v916_v56 = vpack.c.bf16 %v868_v45, %v867_v43  ;;  %v917_v57 = vpack.c.bf16 %v870_v49, %v869_v46  ;;  %v606_v58 = vmul.f32 %v2889_v48, %v3609_v4  ;;  %v807_v60 = vmul.f32 %v3636_v23, %v672_v47  ;;  %v3455_v43 = vld [vmem:[%s4491_s6 + $0x8] sm:$0xff]  }
  0x53   : > { %v808_v61 = vmul.f32 %v3636_v23, %v673_v50  ;;  %v607_v62 = vmul.f32 %v2892_v51, %v3609_v4  ;;  %v608_v63 = vmul.f32 %v2893_v52, %v3609_v4  ;;  %vm736_vm2 = vcmp.ge.f32.partialorder %v672_v47, 0.0  ;;  %v3122_v49 = vld [vmem:[%s3615_s25 + $0xc8] sm:$0xff]   ;;  %3332 = vmatprep.subr.bf16.mxu1 %v3455_v43 }
  0x54   : > { %vm737_vm3 = vcmp.ge.f32.partialorder %v673_v50, 0.0  ;;  %v809_v0 = vmul.f32 %v3636_v23, %v674_v53  ;;  %v810_v1 = vmul.f32 %v3636_v23, %v675_v54  ;;  %vm738_vm4 = vcmp.ge.f32.partialorder %v674_v53, 0.0  ;;  %3333 = vmatpush3.bf16.msra.mxu1 %v3455_v43  ;;  %v3127_v43 = vld [vmem:[%s3615_s25 + $0xf0] sm:$0xff]  }
  0x55   : > { %vm739_vm5 = vcmp.ge.f32.partialorder %v675_v54, 0.0  ;;  %v676_v2 = vadd.f32 %v3627_v14, %v605_v55  ;;  %v2896_v3 = vunpack.c.l.bf16 %v3118_v59  ;;  %v677_v6 = vadd.f32 %v3627_v14, %v606_v58  ;;  %v3123_v55 = vld [vmem:[%s3615_s25 + $0xd0] sm:$0xff]  }
  0x56   : > { %v871_v8 = vsel %vm736_vm2, %v672_v47, %v807_v60  ;;  %v872_v9 = vsel %vm737_vm3, %v673_v50, %v808_v61  ;;  %v678_v10 = vadd.f32 %v3627_v14, %v607_v62  ;;  %v679_v11 = vadd.f32 %v3627_v14, %v608_v63 }
  0x57   : > { %3277 = vmatmul.mubr.bf16.gmra.mxu0 %v912_v7  ;;  %v2897_v7 = vunpack.c.h.bf16 %v3118_v59  ;;  %v874_v13 = vsel %vm739_vm5, %v675_v54, %v810_v1  ;;  %v2900_v15 = vunpack.c.l.bf16 %v3119_v5  ;;  %v2901_v16 = vunpack.c.h.bf16 %v3119_v5 }
  0x58   : > { %3280 = vmatprep.mubr.bf16.mxu0 %v913_v12  ;;  %v873_v12 = vsel %vm738_vm4, %v674_v53, %v809_v0  ;;  %v811_v17 = vmul.f32 %v3636_v23, %v676_v2  ;;  %v609_v18 = vmul.f32 %v2896_v3, %v3609_v4  ;;  %v918_v19 = vpack.c.bf16 %v872_v9, %v871_v8 }
  0x59   : > { %vm740_vm6 = vcmp.ge.f32.partialorder %v676_v2, 0.0  ;;  %v812_v20 = vmul.f32 %v3636_v23, %v677_v6  ;;  %v610_v21 = vmul.f32 %v2897_v7, %v3609_v4  ;;  %v919_v22 = vpack.c.bf16 %v874_v13, %v873_v12 }
  0x5a   : > { %vm741_vm7 = vcmp.ge.f32.partialorder %v677_v6, 0.0  ;;  %v813_v24 = vmul.f32 %v3636_v23, %v678_v10  ;;  %v814_v25 = vmul.f32 %v3636_v23, %v679_v11  ;;  %vm742_vm8 = vcmp.ge.f32.partialorder %v678_v10, 0.0 }
  0x5b   : > { %vm743_vm9 = vcmp.ge.f32.partialorder %v679_v11, 0.0  ;;  %v611_v27 = vmul.f32 %v2900_v15, %v3609_v4  ;;  %v612_v28 = vmul.f32 %v2901_v16, %v3609_v4  ;;  %v875_v30 = vsel %vm740_vm6, %v676_v2, %v811_v17  ;;  %v3124_v15 = vld [vmem:[%s3615_s25 + $0xd8] sm:$0xff]  }
  0x5c   : > { %v876_v33 = vsel %vm741_vm7, %v677_v6, %v812_v20  ;;  %v681_v34 = vadd.f32 %v3627_v14, %v610_v21  ;;  %v2904_v35 = vunpack.c.l.bf16 %v3120_v26  ;;  %v2905_v36 = vunpack.c.h.bf16 %v3120_v26 }
  0x5d   : > { %v878_v38 = vsel %vm743_vm9, %v679_v11, %v814_v25  ;;  %v682_v39 = vadd.f32 %v3627_v14, %v611_v27  ;;  %v683_v40 = vadd.f32 %v3627_v14, %v612_v28  ;;  %v2908_v41 = vunpack.c.l.bf16 %v3121_v32 }
  0x5e   : > { %v2909_v42 = vunpack.c.h.bf16 %v3121_v32  ;;  %v920_v44 = vpack.c.bf16 %v876_v33, %v875_v30  ;;  %v816_v46 = vmul.f32 %v3636_v23, %v681_v34  ;;  %v613_v47 = vmul.f32 %v2904_v35, %v3609_v4 }
  0x5f   : > { %3281 = vmatmul.mubr.bf16.gmra.mxu0 %v914_v31  ;;  %v680_v31 = vadd.f32 %v3627_v14, %v609_v18  ;;  %v614_v48 = vmul.f32 %v2905_v36, %v3609_v4  ;;  %vm745_vm11 = vcmp.ge.f32.partialorder %v681_v34, 0.0  ;;  %v817_v51 = vmul.f32 %v3636_v23, %v682_v39 }
  0x60   : > { %3284 = vmatprep.mubr.bf16.mxu0 %v915_v37  ;;  %v877_v37 = vsel %vm742_vm8, %v678_v10, %v813_v24  ;;  %v818_v52 = vmul.f32 %v3636_v23, %v683_v40  ;;  %v615_v53 = vmul.f32 %v2908_v41, %v3609_v4  ;;  %v616_v54 = vmul.f32 %v2909_v42, %v3609_v4 }
  0x61   : > { %v815_v45 = vmul.f32 %v3636_v23, %v680_v31  ;;  %vm744_vm10 = vcmp.ge.f32.partialorder %v680_v31, 0.0  ;;  %v921_v50 = vpack.c.bf16 %v878_v38, %v877_v37  ;;  %vm746_vm12 = vcmp.ge.f32.partialorder %v682_v39, 0.0 }
  0x62   : > { %vm747_vm13 = vcmp.ge.f32.partialorder %v683_v40, 0.0  ;;  %v2912_v58 = vunpack.c.l.bf16 %v3122_v49  ;;  %v880_v59 = vsel %vm745_vm11, %v681_v34, %v816_v46  ;;  %v684_v60 = vadd.f32 %v3627_v14, %v613_v47 }
  0x63   : > { %v685_v61 = vadd.f32 %v3627_v14, %v614_v48  ;;  %v2913_v62 = vunpack.c.h.bf16 %v3122_v49  ;;  %v2916_v63 = vunpack.c.l.bf16 %v3123_v55  ;;  %v2917_v0 = vunpack.c.h.bf16 %v3123_v55 }
  0x64   : > { %v881_v1 = vsel %vm746_vm12, %v682_v39, %v817_v51  ;;  %v882_v2 = vsel %vm747_vm13, %v683_v40, %v818_v52  ;;  %v686_v3 = vadd.f32 %v3627_v14, %v615_v53  ;;  %v687_v5 = vadd.f32 %v3627_v14, %v616_v54  ;;  %v3126_v40 = vld [vmem:[%s3615_s25 + $0xe8] sm:$0xff]  }
  0x65   : > { %v617_v7 = vmul.f32 %v2912_v58, %v3609_v4  ;;  %vm748_vm14 = vcmp.ge.f32.partialorder %v684_v60, 0.0  ;;  %v819_v8 = vmul.f32 %v3636_v23, %v684_v60  ;;  %v820_v9 = vmul.f32 %v3636_v23, %v685_v61 }
  0x66   : > { %v618_v10 = vmul.f32 %v2913_v62, %v3609_v4  ;;  %v923_v11 = vpack.c.bf16 %v882_v2, %v881_v1  ;;  %vm749_vm15 = vcmp.ge.f32.partialorder %v685_v61, 0.0  ;;  %v619_v12 = vmul.f32 %v2916_v63, %v3609_v4  ;;  %v3128_v2 = vld [vmem:[%s3615_s25 + $0xf8] sm:$0xff]  }
  0x67   : > { %3285 = vmatmul.mubr.bf16.gmra.mxu0 %v916_v56  ;;  %v3456_v56 = vld [vmem:[%s4491_s6] sm:$0xff]   ;;  %v620_v13 = vmul.f32 %v2917_v0, %v3609_v4  ;;  %v821_v16 = vmul.f32 %v3636_v23, %v686_v3  ;;  %v822_v17 = vmul.f32 %v3636_v23, %v687_v5  ;;  %vm750_vm0 = vcmp.ge.f32.partialorder %v686_v3, 0.0 }
  0x68   : > { %3288 = vmatprep.mubr.bf16.mxu0 %v917_v57  ;;  %v879_v57 = vsel %vm744_vm10, %v680_v31, %v815_v45  ;;  %3334 = vmatprep.subr.bf16.mxu1 %v3456_v56  ;;  %vm751_vm1 = vcmp.ge.f32.partialorder %v687_v5, 0.0  ;;  %v688_v18 = vadd.f32 %v3627_v14, %v617_v7  ;;  %v883_v20 = vsel %vm748_vm14, %v684_v60, %v819_v8 }
  0x69   : > { %3335 = vmatpush3.bf16.msra.mxu1 %v3456_v56  ;;  %v922_v6 = vpack.c.bf16 %v880_v59, %v879_v57  ;;  %v884_v21 = vsel %vm749_vm15, %v685_v61, %v820_v9  ;;  %v2920_v24 = vunpack.c.l.bf16 %v3124_v15  ;;  %v690_v25 = vadd.f32 %v3627_v14, %v619_v12 }
  0x6a   : > { %v691_v26 = vadd.f32 %v3627_v14, %v620_v13  ;;  %v2921_v27 = vunpack.c.h.bf16 %v3124_v15  ;;  %v885_v28 = vsel %vm750_vm0, %v686_v3, %v821_v16  ;;  %v886_v29 = vsel %vm751_vm1, %v687_v5, %v822_v17 }
  0x6b   : > { %v924_v32 = vpack.c.bf16 %v884_v21, %v883_v20  ;;  %vm752_vm2 = vcmp.ge.f32.partialorder %v688_v18, 0.0  ;;  %v823_v33 = vmul.f32 %v3636_v23, %v688_v18  ;;  %v621_v35 = vmul.f32 %v2920_v24, %v3609_v4  ;;  %v3457_v20 = vld [vmem:[%s4486_s1] ss:$0 sm:$0xff] }
  0x6c   : > { %v925_v36 = vpack.c.bf16 %v886_v29, %v885_v28  ;;  %v825_v37 = vmul.f32 %v3636_v23, %v690_v25  ;;  %v826_v38 = vmul.f32 %v3636_v23, %v691_v26  ;;  %v622_v39 = vmul.f32 %v2921_v27, %v3609_v4 }
  0x6d   : > { %vm754_vm4 = vcmp.ge.f32.partialorder %v690_v25, 0.0  ;;  %vm755_vm5 = vcmp.ge.f32.partialorder %v691_v26, 0.0  ;;  %v692_v46 = vadd.f32 %v3627_v14, %v621_v35  ;;  %v2928_v47 = vunpack.c.l.bf16 %v3126_v40 }
  0x6e   : > { %v889_v48 = vsel %vm754_vm4, %v690_v25, %v825_v37  ;;  %v890_v49 = vsel %vm755_vm5, %v691_v26, %v826_v38  ;;  %v2929_v51 = vunpack.c.h.bf16 %v3126_v40  ;;  %v2932_v54 = vunpack.c.l.bf16 %v3127_v43 }
  0x6f   : > { %3289 = vmatmul.mubr.bf16.gmra.mxu0 %v918_v19  ;;  %v3125_v19 = vld [vmem:[%s3615_s25 + $0xe0] sm:$0xff]   ;;  %v2933_v55 = vunpack.c.h.bf16 %v3127_v43  ;;  %v927_v57 = vpack.c.bf16 %v890_v49, %v889_v48  ;;  %v827_v58 = vmul.f32 %v3636_v23, %v692_v46  ;;  %v625_v59 = vmul.f32 %v2928_v47, %v3609_v4 }
  0x70   : > { %3292 = vmatprep.mubr.bf16.mxu0 %v919_v22  ;;  %v689_v22 = vadd.f32 %v3627_v14, %v618_v10  ;;  %v2924_v30 = vunpack.c.l.bf16 %v3125_v19  ;;  %v2925_v31 = vunpack.c.h.bf16 %v3125_v19  ;;  %vm756_vm6 = vcmp.ge.f32.partialorder %v692_v46, 0.0 }
  0x71   : > { %v626_v61 = vmul.f32 %v2929_v51, %v3609_v4  ;;  %v627_v0 = vmul.f32 %v2932_v54, %v3609_v4  ;;  %v628_v1 = vmul.f32 %v2933_v55, %v3609_v4  ;;  %v891_v3 = vsel %vm756_vm6, %v692_v46, %v827_v58 }
  0x72   : > { %vm753_vm3 = vcmp.ge.f32.partialorder %v689_v22, 0.0  ;;  %v824_v34 = vmul.f32 %v3636_v23, %v689_v22  ;;  %v623_v41 = vmul.f32 %v2924_v30, %v3609_v4  ;;  %v624_v42 = vmul.f32 %v2925_v31, %v3609_v4 }
  0x73   : > { %v696_v5 = vadd.f32 %v3627_v14, %v625_v59  ;;  %v697_v7 = vadd.f32 %v3627_v14, %v626_v61  ;;  %v2936_v8 = vunpack.c.l.bf16 %v3128_v2  ;;  %v2937_v9 = vunpack.c.h.bf16 %v3128_v2 }
  0x74   : > { %v888_v45 = vsel %vm753_vm3, %v689_v22, %v824_v34  ;;  %v694_v52 = vadd.f32 %v3627_v14, %v623_v41  ;;  %v695_v53 = vadd.f32 %v3627_v14, %v624_v42  ;;  %v698_v12 = vadd.f32 %v3627_v14, %v627_v0 }
  0x75   : > { %v699_v13 = vadd.f32 %v3627_v14, %v628_v1  ;;  %v831_v16 = vmul.f32 %v3636_v23, %v696_v5  ;;  %v629_v19 = vmul.f32 %v2936_v8, %v3609_v4  ;;  %v630_v21 = vmul.f32 %v3457_v20, %v2937_v9 }
  0x76   : > { %v829_v62 = vmul.f32 %v3636_v23, %v694_v52  ;;  %v830_v63 = vmul.f32 %v3636_v23, %v695_v53  ;;  %vm758_vm8 = vcmp.ge.f32.partialorder %v694_v52, 0.0  ;;  %vm759_vm9 = vcmp.ge.f32.partialorder %v695_v53, 0.0 }
  0x77   : > { %3293 = vmatmul.mubr.bf16.gmra.mxu0 %v920_v44  ;;  %v887_v44 = vsel %vm752_vm2, %v688_v18, %v823_v33  ;;  %v832_v18 = vmul.f32 %v3636_v23, %v697_v7  ;;  %vm760_vm10 = vcmp.ge.f32.partialorder %v696_v5, 0.0  ;;  %vm761_vm11 = vcmp.ge.f32.partialorder %v697_v7, 0.0 }
  0x78   : > { %3296 = vmatprep.mubr.bf16.mxu0 %v921_v50  ;;  %v693_v50 = vadd.f32 %v3627_v14, %v622_v39  ;;  %v926_v56 = vpack.c.bf16 %v888_v45, %v887_v44  ;;  %v893_v10 = vsel %vm758_vm8, %v694_v52, %v829_v62  ;;  %v833_v22 = vmul.f32 %v3636_v23, %v698_v12 }
  0x79   : > { %v834_v24 = vmul.f32 %v3636_v23, %v699_v13  ;;  %vm762_vm12 = vcmp.ge.f32.partialorder %v698_v12, 0.0  ;;  %vm763_vm13 = vcmp.ge.f32.partialorder %v699_v13, 0.0  ;;  %v895_v25 = vsel %vm760_vm10, %v696_v5, %v831_v16 }
  0x7a   : > { %vm757_vm7 = vcmp.ge.f32.partialorder %v693_v50, 0.0  ;;  %v828_v60 = vmul.f32 %v3636_v23, %v693_v50  ;;  %v896_v26 = vsel %vm761_vm11, %v697_v7, %v832_v18  ;;  %v700_v27 = vadd.f32 %v3627_v14, %v629_v19 }
  0x7b   : > { %v701_v4 = vadd.f32 %v3627_v14, %v630_v21  ;;  %v897_v28 = vsel %vm762_vm12, %v698_v12, %v833_v22  ;;  %v898_v29 = vsel %vm763_vm13, %v699_v13, %v834_v24  ;;  %v930_v30 = vpack.c.bf16 %v896_v26, %v895_v25  ;;  %v3903_v14 = vld [vmem:[%s4490_s5] ss:$0 sm:$0xff] }
  0x7c   : > { %v931_v31 = vpack.c.bf16 %v898_v29, %v897_v28  ;;  %vm764_vm14 = vcmp.ge.f32.partialorder %v700_v27, 0.0  ;;  %vm2229_vm0 = vcmask 60416  }
  0x7d   : > { %v836_v33 = vmul.f32 %v3636_v23, %v701_v4  ;;  %vm765_vm15 = vcmp.ge.f32.partialorder %v701_v4, 0.0 }
  0x7f   : > { %3297 = vmatmul.mubr.bf16.gmra.mxu0 %v922_v6  ;;  %v892_v6 = vsel %vm757_vm7, %v693_v50, %v828_v60  ;;  %v900_v35 = vsel %vm765_vm15, %v701_v4, %v836_v33 }
  0x80   : > { %3300 = vmatprep.mubr.bf16.mxu0 %v923_v11  ;;  %v894_v11 = vsel %vm759_vm9, %v695_v53, %v830_v63  ;;  %v928_v15 = vpack.c.bf16 %v892_v6, %v891_v3 }
  0x81   : > { %v929_v17 = vpack.c.bf16 %v894_v11, %v893_v10 }
  0x87   : > { %3301 = vmatmul.mubr.bf16.gmra.mxu0 %v924_v32  ;;  %v835_v32 = vmul.f32 %v3636_v23, %v700_v27 }
  0x88   : > { %3304 = vmatprep.mubr.bf16.mxu0 %v925_v36 }
  0x89   : > { %v899_v34 = vsel %vm764_vm14, %v700_v27, %v835_v32 }
  0x8a   : > { %v932_v36 = vpack.c.bf16 %v900_v35, %v899_v34 }
  0x8f   : > { %3305 = vmatmul.mubr.bf16.gmra.mxu0 %v926_v56 }
  0x90   : > { %3308 = vmatprep.mubr.bf16.mxu0 %v927_v57 }
  0x97   : > { %3309 = vmatmul.mubr.bf16.gmra.mxu0 %v928_v15 }
  0x98   : > { %3312 = vmatprep.mubr.bf16.mxu0 %v929_v17 }
  0x9f   : > { %3313 = vmatmul.mubr.bf16.gmra.mxu0 %v930_v30 }
  0xa0   : > { %3316 = vmatprep.mubr.bf16.mxu0 %v931_v31 }
  0xa7   : > { %3317 = vmatmul.mubr.bf16.gmra.mxu0 %v932_v36 }
  0xef   : > { %v3258_v37 = vpop.f32.mrf.mxu0 }
  0xf0   : > { %v3906_v40 = vadd.f32 %v3258_v37, %v3903_v14 }
  0xf1   : > { %v1038_v38 = vpop.f32.mrf.mxu0 }
  0xf2   : > { %v3918_v42 = vadd.f32 %v3903_v14, %v1038_v38 }
  0xf3   : > { %v3259_v39 = vpop.f32.mrf.mxu0 }
  0xf4   : > { %v3909_v23 = vadd.f32 %v3259_v39, %v3903_v14 }
  0xf5   : > { %v1041_v41 = vpop.f32.mrf.mxu0 }
  0xf6   : > { %v1294_v43 = vpack.c.bf16 %v3909_v23, %v3906_v40  ;;  %v3923_v44 = vadd.f32 %v3903_v14, %v1041_v41 }
  0xf7   : > { %v3262_v45 = vpop.f32.mrf.mxu0 }
  0xf8   : > { %3129 = vst [vmem:[%s3915_s26 + $0x8] sm:$0xff] %v1294_v43   ;;  %v1293_v46 = vpack.c.bf16 %v3923_v44, %v3918_v42  ;;  %v3930_v49 = vadd.f32 %v3262_v45, %v3903_v14 }
  0xf9   : > { %v1054_v47 = vpop.f32.mrf.mxu0 }
  0xfa   : > { %2942 = vst [vmem:[%s3915_s26] sm:$0xff] %v1293_v46   ;;  %3336 = vmatprep.mubr.bf16.mxu1 %v1293_v46  ;;  %v3936_v52 = vadd.f32 %v3903_v14, %v1054_v47 }
  0xfb   : > { %v3263_v48 = vpop.f32.mrf.mxu0  ;;  %3337 = vmatmul.mubr.bf16.vlgmr.msra.gmra.mxu1 %v1294_v43 }
  0xfc   : > { %v3933_v50 = vadd.f32 %v3263_v48, %v3903_v14 }
  0xfd   : > { %v1057_v51 = vpop.f32.mrf.mxu0 }
  0xfe   : > { %v1296_v53 = vpack.c.bf16 %v3933_v50, %v3930_v49  ;;  %v3941_v54 = vadd.f32 %v3903_v14, %v1057_v51 }
  0xff   : > { %v3266_v55 = vpop.f32.mrf.mxu0 }
 0x100   : > { %3131 = vst [vmem:[%s3915_s26 + $0x18] sm:$0xff] %v1296_v53   ;;  %v1295_v56 = vpack.c.bf16 %v3941_v54, %v3936_v52  ;;  %v3948_v59 = vadd.f32 %v3266_v55, %v3903_v14 }
 0x101   : > { %v1070_v57 = vpop.f32.mrf.mxu0 }
 0x102   : > { %3130 = vst [vmem:[%s3915_s26 + $0x10] sm:$0xff] %v1295_v56   ;;  %3340 = vmatprep.mubr.bf16.mxu1 %v1295_v56  ;;  %v3954_v62 = vadd.f32 %v3903_v14, %v1070_v57 }
 0x103   : > { %v3267_v58 = vpop.f32.mrf.mxu0  ;;  %3341 = vmatmul.mubr.bf16.gmra.mxu1 %v1296_v53 }
 0x104   : > { %v3951_v60 = vadd.f32 %v3267_v58, %v3903_v14 }
 0x105   : > { %v1073_v61 = vpop.f32.mrf.mxu0 }
 0x106   : > { %v1298_v63 = vpack.c.bf16 %v3951_v60, %v3948_v59  ;;  %v3959_v0 = vadd.f32 %v3903_v14, %v1073_v61 }
 0x107   : > { %v3270_v1 = vpop.f32.mrf.mxu0 }
 0x108   : > { %3133 = vst [vmem:[%s3915_s26 + $0x28] sm:$0xff] %v1298_v63   ;;  %v1297_v2 = vpack.c.bf16 %v3959_v0, %v3954_v62  ;;  %v3966_v6 = vadd.f32 %v3270_v1, %v3903_v14 }
 0x109   : > { %v1086_v3 = vpop.f32.mrf.mxu0 }
 0x10a   : > { %3132 = vst [vmem:[%s3915_s26 + $0x20] sm:$0xff] %v1297_v2   ;;  %3344 = vmatprep.mubr.bf16.mxu1 %v1297_v2  ;;  %v3972_v9 = vadd.f32 %v3903_v14, %v1086_v3 }
 0x10b   : > { %v3271_v5 = vpop.f32.mrf.mxu0  ;;  %3345 = vmatmul.mubr.bf16.gmra.mxu1 %v1298_v63 }
 0x10c   : > { %v3969_v7 = vadd.f32 %v3271_v5, %v3903_v14 }
 0x10d   : > { %v1089_v8 = vpop.f32.mrf.mxu0 }
 0x10e   : > { %v1300_v10 = vpack.c.bf16 %v3969_v7, %v3966_v6  ;;  %v3977_v11 = vadd.f32 %v3903_v14, %v1089_v8 }
 0x10f   : > { %v3274_v12 = vpop.f32.mrf.mxu0 }
 0x110   : > { %3135 = vst [vmem:[%s3915_s26 + $0x38] sm:$0xff] %v1300_v10   ;;  %v1299_v13 = vpack.c.bf16 %v3977_v11, %v3972_v9  ;;  %v3984_v17 = vadd.f32 %v3274_v12, %v3903_v14 }
 0x111   : > { %v1102_v15 = vpop.f32.mrf.mxu0 }
 0x112   : > { %3134 = vst [vmem:[%s3915_s26 + $0x30] sm:$0xff] %v1299_v13   ;;  %3348 = vmatprep.mubr.bf16.mxu1 %v1299_v13  ;;  %v3990_v20 = vadd.f32 %v3903_v14, %v1102_v15 }
 0x113   : > { %v3275_v16 = vpop.f32.mrf.mxu0  ;;  %3349 = vmatmul.mubr.bf16.gmra.mxu1 %v1300_v10 }
 0x114   : > { %v3987_v18 = vadd.f32 %v3275_v16, %v3903_v14 }
 0x115   : > { %v1105_v19 = vpop.f32.mrf.mxu0 }
 0x116   : > { %v1302_v21 = vpack.c.bf16 %v3987_v18, %v3984_v17  ;;  %v3995_v22 = vadd.f32 %v3903_v14, %v1105_v19 }
 0x117   : > { %v3278_v24 = vpop.f32.mrf.mxu0 }
 0x118   : > { %3137 = vst [vmem:[%s3915_s26 + $0x48] sm:$0xff] %v1302_v21   ;;  %v1301_v25 = vpack.c.bf16 %v3995_v22, %v3990_v20  ;;  %v4002_v4 = vadd.f32 %v3278_v24, %v3903_v14 }
 0x119   : > { %v1118_v26 = vpop.f32.mrf.mxu0 }
 0x11a   : > { %3136 = vst [vmem:[%s3915_s26 + $0x40] sm:$0xff] %v1301_v25   ;;  %3352 = vmatprep.mubr.bf16.mxu1 %v1301_v25  ;;  %v4008_v30 = vadd.f32 %v3903_v14, %v1118_v26 }
 0x11b   : > { %v3279_v27 = vpop.f32.mrf.mxu0  ;;  %3353 = vmatmul.mubr.bf16.gmra.mxu1 %v1302_v21 }
 0x11c   : > { %v4005_v28 = vadd.f32 %v3279_v27, %v3903_v14 }
 0x11d   : > { %v1121_v29 = vpop.f32.mrf.mxu0 }
 0x11e   : > { %v1304_v31 = vpack.c.bf16 %v4005_v28, %v4002_v4  ;;  %v4013_v32 = vadd.f32 %v3903_v14, %v1121_v29 }
 0x11f   : > { %v3282_v33 = vpop.f32.mrf.mxu0 }
 0x120   : > { %3139 = vst [vmem:[%s3915_s26 + $0x58] sm:$0xff] %v1304_v31   ;;  %v1303_v34 = vpack.c.bf16 %v4013_v32, %v4008_v30  ;;  %v4020_v37 = vadd.f32 %v3282_v33, %v3903_v14 }
 0x121   : > { %v1134_v35 = vpop.f32.mrf.mxu0 }
 0x122   : > { %3138 = vst [vmem:[%s3915_s26 + $0x50] sm:$0xff] %v1303_v34   ;;  %3356 = vmatprep.mubr.bf16.mxu1 %v1303_v34  ;;  %v4026_v41 = vadd.f32 %v3903_v14, %v1134_v35 }
 0x123   : > { %v3283_v36 = vpop.f32.mrf.mxu0  ;;  %3357 = vmatmul.mubr.bf16.gmra.mxu1 %v1304_v31 }
 0x124   : > { %v4023_v38 = vadd.f32 %v3283_v36, %v3903_v14 }
 0x125   : > { %v1137_v39 = vpop.f32.mrf.mxu0 }
 0x126   : > { %v1306_v43 = vpack.c.bf16 %v4023_v38, %v4020_v37  ;;  %v4031_v45 = vadd.f32 %v3903_v14, %v1137_v39 }
 0x127   : > { %v3286_v46 = vpop.f32.mrf.mxu0 }
 0x128   : > { %3141 = vst [vmem:[%s3915_s26 + $0x68] sm:$0xff] %v1306_v43   ;;  %v1305_v47 = vpack.c.bf16 %v4031_v45, %v4026_v41  ;;  %v4038_v53 = vadd.f32 %v3286_v46, %v3903_v14 }
 0x129   : > { %v1150_v48 = vpop.f32.mrf.mxu0 }
 0x12a   : > { %3140 = vst [vmem:[%s3915_s26 + $0x60] sm:$0xff] %v1305_v47   ;;  %3360 = vmatprep.mubr.bf16.mxu1 %v1305_v47  ;;  %v4044_v57 = vadd.f32 %v3903_v14, %v1150_v48 }
 0x12b   : > { %v3287_v51 = vpop.f32.mrf.mxu0  ;;  %3361 = vmatmul.mubr.bf16.gmra.mxu1 %v1306_v43 }
 0x12c   : > { %v4041_v55 = vadd.f32 %v3287_v51, %v3903_v14 }
 0x12d   : > { %v1153_v56 = vpop.f32.mrf.mxu0 }
 0x12e   : > { %v1308_v58 = vpack.c.bf16 %v4041_v55, %v4038_v53  ;;  %v4049_v61 = vadd.f32 %v3903_v14, %v1153_v56 }
 0x12f   : > { %v3290_v63 = vpop.f32.mrf.mxu0 }
 0x130   : > { %3143 = vst [vmem:[%s3915_s26 + $0x78] sm:$0xff] %v1308_v58   ;;  %v1307_v1 = vpack.c.bf16 %v4049_v61, %v4044_v57  ;;  %v4056_v5 = vadd.f32 %v3290_v63, %v3903_v14 }
 0x131   : > { %v1166_v2 = vpop.f32.mrf.mxu0 }
 0x132   : > { %3142 = vst [vmem:[%s3915_s26 + $0x70] sm:$0xff] %v1307_v1   ;;  %3364 = vmatprep.mubr.bf16.mxu1 %v1307_v1  ;;  %v4062_v12 = vadd.f32 %v3903_v14, %v1166_v2 }
 0x133   : > { %v3291_v3 = vpop.f32.mrf.mxu0  ;;  %3365 = vmatmul.mubr.bf16.gmra.mxu1 %v1308_v58 }
 0x134   : > { %v4059_v8 = vadd.f32 %v3291_v3, %v3903_v14 }
 0x135   : > { %v1169_v10 = vpop.f32.mrf.mxu0 }
 0x136   : > { %v1310_v13 = vpack.c.bf16 %v4059_v8, %v4056_v5  ;;  %v4067_v15 = vadd.f32 %v3903_v14, %v1169_v10 }
 0x137   : > { %v3294_v16 = vpop.f32.mrf.mxu0 }
 0x138   : > { %3145 = vst [vmem:[%s3915_s26 + $0x88] sm:$0xff] %v1310_v13   ;;  %v1309_v19 = vpack.c.bf16 %v4067_v15, %v4062_v12  ;;  %v4074_v25 = vadd.f32 %v3294_v16, %v3903_v14 }
 0x139   : > { %v1182_v21 = vpop.f32.mrf.mxu0 }
 0x13a   : > { %3144 = vst [vmem:[%s3915_s26 + $0x80] sm:$0xff] %v1309_v19   ;;  %3368 = vmatprep.mubr.bf16.mxu1 %v1309_v19  ;;  %v4080_v29 = vadd.f32 %v3903_v14, %v1182_v21 }
 0x13b   : > { %v3295_v24 = vpop.f32.mrf.mxu0  ;;  %3369 = vmatmul.mubr.bf16.gmra.mxu1 %v1310_v13 }
 0x13c   : > { %v4077_v26 = vadd.f32 %v3295_v24, %v3903_v14 }
 0x13d   : > { %v1185_v27 = vpop.f32.mrf.mxu0 }
 0x13e   : > { %v1312_v31 = vpack.c.bf16 %v4077_v26, %v4074_v25  ;;  %v4085_v33 = vadd.f32 %v3903_v14, %v1185_v27 }
 0x13f   : > { %v3298_v34 = vpop.f32.mrf.mxu0 }
 0x140   : > { %3147 = vst [vmem:[%s3915_s26 + $0x98] sm:$0xff] %v1312_v31   ;;  %v1311_v35 = vpack.c.bf16 %v4085_v33, %v4080_v29  ;;  %v4092_v43 = vadd.f32 %v3298_v34, %v3903_v14 }
 0x141   : > { %v1198_v36 = vpop.f32.mrf.mxu0 }
 0x142   : > { %3146 = vst [vmem:[%s3915_s26 + $0x90] sm:$0xff] %v1311_v35   ;;  %3372 = vmatprep.mubr.bf16.mxu1 %v1311_v35  ;;  %v4098_v48 = vadd.f32 %v3903_v14, %v1198_v36 }
 0x143   : > { %v3299_v39 = vpop.f32.mrf.mxu0  ;;  %3373 = vmatmul.mubr.bf16.gmra.mxu1 %v1312_v31 }
 0x144   : > { %v4095_v46 = vadd.f32 %v3299_v39, %v3903_v14 }
 0x145   : > { %v1201_v47 = vpop.f32.mrf.mxu0 }
 0x146   : > { %v1314_v51 = vpack.c.bf16 %v4095_v46, %v4092_v43  ;;  %v4103_v56 = vadd.f32 %v3903_v14, %v1201_v47 }
 0x147   : > { %v3302_v58 = vpop.f32.mrf.mxu0 }
 0x148   : > { %3149 = vst [vmem:[%s3915_s26 + $0xa8] sm:$0xff] %v1314_v51   ;;  %v1313_v63 = vpack.c.bf16 %v4103_v56, %v4098_v48  ;;  %v4110_v3 = vadd.f32 %v3302_v58, %v3903_v14 }
 0x149   : > { %v1214_v1 = vpop.f32.mrf.mxu0 }
 0x14a   : > { %3148 = vst [vmem:[%s3915_s26 + $0xa0] sm:$0xff] %v1313_v63   ;;  %3376 = vmatprep.mubr.bf16.mxu1 %v1313_v63  ;;  %v4116_v16 = vadd.f32 %v3903_v14, %v1214_v1 }
 0x14b   : > { %v3303_v2 = vpop.f32.mrf.mxu0  ;;  %3377 = vmatmul.mubr.bf16.gmra.mxu1 %v1314_v51 }
 0x14c   : > { %v4113_v10 = vadd.f32 %v3303_v2, %v3903_v14 }
 0x14d   : > { %v1217_v13 = vpop.f32.mrf.mxu0 }
 0x14e   : > { %v1316_v19 = vpack.c.bf16 %v4113_v10, %v4110_v3  ;;  %v4121_v21 = vadd.f32 %v3903_v14, %v1217_v13 }
 0x14f   : > { %v3306_v24 = vpop.f32.mrf.mxu0 }
 0x150   : > { %3151 = vst [vmem:[%s3915_s26 + $0xb8] sm:$0xff] %v1316_v19   ;;  %v1315_v27 = vpack.c.bf16 %v4121_v21, %v4116_v16  ;;  %v4128_v35 = vadd.f32 %v3306_v24, %v3903_v14 }
 0x151   : > { %v1230_v31 = vpop.f32.mrf.mxu0 }
 0x152   : > { %3150 = vst [vmem:[%s3915_s26 + $0xb0] sm:$0xff] %v1315_v27   ;;  %3380 = vmatprep.mubr.bf16.mxu1 %v1315_v27  ;;  %v4134_v47 = vadd.f32 %v3903_v14, %v1230_v31 }
 0x153   : > { %v3307_v34 = vpop.f32.mrf.mxu0  ;;  %3381 = vmatmul.mubr.bf16.gmra.mxu1 %v1316_v19 }
 0x154   : > { %v4131_v36 = vadd.f32 %v3307_v34, %v3903_v14 }
 0x155   : > { %v1233_v39 = vpop.f32.mrf.mxu0 }
 0x156   : > { %4509 = vst [vmem:[#allocation2_spill] sm:$0xff] %v4131_v36  ;;  %v1318_v51 = vpack.c.bf16 %v4131_v36, %v4128_v35  ;;  %v4139_v58 = vadd.f32 %v3903_v14, %v1233_v39 }
 0x157   : > { %v3310_v63 = vpop.f32.mrf.mxu0 }
 0x158   : > { %3153 = vst [vmem:[%s3915_s26 + $0xc8] sm:$0xff] %v1318_v51   ;;  %v1317_v1 = vpack.c.bf16 %v4139_v58, %v4134_v47  ;;  %v4146_v19 = vadd.f32 %v3310_v63, %v3903_v14 }
 0x159   : > { %v1246_v2 = vpop.f32.mrf.mxu0 }
 0x15a   : > { %3152 = vst [vmem:[%s3915_s26 + $0xc0] sm:$0xff] %v1317_v1   ;;  %3384 = vmatprep.mubr.bf16.mxu1 %v1317_v1  ;;  %4510 = vst [vmem:[#allocation3_spill] sm:$0xff] %v4146_v19  ;;  %v4152_v31 = vadd.f32 %v3903_v14, %v1246_v2 }
 0x15b   : > { %v3311_v13 = vpop.f32.mrf.mxu0  ;;  %3385 = vmatmul.mubr.bf16.gmra.mxu1 %v1318_v51 }
 0x15c   : > { %v4149_v24 = vadd.f32 %v3311_v13, %v3903_v14  ;;  %4512 = vst [vmem:[#allocation5_spill] sm:$0xff] %v4152_v31 }
 0x15d   : > { %v1249_v27 = vpop.f32.mrf.mxu0 }
 0x15e   : > { %4511 = vst [vmem:[#allocation4_spill] sm:$0xff] %v4149_v24  ;;  %v1320_v34 = vpack.c.bf16 %v4149_v24, %v4146_v19  ;;  %v4157_v39 = vadd.f32 %v3903_v14, %v1249_v27 }
 0x15f   : > { %v3314_v1 = vpop.f32.mrf.mxu0 }
 0x160   : > { %4513 = vst [vmem:[#allocation6_spill] sm:$0xff] %v4157_v39  ;;  %3155 = vst [vmem:[%s3915_s26 + $0xd8] sm:$0xff] %v1320_v34   ;;  %v1319_v51 = vpack.c.bf16 %v4157_v39, %v4152_v31  ;;  %v4164_v2 = vadd.f32 %v3314_v1, %v3903_v14 }
 0x161   : > { %v1262_v63 = vpop.f32.mrf.mxu0 }
 0x162   : > { %3154 = vst [vmem:[%s3915_s26 + $0xd0] sm:$0xff] %v1319_v51   ;;  %3388 = vmatprep.mubr.bf16.mxu1 %v1319_v51  ;;  %4514 = vst [vmem:[#allocation7_spill] sm:$0xff] %v4164_v2  ;;  %v4170_v19 = vadd.f32 %v3903_v14, %v1262_v63 }
 0x163   : > { %v3315_v13 = vpop.f32.mrf.mxu0  ;;  %3389 = vmatmul.mubr.bf16.gmra.mxu1 %v1320_v34 }
 0x164   : > { %v4167_v24 = vadd.f32 %v3315_v13, %v3903_v14  ;;  %4516 = vst [vmem:[#allocation9_spill] sm:$0xff] %v4170_v19 }
 0x165   : > { %v1265_v27 = vpop.f32.mrf.mxu0 }
 0x166   : > { %4515 = vst [vmem:[#allocation8_spill] sm:$0xff] %v4167_v24  ;;  %v1322_v36 = vpack.c.bf16 %v4167_v24, %v4164_v2  ;;  %v4175_v39 = vadd.f32 %v3903_v14, %v1265_v27 }
 0x167   : > { %v3318_v51 = vpop.f32.mrf.mxu0 }
 0x168   : > { %4517 = vst [vmem:[#allocation10_spill] sm:$0xff] %v4175_v39  ;;  %3157 = vst [vmem:[%s3915_s26 + $0xe8] sm:$0xff] %v1322_v36   ;;  %v1321_v34 = vpack.c.bf16 %v4175_v39, %v4170_v19  ;;  %v4182_v63 = vadd.f32 %v3318_v51, %v3903_v14  ;;  %v4202_v51 = vld [vmem:[%s4492_s7] ss:$0 sm:$0xff] }
 0x169   : > { %v1278_v1 = vpop.f32.mrf.mxu0 }
 0x16a   : > { %3156 = vst [vmem:[%s3915_s26 + $0xe0] sm:$0xff] %v1321_v34   ;;  %3392 = vmatprep.mubr.bf16.mxu1 %v1321_v34  ;;  %4518 = vst [vmem:[#allocation11_spill] sm:$0xff] %v4182_v63  ;;  %v4188_v2 = vadd.f32 %v3903_v14, %v1278_v1 }
 0x16b   : > { %v3319_v13 = vpop.f32.mrf.mxu0  ;;  %3393 = vmatmul.mubr.bf16.gmra.mxu1 %v1322_v36 }
 0x16c   : > { %v4185_v24 = vadd.f32 %v3319_v13, %v3903_v14  ;;  %4520 = vst [vmem:[#allocation13_spill] sm:$0xff] %v4188_v2 }
 0x16d   : > { %v1281_v27 = vpop.f32.mrf.mxu0 }
 0x16e   : > { %4519 = vst [vmem:[#allocation12_spill] sm:$0xff] %v4185_v24  ;;  %v1324_v31 = vpack.c.bf16 %v4185_v24, %v4182_v63  ;;  %v4193_v39 = vadd.f32 %v3903_v14, %v1281_v27 }
 0x170   : > { %4521 = vst [vmem:[#allocation14_spill] sm:$0xff] %v4193_v39  ;;  %3159 = vst [vmem:[%s3915_s26 + $0xf8] sm:$0xff] %v1324_v31   ;;  %v1323_v36 = vpack.c.bf16 %v4193_v39, %v4188_v2 }
 0x172   : > { %3158 = vst [vmem:[%s3915_s26 + $0xf0] sm:$0xff] %v1323_v36   ;;  %3396 = vmatprep.mubr.bf16.mxu1 %v1323_v36 }
 0x173   : > { %3397 = vmatmul.mubr.bf16.gmra.mxu1 %v1324_v31 }
 0x1bb   : > { %v3338_v34 = vpop.f32.mrf.mxu1 }
 0x1bc   : > { %v1727_v1 = vadd.f32 %v3338_v34, %v4202_v51 }
 0x1bd   : > { %v1718_v14 = vpop.f32.mrf.mxu1 }
 0x1be   : > { %v2748_v31 = vpack.c.bf16 %v1727_v1, %v1727_v1  ;;  %v1719_v13 = vadd.f32 %v4202_v51, %v1718_v14 }
 0x1bf   : > { %v3339_v27 = vpop.f32.mrf.mxu1 }
 0x1c0   : > { %2232 = vst.msk [vmem:[%s4209_s12 + $0x8] sm:$0xf] %vm2229_vm0, %v2748_v31  ;;  %v2746_v36 = vpack.c.bf16 %v1719_v13, %v1719_v13  ;;  %v1730_v34 = vadd.f32 %v3339_v27, %v4202_v51 }
 0x1c1   : > { %v1721_v24 = vpop.f32.mrf.mxu1 }
 0x1c2   : > { %2230 = vst.msk [vmem:[%s4209_s12] sm:$0xf] %vm2229_vm0, %v2746_v36  ;;  %v2749_v63 = vpack.c.bf16 %v1730_v34, %v1730_v34  ;;  %v1722_v39 = vadd.f32 %v4202_v51, %v1721_v24 }
 0x1c3   : > { %v3342_v2 = vpop.f32.mrf.mxu1 }
 0x1c4   : > { %2233 = vst.msk [vmem:[%s4209_s12 + $0xc] sm:$0xf] %vm2229_vm0, %v2749_v63  ;;  %v2747_v1 = vpack.c.bf16 %v1722_v39, %v1722_v39  ;;  %v1743_v14 = vadd.f32 %v3342_v2, %v4202_v51 }
 0x1c5   : > { %v1734_v19 = vpop.f32.mrf.mxu1 }
 0x1c6   : > { %2231 = vst.msk [vmem:[%s4209_s12 + $0x4] sm:$0xf] %vm2229_vm0, %v2747_v1  ;;  %v2752_v31 = vpack.c.bf16 %v1743_v14, %v1743_v14  ;;  %v1735_v13 = vadd.f32 %v4202_v51, %v1734_v19 }
 0x1c7   : > { %v3343_v27 = vpop.f32.mrf.mxu1 }
 0x1c8   : > { %2236 = vst.msk [vmem:[%s4209_s12 + $0x18] sm:$0xf] %vm2229_vm0, %v2752_v31  ;;  %v2750_v36 = vpack.c.bf16 %v1735_v13, %v1735_v13  ;;  %v1746_v24 = vadd.f32 %v3343_v27, %v4202_v51 }
 0x1c9   : > { %v1737_v34 = vpop.f32.mrf.mxu1 }
 0x1ca   : > { %2234 = vst.msk [vmem:[%s4209_s12 + $0x10] sm:$0xf] %vm2229_vm0, %v2750_v36  ;;  %v2753_v39 = vpack.c.bf16 %v1746_v24, %v1746_v24  ;;  %v1738_v2 = vadd.f32 %v4202_v51, %v1737_v34 }
 0x1cb   : > { %v3346_v63 = vpop.f32.mrf.mxu1 }
 0x1cc   : > { %2237 = vst.msk [vmem:[%s4209_s12 + $0x1c] sm:$0xf] %vm2229_vm0, %v2753_v39  ;;  %v2751_v1 = vpack.c.bf16 %v1738_v2, %v1738_v2  ;;  %v1759_v19 = vadd.f32 %v3346_v63, %v4202_v51 }
 0x1cd   : > { %v1750_v14 = vpop.f32.mrf.mxu1 }
 0x1ce   : > { %2235 = vst.msk [vmem:[%s4209_s12 + $0x14] sm:$0xf] %vm2229_vm0, %v2751_v1  ;;  %v2756_v31 = vpack.c.bf16 %v1759_v19, %v1759_v19  ;;  %v1751_v13 = vadd.f32 %v4202_v51, %v1750_v14 }
 0x1cf   : > { %v3347_v27 = vpop.f32.mrf.mxu1 }
 0x1d0   : > { %2240 = vst.msk [vmem:[%s4209_s12 + $0x28] sm:$0xf] %vm2229_vm0, %v2756_v31  ;;  %v2754_v36 = vpack.c.bf16 %v1751_v13, %v1751_v13  ;;  %v1762_v24 = vadd.f32 %v3347_v27, %v4202_v51 }
 0x1d1   : > { %v1753_v34 = vpop.f32.mrf.mxu1 }
 0x1d2   : > { %2238 = vst.msk [vmem:[%s4209_s12 + $0x20] sm:$0xf] %vm2229_vm0, %v2754_v36  ;;  %v2757_v39 = vpack.c.bf16 %v1762_v24, %v1762_v24  ;;  %v1754_v2 = vadd.f32 %v4202_v51, %v1753_v34 }
 0x1d3   : > { %v3350_v63 = vpop.f32.mrf.mxu1 }
 0x1d4   : > { %2241 = vst.msk [vmem:[%s4209_s12 + $0x2c] sm:$0xf] %vm2229_vm0, %v2757_v39  ;;  %v2755_v1 = vpack.c.bf16 %v1754_v2, %v1754_v2  ;;  %v1775_v19 = vadd.f32 %v3350_v63, %v4202_v51 }
 0x1d5   : > { %v1766_v14 = vpop.f32.mrf.mxu1 }
 0x1d6   : > { %2239 = vst.msk [vmem:[%s4209_s12 + $0x24] sm:$0xf] %vm2229_vm0, %v2755_v1  ;;  %v2760_v31 = vpack.c.bf16 %v1775_v19, %v1775_v19  ;;  %v1767_v13 = vadd.f32 %v4202_v51, %v1766_v14 }
 0x1d7   : > { %v3351_v27 = vpop.f32.mrf.mxu1 }
 0x1d8   : > { %2244 = vst.msk [vmem:[%s4209_s12 + $0x38] sm:$0xf] %vm2229_vm0, %v2760_v31  ;;  %v2758_v36 = vpack.c.bf16 %v1767_v13, %v1767_v13  ;;  %v1778_v24 = vadd.f32 %v3351_v27, %v4202_v51 }
 0x1d9   : > { %v1769_v34 = vpop.f32.mrf.mxu1 }
 0x1da   : > { %2242 = vst.msk [vmem:[%s4209_s12 + $0x30] sm:$0xf] %vm2229_vm0, %v2758_v36  ;;  %v2761_v39 = vpack.c.bf16 %v1778_v24, %v1778_v24  ;;  %v1770_v2 = vadd.f32 %v4202_v51, %v1769_v34 }
 0x1db   : > { %v3354_v63 = vpop.f32.mrf.mxu1 }
 0x1dc   : > { %2245 = vst.msk [vmem:[%s4209_s12 + $0x3c] sm:$0xf] %vm2229_vm0, %v2761_v39  ;;  %v2759_v1 = vpack.c.bf16 %v1770_v2, %v1770_v2  ;;  %v1791_v19 = vadd.f32 %v3354_v63, %v4202_v51 }
 0x1dd   : > { %v1782_v14 = vpop.f32.mrf.mxu1 }
 0x1de   : > { %2243 = vst.msk [vmem:[%s4209_s12 + $0x34] sm:$0xf] %vm2229_vm0, %v2759_v1  ;;  %v2764_v31 = vpack.c.bf16 %v1791_v19, %v1791_v19  ;;  %v1783_v13 = vadd.f32 %v4202_v51, %v1782_v14 }
 0x1df   : > { %v3355_v27 = vpop.f32.mrf.mxu1 }
 0x1e0   : > { %2248 = vst.msk [vmem:[%s4209_s12 + $0x48] sm:$0xf] %vm2229_vm0, %v2764_v31  ;;  %v2762_v36 = vpack.c.bf16 %v1783_v13, %v1783_v13  ;;  %v1794_v24 = vadd.f32 %v3355_v27, %v4202_v51 }
 0x1e1   : > { %v1785_v34 = vpop.f32.mrf.mxu1 }
 0x1e2   : > { %2246 = vst.msk [vmem:[%s4209_s12 + $0x40] sm:$0xf] %vm2229_vm0, %v2762_v36  ;;  %v2765_v39 = vpack.c.bf16 %v1794_v24, %v1794_v24  ;;  %v1786_v2 = vadd.f32 %v4202_v51, %v1785_v34 }
 0x1e3   : > { %v3358_v63 = vpop.f32.mrf.mxu1 }
 0x1e4   : > { %2249 = vst.msk [vmem:[%s4209_s12 + $0x4c] sm:$0xf] %vm2229_vm0, %v2765_v39  ;;  %v2763_v1 = vpack.c.bf16 %v1786_v2, %v1786_v2  ;;  %v1807_v19 = vadd.f32 %v3358_v63, %v4202_v51 }
 0x1e5   : > { %v1798_v14 = vpop.f32.mrf.mxu1 }
 0x1e6   : > { %2247 = vst.msk [vmem:[%s4209_s12 + $0x44] sm:$0xf] %vm2229_vm0, %v2763_v1  ;;  %v2768_v31 = vpack.c.bf16 %v1807_v19, %v1807_v19  ;;  %v1799_v13 = vadd.f32 %v4202_v51, %v1798_v14 }
 0x1e7   : > { %v3359_v27 = vpop.f32.mrf.mxu1 }
 0x1e8   : > { %2252 = vst.msk [vmem:[%s4209_s12 + $0x58] sm:$0xf] %vm2229_vm0, %v2768_v31  ;;  %v2766_v36 = vpack.c.bf16 %v1799_v13, %v1799_v13  ;;  %v1810_v24 = vadd.f32 %v3359_v27, %v4202_v51 }
 0x1e9   : > { %v1801_v34 = vpop.f32.mrf.mxu1 }
 0x1ea   : > { %2250 = vst.msk [vmem:[%s4209_s12 + $0x50] sm:$0xf] %vm2229_vm0, %v2766_v36  ;;  %v2769_v39 = vpack.c.bf16 %v1810_v24, %v1810_v24  ;;  %v1802_v2 = vadd.f32 %v4202_v51, %v1801_v34 }
 0x1eb   : > { %v3362_v63 = vpop.f32.mrf.mxu1 }
 0x1ec   : > { %2253 = vst.msk [vmem:[%s4209_s12 + $0x5c] sm:$0xf] %vm2229_vm0, %v2769_v39  ;;  %v2767_v1 = vpack.c.bf16 %v1802_v2, %v1802_v2  ;;  %v1823_v19 = vadd.f32 %v3362_v63, %v4202_v51 }
 0x1ed   : > { %v1814_v14 = vpop.f32.mrf.mxu1 }
 0x1ee   : > { %2251 = vst.msk [vmem:[%s4209_s12 + $0x54] sm:$0xf] %vm2229_vm0, %v2767_v1  ;;  %v2772_v31 = vpack.c.bf16 %v1823_v19, %v1823_v19  ;;  %v1815_v13 = vadd.f32 %v4202_v51, %v1814_v14 }
 0x1ef   : > { %v3363_v27 = vpop.f32.mrf.mxu1 }
 0x1f0   : > { %2256 = vst.msk [vmem:[%s4209_s12 + $0x68] sm:$0xf] %vm2229_vm0, %v2772_v31  ;;  %v2770_v36 = vpack.c.bf16 %v1815_v13, %v1815_v13  ;;  %v1826_v24 = vadd.f32 %v3363_v27, %v4202_v51 }
 0x1f1   : > { %v1817_v34 = vpop.f32.mrf.mxu1 }
 0x1f2   : > { %2254 = vst.msk [vmem:[%s4209_s12 + $0x60] sm:$0xf] %vm2229_vm0, %v2770_v36  ;;  %v2773_v39 = vpack.c.bf16 %v1826_v24, %v1826_v24  ;;  %v1818_v2 = vadd.f32 %v4202_v51, %v1817_v34 }
 0x1f3   : > { %v3366_v63 = vpop.f32.mrf.mxu1 }
 0x1f4   : > { %2257 = vst.msk [vmem:[%s4209_s12 + $0x6c] sm:$0xf] %vm2229_vm0, %v2773_v39  ;;  %v2771_v1 = vpack.c.bf16 %v1818_v2, %v1818_v2  ;;  %v1839_v19 = vadd.f32 %v3366_v63, %v4202_v51 }
 0x1f5   : > { %v1830_v14 = vpop.f32.mrf.mxu1 }
 0x1f6   : > { %2255 = vst.msk [vmem:[%s4209_s12 + $0x64] sm:$0xf] %vm2229_vm0, %v2771_v1  ;;  %v2776_v31 = vpack.c.bf16 %v1839_v19, %v1839_v19  ;;  %v1831_v13 = vadd.f32 %v4202_v51, %v1830_v14 }
 0x1f7   : > { %v3367_v27 = vpop.f32.mrf.mxu1 }
 0x1f8   : > { %2260 = vst.msk [vmem:[%s4209_s12 + $0x78] sm:$0xf] %vm2229_vm0, %v2776_v31  ;;  %v2774_v36 = vpack.c.bf16 %v1831_v13, %v1831_v13  ;;  %v1842_v24 = vadd.f32 %v3367_v27, %v4202_v51 }
 0x1f9   : > { %v1833_v34 = vpop.f32.mrf.mxu1 }
 0x1fa   : > { %2258 = vst.msk [vmem:[%s4209_s12 + $0x70] sm:$0xf] %vm2229_vm0, %v2774_v36  ;;  %v2777_v39 = vpack.c.bf16 %v1842_v24, %v1842_v24  ;;  %v1834_v2 = vadd.f32 %v4202_v51, %v1833_v34 }
 0x1fb   : > { %v3370_v63 = vpop.f32.mrf.mxu1 }
 0x1fc   : > { %2261 = vst.msk [vmem:[%s4209_s12 + $0x7c] sm:$0xf] %vm2229_vm0, %v2777_v39  ;;  %v2775_v1 = vpack.c.bf16 %v1834_v2, %v1834_v2  ;;  %v1855_v19 = vadd.f32 %v3370_v63, %v4202_v51 }
 0x1fd   : > { %v1846_v14 = vpop.f32.mrf.mxu1 }
 0x1fe   : > { %2259 = vst.msk [vmem:[%s4209_s12 + $0x74] sm:$0xf] %vm2229_vm0, %v2775_v1  ;;  %v2780_v31 = vpack.c.bf16 %v1855_v19, %v1855_v19  ;;  %v1847_v13 = vadd.f32 %v4202_v51, %v1846_v14 }
 0x1ff   : > { %v3371_v27 = vpop.f32.mrf.mxu1 }
 0x200   : > { %2264 = vst.msk [vmem:[%s4209_s12 + $0x88] sm:$0xf] %vm2229_vm0, %v2780_v31  ;;  %v2778_v36 = vpack.c.bf16 %v1847_v13, %v1847_v13  ;;  %v1858_v24 = vadd.f32 %v3371_v27, %v4202_v51 }
 0x201   : > { %v1849_v34 = vpop.f32.mrf.mxu1 }
 0x202   : > { %2262 = vst.msk [vmem:[%s4209_s12 + $0x80] sm:$0xf] %vm2229_vm0, %v2778_v36  ;;  %v2781_v39 = vpack.c.bf16 %v1858_v24, %v1858_v24  ;;  %v1850_v2 = vadd.f32 %v4202_v51, %v1849_v34 }
 0x203   : > { %v3374_v63 = vpop.f32.mrf.mxu1 }
 0x204   : > { %2265 = vst.msk [vmem:[%s4209_s12 + $0x8c] sm:$0xf] %vm2229_vm0, %v2781_v39  ;;  %v2779_v1 = vpack.c.bf16 %v1850_v2, %v1850_v2  ;;  %v1871_v19 = vadd.f32 %v3374_v63, %v4202_v51 }
 0x205   : > { %v1862_v14 = vpop.f32.mrf.mxu1 }
 0x206   : > { %2263 = vst.msk [vmem:[%s4209_s12 + $0x84] sm:$0xf] %vm2229_vm0, %v2779_v1  ;;  %v2784_v31 = vpack.c.bf16 %v1871_v19, %v1871_v19  ;;  %v1863_v13 = vadd.f32 %v4202_v51, %v1862_v14 }
 0x207   : > { %v3375_v27 = vpop.f32.mrf.mxu1 }
 0x208   : > { %2268 = vst.msk [vmem:[%s4209_s12 + $0x98] sm:$0xf] %vm2229_vm0, %v2784_v31  ;;  %v2782_v36 = vpack.c.bf16 %v1863_v13, %v1863_v13  ;;  %v1874_v24 = vadd.f32 %v3375_v27, %v4202_v51 }
 0x209   : > { %v1865_v34 = vpop.f32.mrf.mxu1 }
 0x20a   : > { %2266 = vst.msk [vmem:[%s4209_s12 + $0x90] sm:$0xf] %vm2229_vm0, %v2782_v36  ;;  %v2785_v39 = vpack.c.bf16 %v1874_v24, %v1874_v24  ;;  %v1866_v2 = vadd.f32 %v4202_v51, %v1865_v34 }
 0x20b   : > { %v3378_v63 = vpop.f32.mrf.mxu1 }
 0x20c   : > { %2269 = vst.msk [vmem:[%s4209_s12 + $0x9c] sm:$0xf] %vm2229_vm0, %v2785_v39  ;;  %v2783_v1 = vpack.c.bf16 %v1866_v2, %v1866_v2  ;;  %v1887_v19 = vadd.f32 %v3378_v63, %v4202_v51 }
 0x20d   : > { %v1878_v14 = vpop.f32.mrf.mxu1 }
 0x20e   : > { %2267 = vst.msk [vmem:[%s4209_s12 + $0x94] sm:$0xf] %vm2229_vm0, %v2783_v1  ;;  %v2788_v31 = vpack.c.bf16 %v1887_v19, %v1887_v19  ;;  %v1879_v13 = vadd.f32 %v4202_v51, %v1878_v14 }
 0x20f   : > { %v3379_v27 = vpop.f32.mrf.mxu1 }
 0x210   : > { %2272 = vst.msk [vmem:[%s4209_s12 + $0xa8] sm:$0xf] %vm2229_vm0, %v2788_v31  ;;  %v2786_v36 = vpack.c.bf16 %v1879_v13, %v1879_v13  ;;  %v1890_v24 = vadd.f32 %v3379_v27, %v4202_v51 }
 0x211   : > { %v1881_v34 = vpop.f32.mrf.mxu1 }
 0x212   : > { %2270 = vst.msk [vmem:[%s4209_s12 + $0xa0] sm:$0xf] %vm2229_vm0, %v2786_v36  ;;  %v2789_v39 = vpack.c.bf16 %v1890_v24, %v1890_v24  ;;  %v1882_v2 = vadd.f32 %v4202_v51, %v1881_v34 }
 0x213   : > { %v3382_v63 = vpop.f32.mrf.mxu1 }
 0x214   : > { %2273 = vst.msk [vmem:[%s4209_s12 + $0xac] sm:$0xf] %vm2229_vm0, %v2789_v39  ;;  %v2787_v1 = vpack.c.bf16 %v1882_v2, %v1882_v2  ;;  %v1903_v19 = vadd.f32 %v3382_v63, %v4202_v51 }
 0x215   : > { %v1894_v14 = vpop.f32.mrf.mxu1 }
 0x216   : > { %2271 = vst.msk [vmem:[%s4209_s12 + $0xa4] sm:$0xf] %vm2229_vm0, %v2787_v1  ;;  %v2792_v31 = vpack.c.bf16 %v1903_v19, %v1903_v19  ;;  %v1895_v13 = vadd.f32 %v4202_v51, %v1894_v14 }
 0x217   : > { %v3383_v27 = vpop.f32.mrf.mxu1 }
 0x218   : > { %2276 = vst.msk [vmem:[%s4209_s12 + $0xb8] sm:$0xf] %vm2229_vm0, %v2792_v31  ;;  %v2790_v36 = vpack.c.bf16 %v1895_v13, %v1895_v13  ;;  %v1906_v24 = vadd.f32 %v3383_v27, %v4202_v51 }
 0x219   : > { %v1897_v34 = vpop.f32.mrf.mxu1 }
 0x21a   : > { %2274 = vst.msk [vmem:[%s4209_s12 + $0xb0] sm:$0xf] %vm2229_vm0, %v2790_v36  ;;  %v2793_v39 = vpack.c.bf16 %v1906_v24, %v1906_v24  ;;  %v1898_v2 = vadd.f32 %v4202_v51, %v1897_v34 }
 0x21b   : > { %v3386_v63 = vpop.f32.mrf.mxu1 }
 0x21c   : > { %2277 = vst.msk [vmem:[%s4209_s12 + $0xbc] sm:$0xf] %vm2229_vm0, %v2793_v39  ;;  %v2791_v1 = vpack.c.bf16 %v1898_v2, %v1898_v2  ;;  %v1919_v19 = vadd.f32 %v3386_v63, %v4202_v51 }
 0x21d   : > { %v1910_v14 = vpop.f32.mrf.mxu1 }
 0x21e   : > { %2275 = vst.msk [vmem:[%s4209_s12 + $0xb4] sm:$0xf] %vm2229_vm0, %v2791_v1  ;;  %v2796_v31 = vpack.c.bf16 %v1919_v19, %v1919_v19  ;;  %v1911_v13 = vadd.f32 %v4202_v51, %v1910_v14 }
 0x21f   : > { %v3387_v27 = vpop.f32.mrf.mxu1 }
 0x220   : > { %2280 = vst.msk [vmem:[%s4209_s12 + $0xc8] sm:$0xf] %vm2229_vm0, %v2796_v31  ;;  %v2794_v36 = vpack.c.bf16 %v1911_v13, %v1911_v13  ;;  %v1922_v24 = vadd.f32 %v3387_v27, %v4202_v51 }
 0x221   : > { %v1913_v34 = vpop.f32.mrf.mxu1 }
 0x222   : > { %2278 = vst.msk [vmem:[%s4209_s12 + $0xc0] sm:$0xf] %vm2229_vm0, %v2794_v36  ;;  %v2797_v39 = vpack.c.bf16 %v1922_v24, %v1922_v24  ;;  %v1914_v2 = vadd.f32 %v4202_v51, %v1913_v34 }
 0x223   : > { %v3390_v63 = vpop.f32.mrf.mxu1 }
 0x224   : > { %2281 = vst.msk [vmem:[%s4209_s12 + $0xcc] sm:$0xf] %vm2229_vm0, %v2797_v39  ;;  %v2795_v1 = vpack.c.bf16 %v1914_v2, %v1914_v2  ;;  %v1935_v19 = vadd.f32 %v3390_v63, %v4202_v51 }
 0x225   : > { %v1926_v14 = vpop.f32.mrf.mxu1 }
 0x226   : > { %2279 = vst.msk [vmem:[%s4209_s12 + $0xc4] sm:$0xf] %vm2229_vm0, %v2795_v1  ;;  %v2800_v31 = vpack.c.bf16 %v1935_v19, %v1935_v19  ;;  %v1927_v13 = vadd.f32 %v4202_v51, %v1926_v14 }
 0x227   : > { %v3391_v27 = vpop.f32.mrf.mxu1 }
 0x228   : > { %2284 = vst.msk [vmem:[%s4209_s12 + $0xd8] sm:$0xf] %vm2229_vm0, %v2800_v31  ;;  %v2798_v36 = vpack.c.bf16 %v1927_v13, %v1927_v13  ;;  %v1938_v24 = vadd.f32 %v3391_v27, %v4202_v51 }
 0x229   : > { %v1929_v34 = vpop.f32.mrf.mxu1 }
 0x22a   : > { %2282 = vst.msk [vmem:[%s4209_s12 + $0xd0] sm:$0xf] %vm2229_vm0, %v2798_v36  ;;  %v2801_v39 = vpack.c.bf16 %v1938_v24, %v1938_v24  ;;  %v1930_v2 = vadd.f32 %v4202_v51, %v1929_v34 }
 0x22b   : > { %v3394_v63 = vpop.f32.mrf.mxu1 }
 0x22c   : > { %2285 = vst.msk [vmem:[%s4209_s12 + $0xdc] sm:$0xf] %vm2229_vm0, %v2801_v39  ;;  %v2799_v1 = vpack.c.bf16 %v1930_v2, %v1930_v2  ;;  %v1951_v19 = vadd.f32 %v3394_v63, %v4202_v51 }
 0x22d   : > { %v1942_v14 = vpop.f32.mrf.mxu1 }
 0x22e   : > { %2283 = vst.msk [vmem:[%s4209_s12 + $0xd4] sm:$0xf] %vm2229_vm0, %v2799_v1  ;;  %v2804_v31 = vpack.c.bf16 %v1951_v19, %v1951_v19  ;;  %v1943_v13 = vadd.f32 %v4202_v51, %v1942_v14 }
 0x22f   : > { %v3395_v27 = vpop.f32.mrf.mxu1 }
 0x230   : > { %2288 = vst.msk [vmem:[%s4209_s12 + $0xe8] sm:$0xf] %vm2229_vm0, %v2804_v31  ;;  %v2802_v36 = vpack.c.bf16 %v1943_v13, %v1943_v13  ;;  %v1954_v24 = vadd.f32 %v3395_v27, %v4202_v51 }
 0x231   : > { %v1945_v34 = vpop.f32.mrf.mxu1 }
 0x232   : > { %2286 = vst.msk [vmem:[%s4209_s12 + $0xe0] sm:$0xf] %vm2229_vm0, %v2802_v36  ;;  %v2805_v39 = vpack.c.bf16 %v1954_v24, %v1954_v24  ;;  %v1946_v2 = vadd.f32 %v4202_v51, %v1945_v34 }
 0x233   : > { %v3398_v63 = vpop.f32.mrf.mxu1 }
 0x234   : > { %2289 = vst.msk [vmem:[%s4209_s12 + $0xec] sm:$0xf] %vm2229_vm0, %v2805_v39  ;;  %v2803_v1 = vpack.c.bf16 %v1946_v2, %v1946_v2  ;;  %v1967_v19 = vadd.f32 %v3398_v63, %v4202_v51 }
 0x235   : > { %v1958_v14 = vpop.f32.mrf.mxu1 }
 0x236   : > { %2287 = vst.msk [vmem:[%s4209_s12 + $0xe4] sm:$0xf] %vm2229_vm0, %v2803_v1  ;;  %v2808_v31 = vpack.c.bf16 %v1967_v19, %v1967_v19  ;;  %v1959_v13 = vadd.f32 %v4202_v51, %v1958_v14 }
 0x237   : > { %v3399_v27 = vpop.f32.mrf.mxu1 }
 0x238   : > { %2292 = vst.msk [vmem:[%s4209_s12 + $0xf8] sm:$0xf] %vm2229_vm0, %v2808_v31  ;;  %v2806_v36 = vpack.c.bf16 %v1959_v13, %v1959_v13  ;;  %v1970_v24 = vadd.f32 %v3399_v27, %v4202_v51 }
 0x239   : > { %v1961_v34 = vpop.f32.mrf.mxu1 }
 0x23a   : > { %2290 = vst.msk [vmem:[%s4209_s12 + $0xf0] sm:$0xf] %vm2229_vm0, %v2806_v36  ;;  %v2809_v39 = vpack.c.bf16 %v1970_v24, %v1970_v24  ;;  %v1962_v2 = vadd.f32 %v4202_v51, %v1961_v34  ;;  %2297 = sbr.rel (%p2679_p7) target bundleno = 577 (0x241), region = 56 }
 0x23c   : > { %2293 = vst.msk [vmem:[%s4209_s12 + $0xfc] sm:$0xf] %vm2229_vm0, %v2809_v39  ;;  %v2807_v63 = vpack.c.bf16 %v1962_v2, %v1962_v2 }
 0x23e   : > { %2291 = vst.msk [vmem:[%s4209_s12 + $0xf4] sm:$0xf] %vm2229_vm0, %v2807_v63 }
 0x23f   : > { %v3498_v1 = vmov 0.0  }
 0x240   : > { %2298 = vst [vmem:[%s3596_s28] sm:$0x1] %v3498_v1 }
 0x241 PF: > { %v2300_v19 = vadd.f32 %v3923_v44, %v3918_v42  ;;  %v4523_v2 = vld [vmem:[#allocation5_spill] sm:$0xff]  ;;  %v4524_v63 = vld [vmem:[#allocation6_spill] sm:$0xff]  ;;  %v4525_v1 = vld [vmem:[#allocation3_spill] sm:$0xff] }
 0x243   : > { %v2301_v14 = vadd.f32 %v2300_v19, %v3906_v40 }
 0x245   : > { %v2302_v31 = vadd.f32 %v2301_v14, %v3909_v23 }
 0x247   : > { %v2303_v51 = vadd.f32 %v2302_v31, %v3936_v52  ;;  %v4529_v31 = vld [vmem:[#allocation7_spill] sm:$0xff] }
 0x249   : > { %v2304_v13 = vadd.f32 %v2303_v51, %v3941_v54  ;;  %v4530_v51 = vld [vmem:[#allocation8_spill] sm:$0xff] }
 0x24b   : > { %v2305_v27 = vadd.f32 %v2304_v13, %v3930_v49  ;;  %v4531_v13 = vld [vmem:[#allocation13_spill] sm:$0xff] }
 0x24d   : > { %v2306_v36 = vadd.f32 %v2305_v27, %v3933_v50 }
 0x24f   : > { %v2307_v24 = vadd.f32 %v2306_v36, %v3954_v62  ;;  %v4532_v36 = vld [vmem:[#allocation14_spill] sm:$0xff] }
 0x251   : > { %v2308_v34 = vadd.f32 %v2307_v24, %v3959_v0 }
 0x253   : > { %v2309_v39 = vadd.f32 %v2308_v34, %v3948_v59  ;;  %v4533_v34 = vld [vmem:[#allocation11_spill] sm:$0xff] }
 0x255   : > { %v2310_v42 = vadd.f32 %v2309_v39, %v3951_v60 }
 0x257   : > { %v2311_v40 = vadd.f32 %v2310_v42, %v3972_v9  ;;  %v4534_v42 = vld [vmem:[#allocation12_spill] sm:$0xff] }
 0x259   : > { %v2312_v23 = vadd.f32 %v2311_v40, %v3977_v11 }
 0x25b   : > { %v2313_v44 = vadd.f32 %v2312_v23, %v3966_v6 }
 0x25d   : > { %v2314_v52 = vadd.f32 %v2313_v44, %v3969_v7 }
 0x25f   : > { %v2315_v49 = vadd.f32 %v2314_v52, %v3990_v20 }
 0x261   : > { %v2316_v50 = vadd.f32 %v2315_v49, %v3995_v22 }
 0x263   : > { %v2317_v54 = vadd.f32 %v2316_v50, %v3984_v17 }
 0x265   : > { %v2318_v62 = vadd.f32 %v2317_v54, %v3987_v18  ;;  %v2299_v54 = vld [vmem:[%s3596_s28] sm:$0x1] }
 0x267   : > { %v2319_v59 = vadd.f32 %v2318_v62, %v4008_v30 }
 0x269   : > { %v2320_v60 = vadd.f32 %v2319_v59, %v4013_v32 }
 0x26b   : > { %v2321_v0 = vadd.f32 %v2320_v60, %v4002_v4 }
 0x26d   : > { %v2322_v9 = vadd.f32 %v2321_v0, %v4005_v28 }
 0x26f   : > { %v2323_v6 = vadd.f32 %v2322_v9, %v4026_v41 }
 0x271   : > { %v2324_v7 = vadd.f32 %v2323_v6, %v4031_v45 }
 0x273   : > { %v2325_v11 = vadd.f32 %v2324_v7, %v4020_v37 }
 0x275   : > { %v2326_v20 = vadd.f32 %v2325_v11, %v4023_v38 }
 0x277   : > { %v2327_v17 = vadd.f32 %v2326_v20, %v4044_v57 }
 0x279   : > { %v2328_v18 = vadd.f32 %v2327_v17, %v4049_v61 }
 0x27b   : > { %v2329_v22 = vadd.f32 %v2328_v18, %v4038_v53 }
 0x27d   : > { %v2330_v30 = vadd.f32 %v2329_v22, %v4041_v55 }
 0x27f   : > { %v2331_v4 = vadd.f32 %v2330_v30, %v4062_v12 }
 0x281   : > { %v2332_v28 = vadd.f32 %v2331_v4, %v4067_v15 }
 0x283   : > { %v2333_v32 = vadd.f32 %v2332_v28, %v4056_v5 }
 0x285   : > { %v2334_v41 = vadd.f32 %v2333_v32, %v4059_v8 }
 0x287   : > { %v2335_v37 = vadd.f32 %v2334_v41, %v4080_v29 }
 0x289   : > { %v2336_v38 = vadd.f32 %v2335_v37, %v4085_v33 }
 0x28b   : > { %v2337_v45 = vadd.f32 %v2336_v38, %v4074_v25 }
 0x28d   : > { %v2338_v57 = vadd.f32 %v2337_v45, %v4077_v26 }
 0x28f   : > { %v2339_v53 = vadd.f32 %v2338_v57, %v4098_v48  ;;  %v4522_v48 = vld [vmem:[#allocation2_spill] sm:$0xff] }
 0x291   : > { %v2340_v55 = vadd.f32 %v2339_v53, %v4103_v56 }
 0x293   : > { %v2341_v61 = vadd.f32 %v2340_v55, %v4092_v43 }
 0x295   : > { %v2342_v12 = vadd.f32 %v2341_v61, %v4095_v46 }
 0x297   : > { %v2343_v5 = vadd.f32 %v2342_v12, %v4116_v16 }
 0x299   : > { %v2344_v8 = vadd.f32 %v2343_v5, %v4121_v21  ;;  %v4526_v21 = vld [vmem:[#allocation4_spill] sm:$0xff] }
 0x29b   : > { %v2345_v15 = vadd.f32 %v2344_v8, %v4110_v3  ;;  %v4527_v3 = vld [vmem:[#allocation9_spill] sm:$0xff] }
 0x29d   : > { %v2346_v29 = vadd.f32 %v2345_v15, %v4113_v10  ;;  %v4528_v10 = vld [vmem:[#allocation10_spill] sm:$0xff] }
 0x29f   : > { %v2347_v25 = vadd.f32 %v2346_v29, %v4134_v47 }
 0x2a1   : > { %v2348_v26 = vadd.f32 %v2347_v25, %v4139_v58 }
 0x2a3   : > { %v2349_v33 = vadd.f32 %v2348_v26, %v4128_v35 }
 0x2a5   : > { %v2350_v56 = vadd.f32 %v2349_v33, %v4522_v48 }
 0x2a7   : > { %v2351_v43 = vadd.f32 %v2350_v56, %v4523_v2 }
 0x2a9   : > { %v2352_v46 = vadd.f32 %v2351_v43, %v4524_v63 }
 0x2ab   : > { %v2353_v16 = vadd.f32 %v2352_v46, %v4525_v1 }
 0x2ad   : > { %v2354_v19 = vadd.f32 %v2353_v16, %v4526_v21 }
 0x2af   : > { %v2355_v14 = vadd.f32 %v2354_v19, %v4527_v3 }
 0x2b1   : > { %v2356_v47 = vadd.f32 %v2355_v14, %v4528_v10 }
 0x2b3   : > { %v2357_v58 = vadd.f32 %v2356_v47, %v4529_v31 }
 0x2b5   : > { %v2358_v35 = vadd.f32 %v2357_v58, %v4530_v51 }
 0x2b7   : > { %v2359_v27 = vadd.f32 %v2358_v35, %v4531_v13 }
 0x2b9   : > { %v2360_v24 = vadd.f32 %v2359_v27, %v4532_v36 }
 0x2bb   : > { %v2361_v39 = vadd.f32 %v2360_v24, %v4533_v34 }
 0x2bd   : > { %v2362_v40 = vadd.f32 %v2361_v39, %v4534_v42 }
 0x2bf   : > { %v2363_v23 = vrot.slane %v2362_v40, 4 }
 0x2c1   : > { %v2364_v44 = vadd.f32 %v2363_v23, %v2362_v40 }
 0x2c3   : > { %v2365_v52 = vrot.slane %v2364_v44, 2 }
 0x2c5   : > { %v2366_v49 = vadd.f32 %v2365_v52, %v2364_v44 }
 0x2c7   : > { %v2367_v50 = vrot.slane %v2366_v49, 1 }
 0x2c9   : > { %v2368_v62 = vadd.f32 %v2367_v50, %v2366_v49 }
 0x2cb   : > { %v2369_v59 = vadd.f32 %v2368_v62, %v2299_v54 }
 0x2cd   : > { %2370 = vst [vmem:[%s3596_s28] sm:$0x1] %v2369_v59 }
 0x2ce PF: > { %s21_s17 = sadd.s32 1, %s3496_s17   ;;  %s4535_s13 = smov %s3488_s15 }
 0x2cf   : > { %p18_p8 = scmp.ge.s32.totalorder %s21_s17, 6   ;;  %s4536_s14 = smov %s3492_s16 }
 0x2d0   : > { %s4537_s15 = smov %s4540_s18  ;;  %s4538_s16 = smov %s4544_s19 }
 0x2d1   :  { %20 = sbr.rel (!%p18_p8) target bundleno = 3 (0x3), region = 110 }

// kernel: mba_forward.7
= control target key start
LH: loop header
LB: loop body
LE: loop exit
PB: predicated region body
PF: predicated region fallthrough
CT: control target
= control target key end

     0   :  { %s5145_s0 = inlined_call_operand.vmem [shape: bf16[2048,128], index: 0, kind: input, shape index: {}]   ;;  %s5146_s1 = inlined_call_operand.vmem [shape: bf16[2048,8], index: 1, kind: input, shape index: {}]   ;;  %s5147_s2 = inlined_call_operand.vmem [shape: f32[2,1,128], index: 2, kind: input, shape index: {}]   ;;  %s5148_s3 = inlined_call_operand.vmem [shape: bf16[1024,16], index: 3, kind: input, shape index: {}]   ;;  %s5149_s4 = inlined_call_operand.vmem [shape: bf16[2,16,8], index: 4, kind: input, shape index: {}]   ;;  %s5150_s5 = inlined_call_operand.vmem [shape: bf16[8,8], index: 5, kind: input, shape index: {}]   ;;  %s5151_s6 = inlined_call_operand.vmem [shape: f32[1,8], index: 6, kind: input, shape index: {}]   ;;  %s5152_s7 = inlined_call_operand.vmem [shape: bf16[8,128], index: 7, kind: input, shape index: {}]   ;;  %s5153_s8 = inlined_call_operand.vmem [shape: f32[1,128], index: 8, kind: input, shape index: {}]   ;;  %s5154_s9 = inlined_call_operand.hbm [shape: f32[2048,128], index: 9, kind: output, shape index: {}]  }
   0x1   :  { %5156 = sst [smem:[#allocation11_spill]] %s5150_s5 }
   0x2   :  { %14 = vsyncpa [#allocation3], 0 }
   0x3   :  { %16 = vsyncpa [#allocation3 + $0x1], 0  ;;  %s4172_s30 = smov 0   ;;  %s4174_s10 = smov 0  }
   0x4   :  { %s4176_s11 = smov 0   ;;  %s4178_s12 = smov 0  }
   0x5   :  { %s4180_s13 = smov 0   ;;  %s4182_s14 = smov 0  }
   0x6   :  { %s4184_s15 = smov 0   ;;  %s4186_s16 = smov 0  }
   0x7 LB: > { %s2974_s17 = sadd.s32 4294967295, %s4117_s16   ;;  %s31_s18 = sadd.s32 1, %s4109_s14  ;;  %s4117_s16 = sphi %s4186_s16, %s22_s16   ;;  %s4113_s15 = sphi %s4184_s15, %s5194_s15   ;;  %s4109_s14 = sphi %s4182_s14, %s5193_s14   ;;  %s4105_s13 = sphi %s4180_s13, %s5192_s13   ;;  %s4101_s12 = sphi %s4178_s12, %s5191_s12   ;;  %s4097_s11 = sphi %s4176_s11, %s5190_s11   ;;  %s4093_s10 = sphi %s4174_s10, %s5189_s10   ;;  %s4089_s30 = sphi %s4172_s30, %s5188_s30  }
   0x8   : > { %s34_s19 = sadd.s32 1, %s4113_s15  ;;  %p32_p0 = scmp.ge.s32.totalorder %s31_s18, 2 }
   0x9   : > { %s2980_s20 = sshll.u32 %s4113_s15, 1  ;;  %s2975_s21 = sadd.s32 4294967294, %s4117_s16  }
   0xa   : > { %s261_s22 = sadd.s32 %s4109_s14, %s2980_s20  ;;  %s5196_s18 = smov (%p32_p0, %s31_s18), 0 }
   0xb   : > { %s5198_s19 = smov (!%p32_p0, %s34_s19), %s4113_s15  ;;  %p277_p1 = scmp.ne.s32.totalorder %s4097_s11, %s4093_s10 }
   0xc   : > { %p278_p2 = scmp.eq.s32.totalorder %s2974_s17, 3  ;;  %p36_p3 = scmp.ge.s32.totalorder %s5198_s19, 2 }
   0xd   : > { %p283_p4 = scmp.ne.s32.totalorder %s4093_s10, %s4089_s30  ;;  %p284_p6 = scmp.eq.s32.totalorder %s2975_s21, 3 }
   0xe   : > { %p4225_p5 = por %p278_p2, %p277_p1  ;;  %s5200_s19 = smov (%p36_p3, %s5198_s19), 0 }
   0xf   : > { %5158 = sst [smem:[#allocation5_spill]] %s5200_s19  ;;  %p4231_p7 = por %p284_p6, %p283_p4 }
  0x10   : > { %p2984_p8 = scmp.ge.s32.totalorder %s4117_s16, 1  ;;  %s2981_s25 = sshll.u32 %s5200_s19, 1 }
  0x11   : > { %p363_p9 = scmp.lt.s32.totalorder %s4117_s16, 5  ;;  %s263_s26 = sadd.s32 %s2981_s25, %s5196_s18 }
  0x12   : > { %s267_s27 = sadd.s32 1, %s4097_s11  ;;  %s264_s28 = ssub.s32 %s261_s22, %s263_s26 }
  0x13   : > { %p364_p10 = pnand %p2984_p8, %p363_p9  ;;  %p265_p11 = scmp.eq.s32.totalorder %s264_s28, 0 }
  0x15   : > { %s4241_s29 = scalar_select %p265_p11, %s4097_s11, %s267_s27  }
  0x16   : > { %367 = sbr.rel (%p364_p10) target bundleno = 689 (0x2b1), region = 56 }
  0x1b   : > { %s5160_s5 = sld [smem:[#allocation11_spill]]  ;;  %vm788_vm0 = vcmask 1043456   ;;  %s2986_s21 = sshll.u32 %s4105_s13, 1  ;;  %vm691_vm1 = vcmask 64512   ;;  %vm1313_vm2 = vcmask 130048  }
  0x1c   : > { %p441_p12 = scmp.lt.s32.totalorder %s4105_s13, 1  ;;  %s4251_s22 = sadd.s32 %s4101_s12, %s2986_s21  ;;  %v1731_v40 = vld [vmem:[%s5152_s7] sm:$0xf] }
  0x1d   : > { %s2987_s25 = sshll.u32 %s4251_s22, 6  ;;  %v1836_v43 = vsel %vm788_vm0, %v1731_v40, 0  ;;  %s3167_s28 = sshll.u32 %s4251_s22, 13 }
  0x1e   : > { %p424_p13 = scmp.lt.s32.totalorder %s2987_s25, 255  ;;  %s5202_s13 = smov (!%p441_p12, %s4105_s13), 1 }
  0x1f   : > { %s3166_s26 = sshll.u32 %s5202_s13, 3  ;;  %s4751_s21 = scalar_lea.vmem %s5147_s2, %s5202_s13 }
  0x20   : > { %s5204_s25 = smov (!%p424_p13, %s2987_s25), 255  ;;  %s454_s20 = scalar_lea.vmem %s5149_s4, %s3166_s26 }
  0x21   : > { %v523_v0 = vld [vmem:[%s5160_s5] sm:$0xf]  ;;  %s2988_s27 = sshll.u32 %s5204_s25, 2  ;;  %s2992_s5 = sshll.u32 %s4101_s12, 6 }
  0x22   : > { %3627 = vmatprep.subr.msk.bf16.mxu1 %vm788_vm0, %v523_v0  ;;  %v790_v1 = vsel %vm788_vm0, %v523_v0, 0  ;;  %3626 = vmatprep.subr.msk.bf16.mxu0 %vm788_vm0, %v523_v0  ;;  %s4270_s19 = scalar_lea.vmem %s5146_s1, %s2988_s27  ;;  %v3703_v2 = vld [vmem:[%s454_s20] sm:$0xff]   ;;  %p445_p0 = scmp.lt.s32.totalorder %s2992_s5, 127 }
  0x23   : > { %3625 = vmatpush3.bf16.msra.mxu1 %v790_v1  ;;  %3427 = vmatpush3.bf16.msra.mxu0 %v790_v1  ;;  %v3702_v3 = vld [vmem:[%s4270_s19 + $0x80] sm:$0xff]   ;;  %v3704_v4 = vld [vmem:[%s4270_s19 + $0x88] sm:$0xff]   ;;  %v3705_v5 = vld [vmem:[%s4270_s19 + $0x90] sm:$0xff]   ;;  %s4651_s20 = scalar_lea.vmem %s5145_s0, %s2988_s27  ;;  %s5085_s27 = scalar_lea.hbm %s5154_s9, %s3167_s28 }
  0x24   : > { %3492 = vmatprep.subr.bf16.mxu1 %v3703_v2  ;;  %3460 = vmatprep.mubr.msk.bf16.mxu1 %vm691_vm1, %v3702_v3  ;;  %v3706_v6 = vld [vmem:[%s4270_s19 + $0x98] sm:$0xff]   ;;  %v3707_v7 = vld [vmem:[%s4270_s19 + $0xa0] sm:$0xff]   ;;  %s5206_s5 = smov (!%p445_p0, %s2992_s5), 127  ;;  %v3708_v8 = vld [vmem:[%s4270_s19 + $0xa8] sm:$0xff]  }
  0x25   : > { %v3717_v9 = vld [vmem:[%s4270_s19] sm:$0xff]   ;;  %v3709_v10 = vld [vmem:[%s4270_s19 + $0xb0] sm:$0xff]   ;;  %s2993_s26 = sshll.u32 %s5206_s5, 2  ;;  %v3719_v11 = vld [vmem:[%s4270_s19 + $0x8] sm:$0xff]   ;;  %3628 = vmatprep.subr.msk.bf16.mxu0 %vm788_vm0, %v1731_v40 }
  0x26   : > { %3461 = vmatmul.mubr.msk.bf16.vlgmr.msra.gmra.mxu1 %vm691_vm1, %v3704_v4  ;;  %3428 = vmatprep.mubr.msk.bf16.mxu0 %vm691_vm1, %v3717_v9  ;;  %v3721_v12 = vld [vmem:[%s4270_s19 + $0x10] sm:$0xff]   ;;  %s4293_s17 = scalar_lea.vmem %s5148_s3, %s2993_s26  ;;  %v3710_v13 = vld [vmem:[%s4270_s19 + $0xb8] sm:$0xff]   ;;  %v3725_v15 = vld [vmem:[%s4270_s19 + $0x20] sm:$0xff]  }
  0x27   : > { %3493 = vmatpush3.bf16.msra.mxu1 %v3703_v2  ;;  %3464 = vmatprep.mubr.msk.bf16.mxu1 %vm691_vm1, %v3705_v5  ;;  %v3723_v14 = vld [vmem:[%s4270_s19 + $0x18] sm:$0xff]   ;;  %v3711_v16 = vld [vmem:[%s4270_s19 + $0xc0] sm:$0xff]   ;;  %v3712_v17 = vld [vmem:[%s4270_s19 + $0xc8] sm:$0xff]  }
  0x28   : > { %3429 = vmatmul.mubr.msk.bf16.vlgmr.msra.gmra.mxu0 %vm691_vm1, %v3719_v11  ;;  %v3727_v18 = vld [vmem:[%s4270_s19 + $0x28] sm:$0xff]   ;;  %v3729_v19 = vld [vmem:[%s4270_s19 + $0x30] sm:$0xff]   ;;  %v3714_v21 = vld [vmem:[%s4270_s19 + $0xd8] sm:$0xff]  }
  0x29   : > { %3432 = vmatprep.mubr.msk.bf16.mxu0 %vm691_vm1, %v3721_v12  ;;  %v3713_v20 = vld [vmem:[%s4270_s19 + $0xd0] sm:$0xff]   ;;  %v3731_v22 = vld [vmem:[%s4270_s19 + $0x38] sm:$0xff]   ;;  %v3733_v23 = vld [vmem:[%s4270_s19 + $0x40] sm:$0xff]   ;;  %3559 = vmatpush3.bf16.msra.mxu0 %v1836_v43 }
  0x2a   : > { %v3715_v24 = vld [vmem:[%s4270_s19 + $0xe0] sm:$0xff]   ;;  %v3716_v25 = vld [vmem:[%s4270_s19 + $0xe8] sm:$0xff]   ;;  %v3737_v27 = vld [vmem:[%s4270_s19 + $0x50] sm:$0xff]  }
  0x2b   : > { %v3735_v26 = vld [vmem:[%s4270_s19 + $0x48] sm:$0xff]   ;;  %v3718_v28 = vld [vmem:[%s4270_s19 + $0xf0] sm:$0xff]   ;;  %v3720_v29 = vld [vmem:[%s4270_s19 + $0xf8] sm:$0xff]  }
  0x2c   : > { %v3739_v30 = vld [vmem:[%s4270_s19 + $0x58] sm:$0xff]   ;;  %v3741_v31 = vld [vmem:[%s4270_s19 + $0x60] sm:$0xff]   ;;  %v3724_v33 = vld [vmem:[%s4293_s17 + $0x8] sm:$0xff]  }
  0x2d   : > { %v3722_v32 = vld [vmem:[%s4293_s17] sm:$0xff]   ;;  %v3743_v34 = vld [vmem:[%s4270_s19 + $0x68] sm:$0xff]   ;;  %v3745_v35 = vld [vmem:[%s4270_s19 + $0x70] sm:$0xff]  }
  0x2e   : > { %3465 = vmatmul.mubr.msk.bf16.gmra.mxu1 %vm691_vm1, %v3706_v6  ;;  %v3726_v36 = vld [vmem:[%s4293_s17 + $0x10] sm:$0xff]   ;;  %v3747_v37 = vld [vmem:[%s4270_s19 + $0x78] sm:$0xff]   ;;  %v3730_v39 = vld [vmem:[%s4293_s17 + $0x20] sm:$0xff]   ;;  %s418_s19 = sand.u32 1, %s4093_s10  }
  0x2f   : > { %3468 = vmatprep.mubr.msk.bf16.mxu1 %vm691_vm1, %v3707_v7  ;;  %v3728_v38 = vld [vmem:[%s4293_s17 + $0x18] sm:$0xff]   ;;  %v3732_v41 = vld [vmem:[%s4293_s17 + $0x28] sm:$0xff]   ;;  %v3734_v42 = vld [vmem:[%s4293_s17 + $0x30] sm:$0xff]   ;;  %s4771_s13 = sshll.u32 %s418_s19, 9  ;;  %s5094_s22 = scalar_lea.sflag [#allocation3], %s418_s19 }
  0x30   : > { %3433 = vmatmul.mubr.msk.bf16.gmra.mxu0 %vm691_vm1, %v3723_v14  ;;  %v3736_v44 = vld [vmem:[%s4293_s17 + $0x38] sm:$0xff]   ;;  %v3738_v45 = vld [vmem:[%s4293_s17 + $0x40] sm:$0xff]   ;;  %v3740_v46 = vld [vmem:[%s4293_s17 + $0x48] sm:$0xff]   ;;  %s4788_s5 = scalar_lea.vmem [#allocation2], %s4771_s13  ;;  %s4119_s13 = smov [#allocation2]  }
  0x31   : > { %3436 = vmatprep.mubr.msk.bf16.mxu0 %vm691_vm1, %v3725_v15  ;;  %v3742_v47 = vld [vmem:[%s4293_s17 + $0x50] sm:$0xff]   ;;  %v3744_v48 = vld [vmem:[%s4293_s17 + $0x58] sm:$0xff]   ;;  %v3746_v49 = vld [vmem:[%s4293_s17 + $0x60] sm:$0xff]   ;;  %s4029_s26 = sshll.u32 %s4119_s13, 4  ;;  %s4030_s26 = int_to_ptr.vmem [resolvable:$false] %s4029_s26 }
  0x32   : > { %v3748_v50 = vld [vmem:[%s4293_s17 + $0x68] sm:$0xff]   ;;  %v3749_v51 = vld [vmem:[%s4293_s17 + $0x70] sm:$0xff]   ;;  %v3750_v52 = vld [vmem:[%s4293_s17 + $0x78] sm:$0xff]   ;;  %s4031_s12 = scalar_lea.vmem %s4030_s26, 16384 }
  0x33   : > { %v3751_v53 = vld [vmem:[%s4293_s17 + $0x80] sm:$0xff]   ;;  %v3752_v54 = vld [vmem:[%s4293_s17 + $0x88] sm:$0xff]   ;;  %v3753_v55 = vld [vmem:[%s4293_s17 + $0x90] sm:$0xff]  }
  0x34   : > { %v3754_v56 = vld [vmem:[%s4293_s17 + $0x98] sm:$0xff]   ;;  %v3755_v57 = vld [vmem:[%s4293_s17 + $0xa0] sm:$0xff]   ;;  %v3756_v58 = vld [vmem:[%s4293_s17 + $0xa8] sm:$0xff]  }
  0x35   : > { %v3757_v59 = vld [vmem:[%s4293_s17 + $0xb0] sm:$0xff]   ;;  %v3758_v60 = vld [vmem:[%s4293_s17 + $0xb8] sm:$0xff]   ;;  %v3759_v61 = vld [vmem:[%s4293_s17 + $0xc0] sm:$0xff]  }
  0x36   : > { %3469 = vmatmul.mubr.msk.bf16.gmra.mxu1 %vm691_vm1, %v3708_v8  ;;  %v3760_v62 = vld [vmem:[%s4293_s17 + $0xc8] sm:$0xff]   ;;  %v3761_v63 = vld [vmem:[%s4293_s17 + $0xd0] sm:$0xff]   ;;  %v3762_v0 = vld [vmem:[%s4293_s17 + $0xd8] sm:$0xff]  }
  0x37   : > { %3472 = vmatprep.mubr.msk.bf16.mxu1 %vm691_vm1, %v3709_v10  ;;  %v3763_v1 = vld [vmem:[%s4293_s17 + $0xe0] sm:$0xff]   ;;  %v3764_v2 = vld [vmem:[%s4293_s17 + $0xe8] sm:$0xff]   ;;  %v3765_v3 = vld [vmem:[%s4293_s17 + $0xf0] sm:$0xff]  }
  0x38   : > { %3437 = vmatmul.mubr.msk.bf16.gmra.mxu0 %vm691_vm1, %v3727_v18  ;;  %v3766_v4 = vld [vmem:[%s4293_s17 + $0xf8] sm:$0xff]   ;;  %s2854_s17 = sshll.u32 %s4788_s5, 4  ;;  %s5088_s17 = int_to_ptr.vmem [resolvable:$true] %s2854_s17 }
  0x39   : > { %3440 = vmatprep.mubr.msk.bf16.mxu0 %vm691_vm1, %v3729_v19  ;;  %p4032_p4 = scmp.lt.s32.totalorder %s5088_s17, %s4030_s26 }
  0x3e   : > { %3473 = vmatmul.mubr.msk.bf16.gmra.mxu1 %vm691_vm1, %v3710_v13 }
  0x3f   : > { %3476 = vmatprep.mubr.msk.bf16.mxu1 %vm691_vm1, %v3711_v16 }
  0x40   : > { %3441 = vmatmul.mubr.msk.bf16.gmra.mxu0 %vm691_vm1, %v3731_v22 }
  0x41   : > { %3444 = vmatprep.mubr.msk.bf16.mxu0 %vm691_vm1, %v3733_v23 }
  0x46   : > { %3477 = vmatmul.mubr.msk.bf16.gmra.mxu1 %vm691_vm1, %v3712_v17 }
  0x47   : > { %3480 = vmatprep.mubr.msk.bf16.mxu1 %vm691_vm1, %v3713_v20 }
  0x48   : > { %3445 = vmatmul.mubr.msk.bf16.gmra.mxu0 %vm691_vm1, %v3735_v26 }
  0x49   : > { %3448 = vmatprep.mubr.msk.bf16.mxu0 %vm691_vm1, %v3737_v27 }
  0x4e   : > { %3481 = vmatmul.mubr.msk.bf16.gmra.mxu1 %vm691_vm1, %v3714_v21 }
  0x4f   : > { %3484 = vmatprep.mubr.msk.bf16.mxu1 %vm691_vm1, %v3715_v24 }
  0x50   : > { %3449 = vmatmul.mubr.msk.bf16.gmra.mxu0 %vm691_vm1, %v3739_v30 }
  0x51   : > { %3452 = vmatprep.mubr.msk.bf16.mxu0 %vm691_vm1, %v3741_v31 }
  0x56   : > { %3485 = vmatmul.mubr.msk.bf16.gmra.mxu1 %vm691_vm1, %v3716_v25 }
  0x57   : > { %3488 = vmatprep.mubr.msk.bf16.mxu1 %vm691_vm1, %v3718_v28 }
  0x58   : > { %3453 = vmatmul.mubr.msk.bf16.gmra.mxu0 %vm691_vm1, %v3743_v34 }
  0x59   : > { %3456 = vmatprep.mubr.msk.bf16.mxu0 %vm691_vm1, %v3745_v35 }
  0x5e   : > { %3489 = vmatmul.mubr.msk.bf16.gmra.mxu1 %vm691_vm1, %v3720_v29 }
  0x5f   : > { %3494 = vmatprep.mubr.msk.bf16.mxu1 %vm1313_vm2, %v3722_v32 }
  0x60   : > { %3457 = vmatmul.mubr.msk.bf16.gmra.mxu0 %vm691_vm1, %v3747_v37 }
  0x66   : > { %3495 = vmatmul.mubr.msk.bf16.vlgmr.msra.gmra.mxu1 %vm1313_vm2, %v3724_v33 }
  0x67   : > { %3498 = vmatprep.mubr.msk.bf16.mxu1 %vm1313_vm2, %v3726_v36 }
  0x6e   : > { %3499 = vmatmul.mubr.msk.bf16.gmra.mxu1 %vm1313_vm2, %v3728_v38 }
  0x6f   : > { %3502 = vmatprep.mubr.msk.bf16.mxu1 %vm1313_vm2, %v3730_v39 }
  0x76   : > { %3503 = vmatmul.mubr.msk.bf16.gmra.mxu1 %vm1313_vm2, %v3732_v41 }
  0x77   : > { %3506 = vmatprep.mubr.msk.bf16.mxu1 %vm1313_vm2, %v3734_v42 }
  0x7e   : > { %3507 = vmatmul.mubr.msk.bf16.gmra.mxu1 %vm1313_vm2, %v3736_v44 }
  0x7f   : > { %3510 = vmatprep.mubr.msk.bf16.mxu1 %vm1313_vm2, %v3738_v45 }
  0x86   : > { %3511 = vmatmul.mubr.msk.bf16.gmra.mxu1 %vm1313_vm2, %v3740_v46 }
  0x87   : > { %3514 = vmatprep.mubr.msk.bf16.mxu1 %vm1313_vm2, %v3742_v47 }
  0x8e   : > { %3515 = vmatmul.mubr.msk.bf16.gmra.mxu1 %vm1313_vm2, %v3744_v48 }
  0x8f   : > { %3518 = vmatprep.mubr.msk.bf16.mxu1 %vm1313_vm2, %v3746_v49 }
  0x96   : > { %3519 = vmatmul.mubr.msk.bf16.gmra.mxu1 %vm1313_vm2, %v3748_v50 }
  0x97   : > { %3522 = vmatprep.mubr.msk.bf16.mxu1 %vm1313_vm2, %v3749_v51 }
  0x9e   : > { %3523 = vmatmul.mubr.msk.bf16.gmra.mxu1 %vm1313_vm2, %v3750_v52 }
  0x9f   : > { %3526 = vmatprep.mubr.msk.bf16.mxu1 %vm1313_vm2, %v3751_v53 }
  0xa6   : > { %3527 = vmatmul.mubr.msk.bf16.gmra.mxu1 %vm1313_vm2, %v3752_v54 }
  0xa7   : > { %3530 = vmatprep.mubr.msk.bf16.mxu1 %vm1313_vm2, %v3753_v55 }
  0xae   : > { %3531 = vmatmul.mubr.msk.bf16.gmra.mxu1 %vm1313_vm2, %v3754_v56 }
  0xaf   : > { %3534 = vmatprep.mubr.msk.bf16.mxu1 %vm1313_vm2, %v3755_v57  ;;  %v4494_v57 = vld [vmem:[%s5151_s6] ss:$0 sm:$0xff] }
  0xb6   : > { %3535 = vmatmul.mubr.msk.bf16.gmra.mxu1 %vm1313_vm2, %v3756_v58 }
  0xb7   : > { %3538 = vmatprep.mubr.msk.bf16.mxu1 %vm1313_vm2, %v3757_v59 }
  0xbe   : > { %3539 = vmatmul.mubr.msk.bf16.gmra.mxu1 %vm1313_vm2, %v3758_v60 }
  0xbf   : > { %3542 = vmatprep.mubr.msk.bf16.mxu1 %vm1313_vm2, %v3759_v61 }
  0xc6   : > { %3543 = vmatmul.mubr.msk.bf16.gmra.mxu1 %vm1313_vm2, %v3760_v62 }
  0xc7   : > { %3546 = vmatprep.mubr.msk.bf16.mxu1 %vm1313_vm2, %v3761_v63 }
  0xce   : > { %3547 = vmatmul.mubr.msk.bf16.gmra.mxu1 %vm1313_vm2, %v3762_v0 }
  0xcf   : > { %3550 = vmatprep.mubr.msk.bf16.mxu1 %vm1313_vm2, %v3763_v1 }
  0xd6   : > { %3551 = vmatmul.mubr.msk.bf16.gmra.mxu1 %vm1313_vm2, %v3764_v2 }
  0xd7   : > { %3554 = vmatprep.mubr.msk.bf16.mxu1 %vm1313_vm2, %v3765_v3 }
  0xde   : > { %3555 = vmatmul.mubr.msk.bf16.gmra.mxu1 %vm1313_vm2, %v3766_v4 }
  0xe6   : > { %v4411_v5 = vpop.f32.mrf.mxu1 }
  0xe8   : > { %v4413_v6 = vpop.f32.mrf.mxu1  ;;  %v3430_v13 = vpop.f32.mrf.mxu0 }
  0xe9   : > { %v835_v58 = vadd.f32 %v3430_v13, %v4494_v57 }
  0xea   : > { %v4415_v7 = vpop.f32.mrf.mxu1  ;;  %v826_v15 = vpop.f32.mrf.mxu0 }
  0xeb   : > { %v827_v61 = vadd.f32 %v4494_v57, %v826_v15 }
  0xec   : > { %v4417_v8 = vpop.f32.mrf.mxu1  ;;  %v3431_v17 = vpop.f32.mrf.mxu0 }
  0xed   : > { %v838_v59 = vadd.f32 %v3431_v17, %v4494_v57 }
  0xee   : > { %v4419_v9 = vpop.f32.mrf.mxu1  ;;  %v829_v19 = vpop.f32.mrf.mxu0 }
  0xef   : > { %v830_v62 = vadd.f32 %v4494_v57, %v829_v19 }
  0xf0   : > { %v4421_v10 = vpop.f32.mrf.mxu1  ;;  %v3434_v21 = vpop.f32.mrf.mxu0 }
  0xf1   : > { %v851_v13 = vadd.f32 %v3434_v21, %v4494_v57 }
  0xf2   : > { %v4423_v11 = vpop.f32.mrf.mxu1  ;;  %v842_v23 = vpop.f32.mrf.mxu0 }
  0xf3   : > { %v843_v19 = vadd.f32 %v4494_v57, %v842_v23 }
  0xf4   : > { %v4425_v12 = vpop.f32.mrf.mxu1  ;;  %v3435_v25 = vpop.f32.mrf.mxu0 }
  0xf5   : > { %v854_v15 = vadd.f32 %v3435_v25, %v4494_v57 }
  0xf6   : > { %v4427_v14 = vpop.f32.mrf.mxu1  ;;  %v845_v27 = vpop.f32.mrf.mxu0 }
  0xf8   : > { %v4429_v16 = vpop.f32.mrf.mxu1  ;;  %v4443_v29 = vpop.f32.mrf.mxu0 }
  0xf9   : > { %v867_v25 = vadd.f32 %v4443_v29, %v4494_v57 }
  0xfa   : > { %v4431_v18 = vpop.f32.mrf.mxu1  ;;  %v4449_v32 = vpop.f32.mrf.mxu0 }
  0xfc   : > { %v4433_v20 = vpop.f32.mrf.mxu1  ;;  %v3439_v35 = vpop.f32.mrf.mxu0 }
  0xfd   : > { %v870_v23 = vadd.f32 %v3439_v35, %v4494_v57 }
  0xfe   : > { %v4435_v22 = vpop.f32.mrf.mxu1  ;;  %v861_v38 = vpop.f32.mrf.mxu0 }
 0x100   : > { %v4437_v24 = vpop.f32.mrf.mxu1  ;;  %v4463_v41 = vpop.f32.mrf.mxu0 }
 0x101   : > { %v883_v35 = vadd.f32 %v4463_v41, %v4494_v57 }
 0x102   : > { %v4439_v26 = vpop.f32.mrf.mxu1  ;;  %v4469_v44 = vpop.f32.mrf.mxu0 }
 0x104   : > { %v4441_v28 = vpop.f32.mrf.mxu1  ;;  %v4475_v47 = vpop.f32.mrf.mxu0 }
 0x106   : > { %v4445_v30 = vpop.f32.mrf.mxu1  ;;  %v4481_v50 = vpop.f32.mrf.mxu0 }
 0x108   : > { %v4447_v31 = vpop.f32.mrf.mxu1  ;;  %v4487_v53 = vpop.f32.mrf.mxu0 }
 0x10a   : > { %v4451_v33 = vpop.f32.mrf.mxu1  ;;  %v4489_v56 = vpop.f32.mrf.mxu0 }
 0x10c   : > { %v4453_v34 = vpop.f32.mrf.mxu1  ;;  %v4500_v1 = vpop.f32.mrf.mxu0 }
 0x10e   : > { %v4455_v36 = vpop.f32.mrf.mxu1 }
 0x110   : > { %v4457_v37 = vpop.f32.mrf.mxu1 }
 0x112   : > { %v4459_v39 = vpop.f32.mrf.mxu1 }
 0x114   : > { %v4461_v40 = vpop.f32.mrf.mxu1 }
 0x116   : > { %v4465_v42 = vpop.f32.mrf.mxu1 }
 0x118   : > { %v4467_v43 = vpop.f32.mrf.mxu1 }
 0x11a   : > { %v4471_v45 = vpop.f32.mrf.mxu1 }
 0x11c   : > { %v4473_v46 = vpop.f32.mrf.mxu1 }
 0x11d   : > { %5161 = vst [vmem:[#allocation6_spill] sm:$0xff] %v4473_v46  ;;  %v893_v46 = vpop.f32.mrf.mxu0 }
 0x11e   : > { %v4477_v48 = vpop.f32.mrf.mxu1 }
 0x11f   : > { %5162 = vst [vmem:[#allocation7_spill] sm:$0xff] %v4477_v48 }
 0x120   : > { %v4479_v49 = vpop.f32.mrf.mxu1 }
 0x121   : > { %5163 = vst [vmem:[#allocation8_spill] sm:$0xff] %v4479_v49 }
 0x122   : > { %v4483_v51 = vpop.f32.mrf.mxu1 }
 0x123   : > { %5164 = vst [vmem:[#allocation9_spill] sm:$0xff] %v4483_v51 }
 0x124   : > { %v4485_v52 = vpop.f32.mrf.mxu1 }
 0x125   : > { %5165 = vst [vmem:[#allocation10_spill] sm:$0xff] %v4485_v52 }
 0x126   : > { %v3496_v54 = vpop.f32.mrf.mxu1 }
 0x127   : > { %v1453_v4 = vadd.f32 %v3496_v54, %v835_v58  ;;  %v4508_v58 = vpop.f32.mrf.mxu0 }
 0x128   : > { %v1444_v55 = vpop.f32.mrf.mxu1 }
 0x129   : > { %v1445_v2 = vadd.f32 %v1444_v55, %v827_v61  ;;  %v846_v55 = vadd.f32 %v4494_v57, %v845_v27 }
 0x12a   : > { %v3497_v60 = vpop.f32.mrf.mxu1 }
 0x12b   : > { %v1456_v63 = vadd.f32 %v3497_v60, %v838_v59 }
 0x12c   : > { %v1447_v0 = vpop.f32.mrf.mxu1 }
 0x12d   : > { %v1448_v3 = vadd.f32 %v1447_v0, %v830_v62  ;;  %v1700_v51 = vpack.c.bf16 %v1456_v63, %v1453_v4 }
 0x12e   : > { %v3500_v52 = vpop.f32.mrf.mxu1 }
 0x12f   : > { %v1699_v49 = vpack.c.bf16 %v1448_v3, %v1445_v2  ;;  %v1469_v62 = vadd.f32 %v3500_v52, %v851_v13  ;;  %v906_v2 = vpop.f32.mrf.mxu0 }
 0x130   : > { %v1460_v48 = vpop.f32.mrf.mxu1 }
 0x131   : > { %3560 = vmatprep.mubr.msk.bf16.mxu0 %vm691_vm1, %v1699_v49  ;;  %v1461_v60 = vadd.f32 %v1460_v48, %v843_v19  ;;  %v859_v48 = vadd.f32 %v4494_v57, %v4449_v32  ;;  %v3451_v4 = vpop.f32.mrf.mxu0  ;;  %v886_v32 = vadd.f32 %v4475_v47, %v4494_v57 }
 0x132   : > { %v3501_v17 = vpop.f32.mrf.mxu1  ;;  %3561 = vmatmul.mubr.msk.bf16.vlgmr.msra.gmra.mxu0 %vm691_vm1, %v1700_v51  ;;  %v862_v51 = vadd.f32 %v4494_v57, %v861_v38 }
 0x133   : > { %v1472_v59 = vadd.f32 %v3501_v17, %v854_v15 }
 0x134   : > { %v1463_v54 = vpop.f32.mrf.mxu1 }
 0x135   : > { %v1464_v61 = vadd.f32 %v1463_v54, %v846_v55  ;;  %v1702_v0 = vpack.c.bf16 %v1472_v59, %v1469_v62  ;;  %v909_v54 = vpop.f32.mrf.mxu0 }
 0x136   : > { %v3504_v63 = vpop.f32.mrf.mxu1 }
 0x137   : > { %v1701_v49 = vpack.c.bf16 %v1464_v61, %v1461_v60  ;;  %v1485_v17 = vadd.f32 %v3504_v63, %v867_v25  ;;  %v875_v60 = vadd.f32 %v4494_v57, %v4469_v44  ;;  %v878_v61 = vadd.f32 %v4494_v57, %v4481_v50 }
 0x138   : > { %v1476_v21 = vpop.f32.mrf.mxu1  ;;  %v902_v44 = vadd.f32 %v4500_v1, %v4494_v57  ;;  %v915_v1 = vadd.f32 %v4508_v58, %v4494_v57 }
 0x139   : > { %3564 = vmatprep.mubr.msk.bf16.mxu0 %vm691_vm1, %v1701_v49  ;;  %v1477_v13 = vadd.f32 %v1476_v21, %v859_v48  ;;  %v3454_v49 = vpop.f32.mrf.mxu0 }
 0x13a   : > { %v3505_v27 = vpop.f32.mrf.mxu1  ;;  %3565 = vmatmul.mubr.msk.bf16.gmra.mxu0 %vm691_vm1, %v1702_v0 }
 0x13b   : > { %v1488_v52 = vadd.f32 %v3505_v27, %v870_v23  ;;  %v922_v47 = vpop.f32.mrf.mxu0 }
 0x13c   : > { %v1479_v3 = vpop.f32.mrf.mxu1 }
 0x13d   : > { %v1480_v15 = vadd.f32 %v1479_v3, %v862_v51  ;;  %v1704_v59 = vpack.c.bf16 %v1488_v52, %v1485_v17  ;;  %v899_v51 = vadd.f32 %v4487_v53, %v4494_v57  ;;  %v891_v52 = vadd.f32 %v4494_v57, %v4489_v56  ;;  %v3455_v17 = vpop.f32.mrf.mxu0 }
 0x13e   : > { %v3508_v19 = vpop.f32.mrf.mxu1  ;;  %v894_v3 = vadd.f32 %v4494_v57, %v893_v46  ;;  %v918_v56 = vadd.f32 %v3451_v4, %v4494_v57  ;;  %v907_v46 = vadd.f32 %v4494_v57, %v906_v2  ;;  %v931_v4 = vadd.f32 %v3454_v49, %v4494_v57 }
 0x13f   : > { %v1703_v55 = vpack.c.bf16 %v1480_v15, %v1477_v13  ;;  %v1501_v25 = vadd.f32 %v3508_v19, %v883_v35 }
 0x140   : > { %v1492_v29 = vpop.f32.mrf.mxu1 }
 0x141   : > { %3568 = vmatprep.mubr.msk.bf16.mxu0 %vm691_vm1, %v1703_v55  ;;  %v1493_v0 = vadd.f32 %v1492_v29, %v875_v60 }
 0x142   : > { %v3509_v38 = vpop.f32.mrf.mxu1  ;;  %3569 = vmatmul.mubr.msk.bf16.gmra.mxu0 %vm691_vm1, %v1704_v59 }
 0x143   : > { %v1504_v62 = vadd.f32 %v3509_v38, %v886_v32  ;;  %v925_v38 = vpop.f32.mrf.mxu0 }
 0x144   : > { %v1495_v63 = vpop.f32.mrf.mxu1 }
 0x145   : > { %v1496_v21 = vadd.f32 %v1495_v63, %v878_v61  ;;  %v1706_v27 = vpack.c.bf16 %v1504_v62, %v1501_v25  ;;  %v910_v61 = vadd.f32 %v4494_v57, %v909_v54  ;;  %v923_v54 = vadd.f32 %v4494_v57, %v922_v47 }
 0x146   : > { %v3512_v23 = vpop.f32.mrf.mxu1 }
 0x147   : > { %v1705_v41 = vpack.c.bf16 %v1496_v21, %v1493_v0  ;;  %v1517_v59 = vadd.f32 %v3512_v23, %v899_v51  ;;  %v3458_v0 = vpop.f32.mrf.mxu0 }
 0x148   : > { %v1508_v48 = vpop.f32.mrf.mxu1 }
 0x149   : > { %3572 = vmatprep.mubr.msk.bf16.mxu0 %vm691_vm1, %v1705_v41  ;;  %v1509_v19 = vadd.f32 %v1508_v48, %v891_v52  ;;  %v938_v51 = vpop.f32.mrf.mxu0 }
 0x14a   : > { %v3513_v50 = vpop.f32.mrf.mxu1  ;;  %3573 = vmatmul.mubr.msk.bf16.gmra.mxu0 %vm691_vm1, %v1706_v27 }
 0x14b   : > { %v1520_v13 = vadd.f32 %v3513_v50, %v902_v44  ;;  %v934_v44 = vadd.f32 %v3455_v17, %v4494_v57  ;;  %v926_v50 = vadd.f32 %v4494_v57, %v925_v38  ;;  %v3459_v52 = vpop.f32.mrf.mxu0  ;;  %v947_v17 = vadd.f32 %v3458_v0, %v4494_v57 }
 0x14c   : > { %v1511_v15 = vpop.f32.mrf.mxu1  ;;  %v939_v38 = vadd.f32 %v4494_v57, %v938_v51  ;;  %v963_v0 = vadd.f32 %v4411_v5, %v4494_v57  ;;  %v958_v51 = vadd.f32 %v4494_v57, %v4417_v8  ;;  %v971_v8 = vadd.f32 %v4494_v57, %v4421_v10 }
 0x14d   : > { %v1512_v55 = vadd.f32 %v1511_v15, %v894_v3  ;;  %v1708_v53 = vpack.c.bf16 %v1520_v13, %v1517_v59 }
 0x14e   : > { %v3516_v29 = vpop.f32.mrf.mxu1 }
 0x14f   : > { %v1707_v35 = vpack.c.bf16 %v1512_v55, %v1509_v19  ;;  %v1533_v23 = vadd.f32 %v3516_v29, %v915_v1 }
 0x150   : > { %v1524_v32 = vpop.f32.mrf.mxu1 }
 0x151   : > { %3576 = vmatprep.mubr.msk.bf16.mxu0 %vm691_vm1, %v1707_v35  ;;  %v1525_v21 = vadd.f32 %v1524_v32, %v907_v46  ;;  %v950_v32 = vadd.f32 %v3459_v52, %v4494_v57 }
 0x152   : > { %v3517_v60 = vpop.f32.mrf.mxu1  ;;  %3577 = vmatmul.mubr.msk.bf16.gmra.mxu0 %vm691_vm1, %v1708_v53  ;;  %v941_v53 = vpop.f32.mrf.mxu0 }
 0x153   : > { %v1536_v62 = vadd.f32 %v3517_v60, %v918_v56  ;;  %v942_v1 = vadd.f32 %v4494_v57, %v941_v53 }
 0x154   : > { %v1527_v63 = vpop.f32.mrf.mxu1 }
 0x155   : > { %v1528_v25 = vadd.f32 %v1527_v63, %v910_v61  ;;  %v1710_v48 = vpack.c.bf16 %v1536_v62, %v1533_v23 }
 0x156   : > { %v3520_v41 = vpop.f32.mrf.mxu1 }
 0x157   : > { %v1709_v27 = vpack.c.bf16 %v1528_v25, %v1525_v21  ;;  %v1549_v55 = vadd.f32 %v3520_v41, %v931_v4  ;;  %v966_v41 = vadd.f32 %v4415_v7, %v4494_v57 }
 0x158   : > { %v1540_v58 = vpop.f32.mrf.mxu1 }
 0x159   : > { %3580 = vmatprep.mubr.msk.bf16.mxu0 %vm691_vm1, %v1709_v27  ;;  %v1541_v15 = vadd.f32 %v1540_v58, %v923_v54 }
 0x15a   : > { %v3521_v2 = vpop.f32.mrf.mxu1  ;;  %3581 = vmatmul.mubr.msk.bf16.gmra.mxu0 %vm691_vm1, %v1710_v48  ;;  %v955_v48 = vadd.f32 %v4494_v57, %v4413_v6 }
 0x15b   : > { %v1552_v3 = vadd.f32 %v3521_v2, %v934_v44 }
 0x15c   : > { %v1543_v13 = vpop.f32.mrf.mxu1 }
 0x15d   : > { %v1544_v19 = vadd.f32 %v1543_v13, %v926_v50  ;;  %v1712_v35 = vpack.c.bf16 %v1552_v3, %v1549_v55  ;;  %v979_v3 = vadd.f32 %v4419_v9, %v4494_v57  ;;  %v982_v13 = vadd.f32 %v4423_v11, %v4494_v57 }
 0x15e   : > { %v3524_v59 = vpop.f32.mrf.mxu1 }
 0x15f   : > { %v1711_v29 = vpack.c.bf16 %v1544_v19, %v1541_v15  ;;  %v1565_v62 = vadd.f32 %v3524_v59, %v947_v17  ;;  %v974_v15 = vadd.f32 %v4494_v57, %v4425_v12  ;;  %v995_v17 = vadd.f32 %v4427_v14, %v4494_v57 }
 0x160   : > { %v1556_v49 = vpop.f32.mrf.mxu1  ;;  %v987_v12 = vadd.f32 %v4494_v57, %v4429_v16 }
 0x161   : > { %3584 = vmatprep.mubr.msk.bf16.mxu0 %vm691_vm1, %v1711_v29  ;;  %v1557_v46 = vadd.f32 %v1556_v49, %v939_v38 }
 0x162   : > { %v3525_v47 = vpop.f32.mrf.mxu1  ;;  %3585 = vmatmul.mubr.msk.bf16.gmra.mxu0 %vm691_vm1, %v1712_v35 }
 0x163   : > { %v1568_v56 = vadd.f32 %v3525_v47, %v950_v32  ;;  %v998_v32 = vadd.f32 %v4431_v18, %v4494_v57  ;;  %v990_v47 = vadd.f32 %v4494_v57, %v4433_v20  ;;  %v1003_v20 = vadd.f32 %v4494_v57, %v4437_v24 }
 0x164   : > { %v1559_v60 = vpop.f32.mrf.mxu1 }
 0x165   : > { %v1560_v61 = vadd.f32 %v1559_v60, %v942_v1  ;;  %v1714_v25 = vpack.c.bf16 %v1568_v56, %v1565_v62 }
 0x166   : > { %v3528_v63 = vpop.f32.mrf.mxu1 }
 0x167   : > { %v1713_v21 = vpack.c.bf16 %v1560_v61, %v1557_v46  ;;  %v1581_v58 = vadd.f32 %v3528_v63, %v963_v0  ;;  %v1011_v63 = vadd.f32 %v4435_v22, %v4494_v57 }
 0x168   : > { %v1572_v23 = vpop.f32.mrf.mxu1 }
 0x169   : > { %3588 = vmatprep.mubr.msk.bf16.mxu0 %vm691_vm1, %v1713_v21  ;;  %v1573_v2 = vadd.f32 %v1572_v23, %v955_v48  ;;  %v1014_v21 = vadd.f32 %v4439_v26, %v4494_v57 }
 0x16a   : > { %v3529_v27 = vpop.f32.mrf.mxu1  ;;  %3589 = vmatmul.mubr.msk.bf16.gmra.mxu0 %vm691_vm1, %v1714_v25  ;;  %v1006_v25 = vadd.f32 %v4494_v57, %v4441_v28  ;;  %v1019_v28 = vadd.f32 %v4494_v57, %v4447_v31 }
 0x16b   : > { %v1584_v4 = vadd.f32 %v3529_v27, %v966_v41 }
 0x16c   : > { %v1575_v44 = vpop.f32.mrf.mxu1 }
 0x16d   : > { %v1716_v54 = vpack.c.bf16 %v1584_v4, %v1581_v58  ;;  %v1576_v5 = vadd.f32 %v1575_v44, %v958_v51  ;;  %v1027_v4 = vadd.f32 %v4445_v30, %v4494_v57  ;;  %v1030_v44 = vadd.f32 %v4451_v33, %v4494_v57 }
 0x16e   : > { %v3532_v50 = vpop.f32.mrf.mxu1 }
 0x16f   : > { %v1715_v52 = vpack.c.bf16 %v1576_v5, %v1573_v2  ;;  %v1597_v19 = vadd.f32 %v3532_v50, %v979_v3  ;;  %v1022_v2 = vadd.f32 %v4494_v57, %v4453_v34  ;;  %v1035_v34 = vadd.f32 %v4494_v57, %v4457_v37 }
 0x170   : > { %v1588_v7 = vpop.f32.mrf.mxu1 }
 0x171   : > { %3592 = vmatprep.mubr.msk.bf16.mxu0 %vm691_vm1, %v1715_v52  ;;  %v1589_v29 = vadd.f32 %v1588_v7, %v971_v8  ;;  %v1046_v8 = vadd.f32 %v4459_v39, %v4494_v57 }
 0x172   : > { %v3533_v6 = vpop.f32.mrf.mxu1  ;;  %3593 = vmatmul.mubr.msk.bf16.gmra.mxu0 %vm691_vm1, %v1716_v54 }
 0x173   : > { %v1600_v55 = vadd.f32 %v3533_v6, %v982_v13  ;;  %v1043_v6 = vadd.f32 %v4455_v36, %v4494_v57 }
 0x174   : > { %v1591_v59 = vpop.f32.mrf.mxu1 }
 0x175   : > { %v1718_v35 = vpack.c.bf16 %v1600_v55, %v1597_v19  ;;  %v1592_v9 = vadd.f32 %v1591_v59, %v974_v15  ;;  %v1038_v15 = vadd.f32 %v4494_v57, %v4461_v40  ;;  %v1051_v40 = vadd.f32 %v4494_v57, %v4467_v43 }
 0x176   : > { %v3536_v53 = vpop.f32.mrf.mxu1 }
 0x177   : > { %v1717_v49 = vpack.c.bf16 %v1592_v9, %v1589_v29  ;;  %v1613_v38 = vadd.f32 %v3536_v53, %v995_v17  ;;  %v5166_v17 = vld [vmem:[#allocation6_spill] sm:$0xff] }
 0x178   : > { %v1604_v11 = vpop.f32.mrf.mxu1 }
 0x179   : > { %3596 = vmatprep.mubr.msk.bf16.mxu0 %vm691_vm1, %v1717_v49  ;;  %v1605_v60 = vadd.f32 %v1604_v11, %v987_v12  ;;  %v1059_v49 = vadd.f32 %v4465_v42, %v4494_v57  ;;  %v1062_v11 = vadd.f32 %v4471_v45, %v4494_v57 }
 0x17a   : > { %v3537_v10 = vpop.f32.mrf.mxu1  ;;  %3597 = vmatmul.mubr.msk.bf16.gmra.mxu0 %vm691_vm1, %v1718_v35 }
 0x17b   : > { %v1616_v1 = vadd.f32 %v3537_v10, %v998_v32  ;;  %v1054_v32 = vadd.f32 %v4494_v57, %v5166_v17 }
 0x17c   : > { %v1607_v56 = vpop.f32.mrf.mxu1 }
 0x17d   : > { %v1720_v46 = vpack.c.bf16 %v1616_v1, %v1613_v38  ;;  %v1608_v14 = vadd.f32 %v1607_v56, %v990_v47 }
 0x17e   : > { %v3540_v61 = vpop.f32.mrf.mxu1 }
 0x17f   : > { %v1719_v62 = vpack.c.bf16 %v1608_v14, %v1605_v60  ;;  %v1629_v23 = vadd.f32 %v3540_v61, %v1011_v63  ;;  %v5168_v61 = vld [vmem:[#allocation9_spill] sm:$0xff] }
 0x180   : > { %v1620_v18 = vpop.f32.mrf.mxu1 }
 0x181   : > { %3600 = vmatprep.mubr.msk.bf16.mxu0 %vm691_vm1, %v1719_v62  ;;  %v1621_v27 = vadd.f32 %v1620_v18, %v1003_v20  ;;  %v1078_v62 = vadd.f32 %v5168_v61, %v4494_v57  ;;  %v5169_v18 = vld [vmem:[#allocation8_spill] sm:$0xff] }
 0x182   : > { %v3541_v16 = vpop.f32.mrf.mxu1  ;;  %3601 = vmatmul.mubr.msk.bf16.gmra.mxu0 %vm691_vm1, %v1720_v46  ;;  %v5167_v46 = vld [vmem:[#allocation7_spill] sm:$0xff]  ;;  %v1067_v63 = vadd.f32 %v4494_v57, %v5169_v18 }
 0x183   : > { %v1632_v0 = vadd.f32 %v3541_v16, %v1014_v21  ;;  %v1075_v14 = vadd.f32 %v5167_v46, %v4494_v57  ;;  %v5170_v21 = vld [vmem:[#allocation10_spill] sm:$0xff] }
 0x184   : > { %v1623_v41 = vpop.f32.mrf.mxu1  ;;  %v1070_v16 = vadd.f32 %v4494_v57, %v5170_v21  ;;  %v4699_v21 = vld [vmem:[%s4651_s20 + $0x40] sm:$0xff]  }
 0x185   : > { %v1722_v48 = vpack.c.bf16 %v1632_v0, %v1629_v23  ;;  %v1624_v22 = vadd.f32 %v1623_v41, %v1006_v25 }
 0x186   : > { %v3544_v51 = vpop.f32.mrf.mxu1 }
 0x187   : > { %v1721_v58 = vpack.c.bf16 %v1624_v22, %v1621_v27  ;;  %v1645_v54 = vadd.f32 %v3544_v51, %v1027_v4  ;;  %v4641_v22 = vld [vmem:[%s5153_s8] ss:$0 sm:$0xff] }
 0x188   : > { %v1636_v26 = vpop.f32.mrf.mxu1 }
 0x189   : > { %3604 = vmatprep.mubr.msk.bf16.mxu0 %vm691_vm1, %v1721_v58  ;;  %v1637_v52 = vadd.f32 %v1636_v26, %v1019_v28 }
 0x18a   : > { %v3545_v24 = vpop.f32.mrf.mxu1  ;;  %3605 = vmatmul.mubr.msk.bf16.gmra.mxu0 %vm691_vm1, %v1722_v48 }
 0x18b   : > { %v1648_v5 = vadd.f32 %v3545_v24, %v1030_v44 }
 0x18c   : > { %v1639_v50 = vpop.f32.mrf.mxu1 }
 0x18d   : > { %v1724_v7 = vpack.c.bf16 %v1648_v5, %v1645_v54  ;;  %v1640_v30 = vadd.f32 %v1639_v50, %v1022_v2 }
 0x18e   : > { %v3548_v3 = vpop.f32.mrf.mxu1 }
 0x18f   : > { %v1723_v13 = vpack.c.bf16 %v1640_v30, %v1637_v52  ;;  %v1661_v19 = vadd.f32 %v3548_v3, %v1043_v6  ;;  %v4655_v30 = vld [vmem:[%s4651_s20 + $0x8] sm:$0xff]   ;;  %v4658_v3 = vld [vmem:[%s4651_s20] sm:$0xff]  }
 0x190   : > { %v1652_v33 = vpop.f32.mrf.mxu1 }
 0x191   : > { %3608 = vmatprep.mubr.msk.bf16.mxu0 %vm691_vm1, %v1723_v13  ;;  %v1653_v29 = vadd.f32 %v1652_v33, %v1035_v34 }
 0x192   : > { %v3549_v31 = vpop.f32.mrf.mxu1  ;;  %3609 = vmatmul.mubr.msk.bf16.gmra.mxu0 %vm691_vm1, %v1724_v7 }
 0x193   : > { %v1664_v55 = vadd.f32 %v3549_v31, %v1046_v8 }
 0x194   : > { %v1655_v59 = vpop.f32.mrf.mxu1 }
 0x195   : > { %v1726_v35 = vpack.c.bf16 %v1664_v55, %v1661_v19  ;;  %v1656_v36 = vadd.f32 %v1655_v59, %v1038_v15  ;;  %v4662_v15 = vld [vmem:[%s4651_s20 + $0x18] sm:$0xff]   ;;  %v4666_v55 = vld [vmem:[%s4651_s20 + $0x10] sm:$0xff]   ;;  %v3174_v59 = vunpack.c.l.bf16 %v4655_v30 }
 0x196   : > { %v3552_v9 = vpop.f32.mrf.mxu1  ;;  %v3178_v17 = vunpack.c.l.bf16 %v4666_v55 }
 0x197   : > { %v1725_v53 = vpack.c.bf16 %v1656_v36, %v1653_v29  ;;  %v1677_v10 = vadd.f32 %v3552_v9, %v1059_v49  ;;  %v3170_v29 = vunpack.c.l.bf16 %v4658_v3  ;;  %v3171_v36 = vunpack.c.h.bf16 %v4658_v3 }
 0x198   : > { %v1668_v39 = vpop.f32.mrf.mxu1 }
 0x199   : > { %3612 = vmatprep.mubr.msk.bf16.mxu0 %vm691_vm1, %v1725_v53  ;;  %v1669_v38 = vadd.f32 %v1668_v39, %v1051_v40  ;;  %v3182_v40 = vunpack.c.l.bf16 %v4662_v15 }
 0x19a   : > { %v3553_v37 = vpop.f32.mrf.mxu1  ;;  %3613 = vmatmul.mubr.msk.bf16.gmra.mxu0 %vm691_vm1, %v1726_v35  ;;  %v3175_v35 = vunpack.c.h.bf16 %v4655_v30 }
 0x19b   : > { %v1680_v12 = vadd.f32 %v3553_v37, %v1062_v11  ;;  %v4674_v11 = vld [vmem:[%s4651_s20 + $0x28] sm:$0xff]   ;;  %v4677_v37 = vld [vmem:[%s4651_s20 + $0x20] sm:$0xff]  }
 0x19c   : > { %v1671_v47 = vpop.f32.mrf.mxu1  ;;  %v3186_v46 = vunpack.c.l.bf16 %v4677_v37  ;;  %v3187_v61 = vunpack.c.h.bf16 %v4677_v37 }
 0x19d   : > { %v1728_v1 = vpack.c.bf16 %v1680_v12, %v1677_v10  ;;  %v1672_v42 = vadd.f32 %v1671_v47, %v1054_v32  ;;  %v3183_v32 = vunpack.c.h.bf16 %v4662_v15  ;;  %v3179_v12 = vunpack.c.h.bf16 %v4666_v55 }
 0x19e   : > { %v3556_v56 = vpop.f32.mrf.mxu1 }
 0x19f   : > { %v1727_v60 = vpack.c.bf16 %v1672_v42, %v1669_v38  ;;  %v1693_v20 = vadd.f32 %v3556_v56, %v1075_v14  ;;  %v4685_v42 = vld [vmem:[%s4651_s20 + $0x38] sm:$0xff]   ;;  %v4688_v56 = vld [vmem:[%s4651_s20 + $0x30] sm:$0xff]   ;;  %v3191_v14 = vunpack.c.h.bf16 %v4674_v11 }
 0x1a0   : > { %v1684_v45 = vpop.f32.mrf.mxu1 }
 0x1a1   : > { %3616 = vmatprep.mubr.msk.bf16.mxu0 %vm691_vm1, %v1727_v60  ;;  %v1685_v0 = vadd.f32 %v1684_v45, %v1067_v63  ;;  %v3190_v45 = vunpack.c.l.bf16 %v4674_v11  ;;  %v4696_v63 = vld [vmem:[%s4651_s20 + $0x48] sm:$0xff]  }
 0x1a2   : > { %v3557_v43 = vpop.f32.mrf.mxu1  ;;  %3617 = vmatmul.mubr.msk.bf16.gmra.mxu0 %vm691_vm1, %v1728_v1 }
 0x1a3   : > { %v1696_v25 = vadd.f32 %v3557_v43, %v1078_v62 }
 0x1a4   : > { %v1687_v23 = vpop.f32.mrf.mxu1 }
 0x1a5   : > { %v1730_v41 = vpack.c.bf16 %v1696_v25, %v1693_v20  ;;  %v1688_v27 = vadd.f32 %v1687_v23, %v1070_v16  ;;  %v3198_v20 = vunpack.c.l.bf16 %v4685_v42  ;;  %v3194_v25 = vunpack.c.l.bf16 %v4688_v56 }
 0x1a6   : > { %v3199_v23 = vunpack.c.h.bf16 %v4685_v42 }
 0x1a7   : > { %v1729_v48 = vpack.c.bf16 %v1688_v27, %v1685_v0  ;;  %v3195_v0 = vunpack.c.h.bf16 %v4688_v56 }
 0x1a9   : > { %3620 = vmatprep.mubr.msk.bf16.mxu0 %vm691_vm1, %v1729_v48 }
 0x1aa   : > { %3621 = vmatmul.mubr.msk.bf16.gmra.mxu0 %vm691_vm1, %v1730_v41 }
 0x1f2   : > { %v3562_v51 = vpop.f32.mrf.mxu0 }
 0x1f3   : > { %v1881_v57 = vadd.f32 %v3562_v51, %v4641_v22  ;;  %v4707_v51 = vld [vmem:[%s4651_s20 + $0x58] sm:$0xff]  }
 0x1f4   : > { %v1872_v58 = vpop.f32.mrf.mxu0 }
 0x1f5   : > { %v2129_v26 = vsub.f32 0.0, %v1881_v57  ;;  %v1873_v4 = vadd.f32 %v4641_v22, %v1872_v58  ;;  %v4710_v57 = vld [vmem:[%s4651_s20 + $0x50] sm:$0xff]  }
 0x1f6   : > { %v3563_v44 = vpop.f32.mrf.mxu0 }
 0x1f7   : > { %v2195_v24 = vmul.f32 1.442695, %v2129_v26  ;;  %v2127_v28 = vsub.f32 0.0, %v1873_v4  ;;  %v1884_v2 = vadd.f32 %v3563_v44, %v4641_v22  ;;  %v3206_v4 = vunpack.c.l.bf16 %v4696_v63 }
 0x1f8   : > { %v1875_v54 = vpop.f32.mrf.mxu0  ;;  %v3202_v44 = vunpack.c.l.bf16 %v4699_v21 }
 0x1f9   : > { %3767 = vpow2.f32 %v2195_v24  ;;  %v2191_v5 = vmul.f32 1.442695, %v2127_v28  ;;  %v2130_v50 = vsub.f32 0.0, %v1884_v2  ;;  %v1876_v52 = vadd.f32 %v4641_v22, %v1875_v54 }
 0x1fa   : > { %v3566_v7 = vpop.f32.mrf.mxu0  ;;  %v3207_v24 = vunpack.c.h.bf16 %v4696_v63  ;;  %v3203_v28 = vunpack.c.h.bf16 %v4699_v21 }
 0x1fb   : > { %3769 = vpow2.f32 %v2191_v5  ;;  %v2197_v13 = vmul.f32 1.442695, %v2130_v50  ;;  %v2128_v33 = vsub.f32 0.0, %v1876_v52  ;;  %v1897_v6 = vadd.f32 %v3566_v7, %v4641_v22  ;;  %v4717_v50 = vld [vmem:[%s4651_s20 + $0x68] sm:$0xff]  }
 0x1fc   : > { %v1888_v8 = vpop.f32.mrf.mxu0 }
 0x1fd   : > { %3771 = vpow2.f32 %v2197_v13  ;;  %v2193_v31 = vmul.f32 1.442695, %v2128_v33  ;;  %v2133_v34 = vsub.f32 0.0, %v1897_v6  ;;  %v1889_v19 = vadd.f32 %v4641_v22, %v1888_v8 }
 0x1fe   : > { %v3567_v9 = vpop.f32.mrf.mxu0  ;;  %v3214_v33 = vunpack.c.l.bf16 %v4707_v51  ;;  %v3210_v6 = vunpack.c.l.bf16 %v4710_v57  ;;  %v3215_v8 = vunpack.c.h.bf16 %v4707_v51 }
 0x1ff   : > { %3773 = vpow2.f32 %v2193_v31  ;;  %v2203_v53 = vmul.f32 1.442695, %v2133_v34  ;;  %v2131_v39 = vsub.f32 0.0, %v1889_v19  ;;  %v1900_v49 = vadd.f32 %v3567_v9, %v4641_v22  ;;  %v4725_v9 = vld [vmem:[%s4651_s20 + $0x60] sm:$0xff]  }
 0x200   : > { %v1891_v10 = vpop.f32.mrf.mxu0 }
 0x201   : > { %3775 = vpow2.f32 %v2203_v53  ;;  %v2199_v47 = vmul.f32 1.442695, %v2131_v39  ;;  %v2134_v38 = vsub.f32 0.0, %v1900_v49  ;;  %v1892_v1 = vadd.f32 %v4641_v22, %v1891_v10 }
 0x202   : > { %v3570_v60 = vpop.f32.mrf.mxu0 }
 0x203   : > { %3777 = vpow2.f32 %v2199_v47  ;;  %v2205_v62 = vmul.f32 1.442695, %v2134_v38  ;;  %v2132_v43 = vsub.f32 0.0, %v1892_v1  ;;  %v1913_v18 = vadd.f32 %v3570_v60, %v4641_v22 }
 0x204   : > { %v1904_v16 = vpop.f32.mrf.mxu0 }
 0x205   : > { %3779 = vpow2.f32 %v2205_v62  ;;  %v2201_v41 = vmul.f32 1.442695, %v2132_v43  ;;  %v2137_v27 = vsub.f32 0.0, %v1913_v18  ;;  %v1905_v48 = vadd.f32 %v4641_v22, %v1904_v16  ;;  %v4731_v62 = vld [vmem:[%s4651_s20 + $0x78] sm:$0xff]  }
 0x206   : > { %v3768_v58 = vpop.eup %3767  ;;  %v3571_v26 = vpop.f32.mrf.mxu0 }
 0x207   : > { %v2321_v2 = vadd.f32 1.0, %v3768_v58  ;;  %3781 = vpow2.f32 %v2201_v41  ;;  %v2211_v54 = vmul.f32 1.442695, %v2137_v27  ;;  %v2135_v5 = vsub.f32 0.0, %v1905_v48 }
 0x208   : > { %v3770_v52 = vpop.eup %3769  ;;  %v1916_v7 = vadd.f32 %v3571_v26, %v4641_v22  ;;  %v1907_v13 = vpop.f32.mrf.mxu0 }
 0x209   : > { %3783 = vrcp.f32 %v2321_v2  ;;  %v2319_v31 = vadd.f32 1.0, %v3770_v52  ;;  %v2207_v34 = vmul.f32 1.442695, %v2135_v5  ;;  %v1908_v19 = vadd.f32 %v4641_v22, %v1907_v13  ;;  %v4736_v2 = vld [vmem:[%s4651_s20 + $0x70] sm:$0xff]  }
 0x20a   : > { %v3772_v53 = vpop.eup %3771  ;;  %3785 = vpow2.f32 %v2211_v54  ;;  %v2138_v39 = vsub.f32 0.0, %v1916_v7  ;;  %v3574_v49 = vpop.f32.mrf.mxu0 }
 0x20b   : > { %3787 = vrcp.f32 %v2319_v31  ;;  %v2322_v38 = vadd.f32 1.0, %v3772_v53  ;;  %v2136_v1 = vsub.f32 0.0, %v1908_v19  ;;  %v1929_v60 = vadd.f32 %v3574_v49, %v4641_v22  ;;  %v4743_v53 = vld [vmem:[%s4651_s20 + $0x88] sm:$0xff]  }
 0x20c   : > { %v3774_v43 = vpop.eup %3773  ;;  %3789 = vpow2.f32 %v2207_v34  ;;  %v2213_v18 = vmul.f32 1.442695, %v2138_v39  ;;  %v1920_v16 = vpop.f32.mrf.mxu0 }
 0x20d   : > { %3791 = vrcp.f32 %v2322_v38  ;;  %v2320_v48 = vadd.f32 1.0, %v3774_v43  ;;  %v2209_v58 = vmul.f32 1.442695, %v2136_v1  ;;  %v2141_v26 = vsub.f32 0.0, %v1929_v60  ;;  %v4761_v60 = vld [vmem:[%s4651_s20 + $0x98] sm:$0xff]  }
 0x20e   : > { %v3776_v54 = vpop.eup %3775  ;;  %3793 = vpow2.f32 %v2213_v18  ;;  %v1921_v5 = vadd.f32 %v4641_v22, %v1920_v16  ;;  %v3575_v52 = vpop.f32.mrf.mxu0  ;;  %v4764_v1 = vld [vmem:[%s4751_s21] ss:$0 sm:$0xff] }
 0x20f   : > { %3795 = vrcp.f32 %v2320_v48  ;;  %v2325_v31 = vadd.f32 1.0, %v3776_v54  ;;  %v2219_v34 = vmul.f32 1.442695, %v2141_v26  ;;  %v1932_v19 = vadd.f32 %v3575_v52, %v4641_v22  ;;  %v4755_v48 = vld [vmem:[%s4651_s20 + $0x80] sm:$0xff]  }
 0x210   : > { %v3778_v39 = vpop.eup %3777  ;;  %3797 = vpow2.f32 %v2209_v58  ;;  %v2139_v49 = vsub.f32 0.0, %v1921_v5  ;;  %v1923_v38 = vpop.f32.mrf.mxu0 }
 0x211   : > { %3799 = vrcp.f32 %v2325_v31  ;;  %v2323_v43 = vadd.f32 1.0, %v3778_v39  ;;  %v2142_v18 = vsub.f32 0.0, %v1932_v19  ;;  %v1924_v16 = vadd.f32 %v4641_v22, %v1923_v38 }
 0x212   : > { %v3780_v58 = vpop.eup %3779  ;;  %3801 = vpow2.f32 %v2219_v34  ;;  %v2215_v26 = vmul.f32 1.442695, %v2139_v49  ;;  %v3578_v54 = vpop.f32.mrf.mxu0 }
 0x213   : > { %3803 = vrcp.f32 %v2323_v43  ;;  %v2326_v31 = vadd.f32 1.0, %v3780_v58  ;;  %v2221_v39 = vmul.f32 1.442695, %v2142_v18  ;;  %v2140_v19 = vsub.f32 0.0, %v1924_v16  ;;  %v4775_v58 = vld [vmem:[%s4651_s20 + $0x90] sm:$0xff]  }
 0x214   : > { %v3782_v38 = vpop.eup %3781  ;;  %3805 = vpow2.f32 %v2215_v26  ;;  %v1945_v34 = vadd.f32 %v3578_v54, %v4641_v22  ;;  %v1936_v49 = vpop.f32.mrf.mxu0 }
 0x215   : > { %3807 = vrcp.f32 %v2326_v31  ;;  %v2324_v43 = vadd.f32 1.0, %v3782_v38  ;;  %v2217_v18 = vmul.f32 1.442695, %v2140_v19  ;;  %v1937_v16 = vadd.f32 %v4641_v22, %v1936_v49 }
 0x216   : > { %v3784_v52 = vpop.eup %3783  ;;  %3809 = vpow2.f32 %v2221_v39  ;;  %v2145_v26 = vsub.f32 0.0, %v1945_v34  ;;  %v3579_v7 = vpop.f32.mrf.mxu0 }
 0x217   : > { %v3786_v27 = vpop.eup %3785  ;;  %v2648_v5 = vadd.f32 %v3784_v52, %v4764_v1  ;;  %3811 = vrcp.f32 %v2324_v43  ;;  %v2143_v41 = vsub.f32 0.0, %v1937_v16  ;;  %v1948_v31 = vadd.f32 %v3579_v7, %v4641_v22 }
 0x218   : > { %v3788_v19 = vpop.eup %3787  ;;  %v2329_v38 = vadd.f32 1.0, %v3786_v27  ;;  %3813 = vpow2.f32 %v2217_v18  ;;  %v2227_v49 = vmul.f32 1.442695, %v2145_v26  ;;  %v1939_v47 = vpop.f32.mrf.mxu0 }
 0x219   : > { %v3790_v34 = vpop.eup %3789  ;;  %v2712_v54 = vmul.f32 %v3174_v59, %v2648_v5  ;;  %v2646_v13 = vadd.f32 %v3788_v19, %v4764_v1  ;;  %v2223_v10 = vmul.f32 1.442695, %v2143_v41  ;;  %v2146_v52 = vsub.f32 0.0, %v1948_v31 }
 0x21a   : > { %v3792_v43 = vpop.eup %3791  ;;  %3815 = vrcp.f32 %v2329_v38  ;;  %v2327_v16 = vadd.f32 1.0, %v3790_v34  ;;  %v1940_v7 = vadd.f32 %v4641_v22, %v1939_v47  ;;  %v3582_v27 = vpop.f32.mrf.mxu0 }
 0x21b   : > { %v3794_v26 = vpop.eup %3793  ;;  %2776 = vst [vmem:[%s4788_s5 + $0x10] sm:$0xff] %v2712_v54  ;;  %v2710_v59 = vmul.f32 %v3170_v29, %v2646_v13  ;;  %v2649_v41 = vadd.f32 %v3792_v43, %v4764_v1  ;;  %3817 = vpow2.f32 %v2227_v49  ;;  %v2229_v5 = vmul.f32 1.442695, %v2146_v52 }
 0x21c   : > { %v3796_v31 = vpop.eup %3795  ;;  %3819 = vrcp.f32 %v2327_v16  ;;  %v2330_v19 = vadd.f32 1.0, %v3794_v26  ;;  %v2144_v47 = vsub.f32 0.0, %v1940_v7  ;;  %v1961_v38 = vadd.f32 %v3582_v27, %v4641_v22  ;;  %v1952_v34 = vpop.f32.mrf.mxu0 }
 0x21d   : > { %v3798_v18 = vpop.eup %3797  ;;  %2774 = vst [vmem:[%s4788_s5] sm:$0xff] %v2710_v59  ;;  %v2713_v54 = vmul.f32 %v3175_v35, %v2649_v41  ;;  %v2647_v39 = vadd.f32 %v3796_v31, %v4764_v1  ;;  %3821 = vpow2.f32 %v2223_v10  ;;  %v1953_v29 = vadd.f32 %v4641_v22, %v1952_v34 }
 0x21e   : > { %v3800_v13 = vpop.eup %3799  ;;  %3823 = vrcp.f32 %v2330_v19  ;;  %v2328_v49 = vadd.f32 1.0, %v3798_v18  ;;  %v2225_v52 = vmul.f32 1.442695, %v2144_v47  ;;  %v2149_v43 = vsub.f32 0.0, %v1961_v38  ;;  %v3583_v16 = vpop.f32.mrf.mxu0 }
 0x21f   : > { %v3802_v7 = vpop.eup %3801  ;;  %2777 = vst [vmem:[%s4788_s5 + $0x18] sm:$0xff] %v2713_v54  ;;  %v2711_v27 = vmul.f32 %v3171_v36, %v2647_v39  ;;  %v2652_v30 = vadd.f32 %v3800_v13, %v4764_v1  ;;  %3825 = vpow2.f32 %v2229_v5  ;;  %v2147_v35 = vsub.f32 0.0, %v1953_v29 }
 0x220   : > { %v3804_v26 = vpop.eup %3803  ;;  %3827 = vrcp.f32 %v2328_v49  ;;  %v2333_v10 = vadd.f32 1.0, %v3802_v7  ;;  %v2235_v59 = vmul.f32 1.442695, %v2149_v43  ;;  %v1964_v18 = vadd.f32 %v3583_v16, %v4641_v22  ;;  %v1955_v41 = vpop.f32.mrf.mxu0 }
 0x221   : > { %v3806_v31 = vpop.eup %3805  ;;  %2775 = vst [vmem:[%s4788_s5 + $0x8] sm:$0xff] %v2711_v27  ;;  %v2716_v19 = vmul.f32 %v3182_v40, %v2652_v30  ;;  %v2650_v3 = vadd.f32 %v3804_v26, %v4764_v1  ;;  %3829 = vpow2.f32 %v2225_v52  ;;  %v2231_v36 = vmul.f32 1.442695, %v2147_v35 }
 0x222   : > { %v3808_v39 = vpop.eup %3807  ;;  %3831 = vrcp.f32 %v2333_v10  ;;  %v2331_v5 = vadd.f32 1.0, %v3806_v31  ;;  %v2150_v47 = vsub.f32 0.0, %v1964_v18  ;;  %v1956_v38 = vadd.f32 %v4641_v22, %v1955_v41  ;;  %v3586_v34 = vpop.f32.mrf.mxu0 }
 0x223   : > { %v3810_v54 = vpop.eup %3809  ;;  %2780 = vst [vmem:[%s4788_s5 + $0x30] sm:$0xff] %v2716_v19  ;;  %v2714_v29 = vmul.f32 %v3178_v17, %v2650_v3  ;;  %v2653_v13 = vadd.f32 %v3808_v39, %v4764_v1  ;;  %3833 = vpow2.f32 %v2235_v59  ;;  %v1977_v40 = vadd.f32 %v3586_v34, %v4641_v22 }
 0x224   : > { %v3812_v49 = vpop.eup %3811  ;;  %3835 = vrcp.f32 %v2331_v5  ;;  %v2334_v52 = vadd.f32 1.0, %v3810_v54  ;;  %v2237_v43 = vmul.f32 1.442695, %v2150_v47  ;;  %v2148_v16 = vsub.f32 0.0, %v1956_v38  ;;  %v1968_v7 = vpop.f32.mrf.mxu0 }
 0x225   : > { %v3814_v27 = vpop.eup %3813  ;;  %2778 = vst [vmem:[%s4788_s5 + $0x20] sm:$0xff] %v2714_v29  ;;  %v2717_v30 = vmul.f32 %v3183_v32, %v2653_v13  ;;  %v2651_v35 = vadd.f32 %v3812_v49, %v4764_v1  ;;  %3837 = vpow2.f32 %v2231_v36  ;;  %v2153_v17 = vsub.f32 0.0, %v1977_v40 }
 0x226   : > { %3839 = vrcp.f32 %v2334_v52  ;;  %v2332_v26 = vadd.f32 1.0, %v3814_v27  ;;  %v2233_v10 = vmul.f32 1.442695, %v2148_v16  ;;  %v1969_v59 = vadd.f32 %v4641_v22, %v1968_v7  ;;  %v3587_v18 = vpop.f32.mrf.mxu0 }
 0x227   : > { %v3816_v41 = vpop.eup %3815  ;;  %2781 = vst [vmem:[%s4788_s5 + $0x38] sm:$0xff] %v2717_v30  ;;  %v2715_v31 = vmul.f32 %v3179_v12, %v2651_v35  ;;  %3841 = vpow2.f32 %v2237_v43  ;;  %v2243_v19 = vmul.f32 1.442695, %v2153_v17  ;;  %v1980_v15 = vadd.f32 %v3587_v18, %v4641_v22 }
 0x228   : > { %v3818_v32 = vpop.eup %3817  ;;  %v2656_v3 = vadd.f32 %v3816_v41, %v4764_v1  ;;  %3843 = vrcp.f32 %v2332_v26  ;;  %v2151_v36 = vsub.f32 0.0, %v1969_v59  ;;  %v1971_v39 = vpop.f32.mrf.mxu0  ;;  %v3243_v5 = vunpack.c.h.bf16 %v4775_v58 }
 0x229   : > { %v3820_v47 = vpop.eup %3819  ;;  %2779 = vst [vmem:[%s4788_s5 + $0x28] sm:$0xff] %v2715_v31  ;;  %v2337_v38 = vadd.f32 1.0, %v3818_v32  ;;  %3845 = vpow2.f32 %v2233_v10  ;;  %v2154_v34 = vsub.f32 0.0, %v1980_v15  ;;  %v1972_v55 = vadd.f32 %v4641_v22, %v1971_v39 }
 0x22a   : > { %v3822_v12 = vpop.eup %3821  ;;  %v2720_v54 = vmul.f32 %v3190_v45, %v2656_v3  ;;  %v2654_v29 = vadd.f32 %v3820_v47, %v4764_v1  ;;  %3847 = vpow2.f32 %v2243_v19  ;;  %v2239_v13 = vmul.f32 1.442695, %v2151_v36  ;;  %v3590_v40 = vpop.f32.mrf.mxu0 }
 0x22b   : > { %v3824_v49 = vpop.eup %3823  ;;  %3849 = vrcp.f32 %v2337_v38  ;;  %v2335_v52 = vadd.f32 1.0, %v3822_v12  ;;  %v2245_v43 = vmul.f32 1.442695, %v2154_v34  ;;  %v2152_v16 = vsub.f32 0.0, %v1972_v55 }
 0x22c   : > { %v3826_v7 = vpop.eup %3825  ;;  %2784 = vst [vmem:[%s4788_s5 + $0x50] sm:$0xff] %v2720_v54  ;;  %v2718_v27 = vmul.f32 %v3186_v46, %v2654_v29  ;;  %v2657_v30 = vadd.f32 %v3824_v49, %v4764_v1  ;;  %3851 = vpow2.f32 %v2239_v13  ;;  %v1993_v45 = vadd.f32 %v3590_v40, %v4641_v22  ;;  %v1984_v35 = vpop.f32.mrf.mxu0 }
 0x22d   : > { %v3828_v17 = vpop.eup %3827  ;;  %3853 = vrcp.f32 %v2335_v52  ;;  %v2338_v26 = vadd.f32 1.0, %v3826_v7  ;;  %v2241_v10 = vmul.f32 1.442695, %v2152_v16  ;;  %v1985_v59 = vadd.f32 %v4641_v22, %v1984_v35 }
 0x22e   : > { %v3830_v18 = vpop.eup %3829  ;;  %2782 = vst [vmem:[%s4788_s5 + $0x40] sm:$0xff] %v2718_v27  ;;  %v2721_v41 = vmul.f32 %v3191_v14, %v2657_v30  ;;  %v2655_v46 = vadd.f32 %v3828_v17, %v4764_v1  ;;  %3855 = vpow2.f32 %v2245_v43  ;;  %v2157_v31 = vsub.f32 0.0, %v1993_v45  ;;  %v3591_v19 = vpop.f32.mrf.mxu0 }
 0x22f   : > { %v3832_v15 = vpop.eup %3831  ;;  %3857 = vrcp.f32 %v2338_v26  ;;  %v2336_v32 = vadd.f32 1.0, %v3830_v18  ;;  %v2155_v3 = vsub.f32 0.0, %v1985_v59  ;;  %v1996_v36 = vadd.f32 %v3591_v19, %v4641_v22 }
 0x230   : > { %v3834_v39 = vpop.eup %3833  ;;  %2785 = vst [vmem:[%s4788_s5 + $0x58] sm:$0xff] %v2721_v41  ;;  %v2719_v47 = vmul.f32 %v3187_v61, %v2655_v46  ;;  %v2660_v11 = vadd.f32 %v3832_v15, %v4764_v1  ;;  %3859 = vpow2.f32 %v2241_v10  ;;  %v2251_v14 = vmul.f32 1.442695, %v2157_v31  ;;  %v1987_v38 = vpop.f32.mrf.mxu0 }
 0x231   : > { %v3836_v34 = vpop.eup %3835  ;;  %3861 = vrcp.f32 %v2336_v32  ;;  %v2341_v55 = vadd.f32 1.0, %v3834_v39  ;;  %v2247_v12 = vmul.f32 1.442695, %v2155_v3  ;;  %v2158_v54 = vsub.f32 0.0, %v1996_v36  ;;  %v4862_v3 = vld [vmem:[%s4651_s20 + $0xa8] sm:$0xff]  }
 0x232   : > { %v3838_v29 = vpop.eup %3837  ;;  %2783 = vst [vmem:[%s4788_s5 + $0x48] sm:$0xff] %v2719_v47  ;;  %v2724_v13 = vmul.f32 %v3198_v20, %v2660_v11  ;;  %v2658_v40 = vadd.f32 %v3836_v34, %v4764_v1  ;;  %3863 = vpow2.f32 %v2251_v14  ;;  %v1988_v37 = vadd.f32 %v4641_v22, %v1987_v38  ;;  %v3594_v61 = vpop.f32.mrf.mxu0 }
 0x233   : > { %v3840_v49 = vpop.eup %3839  ;;  %3865 = vrcp.f32 %v2341_v55  ;;  %v2339_v52 = vadd.f32 1.0, %v3838_v29  ;;  %v2253_v43 = vmul.f32 1.442695, %v2158_v54  ;;  %v2009_v16 = vadd.f32 %v3594_v61, %v4641_v22 }
 0x234   : > { %v3842_v7 = vpop.eup %3841  ;;  %2788 = vst [vmem:[%s4788_s5 + $0x70] sm:$0xff] %v2724_v13  ;;  %v2722_v27 = vmul.f32 %v3194_v25, %v2658_v40  ;;  %v2661_v20 = vadd.f32 %v3840_v49, %v4764_v1  ;;  %3867 = vpow2.f32 %v2247_v12  ;;  %v2156_v30 = vsub.f32 0.0, %v1988_v37  ;;  %v2000_v45 = vpop.f32.mrf.mxu0 }
 0x235   : > { %v3844_v35 = vpop.eup %3843  ;;  %3869 = vrcp.f32 %v2339_v52  ;;  %v2342_v17 = vadd.f32 1.0, %v3842_v7  ;;  %v2161_v26 = vsub.f32 0.0, %v2009_v16  ;;  %v2001_v10 = vadd.f32 %v4641_v22, %v2000_v45 }
 0x236   : > { %v3846_v59 = vpop.eup %3845  ;;  %2786 = vst [vmem:[%s4788_s5 + $0x60] sm:$0xff] %v2722_v27  ;;  %v2725_v18 = vmul.f32 %v3199_v23, %v2661_v20  ;;  %v2659_v25 = vadd.f32 %v3844_v35, %v4764_v1  ;;  %3871 = vpow2.f32 %v2253_v43  ;;  %v2249_v41 = vmul.f32 1.442695, %v2156_v30  ;;  %v3595_v46 = vpop.f32.mrf.mxu0 }
 0x237   : > { %v3848_v31 = vpop.eup %3847  ;;  %3873 = vrcp.f32 %v2342_v17  ;;  %v2340_v19 = vadd.f32 1.0, %v3846_v59  ;;  %v2259_v15 = vmul.f32 1.442695, %v2161_v26  ;;  %v2159_v32 = vsub.f32 0.0, %v2001_v10 }
 0x238   : > { %v3850_v36 = vpop.eup %3849  ;;  %2789 = vst [vmem:[%s4788_s5 + $0x78] sm:$0xff] %v2725_v18  ;;  %v2723_v39 = vmul.f32 %v3195_v0, %v2659_v25  ;;  %v2345_v42 = vadd.f32 1.0, %v3848_v31  ;;  %3875 = vpow2.f32 %v2249_v41  ;;  %v2012_v23 = vadd.f32 %v3595_v46, %v4641_v22  ;;  %v2003_v47 = vpop.f32.mrf.mxu0 }
 0x239   : > { %v3852_v11 = vpop.eup %3851  ;;  %v2664_v14 = vadd.f32 %v3850_v36, %v4764_v1  ;;  %3877 = vrcp.f32 %v2340_v19  ;;  %v2255_v38 = vmul.f32 1.442695, %v2159_v32  ;;  %v2004_v34 = vadd.f32 %v4641_v22, %v2003_v47 }
 0x23a   : > { %v3854_v55 = vpop.eup %3853  ;;  %2787 = vst [vmem:[%s4788_s5 + $0x68] sm:$0xff] %v2723_v39  ;;  %3879 = vrcp.f32 %v2345_v42  ;;  %v2343_v12 = vadd.f32 1.0, %v3852_v11  ;;  %v2162_v54 = vsub.f32 0.0, %v2012_v23  ;;  %v3598_v56 = vpop.f32.mrf.mxu0  ;;  %v3254_v0 = vunpack.c.l.bf16 %v4862_v3 }
 0x23b   : > { %v3856_v29 = vpop.eup %3855  ;;  %v2728_v13 = vmul.f32 %v3206_v4, %v2664_v14  ;;  %v2662_v40 = vadd.f32 %v3854_v55, %v4764_v1  ;;  %3881 = vpow2.f32 %v2259_v15  ;;  %v2160_v37 = vsub.f32 0.0, %v2004_v34 }
 0x23c   : > { %v3858_v61 = vpop.eup %3857  ;;  %3883 = vrcp.f32 %v2343_v12  ;;  %v2346_v49 = vadd.f32 1.0, %v3856_v29  ;;  %v2261_v52 = vmul.f32 1.442695, %v2162_v54  ;;  %v2025_v43 = vadd.f32 %v3598_v56, %v4641_v22  ;;  %v2016_v16 = vpop.f32.mrf.mxu0 }
 0x23d   : > { %v3860_v7 = vpop.eup %3859  ;;  %2792 = vst [vmem:[%s4788_s5 + $0x90] sm:$0xff] %v2728_v13  ;;  %v2726_v27 = vmul.f32 %v3202_v44, %v2662_v40  ;;  %v2665_v20 = vadd.f32 %v3858_v61, %v4764_v1  ;;  %3885 = vpow2.f32 %v2255_v38  ;;  %v2257_v4 = vmul.f32 1.442695, %v2160_v37 }
 0x23e   : > { %v3862_v30 = vpop.eup %3861  ;;  %3887 = vrcp.f32 %v2346_v49  ;;  %v2344_v45 = vadd.f32 1.0, %v3860_v7  ;;  %v2165_v35 = vsub.f32 0.0, %v2025_v43  ;;  %v2017_v17 = vadd.f32 %v4641_v22, %v2016_v16  ;;  %v3599_v26 = vpop.f32.mrf.mxu0 }
 0x23f   : > { %v3864_v10 = vpop.eup %3863  ;;  %2790 = vst [vmem:[%s4788_s5 + $0x80] sm:$0xff] %v2726_v27  ;;  %v2729_v59 = vmul.f32 %v3207_v24, %v2665_v20  ;;  %v2663_v18 = vadd.f32 %v3862_v30, %v4764_v1  ;;  %3889 = vpow2.f32 %v2261_v52  ;;  %v2028_v44 = vadd.f32 %v3599_v26, %v4641_v22 }
 0x240   : > { %v3866_v25 = vpop.eup %3865  ;;  %3891 = vrcp.f32 %v2344_v45  ;;  %v2349_v41 = vadd.f32 1.0, %v3864_v10  ;;  %v2267_v46 = vmul.f32 1.442695, %v2165_v35  ;;  %v2163_v31 = vsub.f32 0.0, %v2017_v17  ;;  %v2019_v19 = vpop.f32.mrf.mxu0 }
 0x241   : > { %v3868_v15 = vpop.eup %3867  ;;  %2793 = vst [vmem:[%s4788_s5 + $0x98] sm:$0xff] %v2729_v59  ;;  %v2727_v32 = vmul.f32 %v3203_v28, %v2663_v18  ;;  %v2668_v63 = vadd.f32 %v3866_v25, %v4764_v1  ;;  %3893 = vpow2.f32 %v2257_v4  ;;  %v2166_v24 = vsub.f32 0.0, %v2028_v44 }
 0x242   : > { %v3870_v36 = vpop.eup %3869  ;;  %3895 = vrcp.f32 %v2349_v41  ;;  %v2347_v39 = vadd.f32 1.0, %v3868_v15  ;;  %v2263_v42 = vmul.f32 1.442695, %v2163_v31  ;;  %v2020_v23 = vadd.f32 %v4641_v22, %v2019_v19  ;;  %v3602_v47 = vpop.f32.mrf.mxu0 }
 0x243   : > { %v3872_v11 = vpop.eup %3871  ;;  %2791 = vst [vmem:[%s4788_s5 + $0x88] sm:$0xff] %v2727_v32  ;;  %v2732_v14 = vmul.f32 %v3214_v33, %v2668_v63  ;;  %v2666_v21 = vadd.f32 %v3870_v36, %v4764_v1  ;;  %3897 = vpow2.f32 %v2267_v46  ;;  %v2269_v28 = vmul.f32 1.442695, %v2166_v24 }
 0x244   : > { %v3874_v38 = vpop.eup %3873  ;;  %3899 = vrcp.f32 %v2347_v39  ;;  %v2350_v34 = vadd.f32 1.0, %v3872_v11  ;;  %v2164_v55 = vsub.f32 0.0, %v2020_v23  ;;  %v2041_v12 = vadd.f32 %v3602_v47, %v4641_v22  ;;  %v2032_v54 = vpop.f32.mrf.mxu0 }
 0x245   : > { %v3876_v56 = vpop.eup %3875  ;;  %2796 = vst [vmem:[%s4788_s5 + $0xb0] sm:$0xff] %v2732_v14  ;;  %v2730_v29 = vmul.f32 %v3210_v6, %v2666_v21  ;;  %v2669_v13 = vadd.f32 %v3874_v38, %v4764_v1  ;;  %3901 = vpow2.f32 %v2263_v42  ;;  %v2033_v33 = vadd.f32 %v4641_v22, %v2032_v54 }
 0x246   : > { %v3878_v40 = vpop.eup %3877  ;;  %3903 = vrcp.f32 %v2350_v34  ;;  %v2348_v37 = vadd.f32 1.0, %v3876_v56  ;;  %v2265_v61 = vmul.f32 1.442695, %v2164_v55  ;;  %v2169_v49 = vsub.f32 0.0, %v2041_v12  ;;  %v3603_v52 = vpop.f32.mrf.mxu0  ;;  %v4925_v34 = vld [vmem:[%s4651_s20 + $0xa0] sm:$0xff]  }
 0x247   : > { %v3880_v43 = vpop.eup %3879  ;;  %2794 = vst [vmem:[%s4788_s5 + $0xa0] sm:$0xff] %v2730_v29  ;;  %v2733_v16 = vmul.f32 %v3215_v8, %v2669_v13  ;;  %v2667_v7 = vadd.f32 %v3878_v40, %v4764_v1  ;;  %3905 = vpow2.f32 %v2269_v28  ;;  %v2167_v6 = vsub.f32 0.0, %v2033_v33 }
 0x248   : > { %v3882_v27 = vpop.eup %3881  ;;  %v2672_v20 = vadd.f32 %v3880_v43, %v4764_v1  ;;  %3907 = vrcp.f32 %v2348_v37  ;;  %v2275_v4 = vmul.f32 1.442695, %v2169_v49  ;;  %v2044_v30 = vadd.f32 %v3603_v52, %v4641_v22  ;;  %v2035_v45 = vpop.f32.mrf.mxu0  ;;  %v4935_v49 = vld [vmem:[%s5153_s8] ss:$0 sm:$0xff] }
 0x249   : > { %v3884_v35 = vpop.eup %3883  ;;  %2797 = vst [vmem:[%s4788_s5 + $0xb8] sm:$0xff] %v2733_v16  ;;  %v5171_v17 = vunpack.c.h.bf16 %v4710_v57  ;;  %v2353_v51 = vadd.f32 1.0, %v3882_v27  ;;  %3909 = vpow2.f32 %v2265_v61  ;;  %v2271_v8 = vmul.f32 1.442695, %v2167_v6 }
 0x24a   : > { %v3886_v10 = vpop.eup %3885  ;;  %v5172_v59 = vunpack.c.l.bf16 %v4717_v50  ;;  %v2670_v44 = vadd.f32 %v3884_v35, %v4764_v1  ;;  %3911 = vpow2.f32 %v2275_v4  ;;  %v2170_v25 = vsub.f32 0.0, %v2044_v30  ;;  %v3606_v41 = vpop.f32.mrf.mxu0 }
 0x24b   : > { %v2731_v26 = vmul.f32 %v5171_v17, %v2667_v7  ;;  %v3888_v46 = vpop.eup %3887  ;;  %3913 = vrcp.f32 %v2353_v51  ;;  %v2351_v31 = vadd.f32 1.0, %v3886_v10  ;;  %v2036_v57 = vadd.f32 %v4641_v22, %v2035_v45 }
 0x24c   : > { %v2736_v18 = vmul.f32 %v5172_v59, %v2672_v20  ;;  %v2057_v19 = vadd.f32 %v3606_v41, %v4641_v22  ;;  %v3890_v15 = vpop.eup %3889  ;;  %v5173_v32 = vunpack.c.l.bf16 %v4725_v9  ;;  %v2673_v24 = vadd.f32 %v3888_v46, %v4764_v1  ;;  %v2048_v39 = vpop.f32.mrf.mxu0 }
 0x24d   : > { %2795 = vst [vmem:[%s4788_s5 + $0xa8] sm:$0xff] %v2731_v26  ;;  %3915 = vpow2.f32 %v2271_v8  ;;  %v2277_v36 = vmul.f32 1.442695, %v2170_v25  ;;  %v3892_v42 = vpop.eup %3891  ;;  %v2354_v23 = vadd.f32 1.0, %v3890_v15  ;;  %v2168_v47 = vsub.f32 0.0, %v2036_v57 }
 0x24e   : > { %2800 = vst [vmem:[%s4788_s5 + $0xd0] sm:$0xff] %v2736_v18  ;;  %v2734_v63 = vmul.f32 %v5173_v32, %v2670_v44  ;;  %3917 = vrcp.f32 %v2351_v31  ;;  %v2173_v11 = vsub.f32 0.0, %v2057_v19  ;;  %v3894_v14 = vpop.eup %3893  ;;  %v5174_v21 = vunpack.c.h.bf16 %v4717_v50  ;;  %v3607_v12 = vpop.f32.mrf.mxu0 }
 0x24f   : > { %v2671_v38 = vadd.f32 %v3892_v42, %v4764_v1  ;;  %3919 = vpow2.f32 %v2277_v36  ;;  %v2049_v55 = vadd.f32 %v4641_v22, %v2048_v39  ;;  %v3896_v54 = vpop.eup %3895  ;;  %v2352_v56 = vadd.f32 1.0, %v3894_v14 }
 0x250   : > { %2798 = vst [vmem:[%s4788_s5 + $0xc0] sm:$0xff] %v2734_v63  ;;  %v2737_v28 = vmul.f32 %v5174_v21, %v2673_v24  ;;  %3921 = vrcp.f32 %v2354_v23  ;;  %v2273_v29 = vmul.f32 1.442695, %v2168_v47  ;;  %v2283_v13 = vmul.f32 1.442695, %v2173_v11  ;;  %v3898_v33 = vpop.eup %3897  ;;  %v2051_v52 = vpop.f32.mrf.mxu0 }
 0x251   : > { %v5175_v40 = vunpack.c.h.bf16 %v4725_v9  ;;  %v2676_v37 = vadd.f32 %v3896_v54, %v4764_v1  ;;  %v2171_v61 = vsub.f32 0.0, %v2049_v55  ;;  %v2060_v22 = vadd.f32 %v4935_v49, %v3607_v12  ;;  %v3900_v43 = vpop.eup %3899 }
 0x252   : > { %2801 = vst [vmem:[%s4788_s5 + $0xd8] sm:$0xff] %v2737_v28  ;;  %3923 = vrcp.f32 %v2352_v56  ;;  %v2357_v16 = vadd.f32 1.0, %v3898_v33  ;;  %v3250_v7 = vunpack.c.l.bf16 %v4925_v34  ;;  %v2052_v9 = vadd.f32 %v4935_v49, %v2051_v52  ;;  %v3902_v6 = vpop.eup %3901  ;;  %v3610_v45 = vpop.f32.mrf.mxu0 }
 0x253   : > { %v2735_v50 = vmul.f32 %v5175_v40, %v2671_v38  ;;  %v5176_v27 = vunpack.c.l.bf16 %v4731_v62  ;;  %v2674_v4 = vadd.f32 %v3900_v43, %v4764_v1  ;;  %3925 = vpow2.f32 %v2273_v29  ;;  %v3904_v35 = vpop.eup %3903 }
 0x254   : > { %v2279_v30 = vmul.f32 1.442695, %v2171_v61  ;;  %3927 = vrcp.f32 %v2357_v16  ;;  %v2355_v17 = vadd.f32 1.0, %v3902_v6  ;;  %v2174_v26 = vsub.f32 0.0, %v2060_v22  ;;  %v3906_v8 = vpop.eup %3905  ;;  %v2064_v25 = vpop.f32.mrf.mxu0 }
 0x255   : > { %2799 = vst [vmem:[%s4788_s5 + $0xc8] sm:$0xff] %v2735_v50  ;;  %v2740_v20 = vmul.f32 %v5176_v27, %v2676_v37  ;;  %v2172_v51 = vsub.f32 0.0, %v2052_v9  ;;  %v5177_v10 = vunpack.c.l.bf16 %v4736_v2  ;;  %v2677_v18 = vadd.f32 %v3904_v35, %v4764_v1  ;;  %v3908_v41 = vpop.eup %3907 }
 0x256   : > { %3929 = vpow2.f32 %v2283_v13  ;;  %v2073_v44 = vadd.f32 %v4935_v49, %v3610_v45  ;;  %v2358_v46 = vadd.f32 1.0, %v3906_v8  ;;  %v2285_v31 = vmul.f32 1.442695, %v2174_v26  ;;  %v3910_v19 = vpop.eup %3909  ;;  %v3611_v36 = vpop.f32.mrf.mxu0 }
 0x257   : > { %2804 = vst [vmem:[%s4788_s5 + $0xf0] sm:$0xff] %v2740_v20  ;;  %v2738_v59 = vmul.f32 %v5177_v10, %v2674_v4  ;;  %3931 = vrcp.f32 %v2355_v17  ;;  %v2281_v57 = vmul.f32 1.442695, %v2172_v51  ;;  %v5178_v15 = vunpack.c.h.bf16 %v4731_v62  ;;  %v3912_v39 = vpop.eup %3911 }
 0x258   : > { %v2675_v63 = vadd.f32 %v3908_v41, %v4764_v1  ;;  %3933 = vpow2.f32 %v2279_v30  ;;  %v2177_v24 = vsub.f32 0.0, %v2073_v44  ;;  %v2356_v42 = vadd.f32 1.0, %v3910_v19  ;;  %v3914_v11 = vpop.eup %3913  ;;  %v2067_v38 = vpop.f32.mrf.mxu0 }
 0x259   : > { %2802 = vst [vmem:[%s4788_s5 + $0xe0] sm:$0xff] %v2738_v59  ;;  %v2741_v32 = vmul.f32 %v5178_v15, %v2677_v18  ;;  %3935 = vrcp.f32 %v2358_v46  ;;  %v2065_v23 = vadd.f32 %v4935_v49, %v2064_v25  ;;  %v2076_v47 = vadd.f32 %v4935_v49, %v3611_v36 }
 0x25a   : > { %v5179_v14 = vunpack.c.h.bf16 %v4736_v2  ;;  %v2361_v62 = vadd.f32 1.0, %v3912_v39  ;;  %3937 = vpow2.f32 %v2285_v31  ;;  %v2291_v28 = vmul.f32 1.442695, %v2177_v24  ;;  %v3916_v55 = vpop.eup %3915  ;;  %v3614_v40 = vpop.f32.mrf.mxu0 }
 0x25b   : > { %2805 = vst [vmem:[%s4788_s5 + $0xf8] sm:$0xff] %v2741_v32  ;;  %v2680_v12 = vadd.f32 %v3914_v11, %v4764_v1  ;;  %3939 = vrcp.f32 %v2356_v42  ;;  %v2175_v54 = vsub.f32 0.0, %v2065_v23  ;;  %v2178_v56 = vsub.f32 0.0, %v2076_v47  ;;  %v3918_v29 = vpop.eup %3917 }
 0x25c   : > { %v2739_v21 = vmul.f32 %v5179_v14, %v2675_v63  ;;  %3941 = vrcp.f32 %v2361_v62  ;;  %v2359_v13 = vadd.f32 1.0, %v3916_v55  ;;  %v3255_v33 = vunpack.c.h.bf16 %v4862_v3  ;;  %v3920_v50 = vpop.eup %3919  ;;  %v2080_v27 = vpop.f32.mrf.mxu0 }
 0x25d   : > { %v2068_v2 = vadd.f32 %v4935_v49, %v2067_v38  ;;  %v5180_v37 = vunpack.c.l.bf16 %v4743_v53  ;;  %v2678_v22 = vadd.f32 %v3918_v29, %v4764_v1  ;;  %3943 = vpow2.f32 %v2281_v57  ;;  %v3922_v43 = vpop.eup %3921 }
 0x25e   : > { %2803 = vst [vmem:[%s4788_s5 + $0xe8] sm:$0xff] %v2739_v21  ;;  %v2287_v52 = vmul.f32 1.442695, %v2175_v54  ;;  %3945 = vrcp.f32 %v2359_v13  ;;  %v2362_v16 = vadd.f32 1.0, %v3920_v50  ;;  %v2293_v9 = vmul.f32 1.442695, %v2178_v56  ;;  %v3615_v8 = vpop.f32.mrf.mxu0 }
 0x25f   : > { %v2744_v61 = vmul.f32 %v5180_v37, %v2680_v12  ;;  %v2176_v6 = vsub.f32 0.0, %v2068_v2  ;;  %v5181_v20 = vunpack.c.l.bf16 %v4755_v48  ;;  %v2681_v30 = vadd.f32 %v3922_v43, %v4764_v1  ;;  %v3924_v35 = vpop.eup %3923 }
 0x260   : > { %3947 = vpow2.f32 %v2291_v28  ;;  %v2089_v45 = vadd.f32 %v4935_v49, %v3614_v40  ;;  %v3251_v17 = vunpack.c.h.bf16 %v4925_v34  ;;  %v2081_v51 = vadd.f32 %v4935_v49, %v2080_v27  ;;  %v3926_v10 = vpop.eup %3925  ;;  %v2083_v19 = vpop.f32.mrf.mxu0 }
 0x261   : > { %2808 = vst [vmem:[%s4788_s5 + $0x110] sm:$0xff] %v2744_v61  ;;  %v2742_v4 = vmul.f32 %v5181_v20, %v2678_v22  ;;  %3949 = vrcp.f32 %v2362_v16  ;;  %v2289_v26 = vmul.f32 1.442695, %v2176_v6  ;;  %v5182_v59 = vunpack.c.h.bf16 %v4743_v53  ;;  %v3928_v41 = vpop.eup %3927 }
 0x262   : > { %v2679_v44 = vadd.f32 %v3924_v35, %v4764_v1  ;;  %3951 = vpow2.f32 %v2287_v52  ;;  %v2181_v25 = vsub.f32 0.0, %v2089_v45  ;;  %v2360_v46 = vadd.f32 1.0, %v3926_v10  ;;  %v3618_v47 = vpop.f32.mrf.mxu0 }
 0x263   : > { %2806 = vst [vmem:[%s4788_s5 + $0x100] sm:$0xff] %v2742_v4  ;;  %v2745_v18 = vmul.f32 %v5182_v59, %v2681_v30  ;;  %3953 = vpow2.f32 %v2293_v9  ;;  %v2179_v31 = vsub.f32 0.0, %v2081_v51  ;;  %v2092_v57 = vadd.f32 %v4935_v49, %v3615_v8  ;;  %v3930_v15 = vpop.eup %3929 }
 0x264   : > { %v5183_v32 = vunpack.c.h.bf16 %v4755_v48  ;;  %v2684_v53 = vadd.f32 %v3928_v41, %v4764_v1  ;;  %3955 = vpow2.f32 %v2289_v26  ;;  %v2299_v24 = vmul.f32 1.442695, %v2181_v25  ;;  %v3932_v36 = vpop.eup %3931  ;;  %v2096_v54 = vpop.f32.mrf.mxu0 }
 0x265   : > { %2809 = vst [vmem:[%s4788_s5 + $0x118] sm:$0xff] %v2745_v18  ;;  %3957 = vrcp.f32 %v2360_v46  ;;  %v2365_v39 = vadd.f32 1.0, %v3930_v15  ;;  %v2295_v42 = vmul.f32 1.442695, %v2179_v31  ;;  %v2182_v23 = vsub.f32 0.0, %v2092_v57  ;;  %v3934_v11 = vpop.eup %3933 }
 0x266   : > { %v2743_v63 = vmul.f32 %v5183_v32, %v2679_v44  ;;  %v5184_v14 = vunpack.c.l.bf16 %v4761_v60  ;;  %v2682_v62 = vadd.f32 %v3932_v36, %v4764_v1  ;;  %3959 = vpow2.f32 %v2299_v24  ;;  %v3936_v28 = vpop.eup %3935  ;;  %v3619_v52 = vpop.f32.mrf.mxu0 }
 0x267   : > { %v2084_v48 = vadd.f32 %v4935_v49, %v2083_v19  ;;  %3961 = vrcp.f32 %v2365_v39  ;;  %v2363_v38 = vadd.f32 1.0, %v3934_v11  ;;  %v2301_v55 = vmul.f32 1.442695, %v2182_v23  ;;  %v3938_v56 = vpop.eup %3937  ;;  %v5014_v19 = vld [vmem:[%s4651_s20 + $0xb8] sm:$0xff]  }
 0x268   : > { %2807 = vst [vmem:[%s4788_s5 + $0x108] sm:$0xff] %v2743_v63  ;;  %v2748_v21 = vmul.f32 %v5184_v14, %v2684_v53  ;;  %v2105_v12 = vadd.f32 %v4935_v49, %v3618_v47  ;;  %v5185_v29 = vunpack.c.l.bf16 %v4775_v58  ;;  %v2685_v2 = vadd.f32 %v3936_v28, %v4764_v1  ;;  %v3940_v50 = vpop.eup %3939  ;;  %v2099_v35 = vpop.f32.mrf.mxu0 }
 0x269   : > { %3963 = vpow2.f32 %v2295_v42  ;;  %v2180_v40 = vsub.f32 0.0, %v2084_v48  ;;  %v2366_v37 = vadd.f32 1.0, %v3938_v56  ;;  %v2097_v22 = vadd.f32 %v4935_v49, %v2096_v54  ;;  %v3942_v43 = vpop.eup %3941 }
 0x26a   : > { %2812 = vst [vmem:[%s4788_s5 + $0x130] sm:$0xff] %v2748_v21  ;;  %v2746_v13 = vmul.f32 %v5185_v29, %v2682_v62  ;;  %3965 = vrcp.f32 %v2363_v38  ;;  %v2185_v61 = vsub.f32 0.0, %v2105_v12  ;;  %v5186_v16 = vunpack.c.h.bf16 %v4761_v60  ;;  %v3944_v20 = vpop.eup %3943  ;;  %v3622_v25 = vpop.f32.mrf.mxu0 }
 0x26b   : > { %v2683_v6 = vadd.f32 %v3940_v50, %v4764_v1  ;;  %3967 = vpow2.f32 %v2301_v55  ;;  %v2297_v27 = vmul.f32 1.442695, %v2180_v40  ;;  %v2688_v4 = vadd.f32 %v3942_v43, %v4764_v1  ;;  %v3946_v26 = vpop.eup %3945  ;;  %v5004_v1 = vld [vmem:[%s4751_s21] ss:$0 sm:$0xff]  ;;  %s4025_s21 = scalar_lea.vmem %s5088_s17, 8192 }
 0x26c   : > { %2810 = vst [vmem:[%s4788_s5 + $0x120] sm:$0xff] %v2746_v13  ;;  %v2749_v9 = vmul.f32 %v5186_v16, %v2685_v2  ;;  %3969 = vrcp.f32 %v2366_v37  ;;  %v2307_v30 = vmul.f32 1.442695, %v2185_v61  ;;  %v2183_v45 = vsub.f32 0.0, %v2097_v22  ;;  %v2112_v32 = vpop.f32.mrf.mxu0  ;;  %p4026_p1 = scmp.ne.s32.totalorder %s5088_s17, %s4025_s21  ;;  %p4033_p6 = scmp.lt.s32.totalorder %s4031_s12, %s4025_s21 }
 0x26d   : > { %v2747_v51 = vmul.f32 %v3243_v5, %v2683_v6  ;;  %v2364_v60 = vadd.f32 1.0, %v3944_v20  ;;  %3971 = vpow2.f32 %v2297_v27  ;;  %v2108_v8 = vadd.f32 %v4935_v49, %v3619_v52  ;;  %v3948_v10 = vpop.eup %3947 }
 0x26e   : > { %2813 = vst [vmem:[%s4788_s5 + $0x138] sm:$0xff] %v2749_v9  ;;  %v2752_v59 = vmul.f32 %v3254_v0, %v2688_v4  ;;  %v2686_v18 = vadd.f32 %v5004_v1, %v3946_v26  ;;  %3973 = vpow2.f32 %v2307_v30  ;;  %v2303_v44 = vmul.f32 1.442695, %v2183_v45  ;;  %v3950_v41 = vpop.eup %3949  ;;  %v3623_v14 = vpop.f32.mrf.mxu0  ;;  %v3320_v45 = vld [vmem:[%s4651_s20 + $0xc8] sm:$0xff]   ;;  %p4027_p2 = pnand %p4026_p1, %p4225_p5  ;;  %p4034_p8 = por %p4033_p6, %p4032_p4 }
 0x26f   : > { %2811 = vst [vmem:[%s4788_s5 + $0x128] sm:$0xff] %v2747_v51  ;;  %3975 = vrcp.f32 %v2364_v60  ;;  %v2369_v58 = vadd.f32 1.0, %v3948_v10  ;;  %v2186_v5 = vsub.f32 0.0, %v2108_v8  ;;  %v2100_v46 = vadd.f32 %v4935_v49, %v2099_v35  ;;  %v3952_v31 = vpop.eup %3951 }
 0x270   : > { %2816 = vst [vmem:[%s4788_s5 + $0x150] sm:$0xff] %v2752_v59  ;;  %v2750_v0 = vmul.f32 %v3250_v7, %v2686_v18  ;;  %v2689_v57 = vadd.f32 %v5004_v1, %v3950_v41  ;;  %3977 = vpow2.f32 %v2303_v44  ;;  %v2121_v15 = vadd.f32 %v4935_v49, %v3622_v25  ;;  %v3954_v63 = vpop.eup %3953  ;;  %v5021_v7 = vld [vmem:[%s4651_s20 + $0xb0] sm:$0xff]   ;;  %v2115_v12 = vpop.f32.mrf.mxu0  ;;  %v3319_v59 = vld [vmem:[%s4651_s20 + $0xc0] sm:$0xff]   ;;  %p4028_p3 = pneg %p4027_p2 }
 0x271   : > { %3979 = vrcp.f32 %v2369_v58  ;;  %v2367_v53 = vadd.f32 1.0, %v3952_v31  ;;  %v2309_v24 = vmul.f32 1.442695, %v2186_v5  ;;  %v2184_v36 = vsub.f32 0.0, %v2100_v46  ;;  %v3956_v39 = vpop.eup %3955 }
 0x272   : > { %2814 = vst [vmem:[%s4788_s5 + $0x140] sm:$0xff] %v2750_v0  ;;  %v2753_v42 = vmul.f32 %v3255_v33, %v2689_v57  ;;  %v2370_v23 = vadd.f32 1.0, %v3954_v63  ;;  %v2189_v47 = vsub.f32 0.0, %v2121_v15  ;;  %v2113_v11 = vadd.f32 %v4935_v49, %v2112_v32  ;;  %v3958_v21 = vpop.eup %3957  ;;  %v3322_v32 = vld [vmem:[%s4651_s20 + $0xd8] sm:$0xff]   ;;  %p4035_p9 = pnand %p4034_p8, %p4028_p3 }
 0x273   : > { %v3262_v62 = vunpack.c.l.bf16 %v5014_v19  ;;  %3981 = vrcp.f32 %v2367_v53  ;;  %v2368_v48 = vadd.f32 1.0, %v3956_v39  ;;  %v2124_v28 = vadd.f32 %v4935_v49, %v3623_v14  ;;  %v3960_v38 = vpop.eup %3959 }
 0x274   : > { %2817 = vst [vmem:[%s4788_s5 + $0x158] sm:$0xff] %v2753_v42  ;;  %v2687_v55 = vadd.f32 %v5004_v1, %v3958_v21  ;;  %3983 = vrcp.f32 %v2370_v23  ;;  %v2305_v3 = vmul.f32 1.442695, %v2184_v36  ;;  %v2187_v33 = vsub.f32 0.0, %v2113_v11  ;;  %v3962_v54 = vpop.eup %3961 }
 0x275   : > { %v3258_v56 = vunpack.c.l.bf16 %v5021_v7  ;;  %3985 = vrcp.f32 %v2368_v48  ;;  %v2373_v29 = vadd.f32 1.0, %v3960_v38  ;;  %v2116_v13 = vadd.f32 %v4935_v49, %v2115_v12 }
 0x276   : > { %v3964_v2 = vpop.eup %3963  ;;  %v2751_v40 = vmul.f32 %v3251_v17, %v2687_v55  ;;  %v2692_v50 = vadd.f32 %v5004_v1, %v3962_v54  ;;  %3987 = vpow2.f32 %v2309_v24  ;;  %v2315_v37 = vmul.f32 1.442695, %v2189_v47 }
 0x277   : > { %v3966_v61 = vpop.eup %3965  ;;  %v3263_v22 = vunpack.c.h.bf16 %v5014_v19  ;;  %3989 = vrcp.f32 %v2373_v29  ;;  %v2371_v52 = vadd.f32 1.0, %v3964_v2  ;;  %v2190_v43 = vsub.f32 0.0, %v2124_v28  ;;  %v3324_v2 = vld [vmem:[%s4651_s20 + $0xe8] sm:$0xff]  }
 0x278   : > { %v3968_v16 = vpop.eup %3967  ;;  %2815 = vst [vmem:[%s4788_s5 + $0x148] sm:$0xff] %v2751_v40  ;;  %v2756_v9 = vmul.f32 %v3262_v62, %v2692_v50  ;;  %v2690_v49 = vadd.f32 %v5004_v1, %v3966_v61  ;;  %3991 = vpow2.f32 %v2305_v3  ;;  %v2311_v34 = vmul.f32 1.442695, %v2187_v33 }
 0x279   : > { %v3970_v17 = vpop.eup %3969  ;;  %3993 = vrcp.f32 %v2371_v52  ;;  %v2374_v6 = vadd.f32 1.0, %v3968_v16  ;;  %v2188_v27 = vsub.f32 0.0, %v2116_v13  ;;  %v3259_v26 = vunpack.c.h.bf16 %v5021_v7  ;;  %v3321_v7 = vld [vmem:[%s4651_s20 + $0xd0] sm:$0xff]  }
 0x27a   : > { %v3972_v20 = vpop.eup %3971  ;;  %2820 = vst [vmem:[%s4788_s5 + $0x170] sm:$0xff] %v2756_v9  ;;  %v2754_v4 = vmul.f32 %v3258_v56, %v2690_v49  ;;  %v2693_v30 = vadd.f32 %v5004_v1, %v3970_v17  ;;  %3995 = vpow2.f32 %v2315_v37  ;;  %v2317_v60 = vmul.f32 1.442695, %v2190_v43  ;;  %v3323_v43 = vld [vmem:[%s4651_s20 + $0xe0] sm:$0xff]  }
 0x27b   : > { %v3974_v35 = vpop.eup %3973  ;;  %3997 = vrcp.f32 %v2374_v6  ;;  %v2372_v51 = vadd.f32 1.0, %v3972_v20  ;;  %v3270_v41 = vunpack.c.l.bf16 %v3320_v45  ;;  %v2313_v58 = vmul.f32 1.442695, %v2188_v27 }
 0x27c   : > { %v3976_v8 = vpop.eup %3975  ;;  %2818 = vst [vmem:[%s4788_s5 + $0x160] sm:$0xff] %v2754_v4  ;;  %v2757_v10 = vmul.f32 %v3263_v22, %v2693_v30  ;;  %v2377_v18 = vadd.f32 1.0, %v3974_v35  ;;  %3999 = vpow2.f32 %v2311_v34  ;;  %v3266_v57 = vunpack.c.l.bf16 %v3319_v59 }
 0x27d   : > { %v3978_v44 = vpop.eup %3977  ;;  %v2691_v25 = vadd.f32 %v5004_v1, %v3976_v8  ;;  %4001 = vrcp.f32 %v2372_v51  ;;  %v3271_v15 = vunpack.c.h.bf16 %v3320_v45  ;;  %v3267_v36 = vunpack.c.h.bf16 %v3319_v59 }
 0x27e   : > { %v3980_v5 = vpop.eup %3979  ;;  %2821 = vst [vmem:[%s4788_s5 + $0x178] sm:$0xff] %v2757_v10  ;;  %4003 = vrcp.f32 %v2377_v18  ;;  %v2375_v46 = vadd.f32 1.0, %v3978_v44  ;;  %v3278_v14 = vunpack.c.l.bf16 %v3322_v32  ;;  %v3274_v3 = vunpack.c.l.bf16 %v3321_v7  ;;  %v3326_v44 = vld [vmem:[%s4651_s20 + $0xf8] sm:$0xff]  }
 0x27f   : > { %v2755_v31 = vmul.f32 %v3259_v26, %v2691_v25  ;;  %v2696_v0 = vadd.f32 %v5004_v1, %v3980_v5  ;;  %4005 = vpow2.f32 %v2317_v60  ;;  %v3279_v13 = vunpack.c.h.bf16 %v3322_v32  ;;  %v3325_v5 = vld [vmem:[%s4651_s20 + $0xf0] sm:$0xff]  }
 0x280   : > { %v3982_v19 = vpop.eup %3981  ;;  %4007 = vrcp.f32 %v2375_v46  ;;  %v3275_v52 = vunpack.c.h.bf16 %v3321_v7  ;;  %v3286_v9 = vunpack.c.l.bf16 %v3324_v2  ;;  %v3282_v4 = vunpack.c.l.bf16 %v3323_v43 }
 0x281   : > { %v3984_v63 = vpop.eup %3983  ;;  %2819 = vst [vmem:[%s4788_s5 + $0x168] sm:$0xff] %v2755_v31  ;;  %v2760_v53 = vmul.f32 %v3270_v41, %v2696_v0  ;;  %v2694_v24 = vadd.f32 %v5004_v1, %v3982_v19  ;;  %4009 = vpow2.f32 %v2313_v58  ;;  %v3287_v59 = vunpack.c.h.bf16 %v3324_v2 }
 0x282   : > { %v3986_v39 = vpop.eup %3985  ;;  %v2697_v42 = vadd.f32 %v5004_v1, %v3984_v63  ;;  %v3283_v41 = vunpack.c.h.bf16 %v3323_v43  ;;  %v3294_v0 = vunpack.c.l.bf16 %v3326_v44  ;;  %v3290_v32 = vunpack.c.l.bf16 %v3325_v5 }
 0x283   : > { %v3988_v23 = vpop.eup %3987  ;;  %2824 = vst [vmem:[%s4788_s5 + $0x190] sm:$0xff] %v2760_v53  ;;  %v2758_v47 = vmul.f32 %v3266_v57, %v2694_v24  ;;  %v2695_v11 = vadd.f32 %v5004_v1, %v3986_v39 }
 0x284   : > { %v3990_v21 = vpop.eup %3989  ;;  %v2761_v62 = vmul.f32 %v3271_v15, %v2697_v42  ;;  %v2378_v48 = vadd.f32 1.0, %v3988_v23  ;;  %v3291_v23 = vunpack.c.h.bf16 %v3325_v5 }
 0x285   : > { %v3992_v28 = vpop.eup %3991  ;;  %2822 = vst [vmem:[%s4788_s5 + $0x180] sm:$0xff] %v2758_v47  ;;  %v2759_v38 = vmul.f32 %v3267_v36, %v2695_v11  ;;  %v2700_v55 = vadd.f32 %v5004_v1, %v3990_v21  ;;  %v3295_v36 = vunpack.c.h.bf16 %v3326_v44 }
 0x286   : > { %v3994_v33 = vpop.eup %3993  ;;  %2825 = vst [vmem:[%s4788_s5 + $0x198] sm:$0xff] %v2761_v62  ;;  %4011 = vrcp.f32 %v2378_v48  ;;  %v2376_v12 = vadd.f32 1.0, %v3992_v28 }
 0x287   : > { %v3996_v54 = vpop.eup %3995  ;;  %2823 = vst [vmem:[%s4788_s5 + $0x188] sm:$0xff] %v2759_v38  ;;  %v2764_v56 = vmul.f32 %v3278_v14, %v2700_v55  ;;  %v2698_v29 = vadd.f32 %v5004_v1, %v3994_v33 }
 0x288   : > { %v3998_v40 = vpop.eup %3997  ;;  %4013 = vrcp.f32 %v2376_v12  ;;  %v2381_v50 = vadd.f32 1.0, %v3996_v54 }
 0x289   : > { %v4000_v37 = vpop.eup %3999  ;;  %2828 = vst [vmem:[%s4788_s5 + $0x1b0] sm:$0xff] %v2764_v56  ;;  %v2762_v61 = vmul.f32 %v3274_v3, %v2698_v29  ;;  %v2701_v22 = vadd.f32 %v5004_v1, %v3998_v40 }
 0x28a   : > { %v4002_v16 = vpop.eup %4001  ;;  %4015 = vrcp.f32 %v2381_v50  ;;  %v2379_v49 = vadd.f32 1.0, %v4000_v37 }
 0x28b   : > { %v4004_v34 = vpop.eup %4003  ;;  %2826 = vst [vmem:[%s4788_s5 + $0x1a0] sm:$0xff] %v2762_v61  ;;  %v2765_v17 = vmul.f32 %v3279_v13, %v2701_v22  ;;  %v2699_v6 = vadd.f32 %v5004_v1, %v4002_v16 }
 0x28c   : > { %v4006_v27 = vpop.eup %4005  ;;  %v2704_v20 = vadd.f32 %v5004_v1, %v4004_v34  ;;  %4017 = vrcp.f32 %v2379_v49 }
 0x28d   : > { %v4008_v30 = vpop.eup %4007  ;;  %2829 = vst [vmem:[%s4788_s5 + $0x1b8] sm:$0xff] %v2765_v17  ;;  %v2763_v45 = vmul.f32 %v3275_v52, %v2699_v6  ;;  %v2382_v35 = vadd.f32 1.0, %v4006_v27 }
 0x28e   : > { %v4010_v26 = vpop.eup %4009  ;;  %v2768_v51 = vmul.f32 %v3286_v9, %v2704_v20  ;;  %v2702_v60 = vadd.f32 %v5004_v1, %v4008_v30 }
 0x28f   : > { %2827 = vst [vmem:[%s4788_s5 + $0x1a8] sm:$0xff] %v2763_v45  ;;  %4019 = vrcp.f32 %v2382_v35  ;;  %v2380_v8 = vadd.f32 1.0, %v4010_v26 }
 0x290   : > { %2832 = vst [vmem:[%s4788_s5 + $0x1d0] sm:$0xff] %v2768_v51  ;;  %v2766_v10 = vmul.f32 %v3282_v4, %v2702_v60 }
 0x291   : > { %4021 = vrcp.f32 %v2380_v8 }
 0x292   : > { %2830 = vst [vmem:[%s4788_s5 + $0x1c0] sm:$0xff] %v2766_v10 }
 0x293   : > { %v4012_v18 = vpop.eup %4011 }
 0x294   : > { %v2705_v25 = vadd.f32 %v5004_v1, %v4012_v18 }
 0x295   : > { %v4014_v58 = vpop.eup %4013 }
 0x296   : > { %v2769_v46 = vmul.f32 %v3287_v59, %v2705_v25  ;;  %v2703_v31 = vadd.f32 %v5004_v1, %v4014_v58 }
 0x297   : > { %v4016_v57 = vpop.eup %4015 }
 0x298   : > { %2833 = vst [vmem:[%s4788_s5 + $0x1d8] sm:$0xff] %v2769_v46  ;;  %v2767_v19 = vmul.f32 %v3283_v41, %v2703_v31  ;;  %v2708_v15 = vadd.f32 %v5004_v1, %v4016_v57 }
 0x299   : > { %v4018_v63 = vpop.eup %4017 }
 0x29a   : > { %2831 = vst [vmem:[%s4788_s5 + $0x1c8] sm:$0xff] %v2767_v19  ;;  %v2772_v53 = vmul.f32 %v3294_v0, %v2708_v15  ;;  %v2706_v24 = vadd.f32 %v5004_v1, %v4018_v63 }
 0x29c   : > { %v4020_v39 = vpop.eup %4019  ;;  %2836 = vst [vmem:[%s4788_s5 + $0x1f0] sm:$0xff] %v2772_v53  ;;  %v2770_v42 = vmul.f32 %v3290_v32, %v2706_v24 }
 0x29d   : > { %v2709_v7 = vadd.f32 %v5004_v1, %v4020_v39 }
 0x29e   : > { %v4022_v47 = vpop.eup %4021  ;;  %2834 = vst [vmem:[%s4788_s5 + $0x1e0] sm:$0xff] %v2770_v42 }
 0x29f   : > { %v2773_v11 = vmul.f32 %v3295_v36, %v2709_v7  ;;  %v2707_v14 = vadd.f32 %v5004_v1, %v4022_v47 }
 0x2a1   : > { %2837 = vst [vmem:[%s4788_s5 + $0x1f8] sm:$0xff] %v2773_v11  ;;  %v2771_v21 = vmul.f32 %v3291_v23, %v2707_v14 }
 0x2a3   : > { %2835 = vst [vmem:[%s4788_s5 + $0x1e8] sm:$0xff] %v2771_v21 }
 0x2a4   : > { %4038 = shalt.err (!%p4035_p9)
}
 0x2a5   : > { %s4039_s19 = scalar_lea.hbm %s5085_s27, 8192  ;;  %s4043_s20 = scalar_lea.hbm %s5154_s9, 32768 }
 0x2a6   : > { %p4040_p10 = scmp.ne.s32.totalorder %s5085_s27, %s4039_s19  ;;  %p4044_p13 = scmp.lt.s32.totalorder %s5085_s27, %s5154_s9 }
 0x2a7   : > { %p4045_p0 = scmp.lt.s32.totalorder %s4043_s20, %s4039_s19 }
 0x2a8   : > { %p4041_p11 = pnand %p4040_p10, %p4225_p5 }
 0x2a9   : > { %p4046_p1 = por %p4045_p0, %p4044_p13 }
 0x2aa   : > { %p4042_p12 = pneg %p4041_p11 }
 0x2ac   : > { %p4047_p2 = pnand %p4046_p1, %p4042_p12 }
 0x2ae   : > { %4050 = shalt.err (!%p4047_p2)
}
 0x2af   : > { %s4120_s21 = smov 128   ;;  %s4121_s26 = smov 8  }
 0x2b0   : > { %3629 = dma.vmem_to_hbm [thread:$0]  (%p4225_p5), %s5088_s17, 8192, %s5085_s27, %s5094_s22, %s4120_s21, %s4120_s21, %s4121_s26  }
 0x2b1 PF: > { %p3635_p3 = scmp.ge.s32.totalorder %s4117_s16, 2  ;;  %s2869_s12 = sand.u32 1, %s4089_s30  }
 0x2b2   : > { %s2870_s19 = scalar_lea.sflag [#allocation3], %s2869_s12 }
 0x2b3   : > { %p3632_p4 = pnand %p3635_p3, %p4231_p7 }
 0x2b5   : > { %p3633_p6 = pneg %p3632_p4 }
 0x2b7   : > { %4084 = dma.done.wait (%p3633_p6), %s2870_s19, 8192  }
 0x2b8   : > { %4086 = vsyncadd (%p3633_p6), %s2870_s19, 4294959104  ;;  %s22_s16 = sadd.s32 1, %s4117_s16   ;;  %s5187_s23 = sld [smem:[#allocation5_spill]] }
 0x2b9   : > { %p19_p8 = scmp.ge.s32.totalorder %s22_s16, 6   ;;  %s5188_s30 = smov %s4093_s10 }
 0x2ba   : > { %s5189_s10 = smov %s4097_s11  ;;  %s5190_s11 = smov %s4241_s29 }
 0x2bb   : > { %s5191_s12 = smov %s4109_s14  ;;  %s5192_s13 = smov %s4113_s15 }
 0x2bc   : > { %s5193_s14 = smov %s5196_s18  ;;  %21 = sbr.rel (!%p19_p8) target bundleno = 7 (0x7), region = 103 }
 0x2be   : > { %s5194_s15 = smov %s5187_s23 }
 0x2c1   :  { %2875 = vsyncpa [#allocation3], 1 }
 0x2c2   :  { %2877 = vsyncpa [#allocation3 + $0x1], 1 }

</bundles_post_ra>
